<compile_context>
chip_gen: v6e
topology: v6e:2x2x1
jax: 0.10.0
libtpu: 0.0.40
codegen_flags: <defaults>
</compile_context>

<pallas_src>
import jax
import jax.numpy as jnp
import numpy as np
from jax.experimental import pallas as pl
from jax.experimental.pallas import tpu as pltpu

# ---- small synthetic hyper-parameters (consistent with the module's shapes) ----
MAX_TYPES   = 4     # n_neighbours (fixed to 4 in the module)
MAX_PATHS   = 3     # max_paths   (sys.argv[2] in the original script)
MAX_PATHLEN = 5     # max_pathlen (sys.argv[3] in the original script)
MAX_PROPLEN = 4     # max_prop_len
EMB_DIM     = 32    # embedding_dim (from emb_vals)
OUT_DIM     = 300   # nn.Linear(2*emb_dim, 300)
OUT_PAD     = 384   # 300 padded up to 3*128 for clean lanes / MXU tiles
VOCAB       = 40    # len(emb_vals)


def _cos(a, b):
    # a, b: (Bt, N) -> (Bt, 1); matches torch CosineSimilarity(dim=1, eps=1e-8)
    dot = jnp.sum(a * b, axis=-1, keepdims=True)
    na = jnp.sqrt(jnp.sum(a * a, axis=-1, keepdims=True))
    nb = jnp.sqrt(jnp.sum(b * b, axis=-1, keepdims=True))
    return dot / jnp.maximum(na * nb, 1e-8)


def siamese_kernel(w_ref, n0_ref, n1_ref, f0_ref, f1_ref, p0_ref, p1_ref,
                   v_ref, wt_ref, b_ref, out_ref):
    # Per grid step (one tile of Bt batch elements, BOTH siamese sides):
    #   n{0,1}_ref : (Bt, D)           node embeddings, side 0 / side 1
    #   f{0,1}_ref : (Bt, 4, P, L, D)  path-feature embeddings
    #   p{0,1}_ref : (Bt, 3, Lp, D)    property embeddings
    #   v_ref      : (1, L)
    #   wt_ref     : (2D, OUT_PAD)     transposed Linear weight, zero-padded 300->384
    #   b_ref      : (1, OUT_PAD)      bias, zero-padded
    #   w_ref      : SMEM f32[8] = [w_rootpath, w_children, w_obj, prop_w, domain_w, 0,0,0]
    #   out_ref    : (Bt, 2)           [:,0] = sim_ent, [:,1] = sim_prop
    w_root, w_child, w_obj = w_ref[0], w_ref[1], w_ref[2]
    prop_w, dom_w = w_ref[3], w_ref[4]
    w_data = 1.0 - w_root - w_child - w_obj
    type_w = (w_root, w_child, w_obj, w_data)
    v_row = v_ref[0, :]                                               # (L,)

    def contextual(node_ref, feat_ref):
        node = node_ref[...]                                          # (Bt, D)
        feat = feat_ref[...]                                          # (Bt, 4, P, L, D)
        ctx = jnp.zeros_like(node)                                    # (Bt, D)
        for t in range(MAX_TYPES):                                    # static 4-way unroll
            ft = feat[:, t]                                           # (Bt, P, L, D)
            # path score = <node, feature> summed over path length
            scores = jnp.sum(ft * node[:, None, None, :], axis=-1)    # (Bt, P, L)
            path_w = jnp.sum(scores, axis=-1)                         # (Bt, P)
            # argmax over paths (first occurrence, like torch.max)
            maxval = jnp.max(path_w, axis=-1, keepdims=True)          # (Bt, 1)
            iota_p = jax.lax.broadcasted_iota(jnp.int32, path_w.shape, 1)
            cand = jnp.where(path_w == maxval, iota_p, MAX_PATHS)
            first = jnp.min(cand, axis=-1, keepdims=True)             # (Bt, 1)
            onehot = (iota_p == first).astype(jnp.float32)            # (Bt, P)
            # gather best path for this neighbour type
            best = jnp.sum(onehot[:, :, None, None] * ft, axis=1)     # (Bt, L, D)
            # masked softmax attention over path positions
            node_w = jnp.sum(best * node[:, None, :], axis=-1)        # (Bt, L)
            neg = (jnp.where(node_w != 0.0, 1.0, 0.0) - 1.0) * 9999.0
            logits = node_w + neg
            m = jnp.max(logits, axis=-1, keepdims=True)
            e = jnp.exp(logits - m)
            sm = e / jnp.sum(e, axis=-1, keepdims=True)               # (Bt, L)
            # distance-weighted pooling
            wsm = sm * v_row[None, :]                                 # (Bt, L)
            dwp = jnp.sum(wsm[:, :, None] * best, axis=1)             # (Bt, D)
            ctx = ctx + type_w[t] * dwp
        return jnp.concatenate([node, ctx], axis=-1)                  # (Bt, 2D)

    x0 = contextual(n0_ref, f0_ref)                                   # (Bt, 2D)
    x1 = contextual(n1_ref, f1_ref)                                   # (Bt, 2D)
    bt = x0.shape[0]

    # one batched MXU matmul for BOTH siamese sides: (2*Bt, 2D) @ (2D, OUT_PAD)
    xx = jnp.concatenate([x0, x1], axis=0)                            # (2Bt, 2D)
    y = jnp.dot(xx, wt_ref[...], preferred_element_type=jnp.float32) + b_ref[...]
    y0 = y[:bt]                                                       # (Bt, OUT_PAD)
    y1 = y[bt:]
    sim_ent = _cos(y0, y1)                                            # (Bt, 1)

    # property / domain / range similarities
    prop0 = p0_ref[...]                                               # (Bt, 3, Lp, D)
    prop1 = p1_ref[...]
    sims = []
    for t in range(3):                                                # static unroll, 3 types
        a0 = jnp.sum(prop0[:, t], axis=1)                             # (Bt, D)
        a1 = jnp.sum(prop1[:, t], axis=1)
        sims.append(_cos(a0, a1))                                     # (Bt, 1)
    sim_prop = (prop_w * sims[0] + dom_w * sims[1]
                + (1.0 - prop_w - dom_w) * sims[2])                   # (Bt, 1)

    out_ref[...] = jnp.concatenate([sim_ent, sim_prop], axis=1)       # (Bt, 2)


def siamese_forward(emb_table, nodes, features, prop_nodes, prop_features, params):
    """nodes:(B,2) int, features:(B,2,4,P,L) int, prop_features:(B,2,3,Lp) int."""
    B = nodes.shape[0]
    has_prop = prop_nodes.size != 0
    if not has_prop:
        prop_features = jnp.zeros((B, 2, 3, 1), jnp.int32)
    Lp = prop_features.shape[-1]

    # batch tile: large enough to amortize per-step overhead and feed the MXU,
    # small enough to stay well within scoped VMEM on v5e/v6e/v7x.
    if B >= 128:
        Bt = 128
    else:
        Bt = max(8, ((B + 7) // 8) * 8)
    B_pad = ((B + Bt - 1) // Bt) * Bt
    nb = B_pad // Bt
    pad = B_pad - B

    def pad_batch(x):
        if pad == 0:
            return x
        return jnp.pad(x, ((0, pad),) + ((0, 0),) * (x.ndim - 1))

    nodes_p = pad_batch(nodes.astype(jnp.int32))               # (B_pad, 2)
    feats_p = pad_batch(features.astype(jnp.int32))            # (B_pad, 2, 4, P, L)
    props_p = pad_batch(prop_features.astype(jnp.int32))       # (B_pad, 2, 3, Lp)

    # side-major flattening: rows [0, B_pad) = side 0, rows [B_pad, 2*B_pad) = side 1
    nodes_sm = jnp.transpose(nodes_p, (1, 0)).reshape(2 * B_pad)
    feats_sm = jnp.transpose(feats_p, (1, 0, 2, 3, 4)).reshape(
        2 * B_pad, MAX_TYPES, MAX_PATHS, MAX_PATHLEN)
    props_sm = jnp.transpose(props_p, (1, 0, 2, 3)).reshape(2 * B_pad, 3, Lp)

    # embedding lookups (glue; kept in f32 for parity with the reference)
    node_emb = jnp.take(emb_table, nodes_sm, axis=0).astype(jnp.float32)   # (2B_pad, D)
    feat_emb = jnp.take(emb_table, feats_sm, axis=0).astype(jnp.float32)   # (2B_pad,4,P,L,D)
    prop_emb = jnp.take(emb_table, props_sm, axis=0).astype(jnp.float32)   # (2B_pad,3,Lp,D)

    v, wvec = params["v"], params["wvec"]
    wt = jnp.pad(params["wt"], ((0, 0), (0, OUT_PAD - OUT_DIM)))           # (2D, 384)
    b = jnp.pad(params["b"], ((0, 0), (0, OUT_PAD - OUT_DIM)))             # (1, 384)

    grid_spec = pltpu.PrefetchScalarGridSpec(
        num_scalar_prefetch=0,
        grid=(nb,),
        in_specs=[
            pl.BlockSpec(memory_space=pltpu.MemorySpace.SMEM),                     # wvec
            pl.BlockSpec((Bt, EMB_DIM), lambda g: (g, 0)),                         # node side0
            pl.BlockSpec((Bt, EMB_DIM), lambda g: (g + nb, 0)),                    # node side1
            pl.BlockSpec((Bt, MAX_TYPES, MAX_PATHS, MAX_PATHLEN, EMB_DIM),
                         lambda g: (g, 0, 0, 0, 0)),                               # feat side0
            pl.BlockSpec((Bt, MAX_TYPES, MAX_PATHS, MAX_PATHLEN, EMB_DIM),
                         lambda g: (g + nb, 0, 0, 0, 0)),                          # feat side1
            pl.BlockSpec((Bt, 3, Lp, EMB_DIM), lambda g: (g, 0, 0, 0)),            # prop side0
            pl.BlockSpec((Bt, 3, Lp, EMB_DIM), lambda g: (g + nb, 0, 0, 0)),       # prop side1
            pl.BlockSpec((1, MAX_PATHLEN), lambda g: (0, 0)),                      # v
            pl.BlockSpec((2 * EMB_DIM, OUT_PAD), lambda g: (0, 0)),                # Wt
            pl.BlockSpec((1, OUT_PAD), lambda g: (0, 0)),                          # bias
        ],
        out_specs=pl.BlockSpec((Bt, 2), lambda g: (g, 0)),
    )

    out = pl.pallas_call(
        siamese_kernel,
        out_shape=jax.ShapeDtypeStruct((B_pad, 2), jnp.float32),
        grid_spec=grid_spec,
        compiler_params=pltpu.CompilerParams(
            dimension_semantics=("parallel",),
            vmem_limit_bytes=32 * 1024 * 1024),
    )(wvec, node_emb, node_emb, feat_emb, feat_emb, prop_emb, prop_emb, v, wt, b)

    sim_ent = out[:B, 0]
    if has_prop:
        return jnp.concatenate([sim_ent, out[:B, 1]], axis=0)   # torch.cat((sim_ent, sim_prop))
    return sim_ent


# ---------------- pure-JAX reference (for sanity checking only) ----------------
def reference_forward(emb_table, nodes, features, prop_features, params):
    v = params["v"][0]
    w_root, w_child, w_obj, prop_w, dom_w = [params["wvec"][k] for k in range(5)]
    wt, b = params["wt"], params["b"][0]
    node_emb = emb_table[nodes].astype(jnp.float32)
    feat_emb = emb_table[features].astype(jnp.float32)
    results = []
    for i in range(2):
        ne = node_emb[:, i]
        fe = feat_emb[:, i]
        path_w = jnp.einsum("bd,bnpld->bnpl", ne, fe).sum(-1)
        best = jnp.argmax(path_w, axis=-1)
        onehot = jax.nn.one_hot(best, MAX_PATHS, dtype=fe.dtype)
        best_path = jnp.einsum("bnp,bnpld->bnld", onehot, fe)
        nw = jnp.einsum("bd,bnld->bnl", ne, best_path)
        mask = ((nw != 0).astype(jnp.float32) - 1.0) * 9999.0
        sm = jax.nn.softmax(nw + mask, axis=-1)
        att = sm[..., None] * best_path
        dwp = jnp.sum(v[None, None, :, None] * att, axis=2)
        w_data = 1.0 - w_root - w_child - w_obj
        ctx = (w_root * dwp[:, 0] + w_child * dwp[:, 1]
               + w_obj * dwp[:, 2] + w_data * dwp[:, 3])
        x = jnp.concatenate([ne, ctx], axis=1)
        results.append(x @ wt + b)

    def cos(a, c):
        num = jnp.sum(a * c, axis=-1)
        den = jnp.maximum(jnp.linalg.norm(a, axis=-1) * jnp.linalg.norm(c, axis=-1), 1e-8)
        return num / den

    sim_ent = cos(results[0], results[1])
    agg = jnp.sum(emb_table[prop_features].astype(jnp.float32), axis=-2)
    sim_prop = (prop_w * cos(agg[:, 0, 0], agg[:, 1, 0])
                + dom_w * cos(agg[:, 0, 1], agg[:, 1, 1])
                + (1.0 - prop_w - dom_w) * cos(agg[:, 0, 2], agg[:, 1, 2]))
    return jnp.concatenate([sim_ent, sim_prop])


if __name__ == "__main__":
    key = jax.random.PRNGKey(0)
    ks = jax.random.split(key, 8)
    B = 2

    emb_table = jax.random.normal(ks[0], (VOCAB, EMB_DIM), jnp.float32)
    nodes = jax.random.randint(ks[1], (B, 2), 0, VOCAB, dtype=jnp.int32)
    features = jax.random.randint(
        ks[2], (B, 2, MAX_TYPES, MAX_PATHS, MAX_PATHLEN), 0, VOCAB, dtype=jnp.int32)
    prop_nodes = jax.random.randint(ks[3], (B, 2), 0, VOCAB, dtype=jnp.int32)
    prop_features = jax.random.randint(
        ks[4], (B, 2, 3, MAX_PROPLEN), 0, VOCAB, dtype=jnp.int32)

    params = {
        # v initialized to 1/max_pathlen (as in __init__); w_* = 0.25; prop/domain = 0.33
        "v": jnp.full((1, MAX_PATHLEN), 1.0 / MAX_PATHLEN, jnp.float32),
        "wvec": jnp.array([0.25, 0.25, 0.25, 0.33, 0.33, 0.0, 0.0, 0.0], jnp.float32),
        # nn.Linear(2*emb_dim, 300): store W^T and bias (deterministic synthetic init)
        "wt": 0.1 * jax.random.normal(ks[5], (2 * EMB_DIM, OUT_DIM), jnp.float32),
        "b": 0.1 * jax.random.normal(ks[6], (1, OUT_DIM), jnp.float32),
    }

    out = siamese_forward(emb_table, nodes, features, prop_nodes, prop_features, params)
    out = jax.block_until_ready(out)

    ref = reference_forward(emb_table, nodes, features, prop_features, params)
    np.testing.assert_allclose(np.asarray(out), np.asarray(ref), rtol=1e-3, atol=1e-3)

    print("KERNEL_OK")
</pallas_src>

<mosaic_0001>
module attributes {stable_mosaic.version = 11 : i64} {
  func.func @siamese_kernel(%arg0: i32, %arg1: memref<8xf32, #tpu.memory_space<smem>>, %arg2: memref<8x32xf32, #tpu.memory_space<vmem>>, %arg3: memref<8x32xf32, #tpu.memory_space<vmem>>, %arg4: memref<8x4x3x5x32xf32, #tpu.memory_space<vmem>>, %arg5: memref<8x4x3x5x32xf32, #tpu.memory_space<vmem>>, %arg6: memref<8x3x4x32xf32, #tpu.memory_space<vmem>>, %arg7: memref<8x3x4x32xf32, #tpu.memory_space<vmem>>, %arg8: memref<1x5xf32, #tpu.memory_space<vmem>>, %arg9: memref<64x384xf32, #tpu.memory_space<vmem>>, %arg10: memref<1x384xf32, #tpu.memory_space<vmem>>, %arg11: memref<8x2xf32, #tpu.memory_space<vmem>>) attributes {dimension_semantics = [#tpu.dimension_semantics<parallel>], iteration_bounds = array<i64: 1>, scalar_prefetch = 0 : i64, scratch_operands = 0 : i64, tpu.core_type = #tpu.core_type<tc>, window_params = [{transform_indices = @transform_0, window_bounds = array<i64: 8>}, {transform_indices = @transform_1, window_bounds = array<i64: 8, 32>}, {transform_indices = @transform_2, window_bounds = array<i64: 8, 32>}, {transform_indices = @transform_3, window_bounds = array<i64: 8, 4, 3, 5, 32>}, {transform_indices = @transform_4, window_bounds = array<i64: 8, 4, 3, 5, 32>}, {transform_indices = @transform_5, window_bounds = array<i64: 8, 3, 4, 32>}, {transform_indices = @transform_6, window_bounds = array<i64: 8, 3, 4, 32>}, {pipeline_mode = #tpu.pipeline_mode<synchronous>, transform_indices = @transform_7, window_bounds = array<i64: 1, 5>}, {pipeline_mode = #tpu.pipeline_mode<synchronous>, transform_indices = @transform_8, window_bounds = array<i64: 64, 384>}, {pipeline_mode = #tpu.pipeline_mode<synchronous>, transform_indices = @transform_9, window_bounds = array<i64: 1, 384>}, {transform_indices = @transform_10, window_bounds = array<i64: 8, 2>}]} {
    %c0 = arith.constant 0 : index
    %0 = memref.load %arg1[%c0] : memref<8xf32, #tpu.memory_space<smem>>
    %c1 = arith.constant 1 : index
    %1 = memref.load %arg1[%c1] : memref<8xf32, #tpu.memory_space<smem>>
    %c2 = arith.constant 2 : index
    %2 = memref.load %arg1[%c2] : memref<8xf32, #tpu.memory_space<smem>>
    %c3 = arith.constant 3 : index
    %3 = memref.load %arg1[%c3] : memref<8xf32, #tpu.memory_space<smem>>
    %c4 = arith.constant 4 : index
    %4 = memref.load %arg1[%c4] : memref<8xf32, #tpu.memory_space<smem>>
    %cst = arith.constant 1.000000e+00 : f32
    %5 = arith.subf %cst, %0 : f32
    %6 = arith.subf %5, %1 : f32
    %7 = arith.subf %6, %2 : f32
    %c0_0 = arith.constant 0 : index
    %c0_1 = arith.constant 0 : index
    %8 = vector.load %arg8[%c0_0, %c0_1] : memref<1x5xf32, #tpu.memory_space<vmem>>, vector<1x5xf32>
    %9 = vector.shape_cast %8 : vector<1x5xf32> to vector<5xf32>
    %c0_2 = arith.constant 0 : index
    %c0_3 = arith.constant 0 : index
    %10 = vector.load %arg2[%c0_2, %c0_3] : memref<8x32xf32, #tpu.memory_space<vmem>>, vector<8x32xf32>
    %c0_4 = arith.constant 0 : index
    %c0_5 = arith.constant 0 : index
    %c0_6 = arith.constant 0 : index
    %c0_7 = arith.constant 0 : index
    %c0_8 = arith.constant 0 : index
    %11 = vector.load %arg4[%c0_4, %c0_5, %c0_6, %c0_7, %c0_8] : memref<8x4x3x5x32xf32, #tpu.memory_space<vmem>>, vector<8x4x3x5x32xf32>
    %cst_9 = arith.constant 0.000000e+00 : f32
    %12 = vector.broadcast %cst_9 : f32 to vector<8x32xf32>
    %13 = vector.extract_strided_slice %11 {offsets = [0, 0, 0, 0, 0], sizes = [8, 1, 3, 5, 32], strides = [1, 1, 1, 1, 1]} : vector<8x4x3x5x32xf32> to vector<8x1x3x5x32xf32>
    %14 = vector.shape_cast %13 : vector<8x1x3x5x32xf32> to vector<8x3x5x32xf32>
    %15 = vector.shape_cast %10 : vector<8x32xf32> to vector<8x1x1x32xf32>
    %16 = vector.broadcast %15 : vector<8x1x1x32xf32> to vector<8x3x5x32xf32>
    %17 = arith.mulf %14, %16 : vector<8x3x5x32xf32>
    %cst_10 = arith.constant dense<0.000000e+00> : vector<8x3x5xf32>
    %18 = vector.multi_reduction <add>, %17, %cst_10 [3] : vector<8x3x5x32xf32> to vector<8x3x5xf32>
    %cst_11 = arith.constant dense<0.000000e+00> : vector<8x3xf32>
    %19 = vector.multi_reduction <add>, %18, %cst_11 [2] : vector<8x3x5xf32> to vector<8x3xf32>
    %cst_12 = arith.constant dense<0xFF800000> : vector<8xf32>
    %20 = vector.multi_reduction <maximumf>, %19, %cst_12 [1] : vector<8x3xf32> to vector<8xf32>
    %21 = vector.shape_cast %20 : vector<8xf32> to vector<8x1xf32>
    %22 = tpu.iota {dimensions = array<i32: 1>} : vector<8x3xi32>
    %23 = vector.broadcast %21 : vector<8x1xf32> to vector<8x3xf32>
    %24 = arith.cmpf oeq, %19, %23 : vector<8x3xf32>
    %c3_i32 = arith.constant 3 : i32
    %25 = vector.broadcast %c3_i32 : i32 to vector<8x3xi32>
    %26 = arith.select %24, %22, %25 : vector<8x3xi1>, vector<8x3xi32>
    %cst_13 = arith.constant dense<2147483647> : vector<8xi32>
    %27 = vector.multi_reduction <minsi>, %26, %cst_13 [1] : vector<8x3xi32> to vector<8xi32>
    %28 = vector.shape_cast %27 : vector<8xi32> to vector<8x1xi32>
    %29 = vector.broadcast %28 : vector<8x1xi32> to vector<8x3xi32>
    %30 = arith.cmpi eq, %22, %29 : vector<8x3xi32>
    %31 = arith.extui %30 : vector<8x3xi1> to vector<8x3xi32>
    %32 = arith.sitofp %31 : vector<8x3xi32> to vector<8x3xf32>
    %33 = vector.shape_cast %32 : vector<8x3xf32> to vector<8x3x1x1xf32>
    %34 = vector.broadcast %33 : vector<8x3x1x1xf32> to vector<8x3x5x32xf32>
    %35 = arith.mulf %34, %14 : vector<8x3x5x32xf32>
    %cst_14 = arith.constant dense<0.000000e+00> : vector<8x5x32xf32>
    %36 = vector.multi_reduction <add>, %35, %cst_14 [1] : vector<8x3x5x32xf32> to vector<8x5x32xf32>
    %37 = vector.shape_cast %10 : vector<8x32xf32> to vector<8x1x32xf32>
    %38 = vector.broadcast %37 : vector<8x1x32xf32> to vector<8x5x32xf32>
    %39 = arith.mulf %36, %38 : vector<8x5x32xf32>
    %cst_15 = arith.constant dense<0.000000e+00> : vector<8x5xf32>
    %40 = vector.multi_reduction <add>, %39, %cst_15 [2] : vector<8x5x32xf32> to vector<8x5xf32>
    %cst_16 = arith.constant 0.000000e+00 : f32
    %41 = vector.broadcast %cst_16 : f32 to vector<8x5xf32>
    %42 = arith.cmpf one, %40, %41 : vector<8x5xf32>
    %cst_17 = arith.constant 1.000000e+00 : f32
    %cst_18 = arith.constant 0.000000e+00 : f32
    %43 = vector.broadcast %cst_17 : f32 to vector<8x5xf32>
    %44 = vector.broadcast %cst_18 : f32 to vector<8x5xf32>
    %45 = arith.select %42, %43, %44 : vector<8x5xi1>, vector<8x5xf32>
    %cst_19 = arith.constant 1.000000e+00 : f32
    %46 = vector.broadcast %cst_19 : f32 to vector<8x5xf32>
    %47 = arith.subf %45, %46 : vector<8x5xf32>
    %cst_20 = arith.constant 9.999000e+03 : f32
    %48 = vector.broadcast %cst_20 : f32 to vector<8x5xf32>
    %49 = arith.mulf %47, %48 : vector<8x5xf32>
    %50 = arith.addf %40, %49 : vector<8x5xf32>
    %cst_21 = arith.constant dense<0xFF800000> : vector<8xf32>
    %51 = vector.multi_reduction <maximumf>, %50, %cst_21 [1] : vector<8x5xf32> to vector<8xf32>
    %52 = vector.shape_cast %51 : vector<8xf32> to vector<8x1xf32>
    %53 = vector.broadcast %52 : vector<8x1xf32> to vector<8x5xf32>
    %54 = arith.subf %50, %53 : vector<8x5xf32>
    %55 = math.exp %54 : vector<8x5xf32>
    %cst_22 = arith.constant dense<0.000000e+00> : vector<8xf32>
    %56 = vector.multi_reduction <add>, %55, %cst_22 [1] : vector<8x5xf32> to vector<8xf32>
    %57 = vector.shape_cast %56 : vector<8xf32> to vector<8x1xf32>
    %58 = vector.broadcast %57 : vector<8x1xf32> to vector<8x5xf32>
    %59 = arith.divf %55, %58 : vector<8x5xf32>
    %60 = vector.shape_cast %9 : vector<5xf32> to vector<1x5xf32>
    %61 = vector.broadcast %60 : vector<1x5xf32> to vector<8x5xf32>
    %62 = arith.mulf %59, %61 : vector<8x5xf32>
    %63 = vector.shape_cast %62 : vector<8x5xf32> to vector<8x5x1xf32>
    %64 = vector.broadcast %63 : vector<8x5x1xf32> to vector<8x5x32xf32>
    %65 = arith.mulf %64, %36 : vector<8x5x32xf32>
    %cst_23 = arith.constant dense<0.000000e+00> : vector<8x32xf32>
    %66 = vector.multi_reduction <add>, %65, %cst_23 [1] : vector<8x5x32xf32> to vector<8x32xf32>
    %67 = vector.broadcast %0 : f32 to vector<8x32xf32>
    %68 = arith.mulf %67, %66 : vector<8x32xf32>
    %69 = arith.addf %12, %68 : vector<8x32xf32>
    %70 = vector.extract_strided_slice %11 {offsets = [0, 1, 0, 0, 0], sizes = [8, 1, 3, 5, 32], strides = [1, 1, 1, 1, 1]} : vector<8x4x3x5x32xf32> to vector<8x1x3x5x32xf32>
    %71 = vector.shape_cast %70 : vector<8x1x3x5x32xf32> to vector<8x3x5x32xf32>
    %72 = vector.shape_cast %10 : vector<8x32xf32> to vector<8x1x1x32xf32>
    %73 = vector.broadcast %72 : vector<8x1x1x32xf32> to vector<8x3x5x32xf32>
    %74 = arith.mulf %71, %73 : vector<8x3x5x32xf32>
    %cst_24 = arith.constant dense<0.000000e+00> : vector<8x3x5xf32>
    %75 = vector.multi_reduction <add>, %74, %cst_24 [3] : vector<8x3x5x32xf32> to vector<8x3x5xf32>
    %cst_25 = arith.constant dense<0.000000e+00> : vector<8x3xf32>
    %76 = vector.multi_reduction <add>, %75, %cst_25 [2] : vector<8x3x5xf32> to vector<8x3xf32>
    %cst_26 = arith.constant dense<0xFF800000> : vector<8xf32>
    %77 = vector.multi_reduction <maximumf>, %76, %cst_26 [1] : vector<8x3xf32> to vector<8xf32>
    %78 = vector.shape_cast %77 : vector<8xf32> to vector<8x1xf32>
    %79 = tpu.iota {dimensions = array<i32: 1>} : vector<8x3xi32>
    %80 = vector.broadcast %78 : vector<8x1xf32> to vector<8x3xf32>
    %81 = arith.cmpf oeq, %76, %80 : vector<8x3xf32>
    %c3_i32_27 = arith.constant 3 : i32
    %82 = vector.broadcast %c3_i32_27 : i32 to vector<8x3xi32>
    %83 = arith.select %81, %79, %82 : vector<8x3xi1>, vector<8x3xi32>
    %cst_28 = arith.constant dense<2147483647> : vector<8xi32>
    %84 = vector.multi_reduction <minsi>, %83, %cst_28 [1] : vector<8x3xi32> to vector<8xi32>
    %85 = vector.shape_cast %84 : vector<8xi32> to vector<8x1xi32>
    %86 = vector.broadcast %85 : vector<8x1xi32> to vector<8x3xi32>
    %87 = arith.cmpi eq, %79, %86 : vector<8x3xi32>
    %88 = arith.extui %87 : vector<8x3xi1> to vector<8x3xi32>
    %89 = arith.sitofp %88 : vector<8x3xi32> to vector<8x3xf32>
    %90 = vector.shape_cast %89 : vector<8x3xf32> to vector<8x3x1x1xf32>
    %91 = vector.broadcast %90 : vector<8x3x1x1xf32> to vector<8x3x5x32xf32>
    %92 = arith.mulf %91, %71 : vector<8x3x5x32xf32>
    %cst_29 = arith.constant dense<0.000000e+00> : vector<8x5x32xf32>
    %93 = vector.multi_reduction <add>, %92, %cst_29 [1] : vector<8x3x5x32xf32> to vector<8x5x32xf32>
    %94 = vector.shape_cast %10 : vector<8x32xf32> to vector<8x1x32xf32>
    %95 = vector.broadcast %94 : vector<8x1x32xf32> to vector<8x5x32xf32>
    %96 = arith.mulf %93, %95 : vector<8x5x32xf32>
    %cst_30 = arith.constant dense<0.000000e+00> : vector<8x5xf32>
    %97 = vector.multi_reduction <add>, %96, %cst_30 [2] : vector<8x5x32xf32> to vector<8x5xf32>
    %cst_31 = arith.constant 0.000000e+00 : f32
    %98 = vector.broadcast %cst_31 : f32 to vector<8x5xf32>
    %99 = arith.cmpf one, %97, %98 : vector<8x5xf32>
    %cst_32 = arith.constant 1.000000e+00 : f32
    %cst_33 = arith.constant 0.000000e+00 : f32
    %100 = vector.broadcast %cst_32 : f32 to vector<8x5xf32>
    %101 = vector.broadcast %cst_33 : f32 to vector<8x5xf32>
    %102 = arith.select %99, %100, %101 : vector<8x5xi1>, vector<8x5xf32>
    %cst_34 = arith.constant 1.000000e+00 : f32
    %103 = vector.broadcast %cst_34 : f32 to vector<8x5xf32>
    %104 = arith.subf %102, %103 : vector<8x5xf32>
    %cst_35 = arith.constant 9.999000e+03 : f32
    %105 = vector.broadcast %cst_35 : f32 to vector<8x5xf32>
    %106 = arith.mulf %104, %105 : vector<8x5xf32>
    %107 = arith.addf %97, %106 : vector<8x5xf32>
    %cst_36 = arith.constant dense<0xFF800000> : vector<8xf32>
    %108 = vector.multi_reduction <maximumf>, %107, %cst_36 [1] : vector<8x5xf32> to vector<8xf32>
    %109 = vector.shape_cast %108 : vector<8xf32> to vector<8x1xf32>
    %110 = vector.broadcast %109 : vector<8x1xf32> to vector<8x5xf32>
    %111 = arith.subf %107, %110 : vector<8x5xf32>
    %112 = math.exp %111 : vector<8x5xf32>
    %cst_37 = arith.constant dense<0.000000e+00> : vector<8xf32>
    %113 = vector.multi_reduction <add>, %112, %cst_37 [1] : vector<8x5xf32> to vector<8xf32>
    %114 = vector.shape_cast %113 : vector<8xf32> to vector<8x1xf32>
    %115 = vector.broadcast %114 : vector<8x1xf32> to vector<8x5xf32>
    %116 = arith.divf %112, %115 : vector<8x5xf32>
    %117 = vector.shape_cast %9 : vector<5xf32> to vector<1x5xf32>
    %118 = vector.broadcast %117 : vector<1x5xf32> to vector<8x5xf32>
    %119 = arith.mulf %116, %118 : vector<8x5xf32>
    %120 = vector.shape_cast %119 : vector<8x5xf32> to vector<8x5x1xf32>
    %121 = vector.broadcast %120 : vector<8x5x1xf32> to vector<8x5x32xf32>
    %122 = arith.mulf %121, %93 : vector<8x5x32xf32>
    %cst_38 = arith.constant dense<0.000000e+00> : vector<8x32xf32>
    %123 = vector.multi_reduction <add>, %122, %cst_38 [1] : vector<8x5x32xf32> to vector<8x32xf32>
    %124 = vector.broadcast %1 : f32 to vector<8x32xf32>
    %125 = arith.mulf %124, %123 : vector<8x32xf32>
    %126 = arith.addf %69, %125 : vector<8x32xf32>
    %127 = vector.extract_strided_slice %11 {offsets = [0, 2, 0, 0, 0], sizes = [8, 1, 3, 5, 32], strides = [1, 1, 1, 1, 1]} : vector<8x4x3x5x32xf32> to vector<8x1x3x5x32xf32>
    %128 = vector.shape_cast %127 : vector<8x1x3x5x32xf32> to vector<8x3x5x32xf32>
    %129 = vector.shape_cast %10 : vector<8x32xf32> to vector<8x1x1x32xf32>
    %130 = vector.broadcast %129 : vector<8x1x1x32xf32> to vector<8x3x5x32xf32>
    %131 = arith.mulf %128, %130 : vector<8x3x5x32xf32>
    %cst_39 = arith.constant dense<0.000000e+00> : vector<8x3x5xf32>
    %132 = vector.multi_reduction <add>, %131, %cst_39 [3] : vector<8x3x5x32xf32> to vector<8x3x5xf32>
    %cst_40 = arith.constant dense<0.000000e+00> : vector<8x3xf32>
    %133 = vector.multi_reduction <add>, %132, %cst_40 [2] : vector<8x3x5xf32> to vector<8x3xf32>
    %cst_41 = arith.constant dense<0xFF800000> : vector<8xf32>
    %134 = vector.multi_reduction <maximumf>, %133, %cst_41 [1] : vector<8x3xf32> to vector<8xf32>
    %135 = vector.shape_cast %134 : vector<8xf32> to vector<8x1xf32>
    %136 = tpu.iota {dimensions = array<i32: 1>} : vector<8x3xi32>
    %137 = vector.broadcast %135 : vector<8x1xf32> to vector<8x3xf32>
    %138 = arith.cmpf oeq, %133, %137 : vector<8x3xf32>
    %c3_i32_42 = arith.constant 3 : i32
    %139 = vector.broadcast %c3_i32_42 : i32 to vector<8x3xi32>
    %140 = arith.select %138, %136, %139 : vector<8x3xi1>, vector<8x3xi32>
    %cst_43 = arith.constant dense<2147483647> : vector<8xi32>
    %141 = vector.multi_reduction <minsi>, %140, %cst_43 [1] : vector<8x3xi32> to vector<8xi32>
    %142 = vector.shape_cast %141 : vector<8xi32> to vector<8x1xi32>
    %143 = vector.broadcast %142 : vector<8x1xi32> to vector<8x3xi32>
    %144 = arith.cmpi eq, %136, %143 : vector<8x3xi32>
    %145 = arith.extui %144 : vector<8x3xi1> to vector<8x3xi32>
    %146 = arith.sitofp %145 : vector<8x3xi32> to vector<8x3xf32>
    %147 = vector.shape_cast %146 : vector<8x3xf32> to vector<8x3x1x1xf32>
    %148 = vector.broadcast %147 : vector<8x3x1x1xf32> to vector<8x3x5x32xf32>
    %149 = arith.mulf %148, %128 : vector<8x3x5x32xf32>
    %cst_44 = arith.constant dense<0.000000e+00> : vector<8x5x32xf32>
    %150 = vector.multi_reduction <add>, %149, %cst_44 [1] : vector<8x3x5x32xf32> to vector<8x5x32xf32>
    %151 = vector.shape_cast %10 : vector<8x32xf32> to vector<8x1x32xf32>
    %152 = vector.broadcast %151 : vector<8x1x32xf32> to vector<8x5x32xf32>
    %153 = arith.mulf %150, %152 : vector<8x5x32xf32>
    %cst_45 = arith.constant dense<0.000000e+00> : vector<8x5xf32>
    %154 = vector.multi_reduction <add>, %153, %cst_45 [2] : vector<8x5x32xf32> to vector<8x5xf32>
    %cst_46 = arith.constant 0.000000e+00 : f32
    %155 = vector.broadcast %cst_46 : f32 to vector<8x5xf32>
    %156 = arith.cmpf one, %154, %155 : vector<8x5xf32>
    %cst_47 = arith.constant 1.000000e+00 : f32
    %cst_48 = arith.constant 0.000000e+00 : f32
    %157 = vector.broadcast %cst_47 : f32 to vector<8x5xf32>
    %158 = vector.broadcast %cst_48 : f32 to vector<8x5xf32>
    %159 = arith.select %156, %157, %158 : vector<8x5xi1>, vector<8x5xf32>
    %cst_49 = arith.constant 1.000000e+00 : f32
    %160 = vector.broadcast %cst_49 : f32 to vector<8x5xf32>
    %161 = arith.subf %159, %160 : vector<8x5xf32>
    %cst_50 = arith.constant 9.999000e+03 : f32
    %162 = vector.broadcast %cst_50 : f32 to vector<8x5xf32>
    %163 = arith.mulf %161, %162 : vector<8x5xf32>
    %164 = arith.addf %154, %163 : vector<8x5xf32>
    %cst_51 = arith.constant dense<0xFF800000> : vector<8xf32>
    %165 = vector.multi_reduction <maximumf>, %164, %cst_51 [1] : vector<8x5xf32> to vector<8xf32>
    %166 = vector.shape_cast %165 : vector<8xf32> to vector<8x1xf32>
    %167 = vector.broadcast %166 : vector<8x1xf32> to vector<8x5xf32>
    %168 = arith.subf %164, %167 : vector<8x5xf32>
    %169 = math.exp %168 : vector<8x5xf32>
    %cst_52 = arith.constant dense<0.000000e+00> : vector<8xf32>
    %170 = vector.multi_reduction <add>, %169, %cst_52 [1] : vector<8x5xf32> to vector<8xf32>
    %171 = vector.shape_cast %170 : vector<8xf32> to vector<8x1xf32>
    %172 = vector.broadcast %171 : vector<8x1xf32> to vector<8x5xf32>
    %173 = arith.divf %169, %172 : vector<8x5xf32>
    %174 = vector.shape_cast %9 : vector<5xf32> to vector<1x5xf32>
    %175 = vector.broadcast %174 : vector<1x5xf32> to vector<8x5xf32>
    %176 = arith.mulf %173, %175 : vector<8x5xf32>
    %177 = vector.shape_cast %176 : vector<8x5xf32> to vector<8x5x1xf32>
    %178 = vector.broadcast %177 : vector<8x5x1xf32> to vector<8x5x32xf32>
    %179 = arith.mulf %178, %150 : vector<8x5x32xf32>
    %cst_53 = arith.constant dense<0.000000e+00> : vector<8x32xf32>
    %180 = vector.multi_reduction <add>, %179, %cst_53 [1] : vector<8x5x32xf32> to vector<8x32xf32>
    %181 = vector.broadcast %2 : f32 to vector<8x32xf32>
    %182 = arith.mulf %181, %180 : vector<8x32xf32>
    %183 = arith.addf %126, %182 : vector<8x32xf32>
    %184 = vector.extract_strided_slice %11 {offsets = [0, 3, 0, 0, 0], sizes = [8, 1, 3, 5, 32], strides = [1, 1, 1, 1, 1]} : vector<8x4x3x5x32xf32> to vector<8x1x3x5x32xf32>
    %185 = vector.shape_cast %184 : vector<8x1x3x5x32xf32> to vector<8x3x5x32xf32>
    %186 = vector.shape_cast %10 : vector<8x32xf32> to vector<8x1x1x32xf32>
    %187 = vector.broadcast %186 : vector<8x1x1x32xf32> to vector<8x3x5x32xf32>
    %188 = arith.mulf %185, %187 : vector<8x3x5x32xf32>
    %cst_54 = arith.constant dense<0.000000e+00> : vector<8x3x5xf32>
    %189 = vector.multi_reduction <add>, %188, %cst_54 [3] : vector<8x3x5x32xf32> to vector<8x3x5xf32>
    %cst_55 = arith.constant dense<0.000000e+00> : vector<8x3xf32>
    %190 = vector.multi_reduction <add>, %189, %cst_55 [2] : vector<8x3x5xf32> to vector<8x3xf32>
    %cst_56 = arith.constant dense<0xFF800000> : vector<8xf32>
    %191 = vector.multi_reduction <maximumf>, %190, %cst_56 [1] : vector<8x3xf32> to vector<8xf32>
    %192 = vector.shape_cast %191 : vector<8xf32> to vector<8x1xf32>
    %193 = tpu.iota {dimensions = array<i32: 1>} : vector<8x3xi32>
    %194 = vector.broadcast %192 : vector<8x1xf32> to vector<8x3xf32>
    %195 = arith.cmpf oeq, %190, %194 : vector<8x3xf32>
    %c3_i32_57 = arith.constant 3 : i32
    %196 = vector.broadcast %c3_i32_57 : i32 to vector<8x3xi32>
    %197 = arith.select %195, %193, %196 : vector<8x3xi1>, vector<8x3xi32>
    %cst_58 = arith.constant dense<2147483647> : vector<8xi32>
    %198 = vector.multi_reduction <minsi>, %197, %cst_58 [1] : vector<8x3xi32> to vector<8xi32>
    %199 = vector.shape_cast %198 : vector<8xi32> to vector<8x1xi32>
    %200 = vector.broadcast %199 : vector<8x1xi32> to vector<8x3xi32>
    %201 = arith.cmpi eq, %193, %200 : vector<8x3xi32>
    %202 = arith.extui %201 : vector<8x3xi1> to vector<8x3xi32>
    %203 = arith.sitofp %202 : vector<8x3xi32> to vector<8x3xf32>
    %204 = vector.shape_cast %203 : vector<8x3xf32> to vector<8x3x1x1xf32>
    %205 = vector.broadcast %204 : vector<8x3x1x1xf32> to vector<8x3x5x32xf32>
    %206 = arith.mulf %205, %185 : vector<8x3x5x32xf32>
    %cst_59 = arith.constant dense<0.000000e+00> : vector<8x5x32xf32>
    %207 = vector.multi_reduction <add>, %206, %cst_59 [1] : vector<8x3x5x32xf32> to vector<8x5x32xf32>
    %208 = vector.shape_cast %10 : vector<8x32xf32> to vector<8x1x32xf32>
    %209 = vector.broadcast %208 : vector<8x1x32xf32> to vector<8x5x32xf32>
    %210 = arith.mulf %207, %209 : vector<8x5x32xf32>
    %cst_60 = arith.constant dense<0.000000e+00> : vector<8x5xf32>
    %211 = vector.multi_reduction <add>, %210, %cst_60 [2] : vector<8x5x32xf32> to vector<8x5xf32>
    %cst_61 = arith.constant 0.000000e+00 : f32
    %212 = vector.broadcast %cst_61 : f32 to vector<8x5xf32>
    %213 = arith.cmpf one, %211, %212 : vector<8x5xf32>
    %cst_62 = arith.constant 1.000000e+00 : f32
    %cst_63 = arith.constant 0.000000e+00 : f32
    %214 = vector.broadcast %cst_62 : f32 to vector<8x5xf32>
    %215 = vector.broadcast %cst_63 : f32 to vector<8x5xf32>
    %216 = arith.select %213, %214, %215 : vector<8x5xi1>, vector<8x5xf32>
    %cst_64 = arith.constant 1.000000e+00 : f32
    %217 = vector.broadcast %cst_64 : f32 to vector<8x5xf32>
    %218 = arith.subf %216, %217 : vector<8x5xf32>
    %cst_65 = arith.constant 9.999000e+03 : f32
    %219 = vector.broadcast %cst_65 : f32 to vector<8x5xf32>
    %220 = arith.mulf %218, %219 : vector<8x5xf32>
    %221 = arith.addf %211, %220 : vector<8x5xf32>
    %cst_66 = arith.constant dense<0xFF800000> : vector<8xf32>
    %222 = vector.multi_reduction <maximumf>, %221, %cst_66 [1] : vector<8x5xf32> to vector<8xf32>
    %223 = vector.shape_cast %222 : vector<8xf32> to vector<8x1xf32>
    %224 = vector.broadcast %223 : vector<8x1xf32> to vector<8x5xf32>
    %225 = arith.subf %221, %224 : vector<8x5xf32>
    %226 = math.exp %225 : vector<8x5xf32>
    %cst_67 = arith.constant dense<0.000000e+00> : vector<8xf32>
    %227 = vector.multi_reduction <add>, %226, %cst_67 [1] : vector<8x5xf32> to vector<8xf32>
    %228 = vector.shape_cast %227 : vector<8xf32> to vector<8x1xf32>
    %229 = vector.broadcast %228 : vector<8x1xf32> to vector<8x5xf32>
    %230 = arith.divf %226, %229 : vector<8x5xf32>
    %231 = vector.shape_cast %9 : vector<5xf32> to vector<1x5xf32>
    %232 = vector.broadcast %231 : vector<1x5xf32> to vector<8x5xf32>
    %233 = arith.mulf %230, %232 : vector<8x5xf32>
    %234 = vector.shape_cast %233 : vector<8x5xf32> to vector<8x5x1xf32>
    %235 = vector.broadcast %234 : vector<8x5x1xf32> to vector<8x5x32xf32>
    %236 = arith.mulf %235, %207 : vector<8x5x32xf32>
    %cst_68 = arith.constant dense<0.000000e+00> : vector<8x32xf32>
    %237 = vector.multi_reduction <add>, %236, %cst_68 [1] : vector<8x5x32xf32> to vector<8x32xf32>
    %238 = vector.broadcast %7 : f32 to vector<8x32xf32>
    %239 = arith.mulf %238, %237 : vector<8x32xf32>
    %240 = arith.addf %183, %239 : vector<8x32xf32>
    %241 = tpu.concatenate %10, %240 in 1 : vector<8x32xf32>, vector<8x32xf32> -> vector<8x64xf32>
    %c0_69 = arith.constant 0 : index
    %c0_70 = arith.constant 0 : index
    %242 = vector.load %arg3[%c0_69, %c0_70] : memref<8x32xf32, #tpu.memory_space<vmem>>, vector<8x32xf32>
    %c0_71 = arith.constant 0 : index
    %c0_72 = arith.constant 0 : index
    %c0_73 = arith.constant 0 : index
    %c0_74 = arith.constant 0 : index
    %c0_75 = arith.constant 0 : index
    %243 = vector.load %arg5[%c0_71, %c0_72, %c0_73, %c0_74, %c0_75] : memref<8x4x3x5x32xf32, #tpu.memory_space<vmem>>, vector<8x4x3x5x32xf32>
    %cst_76 = arith.constant 0.000000e+00 : f32
    %244 = vector.broadcast %cst_76 : f32 to vector<8x32xf32>
    %245 = vector.extract_strided_slice %243 {offsets = [0, 0, 0, 0, 0], sizes = [8, 1, 3, 5, 32], strides = [1, 1, 1, 1, 1]} : vector<8x4x3x5x32xf32> to vector<8x1x3x5x32xf32>
    %246 = vector.shape_cast %245 : vector<8x1x3x5x32xf32> to vector<8x3x5x32xf32>
    %247 = vector.shape_cast %242 : vector<8x32xf32> to vector<8x1x1x32xf32>
    %248 = vector.broadcast %247 : vector<8x1x1x32xf32> to vector<8x3x5x32xf32>
    %249 = arith.mulf %246, %248 : vector<8x3x5x32xf32>
    %cst_77 = arith.constant dense<0.000000e+00> : vector<8x3x5xf32>
    %250 = vector.multi_reduction <add>, %249, %cst_77 [3] : vector<8x3x5x32xf32> to vector<8x3x5xf32>
    %cst_78 = arith.constant dense<0.000000e+00> : vector<8x3xf32>
    %251 = vector.multi_reduction <add>, %250, %cst_78 [2] : vector<8x3x5xf32> to vector<8x3xf32>
    %cst_79 = arith.constant dense<0xFF800000> : vector<8xf32>
    %252 = vector.multi_reduction <maximumf>, %251, %cst_79 [1] : vector<8x3xf32> to vector<8xf32>
    %253 = vector.shape_cast %252 : vector<8xf32> to vector<8x1xf32>
    %254 = tpu.iota {dimensions = array<i32: 1>} : vector<8x3xi32>
    %255 = vector.broadcast %253 : vector<8x1xf32> to vector<8x3xf32>
    %256 = arith.cmpf oeq, %251, %255 : vector<8x3xf32>
    %c3_i32_80 = arith.constant 3 : i32
    %257 = vector.broadcast %c3_i32_80 : i32 to vector<8x3xi32>
    %258 = arith.select %256, %254, %257 : vector<8x3xi1>, vector<8x3xi32>
    %cst_81 = arith.constant dense<2147483647> : vector<8xi32>
    %259 = vector.multi_reduction <minsi>, %258, %cst_81 [1] : vector<8x3xi32> to vector<8xi32>
    %260 = vector.shape_cast %259 : vector<8xi32> to vector<8x1xi32>
    %261 = vector.broadcast %260 : vector<8x1xi32> to vector<8x3xi32>
    %262 = arith.cmpi eq, %254, %261 : vector<8x3xi32>
    %263 = arith.extui %262 : vector<8x3xi1> to vector<8x3xi32>
    %264 = arith.sitofp %263 : vector<8x3xi32> to vector<8x3xf32>
    %265 = vector.shape_cast %264 : vector<8x3xf32> to vector<8x3x1x1xf32>
    %266 = vector.broadcast %265 : vector<8x3x1x1xf32> to vector<8x3x5x32xf32>
    %267 = arith.mulf %266, %246 : vector<8x3x5x32xf32>
    %cst_82 = arith.constant dense<0.000000e+00> : vector<8x5x32xf32>
    %268 = vector.multi_reduction <add>, %267, %cst_82 [1] : vector<8x3x5x32xf32> to vector<8x5x32xf32>
    %269 = vector.shape_cast %242 : vector<8x32xf32> to vector<8x1x32xf32>
    %270 = vector.broadcast %269 : vector<8x1x32xf32> to vector<8x5x32xf32>
    %271 = arith.mulf %268, %270 : vector<8x5x32xf32>
    %cst_83 = arith.constant dense<0.000000e+00> : vector<8x5xf32>
    %272 = vector.multi_reduction <add>, %271, %cst_83 [2] : vector<8x5x32xf32> to vector<8x5xf32>
    %cst_84 = arith.constant 0.000000e+00 : f32
    %273 = vector.broadcast %cst_84 : f32 to vector<8x5xf32>
    %274 = arith.cmpf one, %272, %273 : vector<8x5xf32>
    %cst_85 = arith.constant 1.000000e+00 : f32
    %cst_86 = arith.constant 0.000000e+00 : f32
    %275 = vector.broadcast %cst_85 : f32 to vector<8x5xf32>
    %276 = vector.broadcast %cst_86 : f32 to vector<8x5xf32>
    %277 = arith.select %274, %275, %276 : vector<8x5xi1>, vector<8x5xf32>
    %cst_87 = arith.constant 1.000000e+00 : f32
    %278 = vector.broadcast %cst_87 : f32 to vector<8x5xf32>
    %279 = arith.subf %277, %278 : vector<8x5xf32>
    %cst_88 = arith.constant 9.999000e+03 : f32
    %280 = vector.broadcast %cst_88 : f32 to vector<8x5xf32>
    %281 = arith.mulf %279, %280 : vector<8x5xf32>
    %282 = arith.addf %272, %281 : vector<8x5xf32>
    %cst_89 = arith.constant dense<0xFF800000> : vector<8xf32>
    %283 = vector.multi_reduction <maximumf>, %282, %cst_89 [1] : vector<8x5xf32> to vector<8xf32>
    %284 = vector.shape_cast %283 : vector<8xf32> to vector<8x1xf32>
    %285 = vector.broadcast %284 : vector<8x1xf32> to vector<8x5xf32>
    %286 = arith.subf %282, %285 : vector<8x5xf32>
    %287 = math.exp %286 : vector<8x5xf32>
    %cst_90 = arith.constant dense<0.000000e+00> : vector<8xf32>
    %288 = vector.multi_reduction <add>, %287, %cst_90 [1] : vector<8x5xf32> to vector<8xf32>
    %289 = vector.shape_cast %288 : vector<8xf32> to vector<8x1xf32>
    %290 = vector.broadcast %289 : vector<8x1xf32> to vector<8x5xf32>
    %291 = arith.divf %287, %290 : vector<8x5xf32>
    %292 = vector.shape_cast %9 : vector<5xf32> to vector<1x5xf32>
    %293 = vector.broadcast %292 : vector<1x5xf32> to vector<8x5xf32>
    %294 = arith.mulf %291, %293 : vector<8x5xf32>
    %295 = vector.shape_cast %294 : vector<8x5xf32> to vector<8x5x1xf32>
    %296 = vector.broadcast %295 : vector<8x5x1xf32> to vector<8x5x32xf32>
    %297 = arith.mulf %296, %268 : vector<8x5x32xf32>
    %cst_91 = arith.constant dense<0.000000e+00> : vector<8x32xf32>
    %298 = vector.multi_reduction <add>, %297, %cst_91 [1] : vector<8x5x32xf32> to vector<8x32xf32>
    %299 = vector.broadcast %0 : f32 to vector<8x32xf32>
    %300 = arith.mulf %299, %298 : vector<8x32xf32>
    %301 = arith.addf %244, %300 : vector<8x32xf32>
    %302 = vector.extract_strided_slice %243 {offsets = [0, 1, 0, 0, 0], sizes = [8, 1, 3, 5, 32], strides = [1, 1, 1, 1, 1]} : vector<8x4x3x5x32xf32> to vector<8x1x3x5x32xf32>
    %303 = vector.shape_cast %302 : vector<8x1x3x5x32xf32> to vector<8x3x5x32xf32>
    %304 = vector.shape_cast %242 : vector<8x32xf32> to vector<8x1x1x32xf32>
    %305 = vector.broadcast %304 : vector<8x1x1x32xf32> to vector<8x3x5x32xf32>
    %306 = arith.mulf %303, %305 : vector<8x3x5x32xf32>
    %cst_92 = arith.constant dense<0.000000e+00> : vector<8x3x5xf32>
    %307 = vector.multi_reduction <add>, %306, %cst_92 [3] : vector<8x3x5x32xf32> to vector<8x3x5xf32>
    %cst_93 = arith.constant dense<0.000000e+00> : vector<8x3xf32>
    %308 = vector.multi_reduction <add>, %307, %cst_93 [2] : vector<8x3x5xf32> to vector<8x3xf32>
    %cst_94 = arith.constant dense<0xFF800000> : vector<8xf32>
    %309 = vector.multi_reduction <maximumf>, %308, %cst_94 [1] : vector<8x3xf32> to vector<8xf32>
    %310 = vector.shape_cast %309 : vector<8xf32> to vector<8x1xf32>
    %311 = tpu.iota {dimensions = array<i32: 1>} : vector<8x3xi32>
    %312 = vector.broadcast %310 : vector<8x1xf32> to vector<8x3xf32>
    %313 = arith.cmpf oeq, %308, %312 : vector<8x3xf32>
    %c3_i32_95 = arith.constant 3 : i32
    %314 = vector.broadcast %c3_i32_95 : i32 to vector<8x3xi32>
    %315 = arith.select %313, %311, %314 : vector<8x3xi1>, vector<8x3xi32>
    %cst_96 = arith.constant dense<2147483647> : vector<8xi32>
    %316 = vector.multi_reduction <minsi>, %315, %cst_96 [1] : vector<8x3xi32> to vector<8xi32>
    %317 = vector.shape_cast %316 : vector<8xi32> to vector<8x1xi32>
    %318 = vector.broadcast %317 : vector<8x1xi32> to vector<8x3xi32>
    %319 = arith.cmpi eq, %311, %318 : vector<8x3xi32>
    %320 = arith.extui %319 : vector<8x3xi1> to vector<8x3xi32>
    %321 = arith.sitofp %320 : vector<8x3xi32> to vector<8x3xf32>
    %322 = vector.shape_cast %321 : vector<8x3xf32> to vector<8x3x1x1xf32>
    %323 = vector.broadcast %322 : vector<8x3x1x1xf32> to vector<8x3x5x32xf32>
    %324 = arith.mulf %323, %303 : vector<8x3x5x32xf32>
    %cst_97 = arith.constant dense<0.000000e+00> : vector<8x5x32xf32>
    %325 = vector.multi_reduction <add>, %324, %cst_97 [1] : vector<8x3x5x32xf32> to vector<8x5x32xf32>
    %326 = vector.shape_cast %242 : vector<8x32xf32> to vector<8x1x32xf32>
    %327 = vector.broadcast %326 : vector<8x1x32xf32> to vector<8x5x32xf32>
    %328 = arith.mulf %325, %327 : vector<8x5x32xf32>
    %cst_98 = arith.constant dense<0.000000e+00> : vector<8x5xf32>
    %329 = vector.multi_reduction <add>, %328, %cst_98 [2] : vector<8x5x32xf32> to vector<8x5xf32>
    %cst_99 = arith.constant 0.000000e+00 : f32
    %330 = vector.broadcast %cst_99 : f32 to vector<8x5xf32>
    %331 = arith.cmpf one, %329, %330 : vector<8x5xf32>
    %cst_100 = arith.constant 1.000000e+00 : f32
    %cst_101 = arith.constant 0.000000e+00 : f32
    %332 = vector.broadcast %cst_100 : f32 to vector<8x5xf32>
    %333 = vector.broadcast %cst_101 : f32 to vector<8x5xf32>
    %334 = arith.select %331, %332, %333 : vector<8x5xi1>, vector<8x5xf32>
    %cst_102 = arith.constant 1.000000e+00 : f32
    %335 = vector.broadcast %cst_102 : f32 to vector<8x5xf32>
    %336 = arith.subf %334, %335 : vector<8x5xf32>
    %cst_103 = arith.constant 9.999000e+03 : f32
    %337 = vector.broadcast %cst_103 : f32 to vector<8x5xf32>
    %338 = arith.mulf %336, %337 : vector<8x5xf32>
    %339 = arith.addf %329, %338 : vector<8x5xf32>
    %cst_104 = arith.constant dense<0xFF800000> : vector<8xf32>
    %340 = vector.multi_reduction <maximumf>, %339, %cst_104 [1] : vector<8x5xf32> to vector<8xf32>
    %341 = vector.shape_cast %340 : vector<8xf32> to vector<8x1xf32>
    %342 = vector.broadcast %341 : vector<8x1xf32> to vector<8x5xf32>
    %343 = arith.subf %339, %342 : vector<8x5xf32>
    %344 = math.exp %343 : vector<8x5xf32>
    %cst_105 = arith.constant dense<0.000000e+00> : vector<8xf32>
    %345 = vector.multi_reduction <add>, %344, %cst_105 [1] : vector<8x5xf32> to vector<8xf32>
    %346 = vector.shape_cast %345 : vector<8xf32> to vector<8x1xf32>
    %347 = vector.broadcast %346 : vector<8x1xf32> to vector<8x5xf32>
    %348 = arith.divf %344, %347 : vector<8x5xf32>
    %349 = vector.shape_cast %9 : vector<5xf32> to vector<1x5xf32>
    %350 = vector.broadcast %349 : vector<1x5xf32> to vector<8x5xf32>
    %351 = arith.mulf %348, %350 : vector<8x5xf32>
    %352 = vector.shape_cast %351 : vector<8x5xf32> to vector<8x5x1xf32>
    %353 = vector.broadcast %352 : vector<8x5x1xf32> to vector<8x5x32xf32>
    %354 = arith.mulf %353, %325 : vector<8x5x32xf32>
    %cst_106 = arith.constant dense<0.000000e+00> : vector<8x32xf32>
    %355 = vector.multi_reduction <add>, %354, %cst_106 [1] : vector<8x5x32xf32> to vector<8x32xf32>
    %356 = vector.broadcast %1 : f32 to vector<8x32xf32>
    %357 = arith.mulf %356, %355 : vector<8x32xf32>
    %358 = arith.addf %301, %357 : vector<8x32xf32>
    %359 = vector.extract_strided_slice %243 {offsets = [0, 2, 0, 0, 0], sizes = [8, 1, 3, 5, 32], strides = [1, 1, 1, 1, 1]} : vector<8x4x3x5x32xf32> to vector<8x1x3x5x32xf32>
    %360 = vector.shape_cast %359 : vector<8x1x3x5x32xf32> to vector<8x3x5x32xf32>
    %361 = vector.shape_cast %242 : vector<8x32xf32> to vector<8x1x1x32xf32>
    %362 = vector.broadcast %361 : vector<8x1x1x32xf32> to vector<8x3x5x32xf32>
    %363 = arith.mulf %360, %362 : vector<8x3x5x32xf32>
    %cst_107 = arith.constant dense<0.000000e+00> : vector<8x3x5xf32>
    %364 = vector.multi_reduction <add>, %363, %cst_107 [3] : vector<8x3x5x32xf32> to vector<8x3x5xf32>
    %cst_108 = arith.constant dense<0.000000e+00> : vector<8x3xf32>
    %365 = vector.multi_reduction <add>, %364, %cst_108 [2] : vector<8x3x5xf32> to vector<8x3xf32>
    %cst_109 = arith.constant dense<0xFF800000> : vector<8xf32>
    %366 = vector.multi_reduction <maximumf>, %365, %cst_109 [1] : vector<8x3xf32> to vector<8xf32>
    %367 = vector.shape_cast %366 : vector<8xf32> to vector<8x1xf32>
    %368 = tpu.iota {dimensions = array<i32: 1>} : vector<8x3xi32>
    %369 = vector.broadcast %367 : vector<8x1xf32> to vector<8x3xf32>
    %370 = arith.cmpf oeq, %365, %369 : vector<8x3xf32>
    %c3_i32_110 = arith.constant 3 : i32
    %371 = vector.broadcast %c3_i32_110 : i32 to vector<8x3xi32>
    %372 = arith.select %370, %368, %371 : vector<8x3xi1>, vector<8x3xi32>
    %cst_111 = arith.constant dense<2147483647> : vector<8xi32>
    %373 = vector.multi_reduction <minsi>, %372, %cst_111 [1] : vector<8x3xi32> to vector<8xi32>
    %374 = vector.shape_cast %373 : vector<8xi32> to vector<8x1xi32>
    %375 = vector.broadcast %374 : vector<8x1xi32> to vector<8x3xi32>
    %376 = arith.cmpi eq, %368, %375 : vector<8x3xi32>
    %377 = arith.extui %376 : vector<8x3xi1> to vector<8x3xi32>
    %378 = arith.sitofp %377 : vector<8x3xi32> to vector<8x3xf32>
    %379 = vector.shape_cast %378 : vector<8x3xf32> to vector<8x3x1x1xf32>
    %380 = vector.broadcast %379 : vector<8x3x1x1xf32> to vector<8x3x5x32xf32>
    %381 = arith.mulf %380, %360 : vector<8x3x5x32xf32>
    %cst_112 = arith.constant dense<0.000000e+00> : vector<8x5x32xf32>
    %382 = vector.multi_reduction <add>, %381, %cst_112 [1] : vector<8x3x5x32xf32> to vector<8x5x32xf32>
    %383 = vector.shape_cast %242 : vector<8x32xf32> to vector<8x1x32xf32>
    %384 = vector.broadcast %383 : vector<8x1x32xf32> to vector<8x5x32xf32>
    %385 = arith.mulf %382, %384 : vector<8x5x32xf32>
    %cst_113 = arith.constant dense<0.000000e+00> : vector<8x5xf32>
    %386 = vector.multi_reduction <add>, %385, %cst_113 [2] : vector<8x5x32xf32> to vector<8x5xf32>
    %cst_114 = arith.constant 0.000000e+00 : f32
    %387 = vector.broadcast %cst_114 : f32 to vector<8x5xf32>
    %388 = arith.cmpf one, %386, %387 : vector<8x5xf32>
    %cst_115 = arith.constant 1.000000e+00 : f32
    %cst_116 = arith.constant 0.000000e+00 : f32
    %389 = vector.broadcast %cst_115 : f32 to vector<8x5xf32>
    %390 = vector.broadcast %cst_116 : f32 to vector<8x5xf32>
    %391 = arith.select %388, %389, %390 : vector<8x5xi1>, vector<8x5xf32>
    %cst_117 = arith.constant 1.000000e+00 : f32
    %392 = vector.broadcast %cst_117 : f32 to vector<8x5xf32>
    %393 = arith.subf %391, %392 : vector<8x5xf32>
    %cst_118 = arith.constant 9.999000e+03 : f32
    %394 = vector.broadcast %cst_118 : f32 to vector<8x5xf32>
    %395 = arith.mulf %393, %394 : vector<8x5xf32>
    %396 = arith.addf %386, %395 : vector<8x5xf32>
    %cst_119 = arith.constant dense<0xFF800000> : vector<8xf32>
    %397 = vector.multi_reduction <maximumf>, %396, %cst_119 [1] : vector<8x5xf32> to vector<8xf32>
    %398 = vector.shape_cast %397 : vector<8xf32> to vector<8x1xf32>
    %399 = vector.broadcast %398 : vector<8x1xf32> to vector<8x5xf32>
    %400 = arith.subf %396, %399 : vector<8x5xf32>
    %401 = math.exp %400 : vector<8x5xf32>
    %cst_120 = arith.constant dense<0.000000e+00> : vector<8xf32>
    %402 = vector.multi_reduction <add>, %401, %cst_120 [1] : vector<8x5xf32> to vector<8xf32>
    %403 = vector.shape_cast %402 : vector<8xf32> to vector<8x1xf32>
    %404 = vector.broadcast %403 : vector<8x1xf32> to vector<8x5xf32>
    %405 = arith.divf %401, %404 : vector<8x5xf32>
    %406 = vector.shape_cast %9 : vector<5xf32> to vector<1x5xf32>
    %407 = vector.broadcast %406 : vector<1x5xf32> to vector<8x5xf32>
    %408 = arith.mulf %405, %407 : vector<8x5xf32>
    %409 = vector.shape_cast %408 : vector<8x5xf32> to vector<8x5x1xf32>
    %410 = vector.broadcast %409 : vector<8x5x1xf32> to vector<8x5x32xf32>
    %411 = arith.mulf %410, %382 : vector<8x5x32xf32>
    %cst_121 = arith.constant dense<0.000000e+00> : vector<8x32xf32>
    %412 = vector.multi_reduction <add>, %411, %cst_121 [1] : vector<8x5x32xf32> to vector<8x32xf32>
    %413 = vector.broadcast %2 : f32 to vector<8x32xf32>
    %414 = arith.mulf %413, %412 : vector<8x32xf32>
    %415 = arith.addf %358, %414 : vector<8x32xf32>
    %416 = vector.extract_strided_slice %243 {offsets = [0, 3, 0, 0, 0], sizes = [8, 1, 3, 5, 32], strides = [1, 1, 1, 1, 1]} : vector<8x4x3x5x32xf32> to vector<8x1x3x5x32xf32>
    %417 = vector.shape_cast %416 : vector<8x1x3x5x32xf32> to vector<8x3x5x32xf32>
    %418 = vector.shape_cast %242 : vector<8x32xf32> to vector<8x1x1x32xf32>
    %419 = vector.broadcast %418 : vector<8x1x1x32xf32> to vector<8x3x5x32xf32>
    %420 = arith.mulf %417, %419 : vector<8x3x5x32xf32>
    %cst_122 = arith.constant dense<0.000000e+00> : vector<8x3x5xf32>
    %421 = vector.multi_reduction <add>, %420, %cst_122 [3] : vector<8x3x5x32xf32> to vector<8x3x5xf32>
    %cst_123 = arith.constant dense<0.000000e+00> : vector<8x3xf32>
    %422 = vector.multi_reduction <add>, %421, %cst_123 [2] : vector<8x3x5xf32> to vector<8x3xf32>
    %cst_124 = arith.constant dense<0xFF800000> : vector<8xf32>
    %423 = vector.multi_reduction <maximumf>, %422, %cst_124 [1] : vector<8x3xf32> to vector<8xf32>
    %424 = vector.shape_cast %423 : vector<8xf32> to vector<8x1xf32>
    %425 = tpu.iota {dimensions = array<i32: 1>} : vector<8x3xi32>
    %426 = vector.broadcast %424 : vector<8x1xf32> to vector<8x3xf32>
    %427 = arith.cmpf oeq, %422, %426 : vector<8x3xf32>
    %c3_i32_125 = arith.constant 3 : i32
    %428 = vector.broadcast %c3_i32_125 : i32 to vector<8x3xi32>
    %429 = arith.select %427, %425, %428 : vector<8x3xi1>, vector<8x3xi32>
    %cst_126 = arith.constant dense<2147483647> : vector<8xi32>
    %430 = vector.multi_reduction <minsi>, %429, %cst_126 [1] : vector<8x3xi32> to vector<8xi32>
    %431 = vector.shape_cast %430 : vector<8xi32> to vector<8x1xi32>
    %432 = vector.broadcast %431 : vector<8x1xi32> to vector<8x3xi32>
    %433 = arith.cmpi eq, %425, %432 : vector<8x3xi32>
    %434 = arith.extui %433 : vector<8x3xi1> to vector<8x3xi32>
    %435 = arith.sitofp %434 : vector<8x3xi32> to vector<8x3xf32>
    %436 = vector.shape_cast %435 : vector<8x3xf32> to vector<8x3x1x1xf32>
    %437 = vector.broadcast %436 : vector<8x3x1x1xf32> to vector<8x3x5x32xf32>
    %438 = arith.mulf %437, %417 : vector<8x3x5x32xf32>
    %cst_127 = arith.constant dense<0.000000e+00> : vector<8x5x32xf32>
    %439 = vector.multi_reduction <add>, %438, %cst_127 [1] : vector<8x3x5x32xf32> to vector<8x5x32xf32>
    %440 = vector.shape_cast %242 : vector<8x32xf32> to vector<8x1x32xf32>
    %441 = vector.broadcast %440 : vector<8x1x32xf32> to vector<8x5x32xf32>
    %442 = arith.mulf %439, %441 : vector<8x5x32xf32>
    %cst_128 = arith.constant dense<0.000000e+00> : vector<8x5xf32>
    %443 = vector.multi_reduction <add>, %442, %cst_128 [2] : vector<8x5x32xf32> to vector<8x5xf32>
    %cst_129 = arith.constant 0.000000e+00 : f32
    %444 = vector.broadcast %cst_129 : f32 to vector<8x5xf32>
    %445 = arith.cmpf one, %443, %444 : vector<8x5xf32>
    %cst_130 = arith.constant 1.000000e+00 : f32
    %cst_131 = arith.constant 0.000000e+00 : f32
    %446 = vector.broadcast %cst_130 : f32 to vector<8x5xf32>
    %447 = vector.broadcast %cst_131 : f32 to vector<8x5xf32>
    %448 = arith.select %445, %446, %447 : vector<8x5xi1>, vector<8x5xf32>
    %cst_132 = arith.constant 1.000000e+00 : f32
    %449 = vector.broadcast %cst_132 : f32 to vector<8x5xf32>
    %450 = arith.subf %448, %449 : vector<8x5xf32>
    %cst_133 = arith.constant 9.999000e+03 : f32
    %451 = vector.broadcast %cst_133 : f32 to vector<8x5xf32>
    %452 = arith.mulf %450, %451 : vector<8x5xf32>
    %453 = arith.addf %443, %452 : vector<8x5xf32>
    %cst_134 = arith.constant dense<0xFF800000> : vector<8xf32>
    %454 = vector.multi_reduction <maximumf>, %453, %cst_134 [1] : vector<8x5xf32> to vector<8xf32>
    %455 = vector.shape_cast %454 : vector<8xf32> to vector<8x1xf32>
    %456 = vector.broadcast %455 : vector<8x1xf32> to vector<8x5xf32>
    %457 = arith.subf %453, %456 : vector<8x5xf32>
    %458 = math.exp %457 : vector<8x5xf32>
    %cst_135 = arith.constant dense<0.000000e+00> : vector<8xf32>
    %459 = vector.multi_reduction <add>, %458, %cst_135 [1] : vector<8x5xf32> to vector<8xf32>
    %460 = vector.shape_cast %459 : vector<8xf32> to vector<8x1xf32>
    %461 = vector.broadcast %460 : vector<8x1xf32> to vector<8x5xf32>
    %462 = arith.divf %458, %461 : vector<8x5xf32>
    %463 = vector.shape_cast %9 : vector<5xf32> to vector<1x5xf32>
    %464 = vector.broadcast %463 : vector<1x5xf32> to vector<8x5xf32>
    %465 = arith.mulf %462, %464 : vector<8x5xf32>
    %466 = vector.shape_cast %465 : vector<8x5xf32> to vector<8x5x1xf32>
    %467 = vector.broadcast %466 : vector<8x5x1xf32> to vector<8x5x32xf32>
    %468 = arith.mulf %467, %439 : vector<8x5x32xf32>
    %cst_136 = arith.constant dense<0.000000e+00> : vector<8x32xf32>
    %469 = vector.multi_reduction <add>, %468, %cst_136 [1] : vector<8x5x32xf32> to vector<8x32xf32>
    %470 = vector.broadcast %7 : f32 to vector<8x32xf32>
    %471 = arith.mulf %470, %469 : vector<8x32xf32>
    %472 = arith.addf %415, %471 : vector<8x32xf32>
    %473 = tpu.concatenate %242, %472 in 1 : vector<8x32xf32>, vector<8x32xf32> -> vector<8x64xf32>
    %474 = tpu.concatenate %241, %473 in 0 : vector<8x64xf32>, vector<8x64xf32> -> vector<16x64xf32>
    %c0_137 = arith.constant 0 : index
    %c0_138 = arith.constant 0 : index
    %475 = vector.load %arg9[%c0_137, %c0_138] : memref<64x384xf32, #tpu.memory_space<vmem>>, vector<64x384xf32>
    %cst_139 = arith.constant dense<0.000000e+00> : vector<16x384xf32>
    %476 = tpu.matmul %474, %475, %cst_139 {dimension_numbers = #tpu.dot_dimension_numbers<[1], [0], [0], [1], [0, 0, 1, 1], [], []>} : vector<16x64xf32>, vector<64x384xf32>, vector<16x384xf32> -> vector<16x384xf32>
    %c0_140 = arith.constant 0 : index
    %c0_141 = arith.constant 0 : index
    %477 = vector.load %arg10[%c0_140, %c0_141] : memref<1x384xf32, #tpu.memory_space<vmem>>, vector<1x384xf32>
    %478 = vector.broadcast %477 : vector<1x384xf32> to vector<16x384xf32>
    %479 = arith.addf %476, %478 : vector<16x384xf32>
    %480 = vector.extract_strided_slice %479 {offsets = [0, 0], sizes = [8, 384], strides = [1, 1]} : vector<16x384xf32> to vector<8x384xf32>
    %481 = vector.extract_strided_slice %479 {offsets = [8, 0], sizes = [8, 384], strides = [1, 1]} : vector<16x384xf32> to vector<8x384xf32>
    %482 = arith.mulf %480, %481 : vector<8x384xf32>
    %cst_142 = arith.constant dense<0.000000e+00> : vector<8xf32>
    %483 = vector.multi_reduction <add>, %482, %cst_142 [1] : vector<8x384xf32> to vector<8xf32>
    %484 = vector.shape_cast %483 : vector<8xf32> to vector<8x1xf32>
    %485 = arith.mulf %480, %480 : vector<8x384xf32>
    %cst_143 = arith.constant dense<0.000000e+00> : vector<8xf32>
    %486 = vector.multi_reduction <add>, %485, %cst_143 [1] : vector<8x384xf32> to vector<8xf32>
    %487 = vector.shape_cast %486 : vector<8xf32> to vector<8x1xf32>
    %488 = math.sqrt %487 : vector<8x1xf32>
    %489 = arith.mulf %481, %481 : vector<8x384xf32>
    %cst_144 = arith.constant dense<0.000000e+00> : vector<8xf32>
    %490 = vector.multi_reduction <add>, %489, %cst_144 [1] : vector<8x384xf32> to vector<8xf32>
    %491 = vector.shape_cast %490 : vector<8xf32> to vector<8x1xf32>
    %492 = math.sqrt %491 : vector<8x1xf32>
    %493 = arith.mulf %488, %492 : vector<8x1xf32>
    %cst_145 = arith.constant 9.99999993E-9 : f32
    %494 = vector.broadcast %cst_145 : f32 to vector<8x1xf32>
    %495 = arith.maximumf %493, %494 : vector<8x1xf32>
    %496 = arith.divf %484, %495 : vector<8x1xf32>
    %c0_146 = arith.constant 0 : index
    %c0_147 = arith.constant 0 : index
    %c0_148 = arith.constant 0 : index
    %c0_149 = arith.constant 0 : index
    %497 = vector.load %arg6[%c0_146, %c0_147, %c0_148, %c0_149] : memref<8x3x4x32xf32, #tpu.memory_space<vmem>>, vector<8x3x4x32xf32>
    %c0_150 = arith.constant 0 : index
    %c0_151 = arith.constant 0 : index
    %c0_152 = arith.constant 0 : index
    %c0_153 = arith.constant 0 : index
    %498 = vector.load %arg7[%c0_150, %c0_151, %c0_152, %c0_153] : memref<8x3x4x32xf32, #tpu.memory_space<vmem>>, vector<8x3x4x32xf32>
    %499 = vector.extract_strided_slice %497 {offsets = [0, 0, 0, 0], sizes = [8, 1, 4, 32], strides = [1, 1, 1, 1]} : vector<8x3x4x32xf32> to vector<8x1x4x32xf32>
    %500 = vector.shape_cast %499 : vector<8x1x4x32xf32> to vector<8x4x32xf32>
    %cst_154 = arith.constant dense<0.000000e+00> : vector<8x32xf32>
    %501 = vector.multi_reduction <add>, %500, %cst_154 [1] : vector<8x4x32xf32> to vector<8x32xf32>
    %502 = vector.extract_strided_slice %498 {offsets = [0, 0, 0, 0], sizes = [8, 1, 4, 32], strides = [1, 1, 1, 1]} : vector<8x3x4x32xf32> to vector<8x1x4x32xf32>
    %503 = vector.shape_cast %502 : vector<8x1x4x32xf32> to vector<8x4x32xf32>
    %cst_155 = arith.constant dense<0.000000e+00> : vector<8x32xf32>
    %504 = vector.multi_reduction <add>, %503, %cst_155 [1] : vector<8x4x32xf32> to vector<8x32xf32>
    %505 = arith.mulf %501, %504 : vector<8x32xf32>
    %cst_156 = arith.constant dense<0.000000e+00> : vector<8xf32>
    %506 = vector.multi_reduction <add>, %505, %cst_156 [1] : vector<8x32xf32> to vector<8xf32>
    %507 = vector.shape_cast %506 : vector<8xf32> to vector<8x1xf32>
    %508 = arith.mulf %501, %501 : vector<8x32xf32>
    %cst_157 = arith.constant dense<0.000000e+00> : vector<8xf32>
    %509 = vector.multi_reduction <add>, %508, %cst_157 [1] : vector<8x32xf32> to vector<8xf32>
    %510 = vector.shape_cast %509 : vector<8xf32> to vector<8x1xf32>
    %511 = math.sqrt %510 : vector<8x1xf32>
    %512 = arith.mulf %504, %504 : vector<8x32xf32>
    %cst_158 = arith.constant dense<0.000000e+00> : vector<8xf32>
    %513 = vector.multi_reduction <add>, %512, %cst_158 [1] : vector<8x32xf32> to vector<8xf32>
    %514 = vector.shape_cast %513 : vector<8xf32> to vector<8x1xf32>
    %515 = math.sqrt %514 : vector<8x1xf32>
    %516 = arith.mulf %511, %515 : vector<8x1xf32>
    %cst_159 = arith.constant 9.99999993E-9 : f32
    %517 = vector.broadcast %cst_159 : f32 to vector<8x1xf32>
    %518 = arith.maximumf %516, %517 : vector<8x1xf32>
    %519 = arith.divf %507, %518 : vector<8x1xf32>
    %520 = vector.extract_strided_slice %497 {offsets = [0, 1, 0, 0], sizes = [8, 1, 4, 32], strides = [1, 1, 1, 1]} : vector<8x3x4x32xf32> to vector<8x1x4x32xf32>
    %521 = vector.shape_cast %520 : vector<8x1x4x32xf32> to vector<8x4x32xf32>
    %cst_160 = arith.constant dense<0.000000e+00> : vector<8x32xf32>
    %522 = vector.multi_reduction <add>, %521, %cst_160 [1] : vector<8x4x32xf32> to vector<8x32xf32>
    %523 = vector.extract_strided_slice %498 {offsets = [0, 1, 0, 0], sizes = [8, 1, 4, 32], strides = [1, 1, 1, 1]} : vector<8x3x4x32xf32> to vector<8x1x4x32xf32>
    %524 = vector.shape_cast %523 : vector<8x1x4x32xf32> to vector<8x4x32xf32>
    %cst_161 = arith.constant dense<0.000000e+00> : vector<8x32xf32>
    %525 = vector.multi_reduction <add>, %524, %cst_161 [1] : vector<8x4x32xf32> to vector<8x32xf32>
    %526 = arith.mulf %522, %525 : vector<8x32xf32>
    %cst_162 = arith.constant dense<0.000000e+00> : vector<8xf32>
    %527 = vector.multi_reduction <add>, %526, %cst_162 [1] : vector<8x32xf32> to vector<8xf32>
    %528 = vector.shape_cast %527 : vector<8xf32> to vector<8x1xf32>
    %529 = arith.mulf %522, %522 : vector<8x32xf32>
    %cst_163 = arith.constant dense<0.000000e+00> : vector<8xf32>
    %530 = vector.multi_reduction <add>, %529, %cst_163 [1] : vector<8x32xf32> to vector<8xf32>
    %531 = vector.shape_cast %530 : vector<8xf32> to vector<8x1xf32>
    %532 = math.sqrt %531 : vector<8x1xf32>
    %533 = arith.mulf %525, %525 : vector<8x32xf32>
    %cst_164 = arith.constant dense<0.000000e+00> : vector<8xf32>
    %534 = vector.multi_reduction <add>, %533, %cst_164 [1] : vector<8x32xf32> to vector<8xf32>
    %535 = vector.shape_cast %534 : vector<8xf32> to vector<8x1xf32>
    %536 = math.sqrt %535 : vector<8x1xf32>
    %537 = arith.mulf %532, %536 : vector<8x1xf32>
    %cst_165 = arith.constant 9.99999993E-9 : f32
    %538 = vector.broadcast %cst_165 : f32 to vector<8x1xf32>
    %539 = arith.maximumf %537, %538 : vector<8x1xf32>
    %540 = arith.divf %528, %539 : vector<8x1xf32>
    %541 = vector.extract_strided_slice %497 {offsets = [0, 2, 0, 0], sizes = [8, 1, 4, 32], strides = [1, 1, 1, 1]} : vector<8x3x4x32xf32> to vector<8x1x4x32xf32>
    %542 = vector.shape_cast %541 : vector<8x1x4x32xf32> to vector<8x4x32xf32>
    %cst_166 = arith.constant dense<0.000000e+00> : vector<8x32xf32>
    %543 = vector.multi_reduction <add>, %542, %cst_166 [1] : vector<8x4x32xf32> to vector<8x32xf32>
    %544 = vector.extract_strided_slice %498 {offsets = [0, 2, 0, 0], sizes = [8, 1, 4, 32], strides = [1, 1, 1, 1]} : vector<8x3x4x32xf32> to vector<8x1x4x32xf32>
    %545 = vector.shape_cast %544 : vector<8x1x4x32xf32> to vector<8x4x32xf32>
    %cst_167 = arith.constant dense<0.000000e+00> : vector<8x32xf32>
    %546 = vector.multi_reduction <add>, %545, %cst_167 [1] : vector<8x4x32xf32> to vector<8x32xf32>
    %547 = arith.mulf %543, %546 : vector<8x32xf32>
    %cst_168 = arith.constant dense<0.000000e+00> : vector<8xf32>
    %548 = vector.multi_reduction <add>, %547, %cst_168 [1] : vector<8x32xf32> to vector<8xf32>
    %549 = vector.shape_cast %548 : vector<8xf32> to vector<8x1xf32>
    %550 = arith.mulf %543, %543 : vector<8x32xf32>
    %cst_169 = arith.constant dense<0.000000e+00> : vector<8xf32>
    %551 = vector.multi_reduction <add>, %550, %cst_169 [1] : vector<8x32xf32> to vector<8xf32>
    %552 = vector.shape_cast %551 : vector<8xf32> to vector<8x1xf32>
    %553 = math.sqrt %552 : vector<8x1xf32>
    %554 = arith.mulf %546, %546 : vector<8x32xf32>
    %cst_170 = arith.constant dense<0.000000e+00> : vector<8xf32>
    %555 = vector.multi_reduction <add>, %554, %cst_170 [1] : vector<8x32xf32> to vector<8xf32>
    %556 = vector.shape_cast %555 : vector<8xf32> to vector<8x1xf32>
    %557 = math.sqrt %556 : vector<8x1xf32>
    %558 = arith.mulf %553, %557 : vector<8x1xf32>
    %cst_171 = arith.constant 9.99999993E-9 : f32
    %559 = vector.broadcast %cst_171 : f32 to vector<8x1xf32>
    %560 = arith.maximumf %558, %559 : vector<8x1xf32>
    %561 = arith.divf %549, %560 : vector<8x1xf32>
    %562 = vector.broadcast %3 : f32 to vector<8x1xf32>
    %563 = arith.mulf %562, %519 : vector<8x1xf32>
    %564 = vector.broadcast %4 : f32 to vector<8x1xf32>
    %565 = arith.mulf %564, %540 : vector<8x1xf32>
    %566 = arith.addf %563, %565 : vector<8x1xf32>
    %cst_172 = arith.constant 1.000000e+00 : f32
    %567 = arith.subf %cst_172, %3 : f32
    %568 = arith.subf %567, %4 : f32
    %569 = vector.broadcast %568 : f32 to vector<8x1xf32>
    %570 = arith.mulf %569, %561 : vector<8x1xf32>
    %571 = arith.addf %566, %570 : vector<8x1xf32>
    %572 = tpu.concatenate %496, %571 in 1 : vector<8x1xf32>, vector<8x1xf32> -> vector<8x2xf32>
    %c0_173 = arith.constant 0 : index
    %c0_174 = arith.constant 0 : index
    %573 = vector.load %arg11[%c0_173, %c0_174] : memref<8x2xf32, #tpu.memory_space<vmem>>, vector<8x2xf32>
    tpu.vector_store %arg11[%c0_173, %c0_174], %572 {strides = array<i32>} : memref<8x2xf32, #tpu.memory_space<vmem>>, vector<8x2xf32>,
    return
  }
  func.func @transform_0(%arg0: i32) -> i32 {
    %c0_i32 = arith.constant 0 : i32
    %c0_i32_0 = arith.constant 0 : i32
    return %c0_i32 : i32
  }
  func.func @transform_1(%arg0: i32) -> (i32, i32) {
    %c0_i32 = arith.constant 0 : i32
    %c0_i32_0 = arith.constant 0 : i32
    return %arg0, %c0_i32 : i32, i32
  }
  func.func @transform_2(%arg0: i32) -> (i32, i32) {
    %c1_i32 = arith.constant 1 : i32
    %0 = arith.addi %arg0, %c1_i32 : i32
    %c0_i32 = arith.constant 0 : i32
    %c0_i32_0 = arith.constant 0 : i32
    return %0, %c0_i32 : i32, i32
  }
  func.func @transform_3(%arg0: i32) -> (i32, i32, i32, i32, i32) {
    %c0_i32 = arith.constant 0 : i32
    %c0_i32_0 = arith.constant 0 : i32
    %c0_i32_1 = arith.constant 0 : i32
    %c0_i32_2 = arith.constant 0 : i32
    %c0_i32_3 = arith.constant 0 : i32
    return %arg0, %c0_i32, %c0_i32_0, %c0_i32_1, %c0_i32_2 : i32, i32, i32, i32, i32
  }
  func.func @transform_4(%arg0: i32) -> (i32, i32, i32, i32, i32) {
    %c1_i32 = arith.constant 1 : i32
    %0 = arith.addi %arg0, %c1_i32 : i32
    %c0_i32 = arith.constant 0 : i32
    %c0_i32_0 = arith.constant 0 : i32
    %c0_i32_1 = arith.constant 0 : i32
    %c0_i32_2 = arith.constant 0 : i32
    %c0_i32_3 = arith.constant 0 : i32
    return %0, %c0_i32, %c0_i32_0, %c0_i32_1, %c0_i32_2 : i32, i32, i32, i32, i32
  }
  func.func @transform_5(%arg0: i32) -> (i32, i32, i32, i32) {
    %c0_i32 = arith.constant 0 : i32
    %c0_i32_0 = arith.constant 0 : i32
    %c0_i32_1 = arith.constant 0 : i32
    %c0_i32_2 = arith.constant 0 : i32
    return %arg0, %c0_i32, %c0_i32_0, %c0_i32_1 : i32, i32, i32, i32
  }
  func.func @transform_6(%arg0: i32) -> (i32, i32, i32, i32) {
    %c1_i32 = arith.constant 1 : i32
    %0 = arith.addi %arg0, %c1_i32 : i32
    %c0_i32 = arith.constant 0 : i32
    %c0_i32_0 = arith.constant 0 : i32
    %c0_i32_1 = arith.constant 0 : i32
    %c0_i32_2 = arith.constant 0 : i32
    return %0, %c0_i32, %c0_i32_0, %c0_i32_1 : i32, i32, i32, i32
  }
  func.func @transform_7(%arg0: i32) -> (i32, i32) {
    %c0_i32 = arith.constant 0 : i32
    %c0_i32_0 = arith.constant 0 : i32
    %c0_i32_1 = arith.constant 0 : i32
    return %c0_i32, %c0_i32_0 : i32, i32
  }
  func.func @transform_8(%arg0: i32) -> (i32, i32) {
    %c0_i32 = arith.constant 0 : i32
    %c0_i32_0 = arith.constant 0 : i32
    %c0_i32_1 = arith.constant 0 : i32
    return %c0_i32, %c0_i32_0 : i32, i32
  }
  func.func @transform_9(%arg0: i32) -> (i32, i32) {
    %c0_i32 = arith.constant 0 : i32
    %c0_i32_0 = arith.constant 0 : i32
    %c0_i32_1 = arith.constant 0 : i32
    return %c0_i32, %c0_i32_0 : i32, i32
  }
  func.func @transform_10(%arg0: i32) -> (i32, i32) {
    %c0_i32 = arith.constant 0 : i32
    %c0_i32_0 = arith.constant 0 : i32
    return %arg0, %c0_i32 : i32, i32
  }
}

</mosaic_0001>

<bundles_post_ra>
// kernel: tpu_custom_call.1
= control target key start
LH: loop header
LB: loop body
LE: loop exit
PB: predicated region body
PF: predicated region fallthrough
CT: control target
= control target key end

     0   :  { %15 = vsyncpa [#allocation3], 0  ;;  %s17798_s0 = inlined_call_operand.vmem [shape: f32[8], index: 0, kind: input, shape index: {}]   ;;  %s17799_s1 = inlined_call_operand.vmem [shape: f32[16,32], index: 1, kind: input, shape index: {}]   ;;  %s17800_s2 = inlined_call_operand.vmem [shape: f32[16,32], index: 2, kind: input, shape index: {}]   ;;  %s17801_s3 = inlined_call_operand.vmem [shape: f32[16,4,3,5,32], index: 3, kind: input, shape index: {}]   ;;  %s17802_s4 = inlined_call_operand.vmem [shape: f32[16,4,3,5,32], index: 4, kind: input, shape index: {}]   ;;  %s17803_s5 = inlined_call_operand.vmem [shape: f32[16,3,4,32], index: 5, kind: input, shape index: {}]   ;;  %s17804_s6 = inlined_call_operand.vmem [shape: f32[16,3,4,32], index: 6, kind: input, shape index: {}]   ;;  %s17805_s7 = inlined_call_operand.vmem [shape: f32[1,5], index: 7, kind: input, shape index: {}]   ;;  %s17806_s8 = inlined_call_operand.vmem [shape: f32[64,384], index: 8, kind: input, shape index: {}]   ;;  %s17807_s9 = inlined_call_operand.vmem [shape: f32[1,384], index: 9, kind: input, shape index: {}]   ;;  %s17808_s10 = inlined_call_operand.vmem [shape: f32[8,2], index: 10, kind: output, shape index: {}]  }
   0x1   :  { %s22_s15 = sshll.u32 %s17798_s0, 4  ;;  %s23_s15 = int_to_ptr.vmem [resolvable:$true] %s22_s15 }
   0x2   :  { %s11174_s16 = scalar_lea.vmem %s23_s15, 16  ;;  %p11179_p1 = scmp.lt.s32.totalorder %s23_s15, %s23_s15 }
   0x3   :  { %p11175_p0 = scmp.ne.s32.totalorder %s23_s15, %s11174_s16  ;;  %p11180_p2 = scmp.lt.s32.totalorder %s11174_s16, %s11174_s16 }
   0x5   :  { %p11181_p3 = por %p11180_p2, %p11179_p1 }
   0x7   :  { %p11182_p4 = pnand %p11181_p3, %p11175_p0 }
   0x9   :  { %11185 = shalt.err (!%p11182_p4)
}
   0xa   :  { %s11188_s17 = smov [#allocation2]  }
   0xb   :  { %25 = dma.vmem_to_smem %s23_s15, 16, %s11188_s17, [#allocation3]  }
   0xc   :  { %11186 = dma.done.wait [#allocation3], 16  }
   0xd   :  { %11187 = vsyncadd [#allocation3], 4294967280 }
   0xe   :  { %71 = sfence }
   0xf   :  { %v226_v0 = vlaneseq  ;;  %v11189_v1 = vmov 1966171168   ;;  %v124_v5 = vld [vmem:[%s17799_s1] sm:$0xff]  ;;  %v127_v11 = vld [vmem:[%s17801_s3 + $0x10] sm:$0x1f]  ;;  %vm335_vm0 = vcmask 258048  }
  0x10   :  { %v224_v2 = vunpack.c.l.s4 %v11189_v1  ;;  %v125_v12 = vld [vmem:[%s17801_s3] sm:$0x1f]  ;;  %v126_v13 = vld [vmem:[%s17801_s3 + $0x8] sm:$0x1f]  ;;  %v139_v23 = vld [vmem:[%s17801_s3 + $0x70] sm:$0x1f]  ;;  %v222_v29 = vcombine.high %v124_v5, %v124_v5 }
  0x11   :  { %v11252_v3 = vshrl.u32 %v226_v0, 7  ;;  %v137_v16 = vld [vmem:[%s17801_s3 + $0x60] sm:$0x1f]  ;;  %v138_v22 = vld [vmem:[%s17801_s3 + $0x68] sm:$0x1f]  ;;  %vm530_vm1 = vcmask 1041409  }
  0x12   :  { %v225_v4 = vunpack.c.0.s8 %v224_v2  ;;  %v149_v34 = vld [vmem:[%s17801_s3 + $0xc0] sm:$0x1f]  ;;  %v150_v35 = vld [vmem:[%s17801_s3 + $0xc8] sm:$0x1f]  ;;  %v151_v42 = vld [vmem:[%s17801_s3 + $0xd0] sm:$0x1f] }
  0x13   :  { %v11262_v8 = vsub.s32 0, %v11252_v3  ;;  %v161_v43 = vld [vmem:[%s17801_s3 + $0x120] sm:$0x1f]  ;;  %v162_v50 = vld [vmem:[%s17801_s3 + $0x128] sm:$0x1f]  ;;  %vm532_vm2 = vcmask 1042434  }
  0x14   :  { %v11258_v6 = vsub.s32 %v225_v4, %v11252_v3  ;;  %v163_v51 = vld [vmem:[%s17801_s3 + $0x130] sm:$0x1f]  ;;  %v174_v58 = vld [vmem:[%s17801_s3 + $0x188] sm:$0x1f]  ;;  %v173_v59 = vld [vmem:[%s17801_s3 + $0x180] sm:$0x1f] }
  0x15   :  { %17992 = vst [vmem:[#allocation5_spill] sm:$0xff] %v11262_v8  ;;  %v175_v2 = vld [vmem:[%s17801_s3 + $0x190] sm:$0x1f]  ;;  %v185_v4 = vld [vmem:[%s17801_s3 + $0x1e0] sm:$0x1f]  ;;  %vm556_vm3 = vcmask 34816  }
  0x16   :  { %v229_v7 = vrot.slane %v124_v5, %v11258_v6  ;;  %v236_v37 = vrot.slane %v222_v29, %v11258_v6  ;;  %vm623_vm4 = vcmask 1043459   ;;  %vm625_vm5 = vcmask 1044484   ;;  %s16591_s12 = sld [smem:[#allocation2 + $0x1]]  ;;  %s11192_s22 = smov 32  }
  0x17   :  { %vm627_vm6 = vcmask 1045509   ;;  %vm629_vm7 = vcmask 1046534   ;;  %vm631_vm8 = vcmask 1047559   ;;  %vm634_vm9 = vcmask 23552   ;;  %s16601_s13 = sld [smem:[#allocation2 + $0x2]] }
  0x18   :  { %v245_v9 = vrot.slane %v229_v7, %v11258_v6  ;;  %v237_v10 = vcombine.high %v229_v7, %v229_v7  ;;  %v252_v44 = vrot.slane %v236_v37, %v11258_v6  ;;  %v238_v45 = vcombine.high %v236_v37, %v236_v37  ;;  %v211_v37 = vld [vmem:[%s17801_s3 + $0x2b0] sm:$0x1f] }
  0x1a   :  { %v11275_v14 = vrot.slane %v245_v9, %v11262_v8  ;;  %v259_v15 = vrot.slane %v237_v10, %v11258_v6  ;;  %v267_v17 = vcombine.high %v245_v9, %v245_v9  ;;  %v11335_v52 = vrot.slane %v252_v44, %v11262_v8 }
  0x1b   :  { %v266_v53 = vrot.slane %v238_v45, %v11258_v6  ;;  %v268_v5 = vcombine.high %v252_v44, %v252_v44 }
  0x1c   :  { %v313_v18 = vmul.f32 %v11275_v14, %v127_v11  ;;  %v311_v19 = vmul.f32 %v11275_v14, %v125_v12  ;;  %v312_v20 = vmul.f32 %v11275_v14, %v126_v13  ;;  %v11285_v21 = vrot.slane %v259_v15, %v11262_v8  ;;  %v186_v12 = vld [vmem:[%s17801_s3 + $0x1e8] sm:$0x1f]  ;;  %v187_v13 = vld [vmem:[%s17801_s3 + $0x1f0] sm:$0x1f] }
  0x1d   :  { %v11297_v27 = vrot.slane %v267_v17, %v11262_v8  ;;  %v269_v28 = vcombine.high %v259_v15, %v259_v15  ;;  %v324_v60 = vmul.f32 %v11335_v52, %v174_v58  ;;  %v323_v63 = vmul.f32 %v11335_v52, %v173_v59 }
  0x1e   :  { %v342_v24 = vsel %vm335_vm0, %v313_v18, 0.0  ;;  %v336_v25 = vsel %vm335_vm0, %v311_v19, 0.0  ;;  %v314_v26 = vmul.f32 %v11285_v21, %v137_v16  ;;  %v339_v30 = vsel %vm335_vm0, %v312_v20, 0.0 }
  0x1f   :  { %343 = vadd.xlane.f32.xlu1 %v342_v24  ;;  %337 = vadd.xlane.f32.xlu0 %v336_v25  ;;  %v315_v32 = vmul.f32 %v11285_v21, %v138_v22  ;;  %v316_v33 = vmul.f32 %v11285_v21, %v139_v23  ;;  %v317_v36 = vmul.f32 %v11297_v27, %v149_v34  ;;  %v375_v7 = vsel %vm335_vm0, %v324_v60, 0.0  ;;  %v197_v22 = vld [vmem:[%s17801_s3 + $0x240] sm:$0x1f]  ;;  %v198_v23 = vld [vmem:[%s17801_s3 + $0x248] sm:$0x1f] }
  0x20   :  { %v345_v31 = vsel %vm335_vm0, %v314_v26, 0.0  ;;  %v318_v40 = vmul.f32 %v11297_v27, %v150_v35  ;;  %v11315_v41 = vrot.slane %v269_v28, %v11262_v8  ;;  %v319_v48 = vmul.f32 %v11297_v27, %v151_v42 }
  0x21   :  { %v348_v38 = vsel %vm335_vm0, %v315_v32, 0.0  ;;  %v351_v39 = vsel %vm335_vm0, %v316_v33, 0.0  ;;  %v354_v46 = vsel %vm335_vm0, %v317_v36, 0.0  ;;  %v11353_v1 = vrot.slane %v266_v53, %v11262_v8  ;;  %v210_v36 = vld [vmem:[%s17801_s3 + $0x2a8] sm:$0x1f] }
  0x22   :  { %v357_v47 = vsel %vm335_vm0, %v318_v40, 0.0  ;;  %v320_v49 = vmul.f32 %v11315_v41, %v161_v43  ;;  %v360_v54 = vsel %vm335_vm0, %v319_v48, 0.0  ;;  %v321_v56 = vmul.f32 %v11315_v41, %v162_v50  ;;  %v129_v43 = vld [vmem:[%s17801_s3 + $0x20] sm:$0x1f]  ;;  %v154_v50 = vld [vmem:[%s17801_s3 + $0xe8] sm:$0x1f] }
  0x23   :  { %340 = vadd.xlane.f32.xlu0 %v339_v30  ;;  %346 = vadd.xlane.f32.xlu1 %v345_v31  ;;  %v322_v57 = vmul.f32 %v11315_v41, %v163_v51  ;;  %v372_v9 = vsel %vm335_vm0, %v323_v63, 0.0  ;;  %v325_v10 = vmul.f32 %v11335_v52, %v175_v2  ;;  %v326_v11 = vmul.f32 %v11353_v1, %v185_v4  ;;  %v199_v30 = vld [vmem:[%s17801_s3 + $0x250] sm:$0x1f]  ;;  %v209_v31 = vld [vmem:[%s17801_s3 + $0x2a0] sm:$0x1f] }
  0x24   :  { %v363_v55 = vsel %vm335_vm0, %v320_v49, 0.0  ;;  %v366_v61 = vsel %vm335_vm0, %v321_v56, 0.0  ;;  %v11372_v15 = vrot.slane %v268_v5, %v11262_v8  ;;  %v270_v16 = vcombine.high %v266_v53, %v266_v53  ;;  %v189_v2 = vld [vmem:[%s17801_s3 + $0x200] sm:$0x1f] }
  0x25   :  { %v369_v62 = vsel %vm335_vm0, %v322_v57, 0.0  ;;  %v378_v17 = vsel %vm335_vm0, %v325_v10, 0.0  ;;  %v381_v18 = vsel %vm335_vm0, %v326_v11, 0.0  ;;  %v327_v19 = vmul.f32 %v11353_v1, %v186_v12  ;;  %v176_v57 = vld [vmem:[%s17801_s3 + $0x198] sm:$0x1f] }
  0x26   :  { %v328_v20 = vmul.f32 %v11353_v1, %v187_v13  ;;  %v329_v24 = vmul.f32 %v11372_v15, %v197_v22  ;;  %v330_v28 = vmul.f32 %v11372_v15, %v198_v23  ;;  %v11389_v29 = vrot.slane %v270_v16, %v11262_v8  ;;  %v202_v11 = vld [vmem:[%s17801_s3 + $0x268] sm:$0x1f]  ;;  %v140_v23 = vld [vmem:[%s17801_s3 + $0x78] sm:$0x1f] }
  0x27   :  { %349 = vadd.xlane.f32.xlu0 %v348_v38  ;;  %352 = vadd.xlane.f32.xlu1 %v351_v39  ;;  %v384_v25 = vsel %vm335_vm0, %v327_v19, 0.0  ;;  %v331_v34 = vmul.f32 %v11372_v15, %v199_v30  ;;  %v1462_v53 = vmul.f32 %v11297_v27, %v154_v50  ;;  %v11436_v58 = vand.u32 127, %v226_v0  ;;  %v10473_v0 = vld [vmem:[%s17805_s7] ss:$0 sm:$0xff]  ;;  %v130_v19 = vld [vmem:[%s17801_s3 + $0x28] sm:$0x1f] }
  0x28   :  { %v387_v26 = vsel %vm335_vm0, %v328_v20, 0.0  ;;  %v390_v32 = vsel %vm335_vm0, %v329_v24, 0.0  ;;  %v393_v33 = vsel %vm335_vm0, %v330_v28, 0.0  ;;  %v332_v35 = vmul.f32 %v11389_v29, %v209_v31  ;;  %v142_v31 = vld [vmem:[%s17801_s3 + $0x88] sm:$0x1f] }
  0x29   :  { %v396_v38 = vsel %vm335_vm0, %v331_v34, 0.0  ;;  %v333_v40 = vmul.f32 %v11389_v29, %v210_v36  ;;  %v334_v42 = vmul.f32 %v11389_v29, %v211_v37  ;;  %17993 = vst [vmem:[#allocation6_spill] sm:$0xff] %v11436_v58  ;;  %v1466_v60 = vmul.f32 %v11335_v52, %v176_v57  ;;  %v153_v34 = vld [vmem:[%s17801_s3 + $0xe0] sm:$0x1f]  ;;  %v164_v37 = vld [vmem:[%s17801_s3 + $0x138] sm:$0x1f] }
  0x2a   :  { %v399_v39 = vsel %vm335_vm0, %v332_v35, 0.0  ;;  %v1470_v5 = vmul.f32 %v11353_v1, %v189_v2  ;;  %v1474_v13 = vmul.f32 %v11372_v15, %v202_v11  ;;  %v1456_v22 = vmul.f32 %v11275_v14, %v130_v19  ;;  %v190_v50 = vld [vmem:[%s17801_s3 + $0x208] sm:$0x1f] }
  0x2b   :  { %355 = vadd.xlane.f32.xlu0 %v354_v46  ;;  %358 = vadd.xlane.f32.xlu1 %v357_v47  ;;  %v402_v44 = vsel %vm335_vm0, %v333_v40, 0.0  ;;  %v405_v45 = vsel %vm335_vm0, %v334_v42, 0.0  ;;  %v1455_v46 = vmul.f32 %v11275_v14, %v129_v43  ;;  %v152_v47 = vld [vmem:[%s17801_s3 + $0xd8] sm:$0x1f]  ;;  %v1461_v36 = vmul.f32 %v11297_v27, %v153_v34  ;;  %v166_v40 = vld [vmem:[%s17801_s3 + $0x148] sm:$0x1f] }
  0x2c   :  { %v1460_v49 = vmul.f32 %v11297_v27, %v152_v47  ;;  %v1538_v16 = vsel %vm335_vm0, %v1474_v13, 0.0  ;;  %v1484_v24 = vsel %vm335_vm0, %v1456_v22, 0.0  ;;  %v1465_v43 = vmul.f32 %v11315_v41, %v166_v40  ;;  %v188_v47 = vld [vmem:[%s17801_s3 + $0x1f8] sm:$0x1f] }
  0x2d   :  { %v1481_v48 = vsel %vm335_vm0, %v1455_v46, 0.0  ;;  %v11524_v57 = vsub.s32 %v11436_v58, %v11252_v3 }
  0x2e   :  { %v1496_v51 = vsel %vm335_vm0, %v1460_v49, 0.0  ;;  %v1469_v49 = vmul.f32 %v11353_v1, %v188_v47 }
  0x2f   :  { %361 = vadd.xlane.f32.xlu0 %v360_v54  ;;  %364 = vadd.xlane.f32.xlu1 %v363_v55  ;;  %v165_v54 = vld [vmem:[%s17801_s3 + $0x140] sm:$0x1f]  ;;  %v1502_v55 = vsel %vm335_vm0, %v1462_v53, 0.0  ;;  %v1471_v53 = vmul.f32 %v11353_v1, %v190_v50 }
  0x30   :  { %v1464_v56 = vmul.f32 %v11315_v41, %v165_v54  ;;  %v201_v54 = vld [vmem:[%s17801_s3 + $0x260] sm:$0x1f] }
  0x32   :  { %v1508_v59 = vsel %vm335_vm0, %v1464_v56, 0.0 }
  0x33   :  { %367 = vadd.xlane.f32.xlu0 %v366_v61  ;;  %370 = vadd.xlane.f32.xlu1 %v369_v62  ;;  %v178_v61 = vld [vmem:[%s17801_s3 + $0x1a8] sm:$0x1f]  ;;  %v1514_v62 = vsel %vm335_vm0, %v1466_v60, 0.0  ;;  %v1473_v60 = vmul.f32 %v11372_v15, %v201_v54 }
  0x34   :  { %v1468_v63 = vmul.f32 %v11335_v52, %v178_v61 }
  0x35   :  { %v1535_v2 = vsel %vm335_vm0, %v1473_v60, 0.0 }
  0x36   :  { %v1520_v4 = vsel %vm335_vm0, %v1468_v63, 0.0 }
  0x37   :  { %376 = vadd.xlane.f32.xlu1 %v375_v7  ;;  %373 = vadd.xlane.f32.xlu0 %v372_v9  ;;  %v200_v7 = vld [vmem:[%s17801_s3 + $0x258] sm:$0x1f]  ;;  %v1526_v9 = vsel %vm335_vm0, %v1470_v5, 0.0 }
  0x38   :  { %v1472_v10 = vmul.f32 %v11372_v15, %v200_v7 }
  0x3a   :  { %v1532_v12 = vsel %vm335_vm0, %v1472_v10, 0.0 }
  0x3b   :  { %379 = vadd.xlane.f32.xlu0 %v378_v17  ;;  %382 = vadd.xlane.f32.xlu1 %v381_v18  ;;  %v128_v17 = vld [vmem:[%s17801_s3 + $0x18] sm:$0x1f] }
  0x3c   :  { %v1454_v18 = vmul.f32 %v11275_v14, %v128_v17 }
  0x3e   :  { %v1478_v20 = vsel %vm335_vm0, %v1454_v18, 0.0 }
  0x3f   :  { %385 = vadd.xlane.f32.xlu0 %v384_v25  ;;  %388 = vadd.xlane.f32.xlu1 %v387_v26  ;;  %v1457_v25 = vmul.f32 %v11285_v21, %v140_v23  ;;  %v141_v26 = vld [vmem:[%s17801_s3 + $0x80] sm:$0x1f] }
  0x40   :  { %v1458_v30 = vmul.f32 %v11285_v21, %v141_v26 }
  0x41   :  { %v1487_v28 = vsel %vm335_vm0, %v1457_v25, 0.0 }
  0x43   :  { %391 = vadd.xlane.f32.xlu0 %v390_v32  ;;  %394 = vadd.xlane.f32.xlu1 %v393_v33  ;;  %v1490_v32 = vsel %vm335_vm0, %v1458_v30, 0.0  ;;  %v1459_v33 = vmul.f32 %v11285_v21, %v142_v31 }
  0x45   :  { %v1493_v35 = vsel %vm335_vm0, %v1459_v33, 0.0 }
  0x47   :  { %397 = vadd.xlane.f32.xlu0 %v396_v38  ;;  %400 = vadd.xlane.f32.xlu1 %v399_v39  ;;  %v1499_v38 = vsel %vm335_vm0, %v1461_v36, 0.0  ;;  %v1463_v39 = vmul.f32 %v11315_v41, %v164_v37 }
  0x49   :  { %v1505_v42 = vsel %vm335_vm0, %v1463_v39, 0.0 }
  0x4b   :  { %403 = vadd.xlane.f32.xlu0 %v402_v44  ;;  %406 = vadd.xlane.f32.xlu1 %v405_v45  ;;  %v177_v44 = vld [vmem:[%s17801_s3 + $0x1a0] sm:$0x1f]  ;;  %v1511_v45 = vsel %vm335_vm0, %v1465_v43, 0.0 }
  0x4c   :  { %v1467_v46 = vmul.f32 %v11335_v52, %v177_v44 }
  0x4f   :  { %1482 = vadd.xlane.f32.xlu0 %v1481_v48  ;;  %v1517_v48 = vsel %vm335_vm0, %v1467_v46, 0.0 }
  0x53   :  { %1497 = vadd.xlane.f32.xlu0 %v1496_v51  ;;  %v1523_v51 = vsel %vm335_vm0, %v1469_v49, 0.0 }
  0x57   :  { %1503 = vadd.xlane.f32.xlu0 %v1502_v55 }
  0x5b   :  { %1509 = vadd.xlane.f32.xlu0 %v1508_v59  ;;  %v1529_v59 = vsel %vm335_vm0, %v1471_v53, 0.0 }
  0x5c   :  { %688 = vbcast.lane.b32.xlu1 %v11436_v58, 256 }
  0x5f   :  { %1515 = vadd.xlane.f32.xlu0 %v1514_v62 }
  0x60   :  { %1322 = vbcast.lane.b32.xlu1 %v10473_v0, 256 }
  0x63   :  { %1521 = vadd.xlane.f32.xlu0 %v1520_v4 }
  0x67   :  { %1527 = vadd.xlane.f32.xlu0 %v1526_v9 }
  0x6b   :  { %1533 = vadd.xlane.f32.xlu0 %v1532_v12 }
  0x6f   :  { %1539 = vadd.xlane.f32.xlu0 %v1538_v16 }
  0x84   :  { %1479 = vadd.xlane.f32.xlu1 %v1478_v20 }
  0x88   :  { %1485 = vadd.xlane.f32.xlu1 %v1484_v24 }
  0x8c   :  { %1488 = vadd.xlane.f32.xlu1 %v1487_v28 }
  0x90   :  { %1491 = vadd.xlane.f32.xlu1 %v1490_v32 }
  0x94   :  { %1494 = vadd.xlane.f32.xlu1 %v1493_v35 }
  0x98   :  { %1500 = vadd.xlane.f32.xlu1 %v1499_v38 }
  0x9c   :  { %1506 = vadd.xlane.f32.xlu1 %v1505_v42 }
  0xa0   :  { %1512 = vadd.xlane.f32.xlu1 %v1511_v45 }
  0xa4   :  { %1518 = vadd.xlane.f32.xlu1 %v1517_v48 }
  0xa8   :  { %v344_v55 = vpop.xlane.xlu1 %343  ;;  %v338_v56 = vpop.xlane.xlu0 %337  ;;  %1524 = vadd.xlane.f32.xlu1 %v1523_v51 }
  0xa9   :  { %v437_v63 = vrot.slane %v338_v56, %v11524_v57  ;;  %v445_v4 = vrot.slane %v344_v55, %v11524_v57 }
  0xac   :  { %v341_v61 = vpop.xlane.xlu0 %340  ;;  %v347_v62 = vpop.xlane.xlu1 %346  ;;  %1530 = vadd.xlane.f32.xlu1 %v1529_v59 }
  0xad   :  { %v441_v0 = vrot.slane %v341_v61, %v11524_v57  ;;  %v449_v11 = vrot.slane %v347_v62, %v11524_v57 }
  0xaf   :  { %v531_v5 = vsel %vm530_vm1, %v441_v0, %v437_v63 }
  0xb0   :  { %v350_v7 = vpop.xlane.xlu0 %349  ;;  %v353_v9 = vpop.xlane.xlu1 %352  ;;  %1536 = vadd.xlane.f32.xlu1 %v1535_v2  ;;  %v533_v10 = vsel %vm532_vm2, %v445_v4, %v531_v5  ;;  %v213_v4 = vld [vmem:[%s17801_s3 + $0x2c0] sm:$0x1f] }
  0xb1   :  { %v453_v12 = vrot.slane %v350_v7, %v11524_v57  ;;  %v457_v13 = vrot.slane %v353_v9, %v11524_v57  ;;  %v557_v16 = vsel %vm556_vm3, %v533_v10, 0.0 }
  0xb2   :  { %558 = vadd.xlane.f32.xlu0 %v557_v16 }
  0xb3   :  { %v534_v17 = vsel %vm530_vm1, %v453_v12, %v449_v11  ;;  %v1476_v12 = vmul.f32 %v11389_v29, %v213_v4 }
  0xb4   :  { %v356_v18 = vpop.xlane.xlu0 %355  ;;  %v359_v19 = vpop.xlane.xlu1 %358  ;;  %v535_v20 = vsel %vm532_vm2, %v457_v13, %v534_v17 }
  0xb5   :  { %v560_v22 = vsel %vm556_vm3, %v535_v20, 0.0  ;;  %v461_v33 = vrot.slane %v356_v18, %v11524_v57  ;;  %v465_v34 = vrot.slane %v359_v19, %v11524_v57  ;;  %v212_v19 = vld [vmem:[%s17801_s3 + $0x2b8] sm:$0x1f] }
  0xb6   :  { %561 = vadd.xlane.f32.xlu1 %v560_v22 }
  0xb7   :  { %v536_v47 = vsel %vm530_vm1, %v465_v34, %v461_v33 }
  0xb8   :  { %v362_v23 = vpop.xlane.xlu0 %361  ;;  %v365_v24 = vpop.xlane.xlu1 %364 }
  0xb9   :  { %v469_v37 = vrot.slane %v362_v23, %v11524_v57  ;;  %v473_v43 = vrot.slane %v365_v24, %v11524_v57  ;;  %v1544_v24 = vsel %vm335_vm0, %v1476_v12, 0.0 }
  0xbb   :  { %v537_v51 = vsel %vm532_vm2, %v469_v37, %v536_v47 }
  0xbc   :  { %v368_v25 = vpop.xlane.xlu0 %367  ;;  %v371_v26 = vpop.xlane.xlu1 %370  ;;  %v563_v60 = vsel %vm556_vm3, %v537_v51, 0.0 }
  0xbd   :  { %v477_v40 = vrot.slane %v368_v25, %v11524_v57  ;;  %v481_v53 = vrot.slane %v371_v26, %v11524_v57  ;;  %v1475_v26 = vmul.f32 %v11389_v29, %v212_v19 }
  0xbf   :  { %v538_v55 = vsel %vm530_vm1, %v477_v40, %v473_v43 }
  0xc0   :  { %v377_v28 = vpop.xlane.xlu1 %376  ;;  %v374_v30 = vpop.xlane.xlu0 %373  ;;  %v539_v2 = vsel %vm532_vm2, %v481_v53, %v538_v55 }
  0xc1   :  { %v489_v31 = vrot.slane %v377_v28, %v11524_v57  ;;  %v485_v32 = vrot.slane %v374_v30, %v11524_v57  ;;  %v566_v10 = vsel %vm556_vm3, %v539_v2, 0.0  ;;  %v214_v30 = vld [vmem:[%s17801_s3 + $0x2c8] sm:$0x1f] }
  0xc2   :  { %v1477_v33 = vmul.f32 %v11389_v29, %v214_v30 }
  0xc3   :  { %v540_v39 = vsel %vm530_vm1, %v489_v31, %v485_v32  ;;  %v1541_v32 = vsel %vm335_vm0, %v1475_v26, 0.0 }
  0xc4   :  { %v380_v35 = vpop.xlane.xlu0 %379  ;;  %v383_v36 = vpop.xlane.xlu1 %382  ;;  %v1547_v34 = vsel %vm335_vm0, %v1477_v33, 0.0 }
  0xc5   :  { %v493_v38 = vrot.slane %v380_v35, %v11524_v57  ;;  %v497_v48 = vrot.slane %v383_v36, %v11524_v57 }
  0xc7   :  { %v541_v42 = vsel %vm532_vm2, %v493_v38, %v540_v39 }
  0xc8   :  { %v386_v44 = vpop.xlane.xlu0 %385  ;;  %v389_v45 = vpop.xlane.xlu1 %388  ;;  %v569_v46 = vsel %vm556_vm3, %v541_v42, 0.0 }
  0xc9   :  { %v501_v49 = vrot.slane %v386_v44, %v11524_v57  ;;  %v505_v50 = vrot.slane %v389_v45, %v11524_v57  ;;  %570 = vadd.xlane.f32.xlu0 %v569_v46 }
  0xcb   :  { %v542_v54 = vsel %vm530_vm1, %v501_v49, %v497_v48 }
  0xcc   :  { %v392_v56 = vpop.xlane.xlu0 %391  ;;  %v395_v59 = vpop.xlane.xlu1 %394  ;;  %v543_v61 = vsel %vm532_vm2, %v505_v50, %v542_v54 }
  0xcd   :  { %564 = vadd.xlane.f32.xlu0 %v563_v60  ;;  %v572_v62 = vsel %vm556_vm3, %v543_v61, 0.0  ;;  %v509_v63 = vrot.slane %v392_v56, %v11524_v57  ;;  %v513_v0 = vrot.slane %v395_v59, %v11524_v57 }
  0xce   :  { %573 = vadd.xlane.f32.xlu1 %v572_v62 }
  0xcf   :  { %v544_v11 = vsel %vm530_vm1, %v513_v0, %v509_v63 }
  0xd0   :  { %v398_v5 = vpop.xlane.xlu0 %397  ;;  %v401_v7 = vpop.xlane.xlu1 %400 }
  0xd1   :  { %v517_v9 = vrot.slane %v398_v5, %v11524_v57  ;;  %v521_v20 = vrot.slane %v401_v7, %v11524_v57 }
  0xd2   :  { %567 = vadd.xlane.f32.xlu1 %v566_v10 }
  0xd3   :  { %v545_v13 = vsel %vm532_vm2, %v517_v9, %v544_v11 }
  0xd4   :  { %v404_v16 = vpop.xlane.xlu0 %403  ;;  %v575_v17 = vsel %vm556_vm3, %v545_v13, 0.0  ;;  %v407_v18 = vpop.xlane.xlu1 %406 }
  0xd5   :  { %v525_v22 = vrot.slane %v404_v16, %v11524_v57  ;;  %576 = vadd.xlane.f32.xlu0 %v575_v17  ;;  %v529_v23 = vrot.slane %v407_v18, %v11524_v57 }
  0xd7   :  { %v546_v25 = vsel %vm530_vm1, %v525_v22, %v521_v20 }
  0xd8   :  { %v547_v28 = vsel %vm532_vm2, %v529_v23, %v546_v25  ;;  %v11592_v35 = vpop.permute.xlu1 %688  ;;  %v1483_v36 = vpop.xlane.xlu0 %1482 }
  0xd9   :  { %v578_v31 = vsel %vm556_vm3, %v547_v28, 0.0  ;;  %1545 = vadd.xlane.f32.xlu0 %v1544_v24  ;;  %17994 = vst [vmem:[#allocation7_spill] sm:$0xff] %v11592_v35  ;;  %v1581_v39 = vrot.slane %v1483_v36, %v11524_v57 }
  0xda   :  { %579 = vadd.xlane.f32.xlu1 %v578_v31 }
  0xdc   :  { %v11594_v37 = vpop.permute.xlu1 %1322  ;;  %v1498_v42 = vpop.xlane.xlu0 %1497 }
  0xdd   :  { %17995 = vst [vmem:[#allocation8_spill] sm:$0xff] %v11594_v37  ;;  %v1601_v60 = vrot.slane %v1498_v42, %v11524_v57 }
  0xde   :  { %1542 = vadd.xlane.f32.xlu1 %v1541_v32 }
  0xe0   :  { %v1504_v46 = vpop.xlane.xlu0 %1503 }
  0xe1   :  { %v1609_v63 = vrot.slane %v1504_v46, %v11524_v57 }
  0xe2   :  { %1548 = vadd.xlane.f32.xlu1 %v1547_v34 }
  0xe4   :  { %v1510_v54 = vpop.xlane.xlu0 %1509 }
  0xe5   :  { %v1617_v7 = vrot.slane %v1510_v54, %v11524_v57  ;;  %v167_v54 = vld [vmem:[%s17801_s3 + $0x150] sm:$0x1f] }
  0xe8   :  { %v1516_v61 = vpop.xlane.xlu0 %1515 }
  0xe9   :  { %v1625_v19 = vrot.slane %v1516_v61, %v11524_v57 }
  0xec   :  { %v1522_v12 = vpop.xlane.xlu0 %1521 }
  0xed   :  { %v1633_v23 = vrot.slane %v1522_v12, %v11524_v57  ;;  %v204_v12 = vld [vmem:[%s17801_s3 + $0x278] sm:$0x1f] }
  0xf0   :  { %v1528_v20 = vpop.xlane.xlu0 %1527 }
  0xf1   :  { %v1641_v30 = vrot.slane %v1528_v20, %v11524_v57 }
  0xf4   :  { %v1534_v34 = vpop.xlane.xlu0 %1533 }
  0xf5   :  { %v1649_v42 = vrot.slane %v1534_v34, %v11524_v57 }
 0x10d   :  { %v1480_v38 = vpop.xlane.xlu1 %1479 }
 0x10e   :  { %v1577_v40 = vrot.slane %v1480_v38, %v11524_v57 }
 0x110   :  { %v1670_v44 = vsel %vm530_vm1, %v1581_v39, %v1577_v40 }
 0x111   :  { %v1486_v43 = vpop.xlane.xlu1 %1485 }
 0x112   :  { %v1585_v45 = vrot.slane %v1486_v43, %v11524_v57  ;;  %v1540_v43 = vpop.xlane.xlu0 %1539 }
 0x114   :  { %v1671_v47 = vsel %vm532_vm2, %v1585_v45, %v1670_v44  ;;  %v1657_v45 = vrot.slane %v1540_v43, %v11524_v57 }
 0x115   :  { %v1489_v48 = vpop.xlane.xlu1 %1488  ;;  %v1694_v49 = vsel %vm556_vm3, %v1671_v47, 0.0 }
 0x116   :  { %1695 = vadd.xlane.f32.xlu0 %v1694_v49  ;;  %v1589_v50 = vrot.slane %v1489_v48, %v11524_v57  ;;  %v131_v48 = vld [vmem:[%s17801_s3 + $0x30] sm:$0x1f] }
 0x119   :  { %v1492_v51 = vpop.xlane.xlu1 %1491 }
 0x11a   :  { %v1593_v53 = vrot.slane %v1492_v51, %v11524_v57  ;;  %v2572_v51 = vmul.f32 %v11275_v14, %v131_v48  ;;  %v133_v48 = vld [vmem:[%s17801_s3 + $0x40] sm:$0x1f] }
 0x11c   :  { %v1672_v56 = vsel %vm530_vm1, %v1593_v53, %v1589_v50 }
 0x11d   :  { %v1495_v55 = vpop.xlane.xlu1 %1494 }
 0x11e   :  { %v1597_v59 = vrot.slane %v1495_v55, %v11524_v57 }
 0x120   :  { %v1673_v62 = vsel %vm532_vm2, %v1597_v59, %v1672_v56  ;;  %v2596_v56 = vsel %vm335_vm0, %v2572_v51, 0.0  ;;  %v2581_v59 = vmul.f32 %v11315_v41, %v167_v54  ;;  %v2574_v51 = vmul.f32 %v11275_v14, %v133_v48 }
 0x121   :  { %v1501_v0 = vpop.xlane.xlu1 %1500  ;;  %v1697_v2 = vsel %vm556_vm3, %v1673_v62, 0.0 }
 0x122   :  { %v1605_v4 = vrot.slane %v1501_v0, %v11524_v57  ;;  %1698 = vadd.xlane.f32.xlu1 %v1697_v2  ;;  %v2623_v61 = vsel %vm335_vm0, %v2581_v59, 0.0  ;;  %v2602_v54 = vsel %vm335_vm0, %v2574_v51, 0.0 }
 0x124   :  { %v1674_v5 = vsel %vm530_vm1, %v1605_v4, %v1601_v60  ;;  %v169_v60 = vld [vmem:[%s17801_s3 + $0x160] sm:$0x1f]  ;;  %v191_v4 = vld [vmem:[%s17801_s3 + $0x210] sm:$0x1f] }
 0x125   :  { %v1507_v9 = vpop.xlane.xlu1 %1506  ;;  %v1675_v10 = vsel %vm532_vm2, %v1609_v63, %v1674_v5  ;;  %v2583_v62 = vmul.f32 %v11315_v41, %v169_v60  ;;  %v180_v63 = vld [vmem:[%s17801_s3 + $0x1b8] sm:$0x1f] }
 0x126   :  { %v1613_v11 = vrot.slane %v1507_v9, %v11524_v57  ;;  %v1700_v13 = vsel %vm556_vm3, %v1675_v10, 0.0  ;;  %v2585_v2 = vmul.f32 %v11335_v52, %v180_v63  ;;  %v193_v9 = vld [vmem:[%s17801_s3 + $0x220] sm:$0x1f] }
 0x127   :  { %1701 = vadd.xlane.f32.xlu0 %v1700_v13  ;;  %v2629_v0 = vsel %vm335_vm0, %v2583_v62, 0.0 }
 0x128   :  { %v1676_v17 = vsel %vm530_vm1, %v1617_v7, %v1613_v11  ;;  %v2635_v5 = vsel %vm335_vm0, %v2585_v2, 0.0  ;;  %v2587_v7 = vmul.f32 %v11353_v1, %v191_v4  ;;  %v2589_v11 = vmul.f32 %v11353_v1, %v193_v9 }
 0x129   :  { %v1513_v16 = vpop.xlane.xlu1 %1512 }
 0x12a   :  { %v1621_v18 = vrot.slane %v1513_v16, %v11524_v57  ;;  %v2641_v10 = vsel %vm335_vm0, %v2587_v7, 0.0  ;;  %v2647_v16 = vsel %vm335_vm0, %v2589_v11, 0.0 }
 0x12c   :  { %v1677_v22 = vsel %vm532_vm2, %v1621_v18, %v1676_v17  ;;  %v2591_v17 = vmul.f32 %v11372_v15, %v204_v12 }
 0x12d   :  { %v1519_v24 = vpop.xlane.xlu1 %1518  ;;  %v1703_v25 = vsel %vm556_vm3, %v1677_v22, 0.0 }
 0x12e   :  { %v1629_v26 = vrot.slane %v1519_v24, %v11524_v57  ;;  %1704 = vadd.xlane.f32.xlu1 %v1703_v25  ;;  %v2653_v22 = vsel %vm335_vm0, %v2591_v17, 0.0  ;;  %v217_v25 = vld [vmem:[%s17801_s3 + $0x2e0] sm:$0x1f] }
 0x130   :  { %v1678_v28 = vsel %vm530_vm1, %v1629_v26, %v1625_v19  ;;  %v215_v19 = vld [vmem:[%s17801_s3 + $0x2d0] sm:$0x1f] }
 0x131   :  { %v1525_v31 = vpop.xlane.xlu1 %1524  ;;  %v1679_v32 = vsel %vm532_vm2, %v1633_v23, %v1678_v28  ;;  %v2593_v23 = vmul.f32 %v11389_v29, %v215_v19  ;;  %v2595_v28 = vmul.f32 %v11389_v29, %v217_v25 }
 0x132   :  { %v1637_v33 = vrot.slane %v1525_v31, %v11524_v57  ;;  %v1706_v36 = vsel %vm556_vm3, %v1679_v32, 0.0 }
 0x133   :  { %1707 = vadd.xlane.f32.xlu0 %v1706_v36  ;;  %v2659_v26 = vsel %vm335_vm0, %v2593_v23, 0.0  ;;  %v2665_v32 = vsel %vm335_vm0, %v2595_v28, 0.0 }
 0x134   :  { %v1680_v39 = vsel %vm530_vm1, %v1641_v30, %v1637_v33 }
 0x135   :  { %v1531_v38 = vpop.xlane.xlu1 %1530 }
 0x136   :  { %v1645_v40 = vrot.slane %v1531_v38, %v11524_v57 }
 0x138   :  { %v1681_v44 = vsel %vm532_vm2, %v1645_v40, %v1680_v39 }
 0x139   :  { %v1537_v46 = vpop.xlane.xlu1 %1536  ;;  %v1709_v47 = vsel %vm556_vm3, %v1681_v44, 0.0 }
 0x13a   :  { %v1653_v49 = vrot.slane %v1537_v46, %v11524_v57  ;;  %1710 = vadd.xlane.f32.xlu1 %v1709_v47 }
 0x13b   :  { %v11670_v13 = vpop.xlane.xlu0 %558 }
 0x13c   :  { %v1682_v50 = vsel %vm530_vm1, %v1653_v49, %v1649_v42  ;;  %v132_v42 = vld [vmem:[%s17801_s3 + $0x38] sm:$0x1f] }
 0x13d   :  { %v1683_v53 = vsel %vm532_vm2, %v1657_v45, %v1682_v50  ;;  %v2573_v46 = vmul.f32 %v11275_v14, %v132_v42 }
 0x13e   :  { %v1712_v55 = vsel %vm556_vm3, %v1683_v53, 0.0  ;;  %v143_v53 = vld [vmem:[%s17801_s3 + $0x90] sm:$0x1f] }
 0x13f   :  { %1713 = vadd.xlane.f32.xlu0 %v1712_v55  ;;  %v11674_v18 = vpop.xlane.xlu1 %561  ;;  %v2599_v50 = vsel %vm335_vm0, %v2573_v46, 0.0  ;;  %v2575_v55 = vmul.f32 %v11285_v21, %v143_v53 }
 0x141   :  { %v2605_v59 = vsel %vm335_vm0, %v2575_v55, 0.0 }
 0x143   :  { %2597 = vadd.xlane.f32.xlu0 %v2596_v56  ;;  %v144_v56 = vld [vmem:[%s17801_s3 + $0x98] sm:$0x1f] }
 0x144   :  { %v2576_v60 = vmul.f32 %v11285_v21, %v144_v56 }
 0x146   :  { %v2608_v62 = vsel %vm335_vm0, %v2576_v60, 0.0 }
 0x147   :  { %2624 = vadd.xlane.f32.xlu0 %v2623_v61  ;;  %v145_v61 = vld [vmem:[%s17801_s3 + $0xa0] sm:$0x1f] }
 0x148   :  { %v2577_v63 = vmul.f32 %v11285_v21, %v145_v61 }
 0x14a   :  { %v2611_v2 = vsel %vm335_vm0, %v2577_v63, 0.0 }
 0x14b   :  { %2630 = vadd.xlane.f32.xlu0 %v2629_v0  ;;  %v155_v0 = vld [vmem:[%s17801_s3 + $0xf0] sm:$0x1f] }
 0x14c   :  { %v2578_v4 = vmul.f32 %v11297_v27, %v155_v0 }
 0x14e   :  { %v2614_v7 = vsel %vm335_vm0, %v2578_v4, 0.0 }
 0x14f   :  { %2636 = vadd.xlane.f32.xlu0 %v2635_v5  ;;  %v156_v5 = vld [vmem:[%s17801_s3 + $0xf8] sm:$0x1f] }
 0x150   :  { %v2579_v9 = vmul.f32 %v11297_v27, %v156_v5 }
 0x152   :  { %v11679_v20 = vpop.xlane.xlu0 %570  ;;  %v2617_v11 = vsel %vm335_vm0, %v2579_v9, 0.0 }
 0x153   :  { %2642 = vadd.xlane.f32.xlu0 %v2641_v10  ;;  %v157_v10 = vld [vmem:[%s17801_s3 + $0x100] sm:$0x1f] }
 0x154   :  { %v2580_v12 = vmul.f32 %v11297_v27, %v157_v10 }
 0x156   :  { %v11690_v30 = vpop.xlane.xlu0 %564  ;;  %v2620_v17 = vsel %vm335_vm0, %v2580_v12, 0.0 }
 0x157   :  { %2648 = vadd.xlane.f32.xlu0 %v2647_v16  ;;  %v11683_v24 = vpop.xlane.xlu1 %573  ;;  %v168_v16 = vld [vmem:[%s17801_s3 + $0x158] sm:$0x1f] }
 0x158   :  { %v2582_v19 = vmul.f32 %v11315_v41, %v168_v16 }
 0x15a   :  { %v2626_v23 = vsel %vm335_vm0, %v2582_v19, 0.0 }
 0x15b   :  { %2654 = vadd.xlane.f32.xlu0 %v2653_v22  ;;  %v11692_v31 = vpop.xlane.xlu1 %567  ;;  %v179_v22 = vld [vmem:[%s17801_s3 + $0x1b0] sm:$0x1f] }
 0x15c   :  { %v2584_v25 = vmul.f32 %v11335_v52, %v179_v22 }
 0x15e   :  { %v11695_v33 = vpop.xlane.xlu0 %576  ;;  %v2632_v28 = vsel %vm335_vm0, %v2584_v25, 0.0 }
 0x15f   :  { %2660 = vadd.xlane.f32.xlu0 %v2659_v26  ;;  %v181_v26 = vld [vmem:[%s17801_s3 + $0x1c0] sm:$0x1f] }
 0x162   :  { %v1546_v36 = vpop.xlane.xlu0 %1545 }
 0x163   :  { %v11697_v34 = vpop.xlane.xlu1 %579  ;;  %2666 = vadd.xlane.f32.xlu0 %v2665_v32  ;;  %v1665_v39 = vrot.slane %v1546_v36, %v11524_v57  ;;  %v2586_v32 = vmul.f32 %v11335_v52, %v181_v26  ;;  %v192_v36 = vld [vmem:[%s17801_s3 + $0x218] sm:$0x1f] }
 0x167   :  { %v1543_v38 = vpop.xlane.xlu1 %1542 }
 0x168   :  { %v1661_v40 = vrot.slane %v1543_v38, %v11524_v57  ;;  %v2638_v38 = vsel %vm335_vm0, %v2586_v32, 0.0 }
 0x16a   :  { %v1684_v45 = vsel %vm530_vm1, %v1665_v39, %v1661_v40  ;;  %v2588_v39 = vmul.f32 %v11353_v1, %v192_v36  ;;  %v203_v40 = vld [vmem:[%s17801_s3 + $0x270] sm:$0x1f] }
 0x16b   :  { %v1549_v43 = vpop.xlane.xlu1 %1548 }
 0x16c   :  { %v1669_v44 = vrot.slane %v1549_v43, %v11524_v57  ;;  %v2644_v42 = vsel %vm335_vm0, %v2588_v39, 0.0  ;;  %v2590_v43 = vmul.f32 %v11372_v15, %v203_v40 }
 0x16e   :  { %v1685_v47 = vsel %vm532_vm2, %v1669_v44, %v1684_v45  ;;  %v205_v44 = vld [vmem:[%s17801_s3 + $0x280] sm:$0x1f]  ;;  %v2650_v45 = vsel %vm335_vm0, %v2590_v43, 0.0 }
 0x16f   :  { %v1715_v49 = vsel %vm556_vm3, %v1685_v47, 0.0  ;;  %v2592_v46 = vmul.f32 %v11372_v15, %v205_v44  ;;  %v216_v47 = vld [vmem:[%s17801_s3 + $0x2d8] sm:$0x1f] }
 0x170   :  { %1716 = vadd.xlane.f32.xlu1 %v1715_v49  ;;  %v2594_v49 = vmul.f32 %v11389_v29, %v216_v47 }
 0x171   :  { %v2656_v48 = vsel %vm335_vm0, %v2592_v46, 0.0 }
 0x174   :  { %2600 = vadd.xlane.f32.xlu1 %v2599_v50  ;;  %v2662_v50 = vsel %vm335_vm0, %v2594_v49, 0.0 }
 0x178   :  { %2603 = vadd.xlane.f32.xlu1 %v2602_v54 }
 0x17c   :  { %2606 = vadd.xlane.f32.xlu1 %v2605_v59 }
 0x180   :  { %2609 = vadd.xlane.f32.xlu1 %v2608_v62 }
 0x184   :  { %2612 = vadd.xlane.f32.xlu1 %v2611_v2 }
 0x188   :  { %2615 = vadd.xlane.f32.xlu1 %v2614_v7 }
 0x18c   :  { %2618 = vadd.xlane.f32.xlu1 %v2617_v11 }
 0x190   :  { %2621 = vadd.xlane.f32.xlu1 %v2620_v17 }
 0x194   :  { %2627 = vadd.xlane.f32.xlu1 %v2626_v23 }
 0x198   :  { %2633 = vadd.xlane.f32.xlu1 %v2632_v28 }
 0x19c   :  { %2639 = vadd.xlane.f32.xlu1 %v2638_v38 }
 0x19f   :  { %v11780_v51 = vpop.xlane.xlu0 %1695 }
 0x1a0   :  { %2645 = vadd.xlane.f32.xlu1 %v2644_v42 }
 0x1a4   :  { %2651 = vadd.xlane.f32.xlu1 %v2650_v45 }
 0x1a8   :  { %2657 = vadd.xlane.f32.xlu1 %v2656_v48 }
 0x1ab   :  { %v11782_v53 = vpop.xlane.xlu1 %1698 }
 0x1ac   :  { %2663 = vadd.xlane.f32.xlu1 %v2662_v50 }
 0x1b0   :  { %v11784_v54 = vpop.xlane.xlu0 %1701 }
 0x1b7   :  { %v11786_v55 = vpop.xlane.xlu1 %1704 }
 0x1bc   :  { %v11788_v56 = vpop.xlane.xlu0 %1707 }
 0x1c3   :  { %v11790_v59 = vpop.xlane.xlu1 %1710 }
 0x1c8   :  { %v11792_v60 = vpop.xlane.xlu0 %1713 }
 0x1cc   :  { %v2598_v62 = vpop.xlane.xlu0 %2597 }
 0x1cd   :  { %v2695_v0 = vrot.slane %v2598_v62, %v11524_v57 }
 0x1d0   :  { %v2625_v12 = vpop.xlane.xlu0 %2624 }
 0x1d1   :  { %v2731_v62 = vrot.slane %v2625_v12, %v11524_v57 }
 0x1d4   :  { %v2631_v25 = vpop.xlane.xlu0 %2630 }
 0x1d5   :  { %v2739_v48 = vrot.slane %v2631_v25, %v11524_v57 }
 0x1d8   :  { %v2637_v38 = vpop.xlane.xlu0 %2636 }
 0x1dc   :  { %v2643_v45 = vpop.xlane.xlu0 %2642 }
 0x1f9   :  { %v11794_v61 = vpop.xlane.xlu1 %1716 }
 0x1fd   :  { %v2601_v63 = vpop.xlane.xlu1 %2600 }
 0x1fe   :  { %v2699_v2 = vrot.slane %v2601_v63, %v11524_v57 }
 0x200   :  { %v2788_v7 = vsel %vm530_vm1, %v2699_v2, %v2695_v0  ;;  %v2649_v2 = vpop.xlane.xlu0 %2648 }
 0x201   :  { %v2604_v4 = vpop.xlane.xlu1 %2603 }
 0x202   :  { %v2703_v5 = vrot.slane %v2604_v4, %v11524_v57 }
 0x204   :  { %v2789_v9 = vsel %vm532_vm2, %v2703_v5, %v2788_v7  ;;  %v2655_v12 = vpop.xlane.xlu0 %2654 }
 0x205   :  { %v2607_v10 = vpop.xlane.xlu1 %2606  ;;  %v2812_v11 = vsel %vm556_vm3, %v2789_v9, 0.0  ;;  %v2747_v9 = vrot.slane %v2637_v38, %v11524_v57 }
 0x206   :  { %2813 = vadd.xlane.f32.xlu1 %v2812_v11  ;;  %v2707_v19 = vrot.slane %v2607_v10, %v11524_v57 }
 0x209   :  { %v2610_v16 = vpop.xlane.xlu1 %2609 }
 0x20a   :  { %v2711_v17 = vrot.slane %v2610_v16, %v11524_v57 }
 0x20c   :  { %v2790_v26 = vsel %vm530_vm1, %v2711_v17, %v2707_v19 }
 0x20d   :  { %v2613_v22 = vpop.xlane.xlu1 %2612 }
 0x20e   :  { %v2715_v23 = vrot.slane %v2613_v22, %v11524_v57  ;;  %v2763_v22 = vrot.slane %v2649_v2, %v11524_v57 }
 0x210   :  { %v2791_v28 = vsel %vm532_vm2, %v2715_v23, %v2790_v26  ;;  %v2755_v26 = vrot.slane %v2643_v45, %v11524_v57 }
 0x211   :  { %v2616_v32 = vpop.xlane.xlu1 %2615  ;;  %v2815_v36 = vsel %vm556_vm3, %v2791_v28, 0.0 }
 0x212   :  { %2816 = vadd.xlane.f32.xlu0 %v2815_v36  ;;  %v2719_v42 = vrot.slane %v2616_v32, %v11524_v57  ;;  %v2661_v36 = vpop.xlane.xlu0 %2660 }
 0x215   :  { %v2619_v39 = vpop.xlane.xlu1 %2618 }
 0x216   :  { %v2723_v40 = vrot.slane %v2619_v39, %v11524_v57 }
 0x218   :  { %v2792_v46 = vsel %vm530_vm1, %v2723_v40, %v2719_v42  ;;  %v2771_v42 = vrot.slane %v2655_v12, %v11524_v57  ;;  %v183_v12 = vld [vmem:[%s17801_s3 + $0x1d0] sm:$0x1f] }
 0x219   :  { %v2622_v43 = vpop.xlane.xlu1 %2621 }
 0x21a   :  { %v2727_v44 = vrot.slane %v2622_v43, %v11524_v57 }
 0x21c   :  { %v2793_v47 = vsel %vm532_vm2, %v2727_v44, %v2792_v46  ;;  %v135_v44 = vld [vmem:[%s17801_s3 + $0x50] sm:$0x1f] }
 0x21d   :  { %v2628_v49 = vpop.xlane.xlu1 %2627  ;;  %v2818_v50 = vsel %vm556_vm3, %v2793_v47, 0.0  ;;  %v2667_v47 = vpop.xlane.xlu0 %2666 }
 0x21e   :  { %v2735_v63 = vrot.slane %v2628_v49, %v11524_v57  ;;  %2819 = vadd.xlane.f32.xlu1 %v2818_v50  ;;  %v3691_v49 = vmul.f32 %v11275_v14, %v135_v44  ;;  %v148_v44 = vld [vmem:[%s17801_s3 + $0xb8] sm:$0x1f] }
 0x220   :  { %v2794_v0 = vsel %vm530_vm1, %v2735_v63, %v2731_v62  ;;  %v172_v62 = vld [vmem:[%s17801_s3 + $0x178] sm:$0x1f] }
 0x221   :  { %v2634_v4 = vpop.xlane.xlu1 %2633  ;;  %v2795_v5 = vsel %vm532_vm2, %v2739_v48, %v2794_v0  ;;  %v2787_v0 = vrot.slane %v2667_v47, %v11524_v57  ;;  %v158_v47 = vld [vmem:[%s17801_s3 + $0x108] sm:$0x1f] }
 0x222   :  { %v2821_v7 = vsel %vm556_vm3, %v2795_v5, 0.0  ;;  %v2743_v10 = vrot.slane %v2634_v4, %v11524_v57  ;;  %v134_v4 = vld [vmem:[%s17801_s3 + $0x48] sm:$0x1f]  ;;  %v2779_v5 = vrot.slane %v2661_v36, %v11524_v57 }
 0x223   :  { %2822 = vadd.xlane.f32.xlu0 %v2821_v7 }
 0x224   :  { %v2796_v17 = vsel %vm530_vm1, %v2747_v9, %v2743_v10  ;;  %v3717_v9 = vsel %vm335_vm0, %v3691_v49, 0.0  ;;  %v3701_v10 = vmul.f32 %v11315_v41, %v172_v62  ;;  %v3696_v49 = vmul.f32 %v11297_v27, %v158_v47 }
 0x225   :  { %v2640_v11 = vpop.xlane.xlu1 %2639  ;;  %v612_v47 = vrot.slane %v11683_v24, %v11524_v57 }
 0x226   :  { %v2751_v16 = vrot.slane %v2640_v11, %v11524_v57  ;;  %v3732_v62 = vsel %vm335_vm0, %v3696_v49, 0.0  ;;  %v616_v49 = vrot.slane %v11695_v33, %v11524_v57 }
 0x228   :  { %v2797_v19 = vsel %vm532_vm2, %v2751_v16, %v2796_v17  ;;  %v3690_v16 = vmul.f32 %v11275_v14, %v134_v4 }
 0x229   :  { %v2646_v23 = vpop.xlane.xlu1 %2645  ;;  %v2824_v25 = vsel %vm556_vm3, %v2797_v19, 0.0  ;;  %v136_v19 = vld [vmem:[%s17801_s3 + $0x58] sm:$0x1f] }
 0x22a   :  { %v2759_v28 = vrot.slane %v2646_v23, %v11524_v57  ;;  %2825 = vadd.xlane.f32.xlu1 %v2824_v25  ;;  %v3747_v23 = vsel %vm335_vm0, %v3701_v10, 0.0  ;;  %v3703_v25 = vmul.f32 %v11335_v52, %v183_v12  ;;  %v171_v10 = vld [vmem:[%s17801_s3 + $0x170] sm:$0x1f] }
 0x22c   :  { %v2798_v32 = vsel %vm530_vm1, %v2759_v28, %v2755_v26  ;;  %v3714_v26 = vsel %vm335_vm0, %v3690_v16, 0.0  ;;  %v3692_v28 = vmul.f32 %v11275_v14, %v136_v19  ;;  %v3753_v36 = vsel %vm335_vm0, %v3703_v25, 0.0 }
 0x22d   :  { %v2652_v38 = vpop.xlane.xlu1 %2651  ;;  %v2799_v39 = vsel %vm532_vm2, %v2763_v22, %v2798_v32  ;;  %v146_v32 = vld [vmem:[%s17801_s3 + $0xa8] sm:$0x1f]  ;;  %v600_v16 = vrot.slane %v11690_v30, %v11524_v57  ;;  %v592_v19 = vrot.slane %v11670_v13, %v11524_v57 }
 0x22e   :  { %v2827_v40 = vsel %vm556_vm3, %v2799_v39, 0.0  ;;  %v2767_v43 = vrot.slane %v2652_v38, %v11524_v57  ;;  %v3720_v38 = vsel %vm335_vm0, %v3692_v28, 0.0  ;;  %v3693_v39 = vmul.f32 %v11285_v21, %v146_v32 }
 0x22f   :  { %2828 = vadd.xlane.f32.xlu0 %v2827_v40  ;;  %v147_v40 = vld [vmem:[%s17801_s3 + $0xb0] sm:$0x1f] }
 0x230   :  { %v2800_v48 = vsel %vm530_vm1, %v2771_v42, %v2767_v43  ;;  %v3723_v42 = vsel %vm335_vm0, %v3693_v39, 0.0  ;;  %v3694_v43 = vmul.f32 %v11285_v21, %v147_v40  ;;  %v1733_v39 = vrot.slane %v11782_v53, %v11524_v57  ;;  %v184_v40 = vld [vmem:[%s17801_s3 + $0x1d8] sm:$0x1f] }
 0x231   :  { %v2658_v45 = vpop.xlane.xlu1 %2657 }
 0x232   :  { %v2775_v46 = vrot.slane %v2658_v45, %v11524_v57  ;;  %v3726_v45 = vsel %vm335_vm0, %v3694_v43, 0.0  ;;  %v1737_v43 = vrot.slane %v11784_v54, %v11524_v57 }
 0x234   :  { %v2801_v50 = vsel %vm532_vm2, %v2775_v46, %v2800_v48  ;;  %v3695_v46 = vmul.f32 %v11285_v21, %v148_v44 }
 0x235   :  { %v2664_v63 = vpop.xlane.xlu1 %2663  ;;  %v2830_v2 = vsel %vm556_vm3, %v2801_v50, 0.0  ;;  %v159_v50 = vld [vmem:[%s17801_s3 + $0x110] sm:$0x1f] }
 0x236   :  { %v2783_v7 = vrot.slane %v2664_v63, %v11524_v57  ;;  %2831 = vadd.xlane.f32.xlu1 %v2830_v2  ;;  %v3729_v48 = vsel %vm335_vm0, %v3695_v46, 0.0  ;;  %v3697_v63 = vmul.f32 %v11297_v27, %v159_v50  ;;  %v620_v50 = vrot.slane %v11697_v34, %v11524_v57 }
 0x238   :  { %v2802_v11 = vsel %vm530_vm1, %v2783_v7, %v2779_v5  ;;  %v3735_v2 = vsel %vm335_vm0, %v3697_v63, 0.0  ;;  %v170_v5 = vld [vmem:[%s17801_s3 + $0x168] sm:$0x1f] }
 0x239   :  { %v2803_v17 = vsel %vm532_vm2, %v2787_v0, %v2802_v11  ;;  %v160_v0 = vld [vmem:[%s17801_s3 + $0x118] sm:$0x1f]  ;;  %v596_v11 = vrot.slane %v11674_v18, %v11524_v57 }
 0x23a   :  { %v2833_v22 = vsel %vm556_vm3, %v2803_v17, 0.0  ;;  %3718 = vadd.xlane.f32.xlu1 %v3717_v9  ;;  %v3698_v4 = vmul.f32 %v11297_v27, %v160_v0  ;;  %v3699_v9 = vmul.f32 %v11315_v41, %v170_v5  ;;  %v3700_v17 = vmul.f32 %v11315_v41, %v171_v10 }
 0x23b   :  { %2834 = vadd.xlane.f32.xlu0 %v2833_v22  ;;  %v604_v22 = vrot.slane %v11692_v31, %v11524_v57  ;;  %v621_v25 = vsel %vm530_vm1, %v596_v11, %v592_v19  ;;  %v1749_v5 = vrot.slane %v11790_v59, %v11524_v57  ;;  %v1757_v11 = vrot.slane %v11794_v61, %v11524_v57  ;;  %v195_v19 = vld [vmem:[%s17801_s3 + $0x230] sm:$0x1f] }
 0x23c   :  { %v3738_v7 = vsel %vm335_vm0, %v3698_v4, 0.0  ;;  %v3741_v12 = vsel %vm335_vm0, %v3699_v9, 0.0  ;;  %v3744_v28 = vsel %vm335_vm0, %v3700_v17, 0.0 }
 0x23e   :  { %3748 = vadd.xlane.f32.xlu1 %v3747_v23  ;;  %v182_v23 = vld [vmem:[%s17801_s3 + $0x1c8] sm:$0x1f] }
 0x23f   :  { %3715 = vadd.xlane.f32.xlu0 %v3714_v26  ;;  %v622_v26 = vsel %vm532_vm2, %v600_v16, %v621_v25  ;;  %v3702_v32 = vmul.f32 %v11335_v52, %v182_v23 }
 0x241   :  { %v3750_v44 = vsel %vm335_vm0, %v3702_v32, 0.0 }
 0x242   :  { %3754 = vadd.xlane.f32.xlu1 %v3753_v36  ;;  %v624_v36 = vsel %vm623_vm4, %v604_v22, %v622_v26  ;;  %v3706_v26 = vmul.f32 %v11353_v1, %v195_v19  ;;  %v194_v19 = vld [vmem:[%s17801_s3 + $0x228] sm:$0x1f] }
 0x243   :  { %3721 = vadd.xlane.f32.xlu0 %v3720_v38  ;;  %v1729_v38 = vrot.slane %v11780_v51, %v11524_v57 }
 0x247   :  { %3724 = vadd.xlane.f32.xlu0 %v3723_v42  ;;  %v608_v42 = vrot.slane %v11679_v20, %v11524_v57 }
 0x249   :  { %v626_v46 = vsel %vm625_vm5, %v608_v42, %v624_v36  ;;  %v3762_v36 = vsel %vm335_vm0, %v3706_v26, 0.0 }
 0x24a   :  { %v628_v63 = vsel %vm627_vm6, %v612_v47, %v626_v46 }
 0x24b   :  { %3727 = vadd.xlane.f32.xlu0 %v3726_v45  ;;  %v3704_v45 = vmul.f32 %v11335_v52, %v184_v40  ;;  %v630_v9 = vsel %vm629_vm7, %v616_v49, %v628_v63 }
 0x24c   :  { %v632_v16 = vsel %vm631_vm8, %v620_v50, %v630_v9 }
 0x24d   :  { %v3756_v4 = vsel %vm335_vm0, %v3704_v45, 0.0  ;;  %v635_v22 = vsel %vm634_vm9, %v632_v16, -inf }
 0x24f   :  { %3730 = vadd.xlane.f32.xlu0 %v3729_v48  ;;  %v1758_v48 = vsel %vm530_vm1, %v1733_v39, %v1729_v38  ;;  %v208_v39 = vld [vmem:[%s17801_s3 + $0x298] sm:$0x1f] }
 0x250   :  { %v1759_v0 = vsel %vm532_vm2, %v1737_v43, %v1758_v48  ;;  %v3710_v42 = vmul.f32 %v11372_v15, %v208_v39  ;;  %v219_v43 = vld [vmem:[%s17801_s3 + $0x2f0] sm:$0x1f]  ;;  %v196_v39 = vld [vmem:[%s17801_s3 + $0x238] sm:$0x1f] }
 0x251   :  { %v3712_v45 = vmul.f32 %v11389_v29, %v219_v43 }
 0x253   :  { %3733 = vadd.xlane.f32.xlu0 %v3732_v62  ;;  %v1741_v62 = vrot.slane %v11786_v55, %v11524_v57  ;;  %v3780_v46 = vsel %vm335_vm0, %v3712_v45, 0.0 }
 0x255   :  { %v1760_v10 = vsel %vm623_vm4, %v1741_v62, %v1759_v0 }
 0x257   :  { %3736 = vadd.xlane.f32.xlu0 %v3735_v2  ;;  %v1745_v2 = vrot.slane %v11788_v56, %v11524_v57 }
 0x25b   :  { %3739 = vadd.xlane.f32.xlu0 %v3738_v7  ;;  %v1753_v7 = vrot.slane %v11792_v60, %v11524_v57 }
 0x25f   :  { %3742 = vadd.xlane.f32.xlu0 %v3741_v12  ;;  %v1761_v12 = vsel %vm625_vm5, %v1745_v2, %v1760_v10 }
 0x260   :  { %v1762_v17 = vsel %vm627_vm6, %v1749_v5, %v1761_v12 }
 0x261   :  { %v1763_v23 = vsel %vm629_vm7, %v1753_v7, %v1762_v17 }
 0x262   :  { %v1764_v25 = vsel %vm631_vm8, %v1757_v11, %v1763_v23 }
 0x263   :  { %3745 = vadd.xlane.f32.xlu0 %v3744_v28  ;;  %v206_v28 = vld [vmem:[%s17801_s3 + $0x288] sm:$0x1f]  ;;  %v1766_v32 = vsel %vm634_vm9, %v1764_v25, -inf }
 0x264   :  { %v3708_v38 = vmul.f32 %v11372_v15, %v206_v28 }
 0x266   :  { %v3768_v40 = vsel %vm335_vm0, %v3708_v38, 0.0 }
 0x267   :  { %3751 = vadd.xlane.f32.xlu0 %v3750_v44  ;;  %v3774_v44 = vsel %vm335_vm0, %v3710_v42, 0.0 }
 0x26b   :  { %3757 = vadd.xlane.f32.xlu0 %v3756_v4 }
 0x26f   :  { %636 = vmax.xlane.f32.xlu0 %v635_v22 }
 0x273   :  { %1767 = vmax.xlane.f32.xlu0 %v1766_v32 }
 0x277   :  { %3763 = vadd.xlane.f32.xlu0 %v3762_v36  ;;  %v3705_v36 = vmul.f32 %v11353_v1, %v194_v19 }
 0x279   :  { %v3759_v45 = vsel %vm335_vm0, %v3705_v36, 0.0 }
 0x27b   :  { %3769 = vadd.xlane.f32.xlu0 %v3768_v40 }
 0x27f   :  { %3775 = vadd.xlane.f32.xlu0 %v3774_v44 }
 0x283   :  { %3781 = vadd.xlane.f32.xlu0 %v3780_v46  ;;  %v3707_v46 = vmul.f32 %v11353_v1, %v196_v39 }
 0x28f   :  { %v11987_v47 = vpop.xlane.xlu1 %2813 }
 0x290   :  { %v2847_v4 = vrot.slane %v11987_v47, %v11524_v57 }
 0x29b   :  { %v11989_v48 = vpop.xlane.xlu0 %2816 }
 0x29c   :  { %v2851_v63 = vrot.slane %v11989_v48, %v11524_v57 }
 0x29e   :  { %v2876_v10 = vsel %vm530_vm1, %v2851_v63, %v2847_v4  ;;  %v207_v63 = vld [vmem:[%s17801_s3 + $0x290] sm:$0x1f] }
 0x2a7   :  { %v11991_v49 = vpop.xlane.xlu1 %2819 }
 0x2a8   :  { %v2855_v0 = vrot.slane %v11991_v49, %v11524_v57 }
 0x2aa   :  { %v2877_v16 = vsel %vm532_vm2, %v2855_v0, %v2876_v10  ;;  %v3709_v10 = vmul.f32 %v11372_v15, %v207_v63 }
 0x2ac   :  { %v11993_v50 = vpop.xlane.xlu0 %2822  ;;  %v3771_v19 = vsel %vm335_vm0, %v3709_v10, 0.0 }
 0x2ad   :  { %v2859_v5 = vrot.slane %v11993_v50, %v11524_v57 }
 0x2af   :  { %v2878_v17 = vsel %vm623_vm4, %v2859_v5, %v2877_v16 }
 0x2b3   :  { %v11995_v62 = vpop.xlane.xlu1 %2825 }
 0x2b4   :  { %v2863_v9 = vrot.slane %v11995_v62, %v11524_v57 }
 0x2b6   :  { %v2879_v22 = vsel %vm625_vm5, %v2863_v9, %v2878_v17  ;;  %v3765_v9 = vsel %vm335_vm0, %v3707_v46, 0.0 }
 0x2b8   :  { %v12001_v2 = vpop.xlane.xlu0 %2828 }
 0x2b9   :  { %v2867_v11 = vrot.slane %v12001_v2, %v11524_v57 }
 0x2bb   :  { %v2880_v26 = vsel %vm627_vm6, %v2867_v11, %v2879_v22  ;;  %v218_v11 = vld [vmem:[%s17801_s3 + $0x2e8] sm:$0x1f] }
 0x2bc   :  { %v3711_v22 = vmul.f32 %v11389_v29, %v218_v11 }
 0x2be   :  { %v3777_v36 = vsel %vm335_vm0, %v3711_v22, 0.0 }
 0x2bf   :  { %v12007_v7 = vpop.xlane.xlu1 %2831 }
 0x2c0   :  { %v2871_v12 = vrot.slane %v12007_v7, %v11524_v57 }
 0x2c2   :  { %v2881_v32 = vsel %vm629_vm7, %v2871_v12, %v2880_v26 }
 0x2c3   :  { %v3719_v28 = vpop.xlane.xlu1 %3718 }
 0x2c4   :  { %v12022_v23 = vpop.xlane.xlu0 %2834  ;;  %v3817_v43 = vrot.slane %v3719_v28, %v11524_v57 }
 0x2c5   :  { %v2875_v25 = vrot.slane %v12022_v23, %v11524_v57 }
 0x2c7   :  { %v2882_v38 = vsel %vm631_vm8, %v2875_v25, %v2881_v32  ;;  %v220_v25 = vld [vmem:[%s17801_s3 + $0x2f8] sm:$0x1f]  ;;  %v3749_v11 = vpop.xlane.xlu1 %3748 }
 0x2c8   :  { %v3716_v40 = vpop.xlane.xlu0 %3715  ;;  %v2884_v42 = vsel %vm634_vm9, %v2882_v38, -inf  ;;  %v3713_v38 = vmul.f32 %v11389_v29, %v220_v25  ;;  %v3857_v25 = vrot.slane %v3749_v11, %v11524_v57 }
 0x2c9   :  { %v3813_v44 = vrot.slane %v3716_v40, %v11524_v57  ;;  %2885 = vmax.xlane.f32.xlu1 %v2884_v42 }
 0x2cb   :  { %v3906_v4 = vsel %vm530_vm1, %v3817_v43, %v3813_v44  ;;  %v3783_v43 = vsel %vm335_vm0, %v3713_v38, 0.0 }
 0x2cc   :  { %v3722_v0 = vpop.xlane.xlu0 %3721 }
 0x2cd   :  { %v3821_v5 = vrot.slane %v3722_v0, %v11524_v57  ;;  %3760 = vadd.xlane.f32.xlu1 %v3759_v45 }
 0x2cf   :  { %v3907_v16 = vsel %vm532_vm2, %v3821_v5, %v3906_v4 }
 0x2d0   :  { %v3725_v12 = vpop.xlane.xlu0 %3724  ;;  %v3930_v17 = vsel %vm556_vm3, %v3907_v16, 0.0 }
 0x2d1   :  { %3766 = vadd.xlane.f32.xlu1 %v3765_v9  ;;  %3931 = vadd.xlane.f32.xlu0 %v3930_v17  ;;  %v3825_v26 = vrot.slane %v3725_v12, %v11524_v57 }
 0x2d4   :  { %v3728_v28 = vpop.xlane.xlu0 %3727 }
 0x2d5   :  { %v3829_v32 = vrot.slane %v3728_v28, %v11524_v57  ;;  %3772 = vadd.xlane.f32.xlu1 %v3771_v19 }
 0x2d7   :  { %v3908_v40 = vsel %vm530_vm1, %v3829_v32, %v3825_v26  ;;  %v11190_v26 = vmov 0   ;;  %v3755_v32 = vpop.xlane.xlu1 %3754 }
 0x2d8   :  { %v3731_v39 = vpop.xlane.xlu0 %3730  ;;  %10697 = vset.pattern.permute.xlu1 %v11190_v26  ;;  %10696 = vset.pattern.permute.xlu0 %v11190_v26 }
 0x2d9   :  { %v3833_v42 = vrot.slane %v3731_v39, %v11524_v57  ;;  %3778 = vadd.xlane.f32.xlu1 %v3777_v36  ;;  %v3865_v39 = vrot.slane %v3755_v32, %v11524_v57 }
 0x2db   :  { %v3909_v44 = vsel %vm532_vm2, %v3833_v42, %v3908_v40 }
 0x2dc   :  { %v3734_v45 = vpop.xlane.xlu0 %3733  ;;  %v3933_v46 = vsel %vm556_vm3, %v3909_v44, 0.0 }
 0x2dd   :  { %3784 = vadd.xlane.f32.xlu1 %v3783_v43  ;;  %v3837_v63 = vrot.slane %v3734_v45, %v11524_v57 }
 0x2e0   :  { %v3737_v0 = vpop.xlane.xlu0 %3736 }
 0x2e1   :  { %v3841_v4 = vrot.slane %v3737_v0, %v11524_v57  ;;  %3934 = vadd.xlane.f32.xlu1 %v3933_v46 }
 0x2e3   :  { %v3910_v9 = vsel %vm530_vm1, %v3841_v4, %v3837_v63 }
 0x2e4   :  { %v3740_v5 = vpop.xlane.xlu0 %3739 }
 0x2e5   :  { %v3845_v10 = vrot.slane %v3740_v5, %v11524_v57 }
 0x2e7   :  { %v3911_v16 = vsel %vm532_vm2, %v3845_v10, %v3910_v9 }
 0x2e8   :  { %v3743_v12 = vpop.xlane.xlu0 %3742  ;;  %v3936_v17 = vsel %vm556_vm3, %v3911_v16, 0.0 }
 0x2e9   :  { %3937 = vadd.xlane.f32.xlu0 %v3936_v17  ;;  %v3849_v19 = vrot.slane %v3743_v12, %v11524_v57 }
 0x2ec   :  { %v3746_v22 = vpop.xlane.xlu0 %3745 }
 0x2ed   :  { %v3853_v28 = vrot.slane %v3746_v22, %v11524_v57 }
 0x2ef   :  { %v3912_v36 = vsel %vm530_vm1, %v3853_v28, %v3849_v19 }
 0x2f0   :  { %v3752_v38 = vpop.xlane.xlu0 %3751  ;;  %v3913_v40 = vsel %vm532_vm2, %v3857_v25, %v3912_v36 }
 0x2f1   :  { %v3861_v42 = vrot.slane %v3752_v38, %v11524_v57  ;;  %v3939_v43 = vsel %vm556_vm3, %v3913_v40, 0.0 }
 0x2f2   :  { %3940 = vadd.xlane.f32.xlu1 %v3939_v43 }
 0x2f3   :  { %v3914_v45 = vsel %vm530_vm1, %v3865_v39, %v3861_v42 }
 0x2f4   :  { %v3758_v44 = vpop.xlane.xlu0 %3757 }
 0x2f5   :  { %v3869_v46 = vrot.slane %v3758_v44, %v11524_v57 }
 0x2f7   :  { %v3915_v63 = vsel %vm532_vm2, %v3869_v46, %v3914_v45 }
 0x2f8   :  { %v3942_v0 = vsel %vm556_vm3, %v3915_v63, 0.0  ;;  %v12082_v4 = vpop.xlane.xlu0 %636 }
 0x2f9   :  { %3943 = vadd.xlane.f32.xlu0 %v3942_v0 }
 0x2fc   :  { %v12084_v5 = vpop.xlane.xlu0 %1767 }
 0x300   :  { %v3764_v9 = vpop.xlane.xlu0 %3763 }
 0x301   :  { %v3877_v12 = vrot.slane %v3764_v9, %v11524_v57 }
 0x304   :  { %v3770_v11 = vpop.xlane.xlu0 %3769 }
 0x305   :  { %v3885_v28 = vrot.slane %v3770_v11, %v11524_v57 }
 0x308   :  { %v3776_v25 = vpop.xlane.xlu0 %3775 }
 0x309   :  { %v3893_v36 = vrot.slane %v3776_v25, %v11524_v57 }
 0x30c   :  { %v3782_v42 = vpop.xlane.xlu0 %3781 }
 0x30d   :  { %v3901_v63 = vrot.slane %v3782_v42, %v11524_v57 }
 0x352   :  { %v12086_v10 = vpop.xlane.xlu1 %2885 }
 0x356   :  { %v3761_v16 = vpop.xlane.xlu1 %3760 }
 0x357   :  { %v3873_v17 = vrot.slane %v3761_v16, %v11524_v57 }
 0x359   :  { %v3916_v26 = vsel %vm530_vm1, %v3877_v12, %v3873_v17 }
 0x35a   :  { %v3767_v19 = vpop.xlane.xlu1 %3766 }
 0x35b   :  { %v3881_v22 = vrot.slane %v3767_v19, %v11524_v57  ;;  %v12107_v19 = vsub.s32 1, %v11252_v3 }
 0x35d   :  { %v3917_v32 = vsel %vm532_vm2, %v3881_v22, %v3916_v26  ;;  %v12110_v22 = vsub.s32 2, %v11252_v3  ;;  %v646_v25 = vrot.slane %v12082_v4, %v12107_v19  ;;  %v12115_v26 = vsub.s32 3, %v11252_v3 }
 0x35e   :  { %v3773_v38 = vpop.xlane.xlu1 %3772  ;;  %v3945_v39 = vsel %vm556_vm3, %v3917_v32, 0.0 }
 0x35f   :  { %v3889_v40 = vrot.slane %v3773_v38, %v11524_v57  ;;  %3946 = vadd.xlane.f32.xlu1 %v3945_v39  ;;  %17996 = vst [vmem:[#allocation9_spill] sm:$0xff] %v12115_v26  ;;  %vm680_vm10 = vcmp.eq.f32.partialorder %v11674_v18, %v646_v25  ;;  %v654_v38 = vrot.slane %v12082_v4, %v12115_v26 }
 0x360   :  { %v691_v32 = vsel %vm680_vm10, %v11592_v35, 3 }
 0x361   :  { %v3918_v43 = vsel %vm530_vm1, %v3889_v40, %v3885_v28  ;;  %v650_v28 = vrot.slane %v12082_v4, %v12110_v22  ;;  %v12129_v40 = vsub.s32 5, %v11252_v3  ;;  %vm682_vm12 = vcmp.eq.f32.partialorder %v11692_v31, %v654_v38 }
 0x362   :  { %v3779_v44 = vpop.xlane.xlu1 %3778  ;;  %v3919_v45 = vsel %vm532_vm2, %v3893_v36, %v3918_v43  ;;  %v12122_v36 = vsub.s32 4, %v11252_v3  ;;  %v693_v42 = vsel %vm682_vm12, %v11592_v35, 3  ;;  %v12136_v43 = vsub.s32 6, %v11252_v3 }
 0x363   :  { %v3948_v46 = vsel %vm556_vm3, %v3919_v45, 0.0  ;;  %v3897_v0 = vrot.slane %v3779_v44, %v11524_v57  ;;  %vm681_vm11 = vcmp.eq.f32.partialorder %v11690_v30, %v650_v28  ;;  %17998 = vst [vmem:[#allocation11_spill] sm:$0xff] %v12129_v40  ;;  %v662_v30 = vrot.slane %v12082_v4, %v12129_v40 }
 0x364   :  { %3949 = vadd.xlane.f32.xlu0 %v3948_v46  ;;  %17997 = vst [vmem:[#allocation10_spill] sm:$0xff] %v12122_v36  ;;  %v692_v39 = vsel %vm681_vm11, %v11592_v35, 3  ;;  %v658_v18 = vrot.slane %v12082_v4, %v12122_v36  ;;  %17999 = vst [vmem:[#allocation12_spill] sm:$0xff] %v12136_v43  ;;  %v12143_v45 = vsub.s32 7, %v11252_v3  ;;  %v666_v31 = vrot.slane %v12082_v4, %v12136_v43 }
 0x365   :  { %v3920_v16 = vsel %vm530_vm1, %v3901_v63, %v3897_v0  ;;  %vm684_vm14 = vcmp.eq.f32.partialorder %v11683_v24, %v662_v30  ;;  %v1773_v3 = vrot.slane %v12084_v5, %v11262_v8  ;;  %v1781_v0 = vrot.slane %v12084_v5, %v12110_v22 }
 0x366   :  { %v3785_v9 = vpop.xlane.xlu1 %3784  ;;  %vm683_vm13 = vcmp.eq.f32.partialorder %v11679_v20, %v658_v18  ;;  %18000 = vst [vmem:[#allocation13_spill] sm:$0xff] %v12143_v45  ;;  %v695_v46 = vsel %vm684_vm14, %v11592_v35, 3  ;;  %vm685_vm15 = vcmp.eq.f32.partialorder %v11695_v33, %v666_v31  ;;  %v670_v20 = vrot.slane %v12082_v4, %v12143_v45 }
 0x367   :  { %v3905_v11 = vrot.slane %v3785_v9, %v11524_v57  ;;  %v694_v44 = vsel %vm683_vm13, %v11592_v35, 3  ;;  %v696_v63 = vsel %vm685_vm15, %v11592_v35, 3  ;;  %vm1810_vm11 = vcmp.eq.f32.partialorder %v11780_v51, %v1773_v3 }
 0x368   :  { %vm686_vm10 = vcmp.eq.f32.partialorder %v11697_v34, %v670_v20  ;;  %v1818_v33 = vsel %vm1810_vm11, %v11592_v35, 3  ;;  %vm1812_vm12 = vcmp.eq.f32.partialorder %v11784_v54, %v1781_v0  ;;  %v1785_v9 = vrot.slane %v12084_v5, %v12115_v26 }
 0x369   :  { %v3921_v12 = vsel %vm532_vm2, %v3905_v11, %v3920_v16  ;;  %v697_v24 = vsel %vm686_vm10, %v11592_v35, 3  ;;  %v1820_v34 = vsel %vm1812_vm12, %v11592_v35, 3  ;;  %v1793_v11 = vrot.slane %v12084_v5, %v12129_v40 }
 0x36a   :  { %v3951_v17 = vsel %vm556_vm3, %v3921_v12, 0.0  ;;  %vm1813_vm13 = vcmp.eq.f32.partialorder %v11786_v55, %v1785_v9  ;;  %v1801_v16 = vrot.slane %v12084_v5, %v12143_v45  ;;  %v2895_v12 = vrot.slane %v12086_v10, %v12107_v19  ;;  %v12193_v38 = vpop.xlane.xlu1 %3934 }
 0x36b   :  { %3952 = vadd.xlane.f32.xlu1 %v3951_v17  ;;  %v1821_v51 = vsel %vm1813_vm13, %v11592_v35, 3  ;;  %vm1815_vm14 = vcmp.eq.f32.partialorder %v11790_v59, %v1793_v11  ;;  %v2899_v17 = vrot.slane %v12086_v10, %v12110_v22  ;;  %v2907_v25 = vrot.slane %v12086_v10, %v12122_v36 }
 0x36c   :  { %v1823_v54 = vsel %vm1815_vm14, %v11592_v35, 3  ;;  %vm1817_vm15 = vcmp.eq.f32.partialorder %v11794_v61, %v1801_v16  ;;  %vm2929_vm10 = vcmp.eq.f32.partialorder %v11989_v48, %v2895_v12  ;;  %v2915_v28 = vrot.slane %v12086_v10, %v12136_v43 }
 0x36d   :  { %v1825_v55 = vsel %vm1817_vm15, %v11592_v35, 3  ;;  %v2937_v59 = vsel %vm2929_vm10, %v11592_v35, 3  ;;  %vm2930_vm11 = vcmp.eq.f32.partialorder %v11991_v49, %v2899_v17  ;;  %vm2932_vm12 = vcmp.eq.f32.partialorder %v11995_v62, %v2907_v25  ;;  %v12191_v49 = vpop.xlane.xlu0 %3931 }
 0x36e   :  { %v2938_v61 = vsel %vm2930_vm11, %v11592_v35, 3  ;;  %v2940_v48 = vsel %vm2932_vm12, %v11592_v35, 3  ;;  %vm2934_vm13 = vcmp.eq.f32.partialorder %v12007_v7, %v2915_v28  ;;  %v3965_v62 = vrot.slane %v12191_v49, %v11524_v57 }
 0x36f   :  { %v3969_v18 = vrot.slane %v12193_v38, %v11524_v57  ;;  %v1777_v17 = vrot.slane %v12084_v5, %v12107_v19  ;;  %v1789_v25 = vrot.slane %v12084_v5, %v12122_v36  ;;  %v2891_v28 = vrot.slane %v12086_v10, %v11262_v8 }
 0x371   :  { %v3994_v7 = vsel %vm530_vm1, %v3969_v18, %v3965_v62  ;;  %vm1811_vm15 = vcmp.eq.f32.partialorder %v11782_v53, %v1777_v17  ;;  %vm1814_vm10 = vcmp.eq.f32.partialorder %v11788_v56, %v1789_v25  ;;  %vm2928_vm12 = vcmp.eq.f32.partialorder %v11987_v47, %v2891_v28  ;;  %v10502_v25 = vld [vmem:[%s17802_s4 + $0x300] sm:$0x1f] }
 0x372   :  { %v2936_v56 = vsel %vm2928_vm12, %v11592_v35, 3 }
 0x37b   :  { %v12203_v30 = vpop.xlane.xlu1 %3940 }
 0x37c   :  { %702 = vperm.xlu1 %10697, %v691_v32   ;;  %v2942_v32 = vsel %vm2934_vm13, %v11592_v35, 3  ;;  %v3977_v31 = vrot.slane %v12203_v30, %v11524_v57 }
 0x380   :  { %705 = vperm.xlu1 %10697, %v692_v39   ;;  %v12195_v39 = vpop.xlane.xlu0 %3937 }
 0x384   :  { %708 = vperm.xlu1 %10697, %v693_v42   ;;  %v3973_v42 = vrot.slane %v12195_v39, %v11524_v57 }
 0x388   :  { %711 = vperm.xlu1 %10697, %v694_v44   ;;  %v12206_v44 = vpop.xlane.xlu0 %3943 }
 0x389   :  { %v3981_v3 = vrot.slane %v12206_v44, %v11524_v57 }
 0x38c   :  { %714 = vperm.xlu1 %10697, %v695_v46   ;;  %v3995_v46 = vsel %vm532_vm2, %v3973_v42, %v3994_v7 }
 0x390   :  { %717 = vperm.xlu1 %10697, %v696_v63  }
 0x394   :  { %720 = vperm.xlu1 %10697, %v697_v24   ;;  %v3996_v24 = vsel %vm623_vm4, %v3977_v31, %v3995_v46 }
 0x395   :  { %v3997_v9 = vsel %vm625_vm5, %v3981_v3, %v3996_v24 }
 0x398   :  { %1827 = vperm.xlu1 %10697, %v1818_v33  }
 0x39c   :  { %1833 = vperm.xlu1 %10697, %v1820_v34  }
 0x3a0   :  { %1836 = vperm.xlu1 %10697, %v1821_v51  }
 0x3a4   :  { %1842 = vperm.xlu1 %10697, %v1823_v54  }
 0x3a8   :  { %1848 = vperm.xlu1 %10697, %v1825_v55   ;;  %v642_v55 = vrot.slane %v12082_v4, %v11262_v8  ;;  %v1797_v4 = vrot.slane %v12084_v5, %v12136_v43  ;;  %v2911_v5 = vrot.slane %v12086_v10, %v12129_v40 }
 0x3aa   :  { %vm679_vm14 = vcmp.eq.f32.partialorder %v11670_v13, %v642_v55  ;;  %v1822_v13 = vsel %vm1814_vm10, %v11592_v35, 3  ;;  %vm1816_vm11 = vcmp.eq.f32.partialorder %v11792_v60, %v1797_v4 }
 0x3ab   :  { %v1824_v53 = vsel %vm1816_vm11, %v11592_v35, 3 }
 0x3ac   :  { %2948 = vperm.xlu1 %10697, %v2937_v59   ;;  %v690_v59 = vsel %vm679_vm14, %v11592_v35, 3  ;;  %vm2933_vm14 = vcmp.eq.f32.partialorder %v12001_v2, %v2911_v5 }
 0x3ad   :  { %v2941_v47 = vsel %vm2933_vm14, %v11592_v35, 3 }
 0x3b0   :  { %2951 = vperm.xlu1 %10697, %v2938_v61   ;;  %v1819_v61 = vsel %vm1811_vm15, %v11592_v35, 3 }
 0x3b4   :  { %2957 = vperm.xlu1 %10697, %v2940_v48   ;;  %v2903_v48 = vrot.slane %v12086_v10, %v12115_v26 }
 0x3b6   :  { %vm2931_vm13 = vcmp.eq.f32.partialorder %v11993_v50, %v2903_v48 }
 0x3b7   :  { %v2939_v60 = vsel %vm2931_vm13, %v11592_v35, 3 }
 0x3b8   :  { %2963 = vperm.xlu1 %10697, %v2942_v32   ;;  %v2919_v32 = vrot.slane %v12086_v10, %v12143_v45 }
 0x3ba   :  { %vm2935_vm15 = vcmp.eq.f32.partialorder %v12022_v23, %v2919_v32 }
 0x3bb   :  { %v2943_v62 = vsel %vm2935_vm15, %v11592_v35, 3 }
 0x3e8   :  { %v12211_v20 = vpop.xlane.xlu1 %3946 }
 0x3e9   :  { %v3985_v0 = vrot.slane %v12211_v20, %v11524_v57 }
 0x3eb   :  { %v3998_v51 = vsel %vm627_vm6, %v3985_v0, %v3997_v9 }
 0x3ed   :  { %v12213_v63 = vpop.xlane.xlu0 %3949 }
 0x3ee   :  { %v3989_v33 = vrot.slane %v12213_v63, %v11524_v57 }
 0x3f0   :  { %v3999_v16 = vsel %vm629_vm7, %v3989_v33, %v3998_v51 }
 0x3f4   :  { %v12223_v34 = vpop.xlane.xlu1 %3952 }
 0x3f5   :  { %v3993_v11 = vrot.slane %v12223_v34, %v11524_v57 }
 0x3f7   :  { %v4000_v54 = vsel %vm631_vm8, %v3993_v11, %v3999_v16 }
 0x3f8   :  { %v4002_v12 = vsel %vm634_vm9, %v4000_v54, -inf  ;;  %v12263_v50 = vpop.permute.xlu1 %702  ;;  %v12302_v54 = vld [vmem:[%s17800_s2 + $0x8] sm:$0xff] }
 0x3f9   :  { %4003 = vmax.xlane.f32.xlu0 %v4002_v12 }
 0x3fc   :  { %v12265_v18 = vpop.permute.xlu1 %705 }
 0x400   :  { %v12267_v7 = vpop.permute.xlu1 %708 }
 0x404   :  { %v12281_v33 = vpop.permute.xlu1 %711 }
 0x408   :  { %v12290_v11 = vpop.permute.xlu1 %714 }
 0x40f   :  { %699 = vperm.xlu0 %10696, %v690_v59  }
 0x413   :  { %1830 = vperm.xlu0 %10696, %v1819_v61  }
 0x417   :  { %1839 = vperm.xlu0 %10696, %v1822_v13  }
 0x41b   :  { %1845 = vperm.xlu0 %10696, %v1824_v53   ;;  %v10504_v53 = vld [vmem:[%s17802_s4 + $0x310] sm:$0x1f] }
 0x41f   :  { %2945 = vperm.xlu0 %10696, %v2936_v56  }
 0x423   :  { %2954 = vperm.xlu0 %10696, %v2939_v60  }
 0x427   :  { %2960 = vperm.xlu0 %10696, %v2941_v47   ;;  %v10526_v47 = vld [vmem:[%s17802_s4 + $0x3c0] sm:$0x1f] }
 0x42b   :  { %2966 = vperm.xlu0 %10696, %v2943_v62  }
 0x482   :  { %v4004_v42 = vpop.xlane.xlu0 %4003 }
 0x483   :  { %v4013_v2 = vrot.slane %v4004_v42, %v12107_v19  ;;  %v4009_v31 = vrot.slane %v4004_v42, %v11262_v8  ;;  %v4025_v10 = vrot.slane %v4004_v42, %v12122_v36  ;;  %v4017_v46 = vrot.slane %v4004_v42, %v12110_v22 }
 0x484   :  { %v4033_v24 = vrot.slane %v4004_v42, %v12136_v43  ;;  %v4021_v0 = vrot.slane %v4004_v42, %v12115_v26  ;;  %v4029_v9 = vrot.slane %v4004_v42, %v12129_v40  ;;  %v4037_v51 = vrot.slane %v4004_v42, %v12143_v45 }
 0x485   :  { %vm4047_vm10 = vcmp.eq.f32.partialorder %v12193_v38, %v4013_v2  ;;  %vm4046_vm11 = vcmp.eq.f32.partialorder %v12191_v49, %v4009_v31  ;;  %vm4050_vm12 = vcmp.eq.f32.partialorder %v12206_v44, %v4025_v10  ;;  %vm4048_vm13 = vcmp.eq.f32.partialorder %v12195_v39, %v4017_v46 }
 0x486   :  { %v4055_v23 = vsel %vm4047_vm10, %v11592_v35, 3  ;;  %v4054_v3 = vsel %vm4046_vm11, %v11592_v35, 3  ;;  %v4058_v38 = vsel %vm4050_vm12, %v11592_v35, 3  ;;  %v4056_v49 = vsel %vm4048_vm13, %v11592_v35, 3 }
 0x487   :  { %4066 = vperm.xlu0 %10696, %v4055_v23   ;;  %4063 = vperm.xlu1 %10697, %v4054_v3   ;;  %vm4052_vm14 = vcmp.eq.f32.partialorder %v12213_v63, %v4033_v24  ;;  %vm4049_vm15 = vcmp.eq.f32.partialorder %v12203_v30, %v4021_v0  ;;  %vm4051_vm10 = vcmp.eq.f32.partialorder %v12211_v20, %v4029_v9  ;;  %v12296_v30 = vpop.permute.xlu1 %717  ;;  %v10507_v3 = vld [vmem:[%s17802_s4 + $0x328] sm:$0x1f] }
 0x488   :  { %v4060_v44 = vsel %vm4052_vm14, %v11592_v35, 3  ;;  %v4057_v39 = vsel %vm4049_vm15, %v11592_v35, 3  ;;  %v4059_v16 = vsel %vm4051_vm10, %v11592_v35, 3  ;;  %vm4053_vm11 = vcmp.eq.f32.partialorder %v12223_v34, %v4037_v51 }
 0x489   :  { %v4061_v63 = vsel %vm4053_vm11, %v11592_v35, 3  ;;  %v4933_v20 = vrot.slane %v12302_v54, %v11258_v6 }
 0x48a   :  { %v12309_v59 = vpop.permute.xlu0 %699 }
 0x48b   :  { %4075 = vperm.xlu0 %10696, %v4058_v38   ;;  %4069 = vperm.xlu1 %10697, %v4056_v49   ;;  %v12304_v12 = vpop.permute.xlu1 %720  ;;  %v4949_v55 = vrot.slane %v4933_v20, %v11258_v6  ;;  %v4941_v62 = vcombine.high %v4933_v20, %v4933_v20  ;;  %v10503_v38 = vld [vmem:[%s17802_s4 + $0x308] sm:$0x1f] }
 0x48d   :  { %v12312_v34 = vrot.slane %v4949_v55, %v11262_v8  ;;  %v4971_v28 = vcombine.high %v4949_v55, %v4949_v55  ;;  %v4963_v24 = vrot.slane %v4941_v62, %v11258_v6  ;;  %v10529_v55 = vld [vmem:[%s17802_s4 + $0x3d8] sm:$0x1f]  ;;  %v10515_v62 = vld [vmem:[%s17802_s4 + $0x368] sm:$0x1f] }
 0x48e   :  { %v1831_v4 = vpop.permute.xlu0 %1830 }
 0x48f   :  { %4081 = vperm.xlu0 %10696, %v4060_v44   ;;  %4072 = vperm.xlu1 %10697, %v4057_v39   ;;  %v1828_v17 = vpop.permute.xlu1 %1827  ;;  %18001 = vst [vmem:[#allocation14_spill] sm:$0xff] %v12312_v34  ;;  %v5015_v13 = vmul.f32 %v10502_v25, %v12312_v34  ;;  %v1857_v48 = vrot.slane %v1831_v4, %v11524_v57  ;;  %v10514_v25 = vld [vmem:[%s17802_s4 + $0x360] sm:$0x1f] }
 0x490   :  { %v5017_v5 = vmul.f32 %v10504_v53, %v12312_v34  ;;  %v12325_v60 = vrot.slane %v4971_v28, %v11262_v8  ;;  %v1853_v32 = vrot.slane %v1828_v17, %v11524_v57  ;;  %v6134_v9 = vmul.f32 %v10507_v3, %v12312_v34 }
 0x491   :  { %v5039_v56 = vsel %vm335_vm0, %v5015_v13, 0.0  ;;  %v5016_v20 = vmul.f32 %v10503_v38, %v12312_v34  ;;  %v12353_v17 = vrot.slane %v4963_v24, %v11262_v8  ;;  %v4973_v53 = vcombine.high %v4963_v24, %v4963_v24  ;;  %v10505_v38 = vld [vmem:[%s17802_s4 + $0x318] sm:$0x1f] }
 0x492   :  { %18002 = vst [vmem:[#allocation15_spill] sm:$0xff] %v12325_v60  ;;  %v1882_v2 = vsel %vm530_vm1, %v1857_v48, %v1853_v32  ;;  %v1840_v31 = vpop.permute.xlu0 %1839  ;;  %v5045_v46 = vsel %vm335_vm0, %v5017_v5, 0.0  ;;  %v5021_v23 = vmul.f32 %v10526_v47, %v12325_v60  ;;  %v6138_v28 = vmul.f32 %v10529_v55, %v12325_v60  ;;  %v10528_v32 = vld [vmem:[%s17802_s4 + $0x3d0] sm:$0x1f] }
 0x493   :  { %4078 = vperm.xlu1 %10697, %v4059_v16   ;;  %v1834_v61 = vpop.permute.xlu1 %1833  ;;  %v1869_v39 = vrot.slane %v1840_v31, %v11524_v57  ;;  %18003 = vst [vmem:[#allocation16_spill] sm:$0xff] %v12353_v17  ;;  %v5018_v5 = vmul.f32 %v10514_v25, %v12353_v17  ;;  %v5019_v24 = vmul.f32 %v10515_v62, %v12353_v17 }
 0x494   :  { %v1861_v10 = vrot.slane %v1834_v61, %v11524_v57  ;;  %v5057_v51 = vsel %vm335_vm0, %v5021_v23, 0.0  ;;  %v6162_v61 = vsel %vm335_vm0, %v6134_v9, 0.0  ;;  %v6174_v31 = vsel %vm335_vm0, %v6138_v28, 0.0 }
 0x495   :  { %v5048_v3 = vsel %vm335_vm0, %v5018_v5, 0.0  ;;  %v10508_v5 = vld [vmem:[%s17802_s4 + $0x330] sm:$0x1f]  ;;  %v4926_v62 = vcombine.high %v12302_v54, %v12302_v54 }
 0x496   :  { %v1883_v0 = vsel %vm532_vm2, %v1861_v10, %v1882_v2  ;;  %v5023_v10 = vmul.f32 %v10528_v32, %v12325_v60  ;;  %v725_v32 = vrot.slane %v12309_v59, %v11524_v57  ;;  %v10520_v54 = vld [vmem:[%s17802_s4 + $0x390] sm:$0x1f] }
 0x497   :  { %4084 = vperm.xlu1 %10697, %v4061_v63   ;;  %v1837_v42 = vpop.permute.xlu1 %1836  ;;  %v1846_v63 = vpop.permute.xlu0 %1845 }
 0x498   :  { %v1865_v49 = vrot.slane %v1837_v42, %v11524_v57  ;;  %v1877_v13 = vrot.slane %v1846_v63, %v11524_v57  ;;  %v5063_v9 = vsel %vm335_vm0, %v5023_v10, 0.0  ;;  %v10506_v63 = vld [vmem:[%s17802_s4 + $0x320] sm:$0x1f] }
 0x49a   :  { %v1884_v16 = vsel %vm623_vm4, %v1865_v49, %v1883_v0  ;;  %v10539_v0 = vld [vmem:[%s17802_s4 + $0x428] sm:$0x1f] }
 0x49b   :  { %v1843_v44 = vpop.permute.xlu1 %1842  ;;  %v1885_v4 = vsel %vm625_vm5, %v1869_v39, %v1884_v16  ;;  %v5051_v39 = vsel %vm335_vm0, %v5019_v24, 0.0 }
 0x49c   :  { %v1873_v48 = vrot.slane %v1843_v44, %v11524_v57 }
 0x49e   :  { %v1886_v42 = vsel %vm627_vm6, %v1873_v48, %v1885_v4  ;;  %v10541_v4 = vld [vmem:[%s17802_s4 + $0x438] sm:$0x1f] }
 0x49f   :  { %v1849_v47 = vpop.permute.xlu1 %1848  ;;  %v1887_v2 = vsel %vm629_vm7, %v1877_v13, %v1886_v42  ;;  %v10517_v13 = vld [vmem:[%s17802_s4 + $0x378] sm:$0x1f]  ;;  %v2946_v42 = vpop.permute.xlu0 %2945 }
 0x4a0   :  { %v1881_v23 = vrot.slane %v1849_v47, %v11524_v57  ;;  %v10518_v47 = vld [vmem:[%s17802_s4 + $0x380] sm:$0x1f] }
 0x4a2   :  { %v1888_v49 = vsel %vm631_vm8, %v1881_v23, %v1887_v2  ;;  %v729_v2 = vrot.slane %v12263_v50, %v11524_v57  ;;  %v7249_v23 = vmul.f32 %v10508_v5, %v12312_v34  ;;  %v10516_v50 = vld [vmem:[%s17802_s4 + $0x370] sm:$0x1f] }
 0x4a3   :  { %v12393_v16 = vsel %vm634_vm9, %v1888_v49, 2147483647 }
 0x4a4   :  { %v1891_v25 = vshra.s32 %v12393_v16, 16  ;;  %v754_v24 = vsel %vm530_vm1, %v729_v2, %v725_v32  ;;  %v7273_v49 = vsel %vm335_vm0, %v7249_v23, 0.0  ;;  %v10551_v32 = vld [vmem:[%s17802_s4 + $0x488] sm:$0x1f] }
 0x4ae   :  { %5040 = vadd.xlane.f32.xlu0 %v5039_v56  ;;  %v5042_v56 = vsel %vm335_vm0, %v5016_v20, 0.0 }
 0x4b2   :  { %5046 = vadd.xlane.f32.xlu0 %v5045_v46  ;;  %v12376_v46 = vrot.slane %v4973_v53, %v11262_v8  ;;  %v12409_v53 = vcvt.s32.f32 %v1891_v25  ;;  %v10527_v25 = vld [vmem:[%s17802_s4 + $0x3c8] sm:$0x1f] }
 0x4b3   :  { %v5022_v5 = vmul.f32 %v10527_v25, %v12325_v60 }
 0x4b4   :  { %18004 = vst [vmem:[#allocation17_spill] sm:$0xff] %v12376_v46  ;;  %v5025_v44 = vmul.f32 %v10539_v0, %v12376_v46  ;;  %v6141_v28 = vmul.f32 %v10541_v4, %v12376_v46  ;;  %v12438_v0 = vrot.slane %v4926_v62, %v11258_v6  ;;  %v10519_v62 = vld [vmem:[%s17802_s4 + $0x388] sm:$0x1f] }
 0x4b6   :  { %5058 = vadd.xlane.f32.xlu0 %v5057_v51  ;;  %v6132_v51 = vmul.f32 %v10505_v38, %v12312_v34  ;;  %v5069_v20 = vsel %vm335_vm0, %v5025_v44, 0.0  ;;  %v6183_v10 = vsel %vm335_vm0, %v6141_v28, 0.0  ;;  %v733_v38 = vrot.slane %v12265_v18, %v11524_v57 }
 0x4b7   :  { %v737_v18 = vrot.slane %v12267_v7, %v11524_v57  ;;  %v741_v7 = vrot.slane %v12281_v33, %v11524_v57  ;;  %v745_v33 = vrot.slane %v12290_v11, %v11524_v57  ;;  %v6137_v11 = vmul.f32 %v10519_v62, %v12353_v17 }
 0x4b8   :  { %v6156_v55 = vsel %vm335_vm0, %v6132_v51, 0.0  ;;  %v755_v44 = vsel %vm532_vm2, %v733_v38, %v754_v24  ;;  %v10530_v38 = vld [vmem:[%s17802_s4 + $0x3e0] sm:$0x1f] }
 0x4b9   :  { %v756_v4 = vsel %vm623_vm4, %v737_v18, %v755_v44  ;;  %v6139_v25 = vmul.f32 %v10530_v38, %v12325_v60 }
 0x4ba   :  { %6163 = vadd.xlane.f32.xlu0 %v6162_v61  ;;  %v6133_v61 = vmul.f32 %v10506_v63, %v12312_v34  ;;  %v5020_v63 = vmul.f32 %v10516_v50, %v12353_v17  ;;  %v757_v2 = vsel %vm625_vm5, %v741_v7, %v756_v4  ;;  %v5060_v50 = vsel %vm335_vm0, %v5022_v5, 0.0 }
 0x4bb   :  { %5043 = vadd.xlane.f32.xlu1 %v5042_v56  ;;  %v6135_v56 = vmul.f32 %v10517_v13, %v12353_v17  ;;  %v2971_v13 = vrot.slane %v2946_v42, %v11524_v57 }
 0x4bc   :  { %v6159_v48 = vsel %vm335_vm0, %v6133_v61, 0.0  ;;  %v12457_v61 = vrot.slane %v12438_v0, %v11258_v6 }
 0x4bd   :  { %v6165_v59 = vsel %vm335_vm0, %v6135_v56, 0.0  ;;  %v5054_v56 = vsel %vm335_vm0, %v5020_v63, 0.0 }
 0x4be   :  { %6175 = vadd.xlane.f32.xlu0 %v6174_v31  ;;  %v2949_v31 = vpop.permute.xlu1 %2948  ;;  %v12476_v42 = vrot.slane %v12457_v61, %v11262_v8 }
 0x4bf   :  { %5049 = vadd.xlane.f32.xlu1 %v5048_v3  ;;  %v6136_v3 = vmul.f32 %v10518_v47, %v12353_v17  ;;  %v2975_v47 = vrot.slane %v2949_v31, %v11524_v57 }
 0x4c0   :  { %18005 = vst [vmem:[#allocation18_spill] sm:$0xff] %v12476_v42 }
 0x4c1   :  { %v6168_v51 = vsel %vm335_vm0, %v6136_v3, 0.0 }
 0x4c2   :  { %5064 = vadd.xlane.f32.xlu0 %v5063_v9  ;;  %v7252_v9 = vmul.f32 %v10520_v54, %v12353_v17  ;;  %v5028_v54 = vmul.f32 %v10551_v32, %v12476_v42 }
 0x4c3   :  { %5052 = vadd.xlane.f32.xlu1 %v5051_v39  ;;  %v2955_v39 = vpop.permute.xlu0 %2954 }
 0x4c4   :  { %v7282_v28 = vsel %vm335_vm0, %v7252_v9, 0.0  ;;  %v2983_v31 = vrot.slane %v2955_v39, %v11524_v57  ;;  %v749_v9 = vrot.slane %v12296_v30, %v11524_v57  ;;  %v5078_v63 = vsel %vm335_vm0, %v5028_v54, 0.0  ;;  %v10531_v54 = vld [vmem:[%s17802_s4 + $0x3e8] sm:$0x1f] }
 0x4c5   :  { %v753_v30 = vrot.slane %v12304_v12, %v11524_v57 }
 0x4c6   :  { %5070 = vadd.xlane.f32.xlu0 %v5069_v20  ;;  %v10540_v20 = vld [vmem:[%s17802_s4 + $0x430] sm:$0x1f] }
 0x4c7   :  { %6157 = vadd.xlane.f32.xlu1 %v6156_v55  ;;  %v2952_v55 = vpop.permute.xlu1 %2951 }
 0x4c8   :  { %v2979_v24 = vrot.slane %v2952_v55, %v11524_v57  ;;  %v6171_v55 = vsel %vm335_vm0, %v6137_v11, 0.0  ;;  %v10542_v11 = vld [vmem:[%s17802_s4 + $0x440] sm:$0x1f] }
 0x4ca   :  { %1894 = vmin.xlane.f32.xlu0 %v12409_v53 }
 0x4cb   :  { %6160 = vadd.xlane.f32.xlu1 %v6159_v48  ;;  %v5026_v48 = vmul.f32 %v10540_v20, %v12376_v46  ;;  %v2958_v23 = vpop.permute.xlu1 %2957 }
 0x4cc   :  { %v2987_v20 = vrot.slane %v2958_v23, %v11524_v57 }
 0x4cd   :  { %v5072_v3 = vsel %vm335_vm0, %v5026_v48, 0.0 }
 0x4ce   :  { %6184 = vadd.xlane.f32.xlu0 %v6183_v10  ;;  %v2961_v10 = vpop.permute.xlu0 %2960 }
 0x4cf   :  { %6166 = vadd.xlane.f32.xlu1 %v6165_v59  ;;  %v3000_v59 = vsel %vm530_vm1, %v2975_v47, %v2971_v13  ;;  %v2964_v13 = vpop.permute.xlu1 %2963  ;;  %v6177_v47 = vsel %vm335_vm0, %v6139_v25, 0.0 }
 0x4d0   :  { %v3001_v44 = vsel %vm532_vm2, %v2979_v24, %v3000_v59  ;;  %v2995_v32 = vrot.slane %v2964_v13, %v11524_v57  ;;  %v6140_v24 = vmul.f32 %v10531_v54, %v12325_v60 }
 0x4d1   :  { %v3002_v39 = vsel %vm623_vm4, %v2983_v31, %v3001_v44 }
 0x4d2   :  { %7274 = vadd.xlane.f32.xlu0 %v7273_v49  ;;  %v758_v49 = vsel %vm627_vm6, %v745_v33, %v757_v2  ;;  %v2967_v18 = vpop.permute.xlu0 %2966  ;;  %v3003_v48 = vsel %vm625_vm5, %v2987_v20, %v3002_v39  ;;  %v6180_v38 = vsel %vm335_vm0, %v6140_v24, 0.0  ;;  %v10533_v24 = vld [vmem:[%s17802_s4 + $0x3f8] sm:$0x1f] }
 0x4d3   :  { %6169 = vadd.xlane.f32.xlu1 %v6168_v51  ;;  %v2991_v51 = vrot.slane %v2961_v10, %v11524_v57  ;;  %v759_v4 = vsel %vm629_vm7, %v749_v9, %v758_v49  ;;  %v6142_v49 = vmul.f32 %v10542_v11, %v12376_v46  ;;  %v10509_v9 = vld [vmem:[%s17802_s4 + $0x338] sm:$0x1f] }
 0x4d4   :  { %v760_v5 = vsel %vm631_vm8, %v753_v30, %v759_v4  ;;  %v7250_v39 = vmul.f32 %v10509_v9, %v12312_v34  ;;  %v10543_v4 = vld [vmem:[%s17802_s4 + $0x448] sm:$0x1f] }
 0x4d5   :  { %v3004_v7 = vsel %vm627_vm6, %v2991_v51, %v3003_v48  ;;  %v12516_v33 = vsel %vm634_vm9, %v760_v5, 2147483647  ;;  %v6186_v44 = vsel %vm335_vm0, %v6142_v49, 0.0  ;;  %v10521_v51 = vld [vmem:[%s17802_s4 + $0x398] sm:$0x1f]  ;;  %v6143_v13 = vmul.f32 %v10543_v4, %v12376_v46 }
 0x4d6   :  { %7283 = vadd.xlane.f32.xlu0 %v7282_v28  ;;  %v10538_v28 = vld [vmem:[%s17802_s4 + $0x420] sm:$0x1f]  ;;  %v3005_v62 = vsel %vm629_vm7, %v2995_v32, %v3004_v7  ;;  %v763_v23 = vshra.s32 %v12516_v33, 16  ;;  %v7253_v20 = vmul.f32 %v10521_v51, %v12353_v17  ;;  %v4942_v32 = vcombine.high %v12438_v0, %v12438_v0 }
 0x4d7   :  { %5055 = vadd.xlane.f32.xlu1 %v5054_v56  ;;  %v2999_v56 = vrot.slane %v2967_v18, %v11524_v57  ;;  %v5024_v12 = vmul.f32 %v10538_v28, %v12376_v46  ;;  %v10550_v18 = vld [vmem:[%s17802_s4 + $0x480] sm:$0x1f] }
 0x4d8   :  { %v12524_v31 = vcvt.s32.f32 %v763_v23  ;;  %v5027_v25 = vmul.f32 %v10550_v18, %v12476_v42  ;;  %v10554_v28 = vld [vmem:[%s17802_s4 + $0x4a0] sm:$0x1f]  ;;  %v12576_v54 = vrot.slane %v4942_v32, %v11258_v6 }
 0x4d9   :  { %v3006_v2 = vsel %vm631_vm8, %v2999_v56, %v3005_v62  ;;  %v5066_v10 = vsel %vm335_vm0, %v5024_v12, 0.0  ;;  %v6189_v56 = vsel %vm335_vm0, %v6143_v13, 0.0  ;;  %v6145_v5 = vmul.f32 %v10554_v28, %v12476_v42 }
 0x4da   :  { %5073 = vadd.xlane.f32.xlu0 %v5072_v3  ;;  %v12522_v59 = vsel %vm634_vm9, %v3006_v2, 2147483647  ;;  %v5075_v30 = vsel %vm335_vm0, %v5027_v25, 0.0  ;;  %v12588_v6 = vrot.slane %v12576_v54, %v11262_v8 }
 0x4db   :  { %5061 = vadd.xlane.f32.xlu1 %v5060_v50  ;;  %v3009_v3 = vshra.s32 %v12522_v59, 16  ;;  %v6195_v23 = vsel %vm335_vm0, %v6145_v5, 0.0 }
 0x4dc   :  { %18006 = vst [vmem:[#allocation19_spill] sm:$0xff] %v12588_v6 }
 0x4dd   :  { %v12532_v50 = vcvt.s32.f32 %v3009_v3 }
 0x4de   :  { %5079 = vadd.xlane.f32.xlu0 %v5078_v63  ;;  %v7276_v63 = vsel %vm335_vm0, %v7250_v39, 0.0  ;;  %v7256_v39 = vmul.f32 %v10533_v24, %v12325_v60 }
 0x4df   :  { %6172 = vadd.xlane.f32.xlu1 %v6171_v55  ;;  %v7285_v55 = vsel %vm335_vm0, %v7253_v20, 0.0 }
 0x4e3   :  { %6178 = vadd.xlane.f32.xlu1 %v6177_v47  ;;  %v10522_v47 = vld [vmem:[%s17802_s4 + $0x3a0] sm:$0x1f] }
 0x4e4   :  { %v7254_v3 = vmul.f32 %v10522_v47, %v12353_v17 }
 0x4e7   :  { %5067 = vadd.xlane.f32.xlu1 %v5066_v10 }
 0x4eb   :  { %766 = vmin.xlane.f32.xlu1 %v12524_v31 }
 0x4ef   :  { %3012 = vmin.xlane.f32.xlu1 %v12532_v50 }
 0x4f3   :  { %6181 = vadd.xlane.f32.xlu1 %v6180_v38 }
 0x4f7   :  { %6187 = vadd.xlane.f32.xlu1 %v6186_v44  ;;  %v7288_v44 = vsel %vm335_vm0, %v7254_v3, 0.0  ;;  %v10510_v3 = vld [vmem:[%s17802_s4 + $0x340] sm:$0x1f] }
 0x4f8   :  { %v7251_v24 = vmul.f32 %v10510_v3, %v12312_v34 }
 0x4fb   :  { %7277 = vadd.xlane.f32.xlu1 %v7276_v63  ;;  %v10562_v63 = vld [vmem:[%s17802_s4 + $0x4e0] sm:$0x1f] }
 0x4fc   :  { %v5030_v13 = vmul.f32 %v10562_v63, %v12588_v6 }
 0x4fe   :  { %v5084_v32 = vsel %vm335_vm0, %v5030_v13, 0.0 }
 0x4ff   :  { %7286 = vadd.xlane.f32.xlu1 %v7285_v55 }
 0x502   :  { %v4064_v48 = vpop.permute.xlu1 %4063  ;;  %v4067_v7 = vpop.permute.xlu0 %4066 }
 0x503   :  { %5076 = vadd.xlane.f32.xlu1 %v5075_v30  ;;  %v4093_v62 = vrot.slane %v4067_v7, %v11524_v57  ;;  %v4089_v2 = vrot.slane %v4064_v48, %v11524_v57  ;;  %v7294_v30 = vsel %vm335_vm0, %v7256_v39, 0.0 }
 0x505   :  { %v4118_v38 = vsel %vm530_vm1, %v4093_v62, %v4089_v2 }
 0x506   :  { %v4070_v12 = vpop.permute.xlu1 %4069  ;;  %v4076_v0 = vpop.permute.xlu0 %4075 }
 0x507   :  { %6190 = vadd.xlane.f32.xlu1 %v6189_v56  ;;  %v4097_v10 = vrot.slane %v4070_v12, %v11524_v57  ;;  %v4105_v20 = vrot.slane %v4076_v0, %v11524_v57  ;;  %v10553_v12 = vld [vmem:[%s17802_s4 + $0x498] sm:$0x1f] }
 0x509   :  { %v4119_v9 = vsel %vm532_vm2, %v4097_v10, %v4118_v38  ;;  %v6144_v10 = vmul.f32 %v10553_v12, %v12476_v42  ;;  %v7279_v38 = vsel %vm335_vm0, %v7251_v24, 0.0 }
 0x50a   :  { %v4073_v11 = vpop.permute.xlu1 %4072  ;;  %v4082_v55 = vpop.permute.xlu0 %4081 }
 0x50b   :  { %v4101_v49 = vrot.slane %v4073_v11, %v11524_v57  ;;  %6196 = vadd.xlane.f32.xlu1 %v6195_v23  ;;  %v4113_v48 = vrot.slane %v4082_v55, %v11524_v57  ;;  %v6192_v0 = vsel %vm335_vm0, %v6144_v10, 0.0  ;;  %v10532_v11 = vld [vmem:[%s17802_s4 + $0x3f0] sm:$0x1f]  ;;  %v17809_v55 = vmov 0.0  }
 0x50c   :  { %9614 = vmatprep.mubr.f32.mxu0 %v17809_v55 }
 0x50d   :  { %v4120_v51 = vsel %vm623_vm4, %v4101_v49, %v4119_v9  ;;  %v7255_v49 = vmul.f32 %v10532_v11, %v12325_v60  ;;  %v10552_v9 = vld [vmem:[%s17802_s4 + $0x490] sm:$0x1f] }
 0x50e   :  { %v4079_v18 = vpop.permute.xlu1 %4078  ;;  %v4121_v4 = vsel %vm625_vm5, %v4105_v20, %v4120_v51  ;;  %v5029_v39 = vmul.f32 %v10552_v9, %v12476_v42  ;;  %v10563_v51 = vld [vmem:[%s17802_s4 + $0x4e8] sm:$0x1f] }
 0x50f   :  { %v4109_v25 = vrot.slane %v4079_v18, %v11524_v57  ;;  %7289 = vadd.xlane.f32.xlu1 %v7288_v44  ;;  %v7291_v44 = vsel %vm335_vm0, %v7255_v49, 0.0  ;;  %v5031_v20 = vmul.f32 %v10563_v51, %v12588_v6 }
 0x510   :  { %v5081_v63 = vsel %vm335_vm0, %v5029_v39, 0.0  ;;  %v762_v39 = vand.u32 65535, %v12516_v33 }
 0x511   :  { %v4122_v28 = vsel %vm627_vm6, %v4109_v25, %v4121_v4  ;;  %v5087_v18 = vsel %vm335_vm0, %v5031_v20, 0.0 }
 0x512   :  { %v4085_v7 = vpop.permute.xlu1 %4084  ;;  %v4123_v5 = vsel %vm629_vm7, %v4113_v48, %v4122_v28 }
 0x513   :  { %v4117_v56 = vrot.slane %v4085_v7, %v11524_v57  ;;  %7295 = vadd.xlane.f32.xlu1 %v7294_v30 }
 0x515   :  { %v4124_v47 = vsel %vm631_vm8, %v4117_v56, %v4123_v5 }
 0x516   :  { %v12609_v62 = vsel %vm634_vm9, %v4124_v47, 2147483647  ;;  %v1890_v47 = vand.u32 65535, %v12393_v16 }
 0x517   :  { %v4127_v2 = vshra.s32 %v12609_v62, 16  ;;  %5085 = vadd.xlane.f32.xlu1 %v5084_v32 }
 0x518   :  { %v1892_v10 = vcvt.s32.f32 %v1890_v47 }
 0x519   :  { %v12613_v23 = vcvt.s32.f32 %v4127_v2 }
 0x51b   :  { %4130 = vmin.xlane.f32.xlu0 %v12613_v23 }
 0x51f   :  { %6193 = vadd.xlane.f32.xlu0 %v6192_v0 }
 0x523   :  { %7280 = vadd.xlane.f32.xlu0 %v7279_v38 }
 0x527   :  { %7292 = vadd.xlane.f32.xlu0 %v7291_v44 }
 0x52b   :  { %5082 = vadd.xlane.f32.xlu0 %v5081_v63  ;;  %v3008_v63 = vand.u32 65535, %v12522_v59 }
 0x52d   :  { %v3010_v47 = vcvt.s32.f32 %v3008_v63 }
 0x52f   :  { %5088 = vadd.xlane.f32.xlu0 %v5087_v18 }
 0x537   :  { %v12638_v25 = vpop.xlane.xlu0 %5040 }
 0x53b   :  { %v12640_v4 = vpop.xlane.xlu0 %5046 }
 0x53f   :  { %v12642_v30 = vpop.xlane.xlu0 %5058 }
 0x543   :  { %v12644_v13 = vpop.xlane.xlu0 %6163 }
 0x544   :  { %18007 = vst [vmem:[#allocation20_spill] sm:$0xff] %v12644_v13  ;;  %v12646_v28 = vpop.xlane.xlu1 %5043 }
 0x547   :  { %v12648_v48 = vpop.xlane.xlu0 %6175 }
 0x548   :  { %18008 = vst [vmem:[#allocation21_spill] sm:$0xff] %v12648_v48  ;;  %v12650_v7 = vpop.xlane.xlu1 %5049 }
 0x549   :  { %18009 = vst [vmem:[#allocation22_spill] sm:$0xff] %v12650_v7 }
 0x54b   :  { %v12652_v56 = vpop.xlane.xlu0 %5064 }
 0x54c   :  { %18010 = vst [vmem:[#allocation23_spill] sm:$0xff] %v12652_v56  ;;  %v12654_v5 = vpop.xlane.xlu1 %5052 }
 0x54d   :  { %18011 = vst [vmem:[#allocation24_spill] sm:$0xff] %v12654_v5 }
 0x54f   :  { %v12656_v32 = vpop.xlane.xlu0 %5070 }
 0x550   :  { %18012 = vst [vmem:[#allocation25_spill] sm:$0xff] %v12656_v32  ;;  %v12659_v12 = vpop.xlane.xlu1 %6157 }
 0x551   :  { %18013 = vst [vmem:[#allocation26_spill] sm:$0xff] %v12659_v12 }
 0x553   :  { %v12661_v2 = vpop.xlane.xlu0 %1894 }
 0x554   :  { %v12663_v3 = vpop.xlane.xlu1 %6160  ;;  %vm1896_vm12 = vcmp.eq.f32.partialorder %v12409_v53, %v12661_v2  ;;  %v764_v53 = vcvt.s32.f32 %v762_v39 }
 0x555   :  { %v1897_v0 = vsel %vm1896_vm12, %v1892_v10, inf }
 0x556   :  { %1898 = vmin.xlane.f32.xlu1 %v1897_v0 }
 0x557   :  { %v12688_v0 = vpop.xlane.xlu0 %6184 }
 0x558   :  { %v12667_v24 = vpop.xlane.xlu1 %6166  ;;  %18021 = vst [vmem:[#allocation34_spill] sm:$0xff] %v12688_v0 }
 0x559   :  { %18014 = vst [vmem:[#allocation27_spill] sm:$0xff] %v12667_v24 }
 0x55b   :  { %v12690_v55 = vpop.xlane.xlu0 %7274 }
 0x55c   :  { %v12669_v11 = vpop.xlane.xlu1 %6169  ;;  %18022 = vst [vmem:[#allocation35_spill] sm:$0xff] %v12690_v55 }
 0x55d   :  { %18015 = vst [vmem:[#allocation28_spill] sm:$0xff] %v12669_v11 }
 0x55f   :  { %v12692_v33 = vpop.xlane.xlu0 %7283 }
 0x560   :  { %v12671_v38 = vpop.xlane.xlu1 %5055  ;;  %18023 = vst [vmem:[#allocation36_spill] sm:$0xff] %v12692_v33 }
 0x561   :  { %18016 = vst [vmem:[#allocation29_spill] sm:$0xff] %v12671_v38 }
 0x563   :  { %v12694_v39 = vpop.xlane.xlu0 %5073 }
 0x564   :  { %v12673_v49 = vpop.xlane.xlu1 %5061  ;;  %18024 = vst [vmem:[#allocation37_spill] sm:$0xff] %v12694_v39 }
 0x565   :  { %18017 = vst [vmem:[#allocation30_spill] sm:$0xff] %v12673_v49 }
 0x567   :  { %v12696_v59 = vpop.xlane.xlu0 %5079 }
 0x568   :  { %v12675_v16 = vpop.xlane.xlu1 %6172  ;;  %18025 = vst [vmem:[#allocation38_spill] sm:$0xff] %v12696_v59 }
 0x569   :  { %18018 = vst [vmem:[#allocation31_spill] sm:$0xff] %v12675_v16 }
 0x56c   :  { %v12677_v9 = vpop.xlane.xlu1 %6178 }
 0x56d   :  { %18019 = vst [vmem:[#allocation32_spill] sm:$0xff] %v12677_v9 }
 0x570   :  { %v12679_v44 = vpop.xlane.xlu1 %5067 }
 0x571   :  { %18020 = vst [vmem:[#allocation33_spill] sm:$0xff] %v12679_v44 }
 0x574   :  { %v767_v51 = vpop.xlane.xlu1 %766 }
 0x575   :  { %vm768_vm13 = vcmp.eq.f32.partialorder %v12524_v31, %v767_v51  ;;  %v4126_v31 = vand.u32 65535, %v12609_v62 }
 0x576   :  { %v769_v20 = vsel %vm768_vm13, %v764_v53, inf }
 0x577   :  { %770 = vmin.xlane.f32.xlu0 %v769_v20  ;;  %v4128_v63 = vcvt.s32.f32 %v4126_v31 }
 0x578   :  { %v12684_v18 = vpop.xlane.xlu1 %3012 }
 0x579   :  { %vm3014_vm14 = vcmp.eq.f32.partialorder %v12532_v50, %v12684_v18 }
 0x57a   :  { %v3015_v10 = vsel %vm3014_vm14, %v3010_v47, inf }
 0x57b   :  { %3016 = vmin.xlane.f32.xlu0 %v3015_v10 }
 0x57c   :  { %v12703_v20 = vpop.xlane.xlu1 %6181 }
 0x57d   :  { %18026 = vst [vmem:[#allocation39_spill] sm:$0xff] %v12703_v20 }
 0x580   :  { %v12705_v47 = vpop.xlane.xlu1 %6187 }
 0x581   :  { %18027 = vst [vmem:[#allocation40_spill] sm:$0xff] %v12705_v47 }
 0x584   :  { %v12707_v10 = vpop.xlane.xlu1 %7277 }
 0x585   :  { %18028 = vst [vmem:[#allocation41_spill] sm:$0xff] %v12707_v10 }
 0x588   :  { %v12709_v37 = vpop.xlane.xlu1 %7286 }
 0x589   :  { %18029 = vst [vmem:[#allocation42_spill] sm:$0xff] %v12709_v37  ;;  %v773_v37 = vcvt.f32.s32 %v767_v51 }
 0x58b   :  { %v774_v47 = vshll.u32 %v773_v37, 16 }
 0x58c   :  { %v12711_v35 = vpop.xlane.xlu1 %5076 }
 0x58d   :  { %18030 = vst [vmem:[#allocation43_spill] sm:$0xff] %v12711_v35 }
 0x590   :  { %v12715_v62 = vpop.xlane.xlu1 %6190 }
 0x591   :  { %18032 = vst [vmem:[#allocation45_spill] sm:$0xff] %v12715_v62 }
 0x594   :  { %v12719_v39 = vpop.xlane.xlu1 %6196 }
 0x595   :  { %18034 = vst [vmem:[#allocation47_spill] sm:$0xff] %v12719_v39  ;;  %v18041_v39 = vmov 0.0  }
 0x5a4   :  { %v12699_v53 = vpop.xlane.xlu0 %4130 }
 0x5a5   :  { %vm4132_vm15 = vcmp.eq.f32.partialorder %v12613_v23, %v12699_v53 }
 0x5a6   :  { %v4133_v50 = vsel %vm4132_vm15, %v4128_v63, inf  ;;  %v12723_v63 = vpop.xlane.xlu1 %7289 }
 0x5a7   :  { %4134 = vmin.xlane.f32.xlu1 %v4133_v50  ;;  %18036 = vst [vmem:[#allocation49_spill] sm:$0xff] %v12723_v63  ;;  %v1901_v63 = vcvt.f32.s32 %v12661_v2 }
 0x5a8   :  { %v12713_v59 = vpop.xlane.xlu0 %6193 }
 0x5a9   :  { %18031 = vst [vmem:[#allocation44_spill] sm:$0xff] %v12713_v59  ;;  %v1902_v51 = vshll.u32 %v1901_v63, 16 }
 0x5aa   :  { %v12727_v20 = vpop.xlane.xlu1 %7295 }
 0x5ab   :  { %18038 = vst [vmem:[#allocation51_spill] sm:$0xff] %v12727_v20 }
 0x5ac   :  { %v12717_v31 = vpop.xlane.xlu0 %7280 }
 0x5ad   :  { %18033 = vst [vmem:[#allocation46_spill] sm:$0xff] %v12717_v31 }
 0x5ae   :  { %v12731_v35 = vpop.xlane.xlu1 %5085 }
 0x5af   :  { %18040 = vst [vmem:[#allocation53_spill] sm:$0xff] %v12731_v35 }
 0x5b0   :  { %v12721_v23 = vpop.xlane.xlu0 %7292 }
 0x5b1   :  { %18035 = vst [vmem:[#allocation48_spill] sm:$0xff] %v12721_v23 }
 0x5b4   :  { %v12725_v50 = vpop.xlane.xlu0 %5082 }
 0x5b5   :  { %18037 = vst [vmem:[#allocation50_spill] sm:$0xff] %v12725_v50 }
 0x5b8   :  { %v12729_v10 = vpop.xlane.xlu0 %5088 }
 0x5b9   :  { %18039 = vst [vmem:[#allocation52_spill] sm:$0xff] %v12729_v10 }
 0x5df   :  { %v1899_v31 = vpop.xlane.xlu1 %1898 }
 0x5e0   :  { %v1900_v33 = vcvt.f32.s32 %v1899_v31 }
 0x600   :  { %v771_v59 = vpop.xlane.xlu0 %770 }
 0x601   :  { %v772_v62 = vcvt.f32.s32 %v771_v59  ;;  %v1903_v59 = vadd.s32 %v1902_v51, %v1900_v33  ;;  %v3019_v33 = vcvt.f32.s32 %v12684_v18 }
 0x603   :  { %v775_v9 = vadd.s32 %v774_v47, %v772_v62  ;;  %vm1904_vm11 = vcmp.eq.s32.totalorder %v11436_v58, %v1903_v59  ;;  %v3020_v51 = vshll.u32 %v3019_v33, 16 }
 0x604   :  { %v10474_v62 = vsel %vm1904_vm11, 1.0, %v18041_v39  ;;  %v3017_v31 = vpop.xlane.xlu0 %3016 }
 0x605   :  { %vm776_vm10 = vcmp.eq.s32.totalorder %v11436_v58, %v775_v9  ;;  %v1910_v63 = vrot.slane %v10474_v62, %v11262_v8  ;;  %v1924_v59 = vrot.slane %v10474_v62, %v12110_v22  ;;  %v1959_v18 = vrot.slane %v10474_v62, %v12143_v45 }
 0x606   :  { %v10464_v23 = vsel %vm776_vm10, 1.0, %v18041_v39 }
 0x607   :  { %v789_v50 = vrot.slane %v10464_v23, %v12107_v19  ;;  %v782_v20 = vrot.slane %v10464_v23, %v11262_v8  ;;  %v796_v10 = vrot.slane %v10464_v23, %v12110_v22  ;;  %v803_v37 = vrot.slane %v10464_v23, %v12115_v26 }
 0x608   :  { %v810_v9 = vrot.slane %v10464_v23, %v12122_v36  ;;  %v817_v47 = vrot.slane %v10464_v23, %v12129_v40  ;;  %v824_v2 = vrot.slane %v10464_v23, %v12136_v43 }
 0x609   :  { %791 = vbcast.lane.b32.xlu1 %v789_v50, 256  ;;  %784 = vbcast.lane.b32.xlu0 %v782_v20, 256  ;;  %v831_v20 = vrot.slane %v10464_v23, %v12143_v45  ;;  %v3018_v50 = vcvt.f32.s32 %v3017_v31 }
 0x60b   :  { %v3021_v23 = vadd.s32 %v3020_v51, %v3018_v50  ;;  %v4137_v50 = vcvt.f32.s32 %v12699_v53 }
 0x60d   :  { %798 = vbcast.lane.b32.xlu1 %v796_v10, 256  ;;  %805 = vbcast.lane.b32.xlu0 %v803_v37, 256  ;;  %v1917_v10 = vrot.slane %v10474_v62, %v12107_v19  ;;  %v1931_v37 = vrot.slane %v10474_v62, %v12115_v26  ;;  %vm3022_vm12 = vcmp.eq.s32.totalorder %v11436_v58, %v3021_v23 }
 0x611   :  { %812 = vbcast.lane.b32.xlu1 %v810_v9, 256  ;;  %819 = vbcast.lane.b32.xlu0 %v817_v47, 256  ;;  %v1945_v9 = vrot.slane %v10474_v62, %v12129_v40  ;;  %v1938_v47 = vrot.slane %v10474_v62, %v12122_v36 }
 0x615   :  { %826 = vbcast.lane.b32.xlu1 %v824_v2, 256  ;;  %833 = vbcast.lane.b32.xlu0 %v831_v20, 256  ;;  %v1952_v2 = vrot.slane %v10474_v62, %v12136_v43  ;;  %v10483_v20 = vsel %vm3022_vm12, 1.0, %v18041_v39 }
 0x616   :  { %v3035_v31 = vrot.slane %v10483_v20, %v12107_v19  ;;  %v3028_v33 = vrot.slane %v10483_v20, %v11262_v8  ;;  %v3056_v62 = vrot.slane %v10483_v20, %v12122_v36  ;;  %v3063_v51 = vrot.slane %v10483_v20, %v12129_v40 }
 0x619   :  { %1919 = vbcast.lane.b32.xlu1 %v1917_v10, 256  ;;  %1912 = vbcast.lane.b32.xlu0 %v1910_v63, 256  ;;  %v3042_v10 = vrot.slane %v10483_v20, %v12110_v22  ;;  %v3049_v63 = vrot.slane %v10483_v20, %v12115_v26 }
 0x61d   :  { %1933 = vbcast.lane.b32.xlu1 %v1931_v37, 256  ;;  %1926 = vbcast.lane.b32.xlu0 %v1924_v59, 256  ;;  %v4138_v59 = vshll.u32 %v4137_v50, 16 }
 0x621   :  { %1947 = vbcast.lane.b32.xlu1 %v1945_v9, 256  ;;  %1940 = vbcast.lane.b32.xlu0 %v1938_v47, 256  ;;  %v3070_v47 = vrot.slane %v10483_v20, %v12136_v43 }
 0x625   :  { %1961 = vbcast.lane.b32.xlu1 %v1959_v18, 256  ;;  %1954 = vbcast.lane.b32.xlu0 %v1952_v2, 256  ;;  %v3077_v18 = vrot.slane %v10483_v20, %v12143_v45 }
 0x629   :  { %3037 = vbcast.lane.b32.xlu1 %v3035_v31, 256  ;;  %3030 = vbcast.lane.b32.xlu0 %v3028_v33, 256 }
 0x62d   :  { %3044 = vbcast.lane.b32.xlu1 %v3042_v10, 256  ;;  %3051 = vbcast.lane.b32.xlu0 %v3049_v63, 256 }
 0x630   :  { %v4135_v37 = vpop.xlane.xlu1 %4134 }
 0x631   :  { %v4136_v23 = vcvt.f32.s32 %v4135_v37  ;;  %3058 = vbcast.lane.b32.xlu1 %v3056_v62, 256  ;;  %3065 = vbcast.lane.b32.xlu0 %v3063_v51, 256 }
 0x633   :  { %v4139_v9 = vadd.s32 %v4138_v59, %v4136_v23 }
 0x635   :  { %vm4140_vm13 = vcmp.eq.s32.totalorder %v11436_v58, %v4139_v9  ;;  %3072 = vbcast.lane.b32.xlu1 %v3070_v47, 256  ;;  %3079 = vbcast.lane.b32.xlu0 %v3077_v18, 256  ;;  %v10980_v47 = vld [vmem:[%s17801_s3] sm:$0x1f] }
 0x636   :  { %v10492_v53 = vsel %vm4140_vm13, 1.0, %v18041_v39 }
 0x637   :  { %v4153_v2 = vrot.slane %v10492_v53, %v12107_v19  ;;  %v4146_v31 = vrot.slane %v10492_v53, %v11262_v8  ;;  %v4167_v33 = vrot.slane %v10492_v53, %v12115_v26  ;;  %v4160_v10 = vrot.slane %v10492_v53, %v12110_v22 }
 0x638   :  { %v4181_v20 = vrot.slane %v10492_v53, %v12129_v40  ;;  %v4174_v63 = vrot.slane %v10492_v53, %v12122_v36  ;;  %v4195_v50 = vrot.slane %v10492_v53, %v12143_v45  ;;  %v4188_v62 = vrot.slane %v10492_v53, %v12136_v43  ;;  %v10986_v36 = vld [vmem:[%s17801_s3 + $0x120] sm:$0x1f] }
 0x639   :  { %4155 = vbcast.lane.b32.xlu1 %v4153_v2, 256  ;;  %4148 = vbcast.lane.b32.xlu0 %v4146_v31, 256  ;;  %v10981_v2 = vld [vmem:[%s17801_s3 + $0x8] sm:$0x1f] }
 0x63d   :  { %4169 = vbcast.lane.b32.xlu1 %v4167_v33, 256  ;;  %4162 = vbcast.lane.b32.xlu0 %v4160_v10, 256 }
 0x641   :  { %4183 = vbcast.lane.b32.xlu1 %v4181_v20, 256  ;;  %4176 = vbcast.lane.b32.xlu0 %v4174_v63, 256 }
 0x645   :  { %4197 = vbcast.lane.b32.xlu1 %v4195_v50, 256  ;;  %4190 = vbcast.lane.b32.xlu0 %v4188_v62, 256  ;;  %v10982_v50 = vld [vmem:[%s17801_s3 + $0x10] sm:$0x1f] }
 0x67b   :  { %v785_v51 = vpop.permute.xlu0 %784  ;;  %v792_v37 = vpop.permute.xlu1 %791 }
 0x67c   :  { %v838_v59 = vrot.slane %v785_v51, %v11262_v8  ;;  %v842_v23 = vrot.slane %v785_v51, %v12107_v19  ;;  %v846_v9 = vrot.slane %v785_v51, %v12110_v22  ;;  %v850_v31 = vrot.slane %v792_v37, %v11262_v8 }
 0x67d   :  { %v854_v33 = vrot.slane %v792_v37, %v12107_v19  ;;  %v858_v10 = vrot.slane %v792_v37, %v12110_v22  ;;  %v10983_v37 = vld [vmem:[%s17801_s3 + $0x60] sm:$0x1f] }
 0x67e   :  { %v931_v18 = vmul.f32 %v10980_v47, %v838_v59  ;;  %v932_v53 = vmul.f32 %v10981_v2, %v842_v23  ;;  %v933_v62 = vmul.f32 %v10982_v50, %v846_v9  ;;  %v934_v45 = vmul.f32 %v10983_v37, %v850_v31  ;;  %v10984_v9 = vld [vmem:[%s17801_s3 + $0x68] sm:$0x1f] }
 0x67f   :  { %v806_v20 = vpop.permute.xlu0 %805  ;;  %v799_v63 = vpop.permute.xlu1 %798  ;;  %v935_v50 = vmul.f32 %v10984_v9, %v854_v33  ;;  %v10987_v37 = vld [vmem:[%s17801_s3 + $0x128] sm:$0x1f] }
 0x680   :  { %v874_v51 = vrot.slane %v806_v20, %v11262_v8  ;;  %v878_v59 = vrot.slane %v806_v20, %v12107_v19  ;;  %v882_v47 = vrot.slane %v806_v20, %v12110_v22  ;;  %v862_v23 = vrot.slane %v799_v63, %v11262_v8  ;;  %v10985_v20 = vld [vmem:[%s17801_s3 + $0x70] sm:$0x1f] }
 0x681   :  { %v955_v2 = vsel %vm335_vm0, %v931_v18, 0.0  ;;  %v956_v58 = vsel %vm335_vm0, %v932_v53, 0.0  ;;  %v936_v40 = vmul.f32 %v10985_v20, %v858_v10  ;;  %v866_v26 = vrot.slane %v799_v63, %v12107_v19  ;;  %v10988_v10 = vld [vmem:[%s17801_s3 + $0x130] sm:$0x1f] }
 0x682   :  { %v957_v53 = vadd.f32 %v956_v58, %v955_v2  ;;  %v940_v31 = vmul.f32 %v10986_v36, %v874_v51  ;;  %v941_v33 = vmul.f32 %v10987_v37, %v878_v59  ;;  %v870_v9 = vrot.slane %v799_v63, %v12110_v22  ;;  %v10989_v58 = vld [vmem:[%s17801_s3 + $0xc0] sm:$0x1f] }
 0x683   :  { %v820_v18 = vpop.permute.xlu0 %819  ;;  %v813_v43 = vpop.permute.xlu1 %812  ;;  %v958_v35 = vsel %vm335_vm0, %v933_v62, 0.0  ;;  %v12818_v20 = vmul.f32 %v10988_v10, %v882_v47  ;;  %v937_v36 = vmul.f32 %v10989_v58, %v862_v23  ;;  %v960_v37 = vsel %vm335_vm0, %v934_v45, 0.0  ;;  %v10991_v45 = vld [vmem:[%s17801_s3 + $0xd0] sm:$0x1f] }
 0x684   :  { %v898_v51 = vrot.slane %v820_v18, %v11262_v8  ;;  %v12824_v2 = vadd.f32 %v958_v35, %v957_v53  ;;  %v902_v59 = vrot.slane %v820_v18, %v12107_v19  ;;  %v906_v63 = vrot.slane %v820_v18, %v12110_v22  ;;  %v10990_v53 = vld [vmem:[%s17801_s3 + $0xc8] sm:$0x1f] }
 0x685   :  { %v886_v62 = vrot.slane %v813_v43, %v11262_v8  ;;  %v890_v47 = vrot.slane %v813_v43, %v12107_v19  ;;  %v894_v10 = vrot.slane %v813_v43, %v12110_v22  ;;  %v961_v35 = vsel %vm335_vm0, %v935_v50, 0.0 }
 0x686   :  { %18042 = vst [vmem:[#allocation54_spill] sm:$0xff] %v12824_v2  ;;  %v995_v23 = vmul.f32 %v12824_v2, %v11275_v14  ;;  %v938_v18 = vmul.f32 %v10990_v53, %v866_v26  ;;  %v939_v58 = vmul.f32 %v10991_v45, %v870_v9  ;;  %v962_v32 = vadd.f32 %v961_v35, %v960_v37  ;;  %v10992_v26 = vld [vmem:[%s17801_s3 + $0x1e0] sm:$0x1f]  ;;  %v10993_v9 = vld [vmem:[%s17801_s3 + $0x1e8] sm:$0x1f] }
 0x687   :  { %v834_v39 = vpop.permute.xlu0 %833  ;;  %v827_v55 = vpop.permute.xlu1 %826  ;;  %v12849_v53 = vmul.f32 %v10992_v26, %v898_v51  ;;  %v12854_v45 = vmul.f32 %v10993_v9, %v902_v59  ;;  %v10995_v37 = vld [vmem:[%s17801_s3 + $0x180] sm:$0x1f]  ;;  %v10996_v51 = vld [vmem:[%s17801_s3 + $0x188] sm:$0x1f]  ;;  %v10997_v59 = vld [vmem:[%s17801_s3 + $0x190] sm:$0x1f] }
 0x688   :  { %v922_v44 = vrot.slane %v834_v39, %v11262_v8  ;;  %v926_v43 = vrot.slane %v834_v39, %v12107_v19  ;;  %v930_v0 = vrot.slane %v834_v39, %v12110_v22  ;;  %v910_v2 = vrot.slane %v827_v55, %v11262_v8  ;;  %v10994_v39 = vld [vmem:[%s17801_s3 + $0x1f0] sm:$0x1f] }
 0x689   :  { %v1003_v50 = vsel %vm335_vm0, %v995_v23, 0.0  ;;  %v12859_v16 = vmul.f32 %v10994_v39, %v906_v63  ;;  %v12864_v23 = vmul.f32 %v10995_v37, %v886_v62  ;;  %v12869_v35 = vmul.f32 %v10996_v51, %v890_v47  ;;  %v10998_v62 = vld [vmem:[%s17801_s3 + $0x2a0] sm:$0x1f] }
 0x68a   :  { %1004 = vadd.xlane.f32.xlu1 %v1003_v50  ;;  %v12874_v26 = vmul.f32 %v10997_v59, %v894_v10  ;;  %v914_v63 = vrot.slane %v827_v55, %v12107_v19  ;;  %v963_v9 = vsel %vm335_vm0, %v936_v40, 0.0  ;;  %v12881_v50 = vmul.f32 %v10998_v62, %v922_v44  ;;  %v10999_v10 = vld [vmem:[%s17801_s3 + $0x2a8] sm:$0x1f]  ;;  %v11000_v40 = vld [vmem:[%s17801_s3 + $0x2b0] sm:$0x1f] }
 0x68b   :  { %v1913_v39 = vpop.permute.xlu0 %1912  ;;  %v918_v47 = vrot.slane %v827_v55, %v12110_v22  ;;  %v12884_v37 = vadd.f32 %v963_v9, %v962_v32  ;;  %v1920_v51 = vpop.permute.xlu1 %1919  ;;  %v970_v24 = vsel %vm335_vm0, %v940_v31, 0.0  ;;  %v12890_v59 = vmul.f32 %v10999_v10, %v926_v43  ;;  %v11001_v55 = vld [vmem:[%s17801_s3 + $0x240] sm:$0x1f] }
 0x68c   :  { %v12895_v56 = vmul.f32 %v11000_v40, %v930_v0  ;;  %v12900_v32 = vmul.f32 %v11001_v55, %v910_v2  ;;  %v971_v44 = vsel %vm335_vm0, %v941_v33, 0.0  ;;  %v1966_v43 = vrot.slane %v1913_v39, %v11262_v8 }
 0x68d   :  { %18043 = vst [vmem:[#allocation55_spill] sm:$0xff] %v12884_v37  ;;  %v996_v31 = vmul.f32 %v12884_v37, %v11285_v21  ;;  %v1970_v9 = vrot.slane %v1913_v39, %v12107_v19  ;;  %v1974_v62 = vrot.slane %v1913_v39, %v12110_v22  ;;  %v1978_v0 = vrot.slane %v1920_v51, %v11262_v8  ;;  %v11002_v39 = vld [vmem:[%s17801_s3 + $0x248] sm:$0x1f] }
 0x68e   :  { %v1982_v10 = vrot.slane %v1920_v51, %v12107_v19  ;;  %v1986_v40 = vrot.slane %v1920_v51, %v12110_v22  ;;  %v972_v49 = vadd.f32 %v971_v44, %v970_v24  ;;  %v973_v33 = vsel %vm335_vm0, %v12818_v20, 0.0  ;;  %v11003_v24 = vld [vmem:[%s17801_s3 + $0x250] sm:$0x1f] }
 0x68f   :  { %v1006_v2 = vsel %vm335_vm0, %v996_v31, 0.0  ;;  %v965_v55 = vsel %vm335_vm0, %v937_v36, 0.0  ;;  %v966_v37 = vsel %vm335_vm0, %v938_v18, 0.0  ;;  %v1927_v38 = vpop.permute.xlu0 %1926  ;;  %v12919_v11 = vmul.f32 %v11002_v39, %v914_v63  ;;  %v11004_v36 = vld [vmem:[%s17801_s3 + $0x18] sm:$0x1f] }
 0x690   :  { %v12924_v51 = vmul.f32 %v11003_v24, %v918_v47  ;;  %1007 = vadd.xlane.f32.xlu0 %v1006_v2  ;;  %v12926_v44 = vadd.f32 %v973_v33, %v972_v49  ;;  %v967_v20 = vadd.f32 %v966_v37, %v965_v55  ;;  %v12931_v18 = vmul.f32 %v11004_v36, %v1966_v43  ;;  %v11005_v63 = vld [vmem:[%s17801_s3 + $0x20] sm:$0x1f]  ;;  %v11006_v47 = vld [vmem:[%s17801_s3 + $0x28] sm:$0x1f]  ;;  %v1934_v37 = vpop.permute.xlu1 %1933  ;;  %v11007_v43 = vld [vmem:[%s17801_s3 + $0x78] sm:$0x1f] }
 0x691   :  { %v12936_v31 = vmul.f32 %v11005_v63, %v1970_v9  ;;  %v12941_v2 = vmul.f32 %v11006_v47, %v1974_v62  ;;  %v968_v49 = vsel %vm335_vm0, %v939_v58, 0.0  ;;  %v12947_v33 = vmul.f32 %v11007_v43, %v1978_v0  ;;  %v11008_v62 = vld [vmem:[%s17801_s3 + $0x80] sm:$0x1f]  ;;  %v11009_v58 = vld [vmem:[%s17801_s3 + $0x88] sm:$0x1f] }
 0x692   :  { %18044 = vst [vmem:[#allocation56_spill] sm:$0xff] %v12926_v44  ;;  %v998_v55 = vmul.f32 %v12926_v44, %v11315_v41  ;;  %v12951_v9 = vadd.f32 %v968_v49, %v967_v20  ;;  %v1990_v39 = vrot.slane %v1927_v38, %v11262_v8  ;;  %v12957_v24 = vmul.f32 %v11008_v62, %v1982_v10  ;;  %v11010_v44 = vld [vmem:[%s17801_s3 + $0xd8] sm:$0x1f] }
 0x693   :  { %v12962_v36 = vmul.f32 %v11009_v58, %v1986_v40  ;;  %v1994_v0 = vrot.slane %v1927_v38, %v12107_v19  ;;  %v1998_v63 = vrot.slane %v1927_v38, %v12110_v22  ;;  %v2002_v49 = vrot.slane %v1934_v37, %v11262_v8 }
 0x694   :  { %18045 = vst [vmem:[#allocation57_spill] sm:$0xff] %v12951_v9  ;;  %v1012_v20 = vsel %vm335_vm0, %v998_v55, 0.0  ;;  %v997_v47 = vmul.f32 %v12951_v9, %v11297_v27  ;;  %v980_v10 = vsel %vm335_vm0, %v12849_v53, 0.0  ;;  %v2006_v43 = vrot.slane %v1934_v37, %v12107_v19  ;;  %v1941_v55 = vpop.permute.xlu0 %1940  ;;  %v1948_v12 = vpop.permute.xlu1 %1947 }
 0x695   :  { %1013 = vadd.xlane.f32.xlu1 %v1012_v20  ;;  %v981_v40 = vsel %vm335_vm0, %v12854_v45, 0.0  ;;  %v975_v62 = vsel %vm335_vm0, %v12864_v23, 0.0  ;;  %v976_v38 = vsel %vm335_vm0, %v12869_v35, 0.0  ;;  %v12983_v53 = vmul.f32 %v11010_v44, %v1990_v39  ;;  %v11011_v45 = vld [vmem:[%s17801_s3 + $0xe0] sm:$0x1f] }
 0x696   :  { %v1009_v58 = vsel %vm335_vm0, %v997_v47, 0.0  ;;  %v982_v20 = vadd.f32 %v981_v40, %v980_v10  ;;  %v977_v9 = vadd.f32 %v976_v38, %v975_v62  ;;  %v12988_v23 = vmul.f32 %v11011_v45, %v1994_v0  ;;  %v11012_v44 = vld [vmem:[%s17801_s3 + $0xe8] sm:$0x1f]  ;;  %v11013_v0 = vld [vmem:[%s17801_s3 + $0x138] sm:$0x1f] }
 0x697   :  { %1010 = vadd.xlane.f32.xlu0 %v1009_v58  ;;  %v2010_v35 = vrot.slane %v1934_v37, %v12110_v22  ;;  %v983_v47 = vsel %vm335_vm0, %v12859_v16, 0.0  ;;  %v978_v7 = vsel %vm335_vm0, %v12874_v26, 0.0  ;;  %v12998_v39 = vmul.f32 %v11012_v44, %v1998_v63  ;;  %v11014_v16 = vld [vmem:[%s17801_s3 + $0x140] sm:$0x1f] }
 0x698   :  { %v13003_v10 = vmul.f32 %v11013_v0, %v2002_v49  ;;  %v13005_v37 = vadd.f32 %v983_v47, %v982_v20  ;;  %v13007_v40 = vadd.f32 %v978_v7, %v977_v9  ;;  %v13012_v26 = vmul.f32 %v11014_v16, %v2006_v43  ;;  %v1955_v47 = vpop.permute.xlu0 %1954 }
 0x699   :  { %v2014_v62 = vrot.slane %v1941_v55, %v11262_v8  ;;  %v2018_v63 = vrot.slane %v1941_v55, %v12107_v19  ;;  %v2022_v38 = vrot.slane %v1941_v55, %v12110_v22  ;;  %v2026_v7 = vrot.slane %v1948_v12, %v11262_v8 }
 0x69a   :  { %18046 = vst [vmem:[#allocation58_spill] sm:$0xff] %v13005_v37  ;;  %18047 = vst [vmem:[#allocation59_spill] sm:$0xff] %v13007_v40  ;;  %v1000_v49 = vmul.f32 %v13005_v37, %v11353_v1  ;;  %v999_v58 = vmul.f32 %v13007_v40, %v11335_v52  ;;  %v2030_v9 = vrot.slane %v1948_v12, %v12107_v19  ;;  %v990_v43 = vsel %vm335_vm0, %v12881_v50, 0.0 }
 0x69b   :  { %v2034_v20 = vrot.slane %v1948_v12, %v12110_v22  ;;  %v991_v45 = vsel %vm335_vm0, %v12890_v59, 0.0  ;;  %v985_v55 = vsel %vm335_vm0, %v12900_v32, 0.0  ;;  %v986_v37 = vsel %vm335_vm0, %v12919_v11, 0.0  ;;  %v11015_v12 = vld [vmem:[%s17801_s3 + $0x148] sm:$0x1f] }
 0x69c   :  { %v1018_v44 = vsel %vm335_vm0, %v1000_v49, 0.0  ;;  %v1015_v0 = vsel %vm335_vm0, %v999_v58, 0.0  ;;  %v992_v16 = vadd.f32 %v991_v45, %v990_v43  ;;  %v13037_v50 = vmul.f32 %v11015_v12, %v2010_v35  ;;  %v11016_v59 = vld [vmem:[%s17801_s3 + $0x198] sm:$0x1f]  ;;  %v1962_v43 = vpop.permute.xlu1 %1961  ;;  %v11017_v11 = vld [vmem:[%s17801_s3 + $0x1a0] sm:$0x1f] }
 0x69d   :  { %1019 = vadd.xlane.f32.xlu1 %v1018_v44  ;;  %1016 = vadd.xlane.f32.xlu0 %v1015_v0  ;;  %v13042_v32 = vmul.f32 %v11016_v59, %v2014_v62  ;;  %v993_v49 = vsel %vm335_vm0, %v12895_v56, 0.0  ;;  %v987_v58 = vadd.f32 %v986_v37, %v985_v55  ;;  %v13049_v45 = vmul.f32 %v11017_v11, %v2018_v63  ;;  %v11018_v35 = vld [vmem:[%s17801_s3 + $0x1a8] sm:$0x1f]  ;;  %v11019_v56 = vld [vmem:[%s17801_s3 + $0x1f8] sm:$0x1f] }
 0x69e   :  { %v13054_v44 = vmul.f32 %v11018_v35, %v2022_v38  ;;  %v13056_v0 = vadd.f32 %v993_v49, %v992_v16  ;;  %v988_v62 = vsel %vm335_vm0, %v12924_v51, 0.0  ;;  %v13063_v37 = vmul.f32 %v11019_v56, %v2026_v7  ;;  %v11020_v63 = vld [vmem:[%s17801_s3 + $0x200] sm:$0x1f]  ;;  %v11021_v51 = vld [vmem:[%s17801_s3 + $0x208] sm:$0x1f] }
 0x69f   :  { %v13068_v55 = vmul.f32 %v11020_v63, %v2030_v9  ;;  %v13070_v12 = vadd.f32 %v988_v62, %v987_v58  ;;  %v2038_v38 = vrot.slane %v1955_v47, %v11262_v8  ;;  %v13076_v16 = vmul.f32 %v11021_v51, %v2034_v20  ;;  %v3031_v20 = vpop.permute.xlu0 %3030 }
 0x6a0   :  { %18048 = vst [vmem:[#allocation60_spill] sm:$0xff] %v13056_v0  ;;  %v1002_v7 = vmul.f32 %v13056_v0, %v11389_v29  ;;  %v2042_v59 = vrot.slane %v1955_v47, %v12107_v19  ;;  %v2046_v49 = vrot.slane %v1955_v47, %v12110_v22  ;;  %v2050_v58 = vrot.slane %v1962_v43, %v11262_v8  ;;  %v3038_v40 = vpop.permute.xlu1 %3037 }
 0x6a1   :  { %18049 = vst [vmem:[#allocation61_spill] sm:$0xff] %v13070_v12  ;;  %v1001_v9 = vmul.f32 %v13070_v12, %v11372_v15  ;;  %v2083_v11 = vsel %vm335_vm0, %v12931_v18, 0.0  ;;  %v2084_v35 = vsel %vm335_vm0, %v12936_v31, 0.0  ;;  %v2054_v56 = vrot.slane %v1962_v43, %v12107_v19  ;;  %v11022_v12 = vld [vmem:[%s17801_s3 + $0x258] sm:$0x1f] }
 0x6a2   :  { %v1024_v62 = vsel %vm335_vm0, %v1002_v7, 0.0  ;;  %v2085_v63 = vadd.f32 %v2084_v35, %v2083_v11  ;;  %v2088_v47 = vsel %vm335_vm0, %v12947_v33, 0.0  ;;  %v13097_v18 = vmul.f32 %v11022_v12, %v2038_v38  ;;  %v11023_v33 = vld [vmem:[%s17801_s3 + $0x260] sm:$0x1f] }
 0x6a3   :  { %1025 = vadd.xlane.f32.xlu1 %v1024_v62  ;;  %v1021_v51 = vsel %vm335_vm0, %v1001_v9, 0.0  ;;  %v2086_v31 = vsel %vm335_vm0, %v12941_v2, 0.0  ;;  %v2089_v7 = vsel %vm335_vm0, %v12957_v24, 0.0  ;;  %v13106_v11 = vmul.f32 %v11023_v33, %v2042_v59  ;;  %v11024_v2 = vld [vmem:[%s17801_s3 + $0x268] sm:$0x1f] }
 0x6a4   :  { %1022 = vadd.xlane.f32.xlu0 %v1021_v51  ;;  %v2058_v9 = vrot.slane %v1962_v43, %v12110_v22  ;;  %v13109_v35 = vadd.f32 %v2086_v31, %v2085_v63  ;;  %v2090_v12 = vadd.f32 %v2089_v7, %v2088_v47  ;;  %v13114_v38 = vmul.f32 %v11024_v2, %v2046_v49  ;;  %v11025_v43 = vld [vmem:[%s17801_s3 + $0x2b8] sm:$0x1f]  ;;  %v3052_v2 = vpop.permute.xlu0 %3051 }
 0x6a5   :  { %v2091_v24 = vsel %vm335_vm0, %v12962_v36, 0.0  ;;  %v3084_v62 = vrot.slane %v3031_v20, %v11262_v8  ;;  %v3088_v51 = vrot.slane %v3031_v20, %v12107_v19  ;;  %v13123_v59 = vmul.f32 %v11025_v43, %v2050_v58  ;;  %v11026_v36 = vld [vmem:[%s17801_s3 + $0x2c0] sm:$0x1f] }
 0x6a6   :  { %18050 = vst [vmem:[#allocation62_spill] sm:$0xff] %v13109_v35  ;;  %v2123_v63 = vmul.f32 %v13109_v35, %v11275_v14  ;;  %v13127_v47 = vadd.f32 %v2091_v24, %v2090_v12  ;;  %v3092_v49 = vrot.slane %v3031_v20, %v12110_v22  ;;  %v13133_v31 = vmul.f32 %v11026_v36, %v2054_v56  ;;  %v11027_v12 = vld [vmem:[%s17801_s3 + $0x2c8] sm:$0x1f] }
 0x6a7   :  { %v3096_v7 = vrot.slane %v3038_v40, %v11262_v8  ;;  %v3100_v33 = vrot.slane %v3038_v40, %v12107_v19  ;;  %v2093_v58 = vsel %vm335_vm0, %v12983_v53, 0.0  ;;  %v13142_v24 = vmul.f32 %v11027_v12, %v2058_v9  ;;  %v11028_v53 = vld [vmem:[%s17801_s3 + $0x30] sm:$0x1f]  ;;  %v11029_v9 = vld [vmem:[%s17801_s3 + $0x38] sm:$0x1f] }
 0x6a8   :  { %18051 = vst [vmem:[#allocation63_spill] sm:$0xff] %v13127_v47  ;;  %v2131_v20 = vsel %vm335_vm0, %v2123_v63, 0.0  ;;  %v2124_v56 = vmul.f32 %v13127_v47, %v11285_v21  ;;  %v2094_v43 = vsel %vm335_vm0, %v12988_v23, 0.0  ;;  %v13152_v36 = vmul.f32 %v11028_v53, %v3084_v62  ;;  %v3045_v47 = vpop.permute.xlu1 %3044  ;;  %v11030_v23 = vld [vmem:[%s17801_s3 + $0x40] sm:$0x1f] }
 0x6a9   :  { %2132 = vadd.xlane.f32.xlu0 %v2131_v20  ;;  %v13157_v12 = vmul.f32 %v11029_v9, %v3088_v51  ;;  %v3104_v63 = vrot.slane %v3038_v40, %v12110_v22  ;;  %v2095_v35 = vadd.f32 %v2094_v43, %v2093_v58  ;;  %v13164_v20 = vmul.f32 %v11030_v23, %v3092_v49  ;;  %v11031_v40 = vld [vmem:[%s17801_s3 + $0x90] sm:$0x1f]  ;;  %v11032_v58 = vld [vmem:[%s17801_s3 + $0x98] sm:$0x1f] }
 0x6aa   :  { %v2134_v0 = vsel %vm335_vm0, %v2124_v56, 0.0  ;;  %v2096_v62 = vsel %vm335_vm0, %v12998_v39, 0.0  ;;  %v3120_v53 = vrot.slane %v3052_v2, %v11262_v8  ;;  %v13172_v51 = vmul.f32 %v11031_v40, %v3096_v7 }
 0x6ab   :  { %2135 = vadd.xlane.f32.xlu1 %v2134_v0  ;;  %v13177_v56 = vmul.f32 %v11032_v58, %v3100_v33  ;;  %v13179_v49 = vadd.f32 %v2096_v62, %v2095_v35  ;;  %v3124_v43 = vrot.slane %v3052_v2, %v12107_v19  ;;  %v3128_v39 = vrot.slane %v3052_v2, %v12110_v22  ;;  %v11033_v2 = vld [vmem:[%s17801_s3 + $0xa0] sm:$0x1f] }
 0x6ac   :  { %v3108_v0 = vrot.slane %v3045_v47, %v11262_v8  ;;  %v3112_v9 = vrot.slane %v3045_v47, %v12107_v19  ;;  %v2103_v7 = vsel %vm335_vm0, %v13042_v32, 0.0  ;;  %v3116_v40 = vrot.slane %v3045_v47, %v12110_v22  ;;  %v11034_v32 = vld [vmem:[%s17801_s3 + $0x150] sm:$0x1f] }
 0x6ad   :  { %18052 = vst [vmem:[#allocation64_spill] sm:$0xff] %v13179_v49  ;;  %v2125_v23 = vmul.f32 %v13179_v49, %v11297_v27  ;;  %v2104_v35 = vsel %vm335_vm0, %v13049_v45, 0.0  ;;  %v2098_v33 = vsel %vm335_vm0, %v13003_v10, 0.0  ;;  %v13197_v62 = vmul.f32 %v11033_v2, %v3104_v63  ;;  %v3066_v45 = vpop.permute.xlu0 %3065  ;;  %v11035_v10 = vld [vmem:[%s17801_s3 + $0x158] sm:$0x1f] }
 0x6ae   :  { %v13202_v58 = vmul.f32 %v11034_v32, %v3120_v53  ;;  %v2105_v49 = vadd.f32 %v2104_v35, %v2103_v7  ;;  %v2099_v47 = vsel %vm335_vm0, %v13012_v26, 0.0  ;;  %v13210_v48 = vmul.f32 %v11035_v10, %v3124_v43  ;;  %v11036_v53 = vld [vmem:[%s17801_s3 + $0x160] sm:$0x1f]  ;;  %v11037_v26 = vld [vmem:[%s17801_s3 + $0xf0] sm:$0x1f] }
 0x6af   :  { %v2137_v5 = vsel %vm335_vm0, %v2125_v23, 0.0  ;;  %v2106_v63 = vsel %vm335_vm0, %v13054_v44, 0.0  ;;  %v2100_v2 = vadd.f32 %v2099_v47, %v2098_v33  ;;  %v13217_v7 = vmul.f32 %v11036_v53, %v3128_v39  ;;  %v3059_v44 = vpop.permute.xlu1 %3058  ;;  %v11039_v39 = vld [vmem:[%s17801_s3 + $0x100] sm:$0x1f] }
 0x6b0   :  { %2138 = vadd.xlane.f32.xlu0 %v2137_v5  ;;  %v13222_v23 = vmul.f32 %v11037_v26, %v3108_v0  ;;  %v13224_v35 = vadd.f32 %v2106_v63, %v2105_v49  ;;  %v2101_v43 = vsel %vm335_vm0, %v13037_v50, 0.0  ;;  %v11038_v5 = vld [vmem:[%s17801_s3 + $0xf8] sm:$0x1f]  ;;  %v13236_v32 = vmul.f32 %v11039_v39, %v3116_v40 }
 0x6b1   :  { %v13231_v33 = vmul.f32 %v11038_v5, %v3112_v9  ;;  %v13238_v0 = vadd.f32 %v2101_v43, %v2100_v2  ;;  %v3144_v49 = vrot.slane %v3066_v45, %v11262_v8  ;;  %v3148_v47 = vrot.slane %v3066_v45, %v12107_v19 }
 0x6b2   :  { %18053 = vst [vmem:[#allocation65_spill] sm:$0xff] %v13224_v35  ;;  %v2127_v50 = vmul.f32 %v13224_v35, %v11335_v52  ;;  %v3152_v10 = vrot.slane %v3066_v45, %v12110_v22  ;;  %v2113_v9 = vsel %vm335_vm0, %v13097_v18, 0.0  ;;  %v3132_v40 = vrot.slane %v3059_v44, %v11262_v8  ;;  %v3080_v18 = vpop.permute.xlu0 %3079  ;;  %v11040_v35 = vld [vmem:[%s17801_s3 + $0x210] sm:$0x1f] }
 0x6b3   :  { %18054 = vst [vmem:[#allocation66_spill] sm:$0xff] %v13238_v0  ;;  %v2126_v63 = vmul.f32 %v13238_v0, %v11315_v41  ;;  %v3136_v2 = vrot.slane %v3059_v44, %v12107_v19  ;;  %v2114_v53 = vsel %vm335_vm0, %v13106_v11, 0.0  ;;  %v2108_v5 = vsel %vm335_vm0, %v13063_v37, 0.0  ;;  %v11041_v37 = vld [vmem:[%s17801_s3 + $0x218] sm:$0x1f] }
 0x6b4   :  { %v2143_v26 = vsel %vm335_vm0, %v2127_v50, 0.0  ;;  %v2115_v43 = vadd.f32 %v2114_v53, %v2113_v9  ;;  %v2109_v45 = vsel %vm335_vm0, %v13068_v55, 0.0  ;;  %v13262_v0 = vmul.f32 %v11040_v35, %v3144_v49  ;;  %v11042_v9 = vld [vmem:[%s17801_s3 + $0x220] sm:$0x1f] }
 0x6b5   :  { %2144 = vadd.xlane.f32.xlu1 %v2143_v26  ;;  %v2140_v39 = vsel %vm335_vm0, %v2126_v63, 0.0  ;;  %v2116_v11 = vsel %vm335_vm0, %v13114_v38, 0.0  ;;  %v2110_v50 = vadd.f32 %v2109_v45, %v2108_v5  ;;  %v13269_v55 = vmul.f32 %v11041_v37, %v3148_v47  ;;  %v3073_v38 = vpop.permute.xlu1 %3072  ;;  %v11043_v26 = vld [vmem:[%s17801_s3 + $0x1b0] sm:$0x1f]  ;;  %v11044_v5 = vld [vmem:[%s17801_s3 + $0x1b8] sm:$0x1f] }
 0x6b6   :  { %2141 = vadd.xlane.f32.xlu0 %v2140_v39  ;;  %v13274_v63 = vmul.f32 %v11042_v9, %v3152_v10  ;;  %v13276_v53 = vadd.f32 %v2116_v11, %v2115_v43  ;;  %v2111_v35 = vsel %vm335_vm0, %v13076_v16, 0.0  ;;  %v3140_v49 = vrot.slane %v3059_v44, %v12110_v22 }
 0x6b7   :  { %v13284_v47 = vmul.f32 %v11043_v26, %v3132_v40  ;;  %v13289_v10 = vmul.f32 %v11044_v5, %v3136_v2  ;;  %v13291_v43 = vadd.f32 %v2111_v35, %v2110_v50  ;;  %v3168_v45 = vrot.slane %v3080_v18, %v11262_v8  ;;  %v4149_v26 = vpop.permute.xlu0 %4148  ;;  %v11045_v5 = vld [vmem:[%s17801_s3 + $0x1c0] sm:$0x1f] }
 0x6b8   :  { %18055 = vst [vmem:[#allocation67_spill] sm:$0xff] %v13276_v53  ;;  %v2129_v16 = vmul.f32 %v13276_v53, %v11372_v15  ;;  %v3172_v44 = vrot.slane %v3080_v18, %v12107_v19  ;;  %v3176_v39 = vrot.slane %v3080_v18, %v12110_v22  ;;  %v3156_v11 = vrot.slane %v3073_v38, %v11262_v8 }
 0x6b9   :  { %18056 = vst [vmem:[#allocation68_spill] sm:$0xff] %v13291_v43  ;;  %v2128_v40 = vmul.f32 %v13291_v43, %v11353_v1  ;;  %v3160_v37 = vrot.slane %v3073_v38, %v12107_v19  ;;  %v3201_v2 = vsel %vm335_vm0, %v13152_v36, 0.0  ;;  %v3164_v9 = vrot.slane %v3073_v38, %v12110_v22 }
 0x6ba   :  { %v2149_v50 = vsel %vm335_vm0, %v2129_v16, 0.0  ;;  %v3202_v35 = vsel %vm335_vm0, %v13157_v12, 0.0  ;;  %v2118_v18 = vsel %vm335_vm0, %v13123_v59, 0.0  ;;  %v13313_v53 = vmul.f32 %v11045_v5, %v3140_v49  ;;  %v11046_v12 = vld [vmem:[%s17801_s3 + $0x2d0] sm:$0x1f] }
 0x6bb   :  { %2150 = vadd.xlane.f32.xlu1 %v2149_v50  ;;  %v2146_v36 = vsel %vm335_vm0, %v2128_v40, 0.0  ;;  %v3203_v43 = vadd.f32 %v3202_v35, %v3201_v2  ;;  %v2119_v38 = vsel %vm335_vm0, %v13133_v31, 0.0  ;;  %v13321_v59 = vmul.f32 %v11046_v12, %v3168_v45  ;;  %v11047_v16 = vld [vmem:[%s17801_s3 + $0x2d8] sm:$0x1f]  ;;  %v4156_v50 = vpop.permute.xlu1 %4155  ;;  %v11048_v31 = vld [vmem:[%s17801_s3 + $0x2e0] sm:$0x1f] }
 0x6bc   :  { %2147 = vadd.xlane.f32.xlu0 %v2146_v36  ;;  %v13326_v49 = vmul.f32 %v11047_v16, %v3172_v44  ;;  %v3204_v40 = vsel %vm335_vm0, %v13164_v20, 0.0  ;;  %v2120_v2 = vadd.f32 %v2119_v38, %v2118_v18  ;;  %v13333_v35 = vmul.f32 %v11048_v31, %v3176_v39  ;;  %v11049_v45 = vld [vmem:[%s17801_s3 + $0x270] sm:$0x1f]  ;;  %v11050_v20 = vld [vmem:[%s17801_s3 + $0x278] sm:$0x1f] }
 0x6bd   :  { %v13338_v5 = vmul.f32 %v11049_v45, %v3156_v11  ;;  %v13340_v36 = vadd.f32 %v3204_v40, %v3203_v43  ;;  %v2121_v44 = vsel %vm335_vm0, %v13142_v24, 0.0  ;;  %v13347_v18 = vmul.f32 %v11050_v20, %v3160_v37  ;;  %v11051_v39 = vld [vmem:[%s17801_s3 + $0x280] sm:$0x1f]  ;;  %v4163_v45 = vpop.permute.xlu0 %4162 }
 0x6be   :  { %v13352_v38 = vmul.f32 %v11051_v39, %v3164_v9  ;;  %v13354_v12 = vadd.f32 %v2121_v44, %v2120_v2  ;;  %v4202_v43 = vrot.slane %v4149_v26, %v11262_v8  ;;  %v4206_v24 = vrot.slane %v4149_v26, %v12107_v19 }
 0x6bf   :  { %18057 = vst [vmem:[#allocation69_spill] sm:$0xff] %v13340_v36  ;;  %v3241_v11 = vmul.f32 %v13340_v36, %v11275_v14  ;;  %v4210_v16 = vrot.slane %v4149_v26, %v12110_v22  ;;  %v4214_v37 = vrot.slane %v4156_v50, %v11262_v8  ;;  %v4218_v31 = vrot.slane %v4156_v50, %v12107_v19 }
 0x6c0   :  { %18058 = vst [vmem:[#allocation70_spill] sm:$0xff] %v13354_v12  ;;  %v2130_v40 = vmul.f32 %v13354_v12, %v11389_v29  ;;  %v3216_v9 = vsel %vm335_vm0, %v13202_v58, 0.0  ;;  %v3217_v2 = vsel %vm335_vm0, %v13210_v48, 0.0  ;;  %v3206_v26 = vsel %vm335_vm0, %v13172_v51, 0.0  ;;  %v11052_v48 = vld [vmem:[%s17801_s3 + $0x48] sm:$0x1f] }
 0x6c1   :  { %v3249_v44 = vsel %vm335_vm0, %v3241_v11, 0.0  ;;  %v3218_v20 = vadd.f32 %v3217_v2, %v3216_v9  ;;  %v3207_v39 = vsel %vm335_vm0, %v13177_v56, 0.0  ;;  %v4222_v12 = vrot.slane %v4156_v50, %v12110_v22  ;;  %v11053_v51 = vld [vmem:[%s17801_s3 + $0x50] sm:$0x1f] }
 0x6c2   :  { %3250 = vadd.xlane.f32.xlu1 %v3249_v44  ;;  %v2152_v36 = vsel %vm335_vm0, %v2130_v40, 0.0  ;;  %v3219_v58 = vsel %vm335_vm0, %v13217_v7, 0.0  ;;  %v3208_v13 = vadd.f32 %v3207_v39, %v3206_v26  ;;  %v13381_v11 = vmul.f32 %v11052_v48, %v4202_v43  ;;  %v4170_v7 = vpop.permute.xlu1 %4169  ;;  %v11055_v43 = vld [vmem:[%s17801_s3 + $0xa8] sm:$0x1f] }
 0x6c3   :  { %2153 = vadd.xlane.f32.xlu0 %v2152_v36  ;;  %v13386_v56 = vmul.f32 %v11053_v51, %v4206_v24  ;;  %v13388_v40 = vadd.f32 %v3219_v58, %v3218_v20  ;;  %v3209_v50 = vsel %vm335_vm0, %v13197_v62, 0.0  ;;  %v11054_v36 = vld [vmem:[%s17801_s3 + $0x58] sm:$0x1f]  ;;  %v13400_v2 = vmul.f32 %v11055_v43, %v4214_v37  ;;  %v11056_v24 = vld [vmem:[%s17801_s3 + $0xb0] sm:$0x1f] }
 0x6c4   :  { %v13395_v9 = vmul.f32 %v11054_v36, %v4210_v16  ;;  %v13405_v44 = vmul.f32 %v11056_v24, %v4218_v31  ;;  %v13407_v62 = vadd.f32 %v3209_v50, %v3208_v13  ;;  %v4226_v16 = vrot.slane %v4163_v45, %v11262_v8  ;;  %v4177_v31 = vpop.permute.xlu0 %4176  ;;  %v11057_v43 = vld [vmem:[%s17801_s3 + $0xb8] sm:$0x1f] }
 0x6c5   :  { %18059 = vst [vmem:[#allocation71_spill] sm:$0xff] %v13388_v40  ;;  %v3244_v20 = vmul.f32 %v13388_v40, %v11315_v41  ;;  %v4230_v26 = vrot.slane %v4163_v45, %v12107_v19  ;;  %v4234_v39 = vrot.slane %v4163_v45, %v12110_v22  ;;  %v4238_v58 = vrot.slane %v4170_v7, %v11262_v8 }
 0x6c6   :  { %18060 = vst [vmem:[#allocation72_spill] sm:$0xff] %v13407_v62  ;;  %v3242_v37 = vmul.f32 %v13407_v62, %v11285_v21  ;;  %v4242_v48 = vrot.slane %v4170_v7, %v12107_v19  ;;  %v3226_v13 = vsel %vm335_vm0, %v13262_v0, 0.0  ;;  %v4246_v50 = vrot.slane %v4170_v7, %v12110_v22 }
 0x6c7   :  { %v3258_v51 = vsel %vm335_vm0, %v3244_v20, 0.0  ;;  %v3227_v36 = vsel %vm335_vm0, %v13269_v55, 0.0  ;;  %v3211_v45 = vsel %vm335_vm0, %v13222_v23, 0.0  ;;  %v13429_v24 = vmul.f32 %v11057_v43, %v4222_v12  ;;  %v11058_v55 = vld [vmem:[%s17801_s3 + $0x108] sm:$0x1f] }
 0x6c8   :  { %3259 = vadd.xlane.f32.xlu1 %v3258_v51  ;;  %v3252_v0 = vsel %vm335_vm0, %v3242_v37, 0.0  ;;  %v3228_v40 = vadd.f32 %v3227_v36, %v3226_v13  ;;  %v3212_v20 = vsel %vm335_vm0, %v13231_v33, 0.0  ;;  %v13437_v7 = vmul.f32 %v11058_v55, %v4226_v16  ;;  %v11059_v23 = vld [vmem:[%s17801_s3 + $0x110] sm:$0x1f]  ;;  %v13446_v51 = vpop.permute.xlu1 %4183  ;;  %v11060_v33 = vld [vmem:[%s17801_s3 + $0x118] sm:$0x1f] }
 0x6c9   :  { %3253 = vadd.xlane.f32.xlu0 %v3252_v0  ;;  %v13442_v12 = vmul.f32 %v11059_v23, %v4230_v26  ;;  %v3229_v37 = vsel %vm335_vm0, %v13274_v63, 0.0  ;;  %v3213_v13 = vadd.f32 %v3212_v20, %v3211_v45  ;;  %v13451_v36 = vmul.f32 %v11060_v33, %v4234_v39  ;;  %v11061_v16 = vld [vmem:[%s17801_s3 + $0x168] sm:$0x1f]  ;;  %v11062_v45 = vld [vmem:[%s17801_s3 + $0x170] sm:$0x1f] }
 0x6ca   :  { %v13456_v43 = vmul.f32 %v11061_v16, %v4238_v58  ;;  %v13458_v26 = vadd.f32 %v3229_v37, %v3228_v40  ;;  %v3214_v63 = vsel %vm335_vm0, %v13236_v32, 0.0  ;;  %v13465_v0 = vmul.f32 %v11062_v45, %v4242_v48  ;;  %v11063_v39 = vld [vmem:[%s17801_s3 + $0x178] sm:$0x1f]  ;;  %v4191_v37 = vpop.permute.xlu0 %4190 }
 0x6cb   :  { %v13470_v20 = vmul.f32 %v11063_v39, %v4246_v50  ;;  %v13472_v55 = vadd.f32 %v3214_v63, %v3213_v13  ;;  %v4250_v40 = vrot.slane %v4177_v31, %v11262_v8  ;;  %v4254_v32 = vrot.slane %v4177_v31, %v12107_v19 }
 0x6cc   :  { %18061 = vst [vmem:[#allocation73_spill] sm:$0xff] %v13458_v26  ;;  %v3246_v58 = vmul.f32 %v13458_v26, %v11353_v1  ;;  %v4258_v23 = vrot.slane %v4177_v31, %v12110_v22  ;;  %v4262_v48 = vrot.slane %v13446_v51, %v11262_v8  ;;  %v4266_v50 = vrot.slane %v13446_v51, %v12107_v19 }
 0x6cd   :  { %18062 = vst [vmem:[#allocation74_spill] sm:$0xff] %v13472_v55  ;;  %v3243_v33 = vmul.f32 %v13472_v55, %v11297_v27  ;;  %v3236_v13 = vsel %vm335_vm0, %v13321_v59, 0.0  ;;  %v3237_v16 = vsel %vm335_vm0, %v13326_v49, 0.0  ;;  %v3221_v31 = vsel %vm335_vm0, %v13284_v47, 0.0 }
 0x6ce   :  { %v3264_v63 = vsel %vm335_vm0, %v3246_v58, 0.0  ;;  %v3238_v45 = vadd.f32 %v3237_v16, %v3236_v13  ;;  %v3222_v39 = vsel %vm335_vm0, %v13289_v10, 0.0  ;;  %v3239_v55 = vsel %vm335_vm0, %v13333_v35, 0.0  ;;  %v11064_v10 = vld [vmem:[%s17801_s3 + $0x1c8] sm:$0x1f] }
 0x6cf   :  { %3265 = vadd.xlane.f32.xlu1 %v3264_v63  ;;  %v3255_v26 = vsel %vm335_vm0, %v3243_v33, 0.0  ;;  %v3223_v62 = vadd.f32 %v3222_v39, %v3221_v31  ;;  %v4274_v59 = vrot.slane %v4191_v37, %v11262_v8  ;;  %v3224_v58 = vsel %vm335_vm0, %v13313_v53, 0.0  ;;  %v11065_v35 = vld [vmem:[%s17801_s3 + $0x1d0] sm:$0x1f]  ;;  %v11066_v53 = vld [vmem:[%s17801_s3 + $0x1d8] sm:$0x1f] }
 0x6d0   :  { %3256 = vadd.xlane.f32.xlu0 %v3255_v26  ;;  %v13498_v49 = vadd.f32 %v3239_v55, %v3238_v45  ;;  %v4278_v47 = vrot.slane %v4191_v37, %v12107_v19  ;;  %v4282_v13 = vrot.slane %v4191_v37, %v12110_v22  ;;  %v4307_v33 = vmul.f32 %v11064_v10, %v4250_v40  ;;  %v11067_v63 = vld [vmem:[%s17801_s3 + $0x228] sm:$0x1f]  ;;  %v11068_v45 = vld [vmem:[%s17801_s3 + $0x230] sm:$0x1f]  ;;  %v11071_v10 = vld [vmem:[%s17801_s3 + $0x298] sm:$0x1f] }
 0x6d1   :  { %v4308_v16 = vmul.f32 %v11065_v35, %v4254_v32  ;;  %v4270_v26 = vrot.slane %v13446_v51, %v12110_v22  ;;  %v13512_v55 = vadd.f32 %v3224_v58, %v3223_v62  ;;  %v4309_v37 = vmul.f32 %v11066_v53, %v4258_v23  ;;  %v11069_v23 = vld [vmem:[%s17801_s3 + $0x288] sm:$0x1f] }
 0x6d2   :  { %18063 = vst [vmem:[#allocation75_spill] sm:$0xff] %v13498_v49  ;;  %v4310_v40 = vmul.f32 %v11067_v63, %v4262_v48  ;;  %v4311_v32 = vmul.f32 %v11068_v45, %v4266_v50  ;;  %v3248_v51 = vmul.f32 %v13498_v49, %v11389_v29  ;;  %v4313_v31 = vmul.f32 %v11069_v23, %v4274_v59  ;;  %v11070_v48 = vld [vmem:[%s17801_s3 + $0x290] sm:$0x1f] }
 0x6d3   :  { %18064 = vst [vmem:[#allocation76_spill] sm:$0xff] %v13512_v55  ;;  %v3245_v62 = vmul.f32 %v13512_v55, %v11335_v52  ;;  %v4314_v39 = vmul.f32 %v11070_v48, %v4278_v47  ;;  %v3231_v58 = vsel %vm335_vm0, %v13338_v5, 0.0  ;;  %v4315_v35 = vmul.f32 %v11071_v10, %v4282_v13 }
 0x6d4   :  { %v3270_v50 = vsel %vm335_vm0, %v3248_v51, 0.0  ;;  %v3232_v53 = vsel %vm335_vm0, %v13347_v18, 0.0  ;;  %v4324_v59 = vsel %vm335_vm0, %v13400_v2, 0.0  ;;  %v3234_v5 = vsel %vm335_vm0, %v13352_v38, 0.0 }
 0x6d5   :  { %3271 = vadd.xlane.f32.xlu1 %v3270_v50  ;;  %v3261_v63 = vsel %vm335_vm0, %v3245_v62, 0.0  ;;  %v3233_v47 = vadd.f32 %v3232_v53, %v3231_v58  ;;  %v4325_v45 = vsel %vm335_vm0, %v13405_v44, 0.0  ;;  %v4327_v13 = vsel %vm335_vm0, %v13429_v24, 0.0 }
 0x6d6   :  { %3262 = vadd.xlane.f32.xlu0 %v3261_v63  ;;  %v4326_v51 = vadd.f32 %v4325_v45, %v4324_v59  ;;  %v4319_v18 = vsel %vm335_vm0, %v13381_v11, 0.0  ;;  %v4320_v2 = vsel %vm335_vm0, %v13386_v56, 0.0  ;;  %v4329_v38 = vsel %vm335_vm0, %v13437_v7, 0.0  ;;  %v11072_v45 = vld [vmem:[%s17801_s3 + $0x238] sm:$0x1f] }
 0x6d7   :  { %v13554_v23 = vadd.f32 %v3234_v5, %v3233_v47  ;;  %v4321_v62 = vadd.f32 %v4320_v2, %v4319_v18  ;;  %v4330_v44 = vsel %vm335_vm0, %v13442_v12, 0.0  ;;  %v4322_v24 = vsel %vm335_vm0, %v13395_v9, 0.0 }
 0x6d8   :  { %v13560_v48 = vadd.f32 %v4327_v13, %v4326_v51  ;;  %v4331_v58 = vadd.f32 %v4330_v44, %v4329_v38  ;;  %v4339_v11 = vsel %vm335_vm0, %v4307_v33, 0.0  ;;  %v4332_v10 = vsel %vm335_vm0, %v13451_v36, 0.0 }
 0x6d9   :  { %18065 = vst [vmem:[#allocation77_spill] sm:$0xff] %v13554_v23  ;;  %v3247_v56 = vmul.f32 %v13554_v23, %v11372_v15  ;;  %v13567_v50 = vadd.f32 %v4322_v24, %v4321_v62  ;;  %v4340_v7 = vsel %vm335_vm0, %v4308_v16, 0.0  ;;  %v4349_v9 = vsel %vm335_vm0, %v4313_v31, 0.0  ;;  %v4198_v24 = vpop.permute.xlu1 %4197 }
 0x6da   :  { %18066 = vst [vmem:[#allocation78_spill] sm:$0xff] %v13560_v48  ;;  %v4360_v12 = vmul.f32 %v13560_v48, %v11285_v21  ;;  %v13574_v53 = vadd.f32 %v4332_v10, %v4331_v58  ;;  %v4341_v59 = vadd.f32 %v4340_v7, %v4339_v11  ;;  %v4342_v47 = vsel %vm335_vm0, %v4309_v37, 0.0 }
 0x6db   :  { %18067 = vst [vmem:[#allocation79_spill] sm:$0xff] %v13567_v50  ;;  %v3267_v33 = vsel %vm335_vm0, %v3247_v56, 0.0  ;;  %v4359_v63 = vmul.f32 %v13567_v50, %v11275_v14  ;;  %v4350_v5 = vsel %vm335_vm0, %v4314_v39, 0.0  ;;  %v4312_v31 = vmul.f32 %v11072_v45, %v4270_v26 }
 0x6dc   :  { %18068 = vst [vmem:[#allocation80_spill] sm:$0xff] %v13574_v53  ;;  %3268 = vadd.xlane.f32.xlu0 %v3267_v33  ;;  %v4370_v36 = vsel %vm335_vm0, %v4360_v12, 0.0  ;;  %v13583_v16 = vadd.f32 %v4342_v47, %v4341_v59  ;;  %v4351_v21 = vadd.f32 %v4350_v5, %v4349_v9  ;;  %v4352_v51 = vsel %vm335_vm0, %v4315_v35, 0.0  ;;  %v11073_v47 = vld [vmem:[%s17801_s3 + $0x2e8] sm:$0x1f] }
 0x6dd   :  { %4371 = vadd.xlane.f32.xlu1 %v4370_v36  ;;  %v4334_v14 = vsel %vm335_vm0, %v13456_v43, 0.0  ;;  %v4335_v37 = vsel %vm335_vm0, %v13465_v0, 0.0  ;;  %v4361_v39 = vmul.f32 %v13574_v53, %v11297_v27  ;;  %v4367_v26 = vsel %vm335_vm0, %v4359_v63, 0.0  ;;  %v10555_v43 = vld [vmem:[%s17802_s4 + $0x4a8] sm:$0x1f] }
 0x6de   :  { %18069 = vst [vmem:[#allocation81_spill] sm:$0xff] %v13583_v16  ;;  %v4363_v13 = vmul.f32 %v13583_v16, %v11335_v52  ;;  %v13597_v18 = vadd.f32 %v4352_v51, %v4351_v21  ;;  %v4336_v2 = vadd.f32 %v4335_v37, %v4334_v14  ;;  %v4337_v35 = vsel %vm335_vm0, %v13470_v20, 0.0  ;;  %v10544_v63 = vld [vmem:[%s17802_s4 + $0x450] sm:$0x1f]  ;;  %v10534_v14 = vld [vmem:[%s17802_s4 + $0x400] sm:$0x1f] }
 0x6df   :  { %v4344_v0 = vsel %vm335_vm0, %v4310_v40, 0.0  ;;  %v4345_v62 = vsel %vm335_vm0, %v4311_v32, 0.0  ;;  %v6146_v58 = vmul.f32 %v10555_v43, %v12476_v42  ;;  %v4347_v11 = vsel %vm335_vm0, %v4312_v31, 0.0  ;;  %v11074_v36 = vld [vmem:[%s17801_s3 + $0x2f0] sm:$0x1f] }
 0x6e0   :  { %18070 = vst [vmem:[#allocation82_spill] sm:$0xff] %v13597_v18  ;;  %4368 = vadd.xlane.f32.xlu0 %v4367_v26  ;;  %v4379_v27 = vsel %vm335_vm0, %v4363_v13, 0.0  ;;  %v4365_v52 = vmul.f32 %v13597_v18, %v11372_v15  ;;  %v13610_v38 = vadd.f32 %v4337_v35, %v4336_v2  ;;  %v4346_v44 = vadd.f32 %v4345_v62, %v4344_v0  ;;  %v10566_v15 = vld [vmem:[%s17802_s4 + $0x500] sm:$0x1f]  ;;  %v11075_v43 = vld [vmem:[%s17801_s3 + $0x2f8] sm:$0x1f] }
 0x6e1   :  { %4380 = vadd.xlane.f32.xlu1 %v4379_v27  ;;  %v4373_v40 = vsel %vm335_vm0, %v4361_v39, 0.0  ;;  %v4286_v10 = vrot.slane %v4198_v24, %v11262_v8  ;;  %v4290_v7 = vrot.slane %v4198_v24, %v12107_v19  ;;  %v6198_v12 = vsel %vm335_vm0, %v6146_v58, 0.0  ;;  %v10511_v39 = vld [vmem:[%s17802_s4 + $0x348] sm:$0x1f] }
 0x6e2   :  { %18071 = vst [vmem:[#allocation83_spill] sm:$0xff] %v13610_v38  ;;  %v4385_v20 = vsel %vm335_vm0, %v4365_v52, 0.0  ;;  %v4362_v32 = vmul.f32 %v13610_v38, %v11315_v41  ;;  %v13618_v56 = vadd.f32 %v4347_v11, %v4346_v44  ;;  %v6148_v59 = vmul.f32 %v10566_v15, %v12588_v6  ;;  %v10565_v41 = vld [vmem:[%s17802_s4 + $0x4f8] sm:$0x1f]  ;;  %v10523_v44 = vld [vmem:[%s17802_s4 + $0x3a8] sm:$0x1f] }
 0x6e3   :  { %v4316_v5 = vmul.f32 %v11073_v47, %v4286_v10  ;;  %v4317_v21 = vmul.f32 %v11074_v36, %v4290_v7  ;;  %v6147_v45 = vmul.f32 %v10565_v41, %v12588_v6  ;;  %v7258_v51 = vmul.f32 %v10544_v63, %v12376_v46  ;;  %v10545_v52 = vld [vmem:[%s17802_s4 + $0x458] sm:$0x1f]  ;;  %v10564_v7 = vld [vmem:[%s17802_s4 + $0x4f0] sm:$0x1f]  ;;  %v10575_v63 = vld [vmem:[%s17802_s4 + $0x548] sm:$0x1f] }
 0x6e4   :  { %18072 = vst [vmem:[#allocation84_spill] sm:$0xff] %v13618_v56  ;;  %4374 = vadd.xlane.f32.xlu0 %v4373_v40  ;;  %v4376_v9 = vsel %vm335_vm0, %v4362_v32, 0.0  ;;  %v4364_v33 = vmul.f32 %v13618_v56, %v11353_v1  ;;  %v4294_v1 = vrot.slane %v4198_v24, %v12110_v22  ;;  %v6204_v31 = vsel %vm335_vm0, %v6148_v59, 0.0  ;;  %v18086_v56 = vld [vmem:[#allocation31_spill] sm:$0xff] }
 0x6e5   :  { %4386 = vadd.xlane.f32.xlu1 %v4385_v20  ;;  %v4354_v13 = vsel %vm335_vm0, %v4316_v5, 0.0  ;;  %v4355_v2 = vsel %vm335_vm0, %v4317_v21, 0.0  ;;  %v6201_v26 = vsel %vm335_vm0, %v6147_v45, 0.0  ;;  %v7257_v35 = vmul.f32 %v10534_v14, %v12325_v60  ;;  %v10524_v21 = vld [vmem:[%s17802_s4 + $0x3b0] sm:$0x1f] }
 0x6e6   :  { %v4382_v37 = vsel %vm335_vm0, %v4364_v33, 0.0  ;;  %v4318_v0 = vmul.f32 %v11075_v43, %v4294_v1  ;;  %v7300_v62 = vsel %vm335_vm0, %v7258_v51, 0.0  ;;  %v8366_v27 = vmul.f32 %v10511_v39, %v12312_v34  ;;  %v10546_v39 = vld [vmem:[%s17802_s4 + $0x460] sm:$0x1f]  ;;  %v10567_v43 = vld [vmem:[%s17802_s4 + $0x508] sm:$0x1f] }
 0x6e7   :  { %v4356_v24 = vadd.f32 %v4355_v2, %v4354_v13  ;;  %v7297_v20 = vsel %vm335_vm0, %v7257_v35, 0.0  ;;  %v7259_v58 = vmul.f32 %v10545_v52, %v12376_v46  ;;  %v8369_v40 = vmul.f32 %v10523_v44, %v12353_v17 }
 0x6e8   :  { %4377 = vadd.xlane.f32.xlu0 %v4376_v9  ;;  %v8390_v11 = vsel %vm335_vm0, %v8366_v27, 0.0  ;;  %v4357_v32 = vsel %vm335_vm0, %v4318_v0, 0.0  ;;  %v4972_v15 = vcombine.high %v12457_v61, %v12457_v61  ;;  %v5032_v41 = vmul.f32 %v10564_v7, %v12588_v6  ;;  %v10512_v9 = vld [vmem:[%s17802_s4 + $0x350] sm:$0x1f]  ;;  %v10557_v0 = vld [vmem:[%s17802_s4 + $0x4b8] sm:$0x1f] }
 0x6e9   :  { %6199 = vadd.xlane.f32.xlu1 %v6198_v12  ;;  %v13675_v10 = vadd.f32 %v4357_v32, %v4356_v24  ;;  %v7303_v12 = vsel %vm335_vm0, %v7259_v58, 0.0  ;;  %v8399_v59 = vsel %vm335_vm0, %v8369_v40, 0.0  ;;  %v8367_v47 = vmul.f32 %v10512_v9, %v12312_v34  ;;  %v10578_v24 = vld [vmem:[%s17802_s4 + $0x560] sm:$0x1f] }
 0x6ea   :  { %v13687_v61 = vrot.slane %v4972_v15, %v11262_v8  ;;  %v5090_v5 = vsel %vm335_vm0, %v5032_v41, 0.0  ;;  %v7260_v35 = vmul.f32 %v10546_v39, %v12376_v46  ;;  %v6149_v27 = vmul.f32 %v10567_v43, %v12588_v6  ;;  %v10556_v15 = vld [vmem:[%s17802_s4 + $0x4b0] sm:$0x1f] }
 0x6eb   :  { %18073 = vst [vmem:[#allocation85_spill] sm:$0xff] %v13675_v10  ;;  %v4366_v33 = vmul.f32 %v13675_v10, %v11389_v29  ;;  %v10577_v29 = vld [vmem:[%s17802_s4 + $0x558] sm:$0x1f]  ;;  %v8393_v1 = vsel %vm335_vm0, %v8367_v47, 0.0  ;;  %v7262_v44 = vmul.f32 %v10557_v0, %v12476_v42  ;;  %v4974_v7 = vcombine.high %v12576_v54, %v12576_v54  ;;  %v10586_v47 = vld [vmem:[%s17802_s4 + $0x5a0] sm:$0x1f] }
 0x6ec   :  { %4383 = vadd.xlane.f32.xlu0 %v4382_v37  ;;  %18074 = vst [vmem:[#allocation86_spill] sm:$0xff] %v13687_v61  ;;  %v5034_v36 = vmul.f32 %v10575_v63, %v13687_v61  ;;  %v6150_v14 = vmul.f32 %v10577_v29, %v13687_v61  ;;  %v10574_v37 = vld [vmem:[%s17802_s4 + $0x540] sm:$0x1f]  ;;  %v7306_v52 = vsel %vm335_vm0, %v7260_v35, 0.0  ;;  %v6207_v58 = vsel %vm335_vm0, %v6149_v27, 0.0 }
 0x6ed   :  { %6205 = vadd.xlane.f32.xlu1 %v6204_v31  ;;  %v4388_v45 = vsel %vm335_vm0, %v4366_v33, 0.0  ;;  %v8370_v31 = vmul.f32 %v10524_v21, %v12353_v17  ;;  %v5033_v2 = vmul.f32 %v10574_v37, %v13687_v61  ;;  %v7312_v40 = vsel %vm335_vm0, %v7262_v44, 0.0  ;;  %v10513_v63 = vld [vmem:[%s17802_s4 + $0x358] sm:$0x1f]  ;;  %v10535_v29 = vld [vmem:[%s17802_s4 + $0x408] sm:$0x1f] }
 0x6ee   :  { %v5096_v51 = vsel %vm335_vm0, %v5034_v36, 0.0  ;;  %v7261_v41 = vmul.f32 %v10556_v15, %v12476_v42  ;;  %v13754_v54 = vrot.slane %v4974_v7, %v11262_v8  ;;  %v8368_v36 = vmul.f32 %v10513_v63, %v12312_v34  ;;  %v10576_v39 = vld [vmem:[%s17802_s4 + $0x550] sm:$0x1f]  ;;  %v10587_v0 = vld [vmem:[%s17802_s4 + $0x5a8] sm:$0x1f] }
 0x6ef   :  { %v8402_v13 = vsel %vm335_vm0, %v8370_v31, 0.0  ;;  %v6275_v16 = vrot.slane %v18086_v56, %v11524_v57 }
 0x6f0   :  { %6202 = vadd.xlane.f32.xlu0 %v6201_v26  ;;  %v6210_v26 = vsel %vm335_vm0, %v6150_v14, 0.0  ;;  %18075 = vst [vmem:[#allocation87_spill] sm:$0xff] %v13754_v54  ;;  %v8396_v31 = vsel %vm335_vm0, %v8368_v36, 0.0 }
 0x6f1   :  { %7301 = vadd.xlane.f32.xlu1 %v7300_v62  ;;  %v5093_v62 = vsel %vm335_vm0, %v5033_v2, 0.0 }
 0x6f4   :  { %7298 = vadd.xlane.f32.xlu0 %v7297_v20  ;;  %v10525_v20 = vld [vmem:[%s17802_s4 + $0x3b8] sm:$0x1f] }
 0x6f5   :  { %8391 = vadd.xlane.f32.xlu1 %v8390_v11  ;;  %v6151_v11 = vmul.f32 %v10578_v24, %v13687_v61  ;;  %v8371_v32 = vmul.f32 %v10525_v20, %v12353_v17 }
 0x6f7   :  { %v8405_v9 = vsel %vm335_vm0, %v8371_v32, 0.0 }
 0x6f8   :  { %7304 = vadd.xlane.f32.xlu0 %v7303_v12  ;;  %v10536_v12 = vld [vmem:[%s17802_s4 + $0x410] sm:$0x1f] }
 0x6f9   :  { %8400 = vadd.xlane.f32.xlu1 %v8399_v59  ;;  %v6213_v59 = vsel %vm335_vm0, %v6151_v11, 0.0  ;;  %v8373_v33 = vmul.f32 %v10536_v12, %v12325_v60  ;;  %v10537_v11 = vld [vmem:[%s17802_s4 + $0x418] sm:$0x1f]  ;;  %v10558_v12 = vld [vmem:[%s17802_s4 + $0x4c0] sm:$0x1f] }
 0x6fa   :  { %v8374_v7 = vmul.f32 %v10537_v11, %v12325_v60 }
 0x6fb   :  { %v8411_v21 = vsel %vm335_vm0, %v8373_v33, 0.0  ;;  %v7263_v33 = vmul.f32 %v10558_v12, %v12476_v42 }
 0x6fc   :  { %4389 = vadd.xlane.f32.xlu0 %v4388_v45  ;;  %v5036_v45 = vmul.f32 %v10586_v47, %v13754_v54  ;;  %v8414_v63 = vsel %vm335_vm0, %v8374_v7, 0.0 }
 0x6fd   :  { %5091 = vadd.xlane.f32.xlu1 %v5090_v5  ;;  %v7309_v5 = vsel %vm335_vm0, %v7261_v41, 0.0 }
 0x6fe   :  { %v5102_v14 = vsel %vm335_vm0, %v5036_v45, 0.0  ;;  %v7315_v45 = vsel %vm335_vm0, %v7263_v33, 0.0  ;;  %v10592_v33 = vld [vmem:[%s17802_s4 + $0x5d0] sm:$0x1f] }
 0x700   :  { %8394 = vadd.xlane.f32.xlu0 %v8393_v1  ;;  %v10579_v1 = vld [vmem:[%s17802_s4 + $0x568] sm:$0x1f] }
 0x701   :  { %5097 = vadd.xlane.f32.xlu1 %v5096_v51  ;;  %v8372_v51 = vmul.f32 %v10535_v29, %v12325_v60  ;;  %v6152_v37 = vmul.f32 %v10579_v1, %v13687_v61 }
 0x703   :  { %v8408_v2 = vsel %vm335_vm0, %v8372_v51, 0.0  ;;  %v6216_v35 = vsel %vm335_vm0, %v6152_v37, 0.0  ;;  %v10580_v37 = vld [vmem:[%s17802_s4 + $0x570] sm:$0x1f] }
 0x704   :  { %8403 = vadd.xlane.f32.xlu0 %v8402_v13  ;;  %v10590_v13 = vld [vmem:[%s17802_s4 + $0x5c0] sm:$0x1f] }
 0x705   :  { %6211 = vadd.xlane.f32.xlu1 %v6210_v26  ;;  %v5035_v26 = vmul.f32 %v10576_v39, %v13687_v61  ;;  %v6154_v43 = vmul.f32 %v10590_v13, %v13754_v54 }
 0x707   :  { %v5099_v27 = vsel %vm335_vm0, %v5035_v26, 0.0  ;;  %v6222_v24 = vsel %vm335_vm0, %v6154_v43, 0.0  ;;  %v10588_v43 = vld [vmem:[%s17802_s4 + $0x5b0] sm:$0x1f] }
 0x708   :  { %5094 = vadd.xlane.f32.xlu0 %v5093_v62  ;;  %v10568_v62 = vld [vmem:[%s17802_s4 + $0x510] sm:$0x1f] }
 0x709   :  { %7307 = vadd.xlane.f32.xlu1 %v7306_v52  ;;  %v5037_v52 = vmul.f32 %v10587_v0, %v13754_v54  ;;  %v7264_v20 = vmul.f32 %v10568_v62, %v12588_v6  ;;  %v10549_v0 = vld [vmem:[%s17802_s4 + $0x478] sm:$0x1f] }
 0x70b   :  { %v7318_v15 = vsel %vm335_vm0, %v7264_v20, 0.0  ;;  %v8377_v20 = vmul.f32 %v10549_v0, %v12376_v46 }
 0x70c   :  { %6208 = vadd.xlane.f32.xlu0 %v6207_v58  ;;  %v10589_v58 = vld [vmem:[%s17802_s4 + $0x5b8] sm:$0x1f] }
 0x70d   :  { %7313 = vadd.xlane.f32.xlu1 %v7312_v40  ;;  %v5105_v40 = vsel %vm335_vm0, %v5037_v52, 0.0  ;;  %v6153_v32 = vmul.f32 %v10589_v58, %v13754_v54  ;;  %v5038_v52 = vmul.f32 %v10588_v43, %v13754_v54  ;;  %v10570_v58 = vld [vmem:[%s17802_s4 + $0x520] sm:$0x1f]  ;;  %v8423_v12 = vsel %vm335_vm0, %v8377_v20, 0.0  ;;  %v10572_v43 = vld [vmem:[%s17802_s4 + $0x530] sm:$0x1f] }
 0x70e   :  { %v8382_v20 = vmul.f32 %v10572_v43, %v12588_v6 }
 0x710   :  { %6214 = vadd.xlane.f32.xlu0 %v6213_v59  ;;  %v10548_v59 = vld [vmem:[%s17802_s4 + $0x470] sm:$0x1f] }
 0x711   :  { %8406 = vadd.xlane.f32.xlu1 %v8405_v9  ;;  %v6219_v9 = vsel %vm335_vm0, %v6153_v32, 0.0  ;;  %v8376_v47 = vmul.f32 %v10548_v59, %v12376_v46  ;;  %v5108_v32 = vsel %vm335_vm0, %v5038_v52, 0.0 }
 0x713   :  { %v13820_v36 = vpop.xlane.xlu1 %1004 }
 0x714   :  { %7310 = vadd.xlane.f32.xlu0 %v7309_v5  ;;  %v10569_v5 = vld [vmem:[%s17802_s4 + $0x518] sm:$0x1f]  ;;  %vm1027_vm14 = vcmp.ne.f32.partialorder %v13820_v36, 0.0 }
 0x715   :  { %8412 = vadd.xlane.f32.xlu1 %v8411_v21  ;;  %v10591_v21 = vld [vmem:[%s17802_s4 + $0x5c8] sm:$0x1f]  ;;  %v7265_v29 = vmul.f32 %v10569_v5, %v12588_v6 }
 0x716   :  { %v6155_v51 = vmul.f32 %v10591_v21, %v13754_v54 }
 0x717   :  { %v7321_v13 = vsel %vm335_vm0, %v7265_v29, 0.0  ;;  %v10559_v29 = vld [vmem:[%s17802_s4 + $0x4c8] sm:$0x1f] }
 0x718   :  { %8397 = vadd.xlane.f32.xlu0 %v8396_v31  ;;  %v8420_v31 = vsel %vm335_vm0, %v8376_v47, 0.0  ;;  %v6225_v26 = vsel %vm335_vm0, %v6155_v51, 0.0 }
 0x719   :  { %5103 = vadd.xlane.f32.xlu1 %v5102_v14  ;;  %v13791_v44 = vpop.xlane.xlu0 %1007  ;;  %v10547_v14 = vld [vmem:[%s17802_s4 + $0x468] sm:$0x1f] }
 0x71a   :  { %vm1028_vm15 = vcmp.ne.f32.partialorder %v13791_v44, 0.0 }
 0x71c   :  { %8409 = vadd.xlane.f32.xlu0 %v8408_v2  ;;  %v8375_v2 = vmul.f32 %v10547_v14, %v12376_v46 }
 0x71d   :  { %6217 = vadd.xlane.f32.xlu1 %v6216_v35  ;;  %v7267_v35 = vmul.f32 %v10580_v37, %v13687_v61  ;;  %v8378_v37 = vmul.f32 %v10559_v29, %v12476_v42 }
 0x71e   :  { %v13837_v39 = vpop.xlane.xlu1 %1013 }
 0x71f   :  { %v8426_v0 = vsel %vm335_vm0, %v8378_v37, 0.0  ;;  %v10594_v37 = vld [vmem:[%s17802_s4 + $0x5e0] sm:$0x1f]  ;;  %vm1030_vm11 = vcmp.ne.f32.partialorder %v13837_v39, 0.0 }
 0x720   :  { %5100 = vadd.xlane.f32.xlu0 %v5099_v27  ;;  %v13811_v41 = vpop.xlane.xlu0 %1010  ;;  %v8417_v27 = vsel %vm335_vm0, %v8375_v2, 0.0 }
 0x721   :  { %6223 = vadd.xlane.f32.xlu1 %v6222_v24  ;;  %v7327_v24 = vsel %vm335_vm0, %v7267_v35, 0.0  ;;  %v10582_v35 = vld [vmem:[%s17802_s4 + $0x580] sm:$0x1f]  ;;  %vm1029_vm10 = vcmp.ne.f32.partialorder %v13811_v41, 0.0 }
 0x724   :  { %5106 = vadd.xlane.f32.xlu0 %v5105_v40  ;;  %v10560_v40 = vld [vmem:[%s17802_s4 + $0x4d0] sm:$0x1f] }
 0x725   :  { %7319 = vadd.xlane.f32.xlu1 %v7318_v15  ;;  %v7266_v15 = vmul.f32 %v10570_v58, %v12588_v6  ;;  %v8379_v59 = vmul.f32 %v10560_v40, %v12476_v42  ;;  %v10593_v58 = vld [vmem:[%s17802_s4 + $0x5d8] sm:$0x1f] }
 0x726   :  { %v13827_v1 = vpop.xlane.xlu0 %1016  ;;  %v13858_v11 = vpop.xlane.xlu1 %1019 }
 0x727   :  { %v7324_v47 = vsel %vm335_vm0, %v7266_v15, 0.0  ;;  %v8429_v21 = vsel %vm335_vm0, %v8379_v59, 0.0  ;;  %v8438_v59 = vsel %vm335_vm0, %v8382_v20, 0.0  ;;  %vm1031_vm12 = vcmp.ne.f32.partialorder %v13827_v1, 0.0 }
 0x728   :  { %6220 = vadd.xlane.f32.xlu0 %v6219_v9  ;;  %v10581_v9 = vld [vmem:[%s17802_s4 + $0x578] sm:$0x1f] }
 0x729   :  { %8415 = vadd.xlane.f32.xlu1 %v8414_v63  ;;  %v7268_v5 = vmul.f32 %v10581_v9, %v13687_v61 }
 0x72b   :  { %v7330_v14 = vsel %vm335_vm0, %v7268_v5, 0.0  ;;  %v10584_v5 = vld [vmem:[%s17802_s4 + $0x590] sm:$0x1f] }
 0x72c   :  { %7316 = vadd.xlane.f32.xlu0 %v7315_v45  ;;  %v13875_v63 = vpop.xlane.xlu1 %1025  ;;  %v7270_v45 = vmul.f32 %v10592_v33, %v13754_v54  ;;  %v10571_v33 = vld [vmem:[%s17802_s4 + $0x528] sm:$0x1f] }
 0x72d   :  { %8421 = vadd.xlane.f32.xlu1 %v8420_v31  ;;  %v13849_v62 = vpop.xlane.xlu0 %1022  ;;  %v10561_v31 = vld [vmem:[%s17802_s4 + $0x4d8] sm:$0x1f]  ;;  %v8381_v29 = vmul.f32 %v10571_v33, %v12588_v6  ;;  %v5162_v33 = vrot.slane %v12642_v30, %v11524_v57 }
 0x72f   :  { %v8435_v43 = vsel %vm335_vm0, %v8381_v29, 0.0 }
 0x730   :  { %7322 = vadd.xlane.f32.xlu0 %v7321_v13  ;;  %v7336_v13 = vsel %vm335_vm0, %v7270_v45, 0.0 }
 0x731   :  { %6226 = vadd.xlane.f32.xlu1 %v6225_v26  ;;  %v8380_v26 = vmul.f32 %v10561_v31, %v12476_v42 }
 0x732   :  { %v13865_v7 = vpop.xlane.xlu0 %2132 }
 0x733   :  { %vm2155_vm13 = vcmp.ne.f32.partialorder %v13865_v7, 0.0 }
 0x734   :  { %8418 = vadd.xlane.f32.xlu0 %v8417_v27  ;;  %v13892_v2 = vpop.xlane.xlu1 %2135  ;;  %v7269_v27 = vmul.f32 %v10582_v35, %v13687_v61  ;;  %v5142_v35 = vrot.slane %v12646_v28, %v11524_v57  ;;  %v10597_v28 = vld [vmem:[%s17802_s4 + $0x5f8] sm:$0x1f] }
 0x735   :  { %7328 = vadd.xlane.f32.xlu1 %v7327_v24  ;;  %v8432_v24 = vsel %vm335_vm0, %v8380_v26, 0.0  ;;  %v5138_v26 = vrot.slane %v12638_v25, %v11524_v57  ;;  %v10583_v25 = vld [vmem:[%s17802_s4 + $0x588] sm:$0x1f] }
 0x736   :  { %v7333_v15 = vsel %vm335_vm0, %v7269_v27, 0.0 }
 0x738   :  { %5109 = vadd.xlane.f32.xlu0 %v5108_v32  ;;  %v10573_v32 = vld [vmem:[%s17802_s4 + $0x538] sm:$0x1f] }
 0x739   :  { %8424 = vadd.xlane.f32.xlu1 %v8423_v12  ;;  %v13887_v51 = vpop.xlane.xlu0 %2138  ;;  %v7271_v12 = vmul.f32 %v10593_v58, %v13754_v54  ;;  %v8383_v9 = vmul.f32 %v10573_v32, %v12588_v6  ;;  %v5146_v32 = vrot.slane %v12640_v4, %v11524_v57  ;;  %v10585_v4 = vld [vmem:[%s17802_s4 + $0x598] sm:$0x1f] }
 0x73a   :  { %v8386_v49 = vmul.f32 %v10585_v4, %v13687_v61 }
 0x73b   :  { %v7339_v45 = vsel %vm335_vm0, %v7271_v12, 0.0  ;;  %v8441_v31 = vsel %vm335_vm0, %v8383_v9, 0.0  ;;  %v5231_v9 = vsel %vm530_vm1, %v5142_v35, %v5138_v26  ;;  %v18079_v26 = vld [vmem:[#allocation26_spill] sm:$0xff] }
 0x73c   :  { %7325 = vadd.xlane.f32.xlu0 %v7324_v47  ;;  %v6255_v30 = vrot.slane %v18079_v26, %v11524_v57 }
 0x73d   :  { %8430 = vadd.xlane.f32.xlu1 %v8429_v21 }
 0x73e   :  { %v13910_v40 = vpop.xlane.xlu1 %2144 }
 0x73f   :  { %v13903_v52 = vpop.xlane.xlu0 %2141 }
 0x740   :  { %7331 = vadd.xlane.f32.xlu0 %v7330_v14  ;;  %v8385_v14 = vmul.f32 %v10584_v5, %v13687_v61 }
 0x741   :  { %7337 = vadd.xlane.f32.xlu1 %v7336_v13  ;;  %v10595_v13 = vld [vmem:[%s17802_s4 + $0x5e8] sm:$0x1f] }
 0x742   :  { %v8387_v58 = vmul.f32 %v10595_v13, %v13754_v54 }
 0x744   :  { %8427 = vadd.xlane.f32.xlu0 %v8426_v0  ;;  %v13927_v21 = vpop.xlane.xlu1 %2150  ;;  %v7272_v0 = vmul.f32 %v10594_v37, %v13754_v54  ;;  %v8453_v5 = vsel %vm335_vm0, %v8387_v58, 0.0  ;;  %v18078_v37 = vld [vmem:[#allocation24_spill] sm:$0xff] }
 0x745   :  { %8433 = vadd.xlane.f32.xlu1 %v8432_v24  ;;  %v13922_v47 = vpop.xlane.xlu0 %2147  ;;  %v8447_v24 = vsel %vm335_vm0, %v8385_v14, 0.0  ;;  %v5154_v13 = vrot.slane %v18078_v37, %v11524_v57  ;;  %v18083_v37 = vld [vmem:[#allocation30_spill] sm:$0xff] }
 0x746   :  { %v7342_v12 = vsel %vm335_vm0, %v7272_v0, 0.0  ;;  %v5166_v10 = vrot.slane %v18083_v37, %v11524_v57 }
 0x748   :  { %7334 = vadd.xlane.f32.xlu0 %v7333_v15  ;;  %v6259_v15 = vrot.slane %v12663_v3, %v11524_v57  ;;  %v18076_v3 = vld [vmem:[#allocation20_spill] sm:$0xff] }
 0x749   :  { %8439 = vadd.xlane.f32.xlu1 %v8438_v59  ;;  %v8384_v59 = vmul.f32 %v10583_v25, %v13687_v61  ;;  %v6263_v29 = vrot.slane %v18076_v3, %v11524_v57  ;;  %v18082_v25 = vld [vmem:[#allocation29_spill] sm:$0xff] }
 0x74b   :  { %v13948_v20 = vpop.xlane.xlu1 %3250  ;;  %v8444_v26 = vsel %vm335_vm0, %v8384_v59, 0.0  ;;  %v18087_v59 = vld [vmem:[#allocation25_spill] sm:$0xff] }
 0x74c   :  { %7340 = vadd.xlane.f32.xlu0 %v7339_v45  ;;  %v13945_v27 = vpop.xlane.xlu0 %2153  ;;  %v8389_v45 = vmul.f32 %v10597_v28, %v13754_v54  ;;  %v5158_v28 = vrot.slane %v18082_v25, %v11524_v57  ;;  %v18085_v25 = vld [vmem:[#allocation27_spill] sm:$0xff] }
 0x74d   :  { %8442 = vadd.xlane.f32.xlu1 %v8441_v31  ;;  %v18077_v31 = vld [vmem:[#allocation21_spill] sm:$0xff] }
 0x74e   :  { %v6279_v14 = vrot.slane %v18077_v31, %v11524_v57  ;;  %v5232_v31 = vsel %vm532_vm2, %v5146_v32, %v5231_v9  ;;  %v8459_v32 = vsel %vm335_vm0, %v8389_v45, 0.0  ;;  %v10596_v9 = vld [vmem:[%s17802_s4 + $0x5f0] sm:$0x1f] }
 0x750   :  { %8436 = vadd.xlane.f32.xlu0 %v8435_v43  ;;  %v18080_v43 = vld [vmem:[#allocation22_spill] sm:$0xff] }
 0x751   :  { %8448 = vadd.xlane.f32.xlu1 %v8447_v24  ;;  %v5150_v0 = vrot.slane %v18080_v43, %v11524_v57  ;;  %v18081_v24 = vld [vmem:[#allocation28_spill] sm:$0xff]  ;;  %v13987_v3 = vpop.xlane.xlu1 %3259  ;;  %v6348_v43 = vsel %vm530_vm1, %v6259_v15, %v6255_v30  ;;  %v18088_v15 = vld [vmem:[#allocation34_spill] sm:$0xff]  ;;  %v18089_v30 = vld [vmem:[#allocation33_spill] sm:$0xff] }
 0x752   :  { %v13979_v35 = vpop.xlane.xlu0 %3253  ;;  %v6271_v58 = vrot.slane %v18081_v24, %v11524_v57  ;;  %v18084_v24 = vld [vmem:[#allocation23_spill] sm:$0xff]  ;;  %v6291_v4 = vrot.slane %v18088_v15, %v11524_v57  ;;  %v5174_v37 = vrot.slane %v18089_v30, %v11524_v57  ;;  %v6349_v23 = vsel %vm532_vm2, %v6263_v29, %v6348_v43 }
 0x753   :  { %v5170_v18 = vrot.slane %v18084_v24, %v11524_v57  ;;  %v5233_v24 = vsel %vm530_vm1, %v5154_v13, %v5150_v0  ;;  %v8450_v15 = vsel %vm335_vm0, %v8386_v49, 0.0  ;;  %v8388_v13 = vmul.f32 %v10596_v9, %v13754_v54  ;;  %v18094_v49 = vld [vmem:[#allocation40_spill] sm:$0xff] }
 0x754   :  { %7343 = vadd.xlane.f32.xlu0 %v7342_v12  ;;  %v6267_v12 = vrot.slane %v18085_v25, %v11524_v57  ;;  %v18090_v25 = vld [vmem:[#allocation35_spill] sm:$0xff]  ;;  %v5234_v45 = vsel %vm532_vm2, %v5158_v28, %v5233_v24  ;;  %v5235_v0 = vsel %vm530_vm1, %v5166_v10, %v5162_v33  ;;  %v18093_v28 = vld [vmem:[#allocation37_spill] sm:$0xff]  ;;  %v18096_v24 = vld [vmem:[#allocation38_spill] sm:$0xff] }
 0x755   :  { %8454 = vadd.xlane.f32.xlu1 %v8453_v5  ;;  %v5178_v5 = vrot.slane %v18087_v59, %v11524_v57  ;;  %v7372_v56 = vrot.slane %v18090_v25, %v11524_v57  ;;  %v18091_v59 = vld [vmem:[#allocation36_spill] sm:$0xff]  ;;  %v18095_v33 = vld [vmem:[#allocation39_spill] sm:$0xff]  ;;  %v5190_v25 = vrot.slane %v18096_v24, %v11524_v57 }
 0x756   :  { %v6350_v38 = vsel %vm530_vm1, %v6271_v58, %v6267_v12  ;;  %v7384_v53 = vrot.slane %v18091_v59, %v11524_v57  ;;  %v5182_v58 = vrot.slane %v18093_v28, %v11524_v57  ;;  %v6295_v12 = vrot.slane %v18094_v49, %v11524_v57 }
 0x757   :  { %v6351_v43 = vsel %vm532_vm2, %v6275_v16, %v6350_v38  ;;  %v5237_v10 = vsel %vm530_vm1, %v5178_v5, %v5174_v37  ;;  %v6287_v9 = vrot.slane %v18095_v33, %v11524_v57  ;;  %v5236_v16 = vsel %vm532_vm2, %v5170_v18, %v5235_v0  ;;  %v18097_v38 = vld [vmem:[#allocation42_spill] sm:$0xff]  ;;  %v18099_v37 = vld [vmem:[#allocation45_spill] sm:$0xff] }
 0x758   :  { %8445 = vadd.xlane.f32.xlu0 %v8444_v26  ;;  %v18092_v26 = vld [vmem:[#allocation32_spill] sm:$0xff]  ;;  %v14029_v29 = vpop.xlane.xlu1 %3265  ;;  %v7388_v59 = vrot.slane %v18097_v38, %v11524_v57  ;;  %v6375_v5 = vsel %vm556_vm3, %v6351_v43, 0.0  ;;  %v6299_v49 = vrot.slane %v18099_v37, %v11524_v57  ;;  %v18100_v18 = vld [vmem:[#allocation41_spill] sm:$0xff]  ;;  %v18101_v38 = vld [vmem:[#allocation43_spill] sm:$0xff]  ;;  %v6354_v43 = vsel %vm530_vm1, %v6295_v12, %v6291_v4 }
 0x759   :  { %8460 = vadd.xlane.f32.xlu1 %v8459_v32  ;;  %v14020_v48 = vpop.xlane.xlu0 %3256  ;;  %v6283_v30 = vrot.slane %v18092_v26, %v11524_v57  ;;  %v5258_v32 = vsel %vm556_vm3, %v5234_v45, 0.0  ;;  %v18098_v26 = vmov 0.0   ;;  %v8456_v45 = vsel %vm335_vm0, %v8388_v13, 0.0  ;;  %v18102_v37 = vld [vmem:[#allocation49_spill] sm:$0xff] }
 0x75a   :  { %v1035_v28 = vsel %vm1027_vm14, 1.0, %v18098_v26  ;;  %v1036_v33 = vsel %vm1028_vm15, 1.0, %v18098_v26  ;;  %v7376_v0 = vrot.slane %v18100_v18, %v11524_v57  ;;  %v5186_v50 = vrot.slane %v18101_v38, %v11524_v57 }
 0x75b   :  { %v6352_v24 = vsel %vm530_vm1, %v6283_v30, %v6279_v14  ;;  %v7392_v55 = vrot.slane %v18102_v37, %v11524_v57  ;;  %v10465_v54 = vadd.f32 -1.0, %v1035_v28  ;;  %v6372_v18 = vsel %vm556_vm3, %v6349_v23, 0.0  ;;  %v18103_v23 = vld [vmem:[#allocation47_spill] sm:$0xff] }
 0x75c   :  { %8451 = vadd.xlane.f32.xlu0 %v8450_v15  ;;  %v5238_v15 = vsel %vm532_vm2, %v5182_v58, %v5237_v10  ;;  %v6353_v30 = vsel %vm532_vm2, %v6287_v9, %v6352_v24  ;;  %v10466_v58 = vadd.f32 -1.0, %v1036_v33  ;;  %v5255_v10 = vsel %vm556_vm3, %v5232_v31, 0.0  ;;  %v18105_v24 = vld [vmem:[#allocation46_spill] sm:$0xff] }
 0x75d   :  { %5259 = vadd.xlane.f32.xlu1 %v5258_v32  ;;  %v1037_v32 = vsel %vm1029_vm10, 1.0, %v18098_v26  ;;  %v7467_v38 = vsel %vm530_vm1, %v7388_v59, %v7384_v53  ;;  %v6355_v12 = vsel %vm532_vm2, %v6299_v49, %v6354_v43  ;;  %v5261_v28 = vsel %vm556_vm3, %v5236_v16, 0.0  ;;  %v18104_v59 = vld [vmem:[#allocation44_spill] sm:$0xff] }
 0x75e   :  { %v14064_v14 = vpop.xlane.xlu1 %3271  ;;  %v10467_v4 = vadd.f32 -1.0, %v1037_v32  ;;  %v14073_v37 = vsel %vm556_vm3, %v5238_v15, 0.0  ;;  %v6378_v9 = vsel %vm556_vm3, %v6353_v30, 0.0  ;;  %v14079_v31 = vsel %vm530_vm1, %v5190_v25, %v5186_v50  ;;  %v18107_v30 = vld [vmem:[#allocation53_spill] sm:$0xff] }
 0x75f   :  { %v14058_v13 = vpop.xlane.xlu0 %3262  ;;  %v6307_v53 = vrot.slane %v18103_v23, %v11524_v57  ;;  %v6303_v49 = vrot.slane %v18104_v59, %v11524_v57  ;;  %v1051_v33 = vmul.f32 9999.0, %v10465_v54  ;;  %v7468_v16 = vsel %vm532_vm2, %v7392_v55, %v7467_v38  ;;  %v18106_v55 = vld [vmem:[#allocation51_spill] sm:$0xff] }
 0x760   :  { %8457 = vadd.xlane.f32.xlu0 %v8456_v45  ;;  %v1038_v45 = vsel %vm1030_vm11, 1.0, %v18098_v26  ;;  %v7380_v15 = vrot.slane %v18105_v24, %v11524_v57  ;;  %v1052_v32 = vmul.f32 9999.0, %v10466_v58  ;;  %v6381_v50 = vsel %vm556_vm3, %v6355_v12, 0.0 }
 0x761   :  { %6376 = vadd.xlane.f32.xlu1 %v6375_v5  ;;  %v7465_v5 = vsel %vm530_vm1, %v7376_v0, %v7372_v56  ;;  %v1053_v25 = vmul.f32 9999.0, %v10467_v4  ;;  %v10468_v0 = vadd.f32 -1.0, %v1038_v45  ;;  %vm2156_vm14 = vcmp.ne.f32.partialorder %v13892_v2, 0.0 }
 0x762   :  { %v7400_v43 = vrot.slane %v18106_v55, %v11524_v57  ;;  %vm2157_vm15 = vcmp.ne.f32.partialorder %v13887_v51, 0.0  ;;  %v14103_v38 = vadd.f32 %v1051_v33, %v13820_v36  ;;  %v1039_v4 = vsel %vm1031_vm12, 1.0, %v18098_v26 }
 0x763   :  { %vm2158_vm10 = vcmp.ne.f32.partialorder %v13903_v52, 0.0  ;;  %v14108_v12 = vsel %vm530_vm1, %v6307_v53, %v6303_v49  ;;  %v14111_v45 = vadd.f32 %v1052_v32, %v13791_v44  ;;  %vm1032_vm11 = vcmp.ne.f32.partialorder %v13858_v11, 0.0  ;;  %v18109_v49 = vld [vmem:[#allocation48_spill] sm:$0xff] }
 0x764   :  { %5256 = vadd.xlane.f32.xlu0 %v5255_v10  ;;  %v7492_v10 = vsel %vm556_vm3, %v7468_v16, 0.0  ;;  %v2164_v23 = vsel %vm2156_vm14, 1.0, %v18098_v26  ;;  %v14119_v36 = vadd.f32 %v1053_v25, %v13811_v41  ;;  %v1054_v33 = vmul.f32 9999.0, %v10468_v0  ;;  %v18110_v41 = vld [vmem:[#allocation50_spill] sm:$0xff] }
 0x765   :  { %v14089_v56 = vpop.xlane.xlu0 %3268  ;;  %6379 = vadd.xlane.f32.xlu1 %v6378_v9  ;;  %v2163_v9 = vsel %vm2155_vm13, 1.0, %v18098_v26  ;;  %v7466_v44 = vsel %vm532_vm2, %v7380_v15, %v7465_v5  ;;  %v7396_v16 = vrot.slane %v18109_v49, %v11524_v57  ;;  %v10469_v24 = vadd.f32 -1.0, %v1039_v4 }
 0x766   :  { %v14094_v54 = vpop.xlane.xlu1 %4371  ;;  %18108 = vst [vmem:[#allocation20_spill] sm:$0xff] %v14119_v36  ;;  %v2166_v32 = vsel %vm2158_vm10, 1.0, %v18098_v26  ;;  %vm2159_vm12 = vcmp.ne.f32.partialorder %v13910_v40, 0.0  ;;  %v1040_v25 = vsel %vm1032_vm11, 1.0, %v18098_v26  ;;  %v10475_v0 = vadd.f32 -1.0, %v2163_v9 }
 0x767   :  { %v10476_v55 = vadd.f32 -1.0, %v2164_v23  ;;  %v1082_v5 = vrot.slane %v14111_v45, %v11524_v57  ;;  %v1078_v15 = vrot.slane %v14103_v38, %v11524_v57  ;;  %vm2160_vm13 = vcmp.ne.f32.partialorder %v13922_v47, 0.0 }
 0x768   :  { %6373 = vadd.xlane.f32.xlu0 %v6372_v18  ;;  %v2165_v18 = vsel %vm2157_vm15, 1.0, %v18098_v26  ;;  %v14144_v58 = vadd.f32 %v1054_v33, %v13837_v39  ;;  %v10478_v9 = vadd.f32 -1.0, %v2166_v32  ;;  %v1055_v61 = vmul.f32 9999.0, %v10469_v24 }
 0x769   :  { %v14116_v59 = vpop.xlane.xlu0 %4368  ;;  %6382 = vadd.xlane.f32.xlu1 %v6381_v50  ;;  %v5194_v50 = vrot.slane %v18110_v41, %v11524_v57  ;;  %v10477_v4 = vadd.f32 -1.0, %v2165_v18  ;;  %v1086_v41 = vrot.slane %v14119_v36, %v11524_v57  ;;  %v10470_v6 = vadd.f32 -1.0, %v1040_v25 }
 0x76a   :  { %v14122_v53 = vpop.xlane.xlu1 %4380  ;;  %18111 = vst [vmem:[#allocation21_spill] sm:$0xff] %v14144_v58  ;;  %v7489_v18 = vsel %vm556_vm3, %v7466_v44, 0.0  ;;  %v14151_v42 = vsel %vm530_vm1, %v7400_v43, %v7396_v16  ;;  %v2179_v46 = vmul.f32 9999.0, %v10475_v0  ;;  %v2168_v60 = vsel %vm2160_vm13, 1.0, %v18098_v26  ;;  %v18112_v43 = vld [vmem:[#allocation52_spill] sm:$0xff] }
 0x76b   :  { %vm2161_vm14 = vcmp.ne.f32.partialorder %v13927_v21, 0.0  ;;  %v1107_v39 = vsel %vm530_vm1, %v1082_v5, %v1078_v15  ;;  %v2181_v33 = vmul.f32 9999.0, %v10477_v4  ;;  %v5240_v44 = vsel %vm532_vm2, %v5194_v50, %v14079_v31 }
 0x76c   :  { %5262 = vadd.xlane.f32.xlu0 %v5261_v28  ;;  %v2167_v28 = vsel %vm2159_vm12, 1.0, %v18098_v26  ;;  %v5202_v16 = vrot.slane %v18112_v43, %v11524_v57  ;;  %v1108_v24 = vsel %vm532_vm2, %v1086_v41, %v1107_v39  ;;  %v1090_v25 = vrot.slane %v14144_v58, %v11524_v57 }
 0x76d   :  { %v14139_v49 = vpop.xlane.xlu0 %4374  ;;  %7493 = vadd.xlane.f32.xlu1 %v7492_v10  ;;  %v2180_v10 = vmul.f32 9999.0, %v10476_v55  ;;  %v10479_v32 = vadd.f32 -1.0, %v2167_v28  ;;  %v2182_v0 = vmul.f32 9999.0, %v10478_v9  ;;  %v10480_v34 = vadd.f32 -1.0, %v2168_v60 }
 0x76e   :  { %v14147_v23 = vpop.xlane.xlu1 %4386  ;;  %v2169_v5 = vsel %vm2161_vm14, 1.0, %v18098_v26  ;;  %v14169_v4 = vadd.f32 %v1055_v61, %v13827_v1  ;;  %vm1034_vm15 = vcmp.ne.f32.partialorder %v13875_v63, 0.0  ;;  %v14173_v31 = vadd.f32 %v2179_v46, %v13865_v7 }
 0x76f   :  { %v14176_v50 = vadd.f32 %v2180_v10, %v13892_v2  ;;  %vm1033_vm10 = vcmp.ne.f32.partialorder %v13849_v62, 0.0  ;;  %v14180_v60 = vadd.f32 %v2181_v33, %v13887_v51  ;;  %v14187_v1 = vadd.f32 %v2182_v0, %v13903_v52 }
 0x770   :  { %5265 = vadd.xlane.f32.xlu0 %v14073_v37  ;;  %v1056_v37 = vmul.f32 9999.0, %v10470_v6  ;;  %v2183_v6 = vmul.f32 9999.0, %v10479_v32  ;;  %v10481_v46 = vadd.f32 -1.0, %v2169_v5  ;;  %vm2162_vm11 = vcmp.ne.f32.partialorder %v13945_v27, 0.0 }
 0x771   :  { %v14157_v17 = vpop.xlane.xlu0 %4377  ;;  %18113 = vst [vmem:[#allocation24_spill] sm:$0xff] %v14176_v50  ;;  %18114 = vst [vmem:[#allocation26_spill] sm:$0xff] %v14180_v60  ;;  %v14194_v9 = vsel %vm623_vm4, %v1090_v25, %v1108_v24  ;;  %v2184_v51 = vmul.f32 9999.0, %v10480_v34  ;;  %v5267_v28 = vsel %vm556_vm3, %v5240_v44, 0.0  ;;  %v1042_v10 = vsel %vm1034_vm15, 1.0, %v18098_v26 }
 0x772   :  { %v6200_v55 = vpop.xlane.xlu1 %6199  ;;  %18115 = vst [vmem:[#allocation22_spill] sm:$0xff] %v14187_v1  ;;  %v2206_v39 = vrot.slane %v14173_v31, %v11524_v57  ;;  %v2210_v34 = vrot.slane %v14176_v50, %v11524_v57  ;;  %v2214_v33 = vrot.slane %v14180_v60, %v11524_v57  ;;  %v2170_v32 = vsel %vm2162_vm11, 1.0, %v18098_v26 }
 0x773   :  { %v6311_v15 = vrot.slane %v6200_v55, %v11524_v57  ;;  %vm3273_vm12 = vcmp.ne.f32.partialorder %v13948_v20, 0.0  ;;  %v2218_v24 = vrot.slane %v14187_v1, %v11524_v57  ;;  %v2185_v25 = vmul.f32 9999.0, %v10481_v46 }
 0x774   :  { %7490 = vadd.xlane.f32.xlu0 %v7489_v18  ;;  %v1041_v18 = vsel %vm1033_vm10, 1.0, %v18098_v26  ;;  %v10472_v55 = vadd.f32 -1.0, %v1042_v10  ;;  %v14230_v5 = vadd.f32 %v2184_v51, %v13922_v47  ;;  %vm4391_vm13 = vcmp.ne.f32.partialorder %v14116_v59, 0.0 }
 0x775   :  { %v14182_v41 = vpop.xlane.xlu0 %4383  ;;  %v6357_v61 = vsel %vm532_vm2, %v6311_v15, %v14108_v12  ;;  %v18116_v12 = vrot.slane %v18107_v30, %v11524_v57  ;;  %v14214_v30 = vadd.f32 %v2183_v6, %v13910_v40  ;;  %v10471_v40 = vadd.f32 -1.0, %v1041_v18 }
 0x776   :  { %v14190_v7 = vpop.xlane.xlu1 %6205  ;;  %v6384_v2 = vsel %vm556_vm3, %v6357_v61, 0.0  ;;  %18118 = vst [vmem:[#allocation29_spill] sm:$0xff] %v14230_v5  ;;  %v2235_v15 = vsel %vm530_vm1, %v2210_v34, %v2206_v39  ;;  %v10482_v6 = vadd.f32 -1.0, %v2170_v32  ;;  %v3281_v61 = vsel %vm3273_vm12, 1.0, %v18098_v26 }
 0x777   :  { %6385 = vadd.xlane.f32.xlu1 %v6384_v2  ;;  %v14201_v52 = vsel %vm530_vm1, %v5202_v16, %v18116_v12  ;;  %18117 = vst [vmem:[#allocation28_spill] sm:$0xff] %v14214_v30  ;;  %v14223_v16 = vadd.f32 %v1056_v37, %v13858_v11  ;;  %vm4393_vm14 = vcmp.ne.f32.partialorder %v14139_v49, 0.0  ;;  %v2236_v11 = vsel %vm532_vm2, %v2214_v33, %v2235_v15 }
 0x778   :  { %5268 = vadd.xlane.f32.xlu0 %v5267_v28  ;;  %v2222_v37 = vrot.slane %v14214_v30, %v11524_v57  ;;  %vm4392_vm15 = vcmp.ne.f32.partialorder %v14094_v54, 0.0  ;;  %vm4394_vm10 = vcmp.ne.f32.partialorder %v14157_v17, 0.0  ;;  %v2237_v46 = vsel %vm623_vm4, %v2218_v24, %v2236_v11 }
 0x779   :  { %v14218_v44 = vpop.xlane.xlu0 %6202  ;;  %v14243_v2 = vadd.f32 %v2185_v25, %v13927_v21  ;;  %v4399_v51 = vsel %vm4391_vm13, 1.0, %v18098_v26  ;;  %v2226_v18 = vrot.slane %v14230_v5, %v11524_v57  ;;  %v10484_v10 = vadd.f32 -1.0, %v3281_v61 }
 0x77a   :  { %v14227_v0 = vpop.xlane.xlu1 %7301  ;;  %vm3274_vm11 = vcmp.ne.f32.partialorder %v13979_v35, 0.0  ;;  %v4401_v39 = vsel %vm4393_vm14, 1.0, %v18098_v26  ;;  %v2186_v34 = vmul.f32 9999.0, %v10482_v6  ;;  %v4400_v33 = vsel %vm4392_vm15, 1.0, %v18098_v26 }
 0x77b   :  { %18119 = vst [vmem:[#allocation30_spill] sm:$0xff] %v14243_v2  ;;  %v4402_v21 = vsel %vm4394_vm10, 1.0, %v18098_v26  ;;  %v14257_v24 = vmul.f32 9999.0, %v10472_v55  ;;  %v10493_v25 = vadd.f32 -1.0, %v4399_v51  ;;  %vm4396_vm12 = vcmp.ne.f32.partialorder %v14182_v41, 0.0 }
 0x77c   :  { %v1057_v11 = vmul.f32 9999.0, %v10471_v40  ;;  %v10495_v6 = vadd.f32 -1.0, %v4401_v39  ;;  %vm4395_vm13 = vcmp.ne.f32.partialorder %v14122_v53, 0.0  ;;  %v10494_v55 = vadd.f32 -1.0, %v4400_v33 }
 0x77d   :  { %v7299_v47 = vpop.xlane.xlu0 %7298  ;;  %v10496_v51 = vadd.f32 -1.0, %v4402_v21  ;;  %v14271_v30 = vadd.f32 %v2186_v34, %v13945_v27  ;;  %v4404_v40 = vsel %vm4396_vm12, 1.0, %v18098_v26  ;;  %vm3276_vm14 = vcmp.ne.f32.partialorder %v13987_v3, 0.0 }
 0x77e   :  { %v7404_v28 = vrot.slane %v7299_v47, %v11524_v57  ;;  %v14247_v12 = vpop.xlane.xlu1 %8391  ;;  %v3282_v47 = vsel %vm3274_vm11, 1.0, %v18098_v26  ;;  %v4403_v50 = vsel %vm4395_vm13, 1.0, %v18098_v26  ;;  %vm3275_vm15 = vcmp.ne.f32.partialorder %v14020_v48, 0.0 }
 0x77f   :  { %18120 = vst [vmem:[#allocation23_spill] sm:$0xff] %v14271_v30  ;;  %v10485_v60 = vadd.f32 -1.0, %v3282_v47  ;;  %v4417_v33 = vmul.f32 9999.0, %v10495_v6  ;;  %vm4397_vm10 = vcmp.ne.f32.partialorder %v14147_v23, 0.0  ;;  %v2234_v34 = vrot.slane %v14271_v30, %v11524_v57 }
 0x780   :  { %v7470_v32 = vsel %vm532_vm2, %v7404_v28, %v14151_v42  ;;  %v2230_v42 = vrot.slane %v14243_v2, %v11524_v57  ;;  %v2238_v28 = vsel %vm625_vm5, %v2222_v37, %v2237_v46  ;;  %v4416_v37 = vmul.f32 9999.0, %v10494_v55 }
 0x781   :  { %v14260_v15 = vpop.xlane.xlu0 %7304  ;;  %v7495_v61 = vsel %vm556_vm3, %v7470_v32, 0.0  ;;  %v3297_v32 = vmul.f32 9999.0, %v10484_v10  ;;  %v2239_v39 = vsel %vm627_vm6, %v2226_v18, %v2238_v28  ;;  %v4418_v46 = vmul.f32 9999.0, %v10496_v51 }
 0x782   :  { %7496 = vadd.xlane.f32.xlu0 %v7495_v61  ;;  %v14265_v43 = vpop.xlane.xlu1 %8400  ;;  %v4415_v61 = vmul.f32 9999.0, %v10493_v25  ;;  %v10498_v10 = vadd.f32 -1.0, %v4404_v40  ;;  %v3284_v21 = vsel %vm3276_vm14, 1.0, %v18098_v26  ;;  %v10497_v25 = vadd.f32 -1.0, %v4403_v50 }
 0x783   :  { %v3298_v28 = vmul.f32 9999.0, %v10485_v60  ;;  %v4405_v2 = vsel %vm4397_vm10, 1.0, %v18098_v26  ;;  %v3283_v51 = vsel %vm3275_vm15, 1.0, %v18098_v26  ;;  %vm3277_vm12 = vcmp.ne.f32.partialorder %v14058_v13, 0.0 }
 0x784   :  { %v14288_v6 = vadd.f32 %v4415_v61, %v14116_v59  ;;  %v14300_v50 = vadd.f32 %v4417_v33, %v14139_v49  ;;  %v14306_v40 = vadd.f32 %v4416_v37, %v14094_v54  ;;  %v14309_v61 = vadd.f32 %v4418_v46, %v14157_v17 }
 0x785   :  { %v14277_v5 = vpop.xlane.xlu0 %4389  ;;  %v4419_v30 = vmul.f32 9999.0, %v10497_v25  ;;  %v10499_v1 = vadd.f32 -1.0, %v4405_v2  ;;  %v2240_v49 = vsel %vm629_vm7, %v2230_v42, %v2239_v39  ;;  %v14316_v33 = vadd.f32 %v3297_v32, %v13948_v20 }
 0x786   :  { %vm4398_vm11 = vcmp.ne.f32.partialorder %v14277_v5, 0.0  ;;  %v5092_v27 = vpop.xlane.xlu1 %5091  ;;  %v10486_v36 = vadd.f32 -1.0, %v3283_v51  ;;  %v4442_v54 = vrot.slane %v14288_v6, %v11524_v57  ;;  %v14323_v37 = vadd.f32 %v3298_v28, %v13979_v35 }
 0x787   :  { %v5206_v18 = vrot.slane %v5092_v27, %v11524_v57  ;;  %v4406_v47 = vsel %vm4398_vm11, 1.0, %v18098_v26  ;;  %v4450_v2 = vrot.slane %v14300_v50, %v11524_v57  ;;  %v2241_v20 = vsel %vm631_vm8, %v2234_v34, %v2240_v49 }
 0x788   :  { %v10500_v27 = vadd.f32 -1.0, %v4406_v47  ;;  %v4446_v42 = vrot.slane %v14306_v40, %v11524_v57  ;;  %v4454_v32 = vrot.slane %v14309_v61, %v11524_v57  ;;  %v14341_v46 = vadd.f32 %v4419_v30, %v14122_v53 }
 0x789   :  { %v14291_v58 = vpop.xlane.xlu0 %8394  ;;  %v5242_v55 = vsel %vm532_vm2, %v5206_v18, %v14201_v52  ;;  %v4420_v52 = vmul.f32 9999.0, %v10498_v10  ;;  %v14312_v18 = vadd.f32 %v1057_v11, %v13849_v62  ;;  %v3285_v62 = vsel %vm3277_vm12, 1.0, %v18098_v26 }
 0x78a   :  { %v14302_v60 = vpop.xlane.xlu1 %5097  ;;  %v5270_v59 = vsel %vm556_vm3, %v5242_v55, 0.0  ;;  %v10487_v55 = vadd.f32 -1.0, %v3284_v21  ;;  %v4422_v39 = vmul.f32 9999.0, %v10500_v27  ;;  %v4421_v10 = vmul.f32 9999.0, %v10499_v1 }
 0x78b   :  { %5271 = vadd.xlane.f32.xlu1 %v5270_v59  ;;  %v14338_v35 = vadd.f32 %v4420_v52, %v14182_v41  ;;  %v7408_v21 = vrot.slane %v14227_v0, %v11524_v57  ;;  %v7412_v34 = vrot.slane %v14260_v15, %v11524_v57  ;;  %v3299_v25 = vmul.f32 9999.0, %v10486_v36 }
 0x78c   :  { %vm3278_vm13 = vcmp.ne.f32.partialorder %v14029_v29, 0.0  ;;  %vm3279_vm14 = vcmp.ne.f32.partialorder %v14089_v56, 0.0  ;;  %v4471_v47 = vsel %vm530_vm1, %v4446_v42, %v4442_v54  ;;  %vm1115_vm15 = vcmask 39936  }
 0x78d   :  { %v14320_v17 = vpop.xlane.xlu0 %8403  ;;  %v10488_v28 = vadd.f32 -1.0, %v3285_v62  ;;  %v4472_v53 = vsel %vm532_vm2, %v4450_v2, %v4471_v47  ;;  %v6315_v1 = vrot.slane %v14218_v44, %v11524_v57  ;;  %v6319_v30 = vrot.slane %v14190_v7, %v11524_v57 }
 0x78e   :  { %v14330_v11 = vpop.xlane.xlu1 %6211  ;;  %v4473_v36 = vsel %vm623_vm4, %v4454_v32, %v4472_v53  ;;  %v4462_v15 = vrot.slane %v14338_v35, %v11524_v57  ;;  %v14361_v51 = vadd.f32 %v4422_v39, %v14277_v5  ;;  %v3287_v52 = vsel %vm3279_vm14, 1.0, %v18098_v26 }
 0x78f   :  { %v4458_v27 = vrot.slane %v14341_v46, %v11524_v57  ;;  %v14368_v44 = vadd.f32 %v4421_v10, %v14147_v23  ;;  %v7471_v7 = vsel %vm530_vm1, %v7412_v34, %v7408_v21  ;;  %v14372_v49 = vadd.f32 %v3299_v25, %v14020_v48 }
 0x790   :  { %v3286_v5 = vsel %vm3278_vm13, 1.0, %v18098_v26  ;;  %vm3280_vm10 = vcmp.ne.f32.partialorder %v14064_v14, 0.0  ;;  %v3301_v2 = vmul.f32 9999.0, %v10488_v28  ;;  %v10490_v48 = vadd.f32 -1.0, %v3287_v52 }
 0x791   :  { %v14350_v41 = vpop.xlane.xlu0 %5094  ;;  %v4474_v39 = vsel %vm625_vm5, %v4458_v27, %v4473_v36  ;;  %v4470_v10 = vrot.slane %v14361_v51, %v11524_v57  ;;  %v6358_v21 = vsel %vm530_vm1, %v6319_v30, %v6315_v1  ;;  %v3300_v25 = vmul.f32 9999.0, %v10487_v55 }
 0x792   :  { %v7308_v0 = vpop.xlane.xlu1 %7307  ;;  %v4475_v34 = vsel %vm627_vm6, %v4462_v15, %v4474_v39  ;;  %v10489_v47 = vadd.f32 -1.0, %v3286_v5  ;;  %v4466_v28 = vrot.slane %v14368_v44, %v11524_v57  ;;  %v3328_v36 = vrot.slane %v14323_v37, %v11524_v57 }
 0x793   :  { %v7416_v59 = vrot.slane %v7308_v0, %v11524_v57  ;;  %v3324_v0 = vrot.slane %v14316_v33, %v11524_v57  ;;  %v3288_v1 = vsel %vm3280_vm10, 1.0, %v18098_v26  ;;  %v3332_v15 = vrot.slane %v14372_v49, %v11524_v57 }
 0x794   :  { %v2243_v27 = vsel %vm1115_vm15, %v2241_v20, -inf  ;;  %v14408_v5 = vadd.f32 %v3301_v2, %v14058_v13  ;;  %v3302_v39 = vmul.f32 9999.0, %v10489_v47  ;;  %v1098_v20 = vrot.slane %v14223_v16, %v11524_v57 }
 0x795   :  { %v6209_v54 = vpop.xlane.xlu0 %6208  ;;  %v7472_v62 = vsel %vm532_vm2, %v7416_v59, %v7471_v7  ;;  %v8505_v59 = vrot.slane %v14320_v17, %v11524_v57  ;;  %v4476_v7 = vsel %vm629_vm7, %v4466_v28, %v4475_v34  ;;  %v10491_v17 = vadd.f32 -1.0, %v3288_v1 }
 0x796   :  { %v6323_v42 = vrot.slane %v6209_v54, %v11524_v57  ;;  %v14380_v32 = vpop.xlane.xlu1 %7313  ;;  %v7498_v23 = vsel %vm556_vm3, %v7472_v62, 0.0  ;;  %v3303_v54 = vmul.f32 9999.0, %v10490_v48  ;;  %v14421_v13 = vadd.f32 %v14257_v24, %v13875_v63 }
 0x797   :  { %7499 = vadd.xlane.f32.xlu1 %v7498_v23  ;;  %v14413_v23 = vadd.f32 %v3300_v25, %v13987_v3  ;;  %v3353_v2 = vsel %vm530_vm1, %v3328_v36, %v3324_v0  ;;  %v18121_v3 = vrot.slane %v14169_v4, %v11524_v57  ;;  %v3340_v47 = vrot.slane %v14408_v5, %v11524_v57 }
 0x798   :  { %v6359_v53 = vsel %vm532_vm2, %v6323_v42, %v6358_v21  ;;  %v4477_v42 = vsel %vm631_vm8, %v4470_v10, %v4476_v7  ;;  %v8501_v21 = vrot.slane %v14265_v43, %v11524_v57  ;;  %v1102_v43 = vrot.slane %v14312_v18, %v11524_v57 }
 0x799   :  { %v14398_v30 = vpop.xlane.xlu0 %6214  ;;  %v6387_v55 = vsel %vm556_vm3, %v6359_v53, 0.0  ;;  %v1110_v10 = vsel %vm625_vm5, %v18121_v3, %v14194_v9  ;;  %v3354_v34 = vsel %vm532_vm2, %v3332_v15, %v3353_v2  ;;  %v4479_v63 = vsel %vm1115_vm15, %v4477_v42, -inf }
 0x79a   :  { %6388 = vadd.xlane.f32.xlu0 %v6387_v55  ;;  %v8407_v52 = vpop.xlane.xlu1 %8406  ;;  %v8584_v24 = vsel %vm530_vm1, %v8505_v59, %v8501_v21  ;;  %v14441_v28 = vadd.f32 %v3303_v54, %v14089_v56  ;;  %v8493_v9 = vrot.slane %v14291_v58, %v11524_v57  ;;  %v3336_v0 = vrot.slane %v14413_v23, %v11524_v57 }
 0x79b   :  { %v8509_v62 = vrot.slane %v8407_v52, %v11524_v57  ;;  %2244 = vmax.xlane.f32.xlu1 %v2243_v27  ;;  %v14449_v36 = vadd.f32 %v3302_v39, %v14029_v29  ;;  %v3304_v1 = vmul.f32 9999.0, %v10491_v17  ;;  %v8489_v55 = vrot.slane %v14247_v12, %v11524_v57 }
 0x79c   :  { %v1111_v56 = vsel %vm627_vm6, %v1098_v20, %v1110_v10  ;;  %v1106_v59 = vrot.slane %v14421_v13, %v11524_v57  ;;  %v3355_v7 = vsel %vm623_vm4, %v3336_v0, %v3354_v34  ;;  %v3348_v29 = vrot.slane %v14441_v28, %v11524_v57 }
 0x79d   :  { %v14424_v48 = vpop.xlane.xlu0 %7310  ;;  %v8585_v53 = vsel %vm532_vm2, %v8509_v62, %v8584_v24  ;;  %v8582_v54 = vsel %vm530_vm1, %v8493_v9, %v8489_v55  ;;  %v1112_v12 = vsel %vm629_vm7, %v1102_v43, %v1111_v56  ;;  %v3356_v62 = vsel %vm625_vm5, %v3340_v47, %v3355_v7 }
 0x79e   :  { %v14434_v25 = vpop.xlane.xlu1 %8412  ;;  %v8609_v27 = vsel %vm556_vm3, %v8585_v53, 0.0  ;;  %v3344_v42 = vrot.slane %v14449_v36, %v11524_v57  ;;  %v14469_v39 = vadd.f32 %v3304_v1, %v14064_v14  ;;  %v6331_v17 = vrot.slane %v14398_v30, %v11524_v57 }
 0x79f   :  { %4480 = vmax.xlane.f32.xlu1 %v4479_v63  ;;  %v6327_v3 = vrot.slane %v14330_v11, %v11524_v57  ;;  %v1113_v43 = vsel %vm631_vm8, %v1106_v59, %v1112_v12  ;;  %v5214_v47 = vrot.slane %v14302_v60, %v11524_v57  ;;  %v5210_v11 = vrot.slane %v14350_v41, %v11524_v57 }
 0x7a0   :  { %v3357_v34 = vsel %vm627_vm6, %v3344_v42, %v3356_v62  ;;  %v3352_v30 = vrot.slane %v14469_v39, %v11524_v57  ;;  %v1116_v53 = vsel %vm1115_vm15, %v1113_v43, -inf  ;;  %v8517_v7 = vrot.slane %v14434_v25, %v11524_v57 }
 0x7a1   :  { %v8398_v15 = vpop.xlane.xlu0 %8397  ;;  %v3358_v63 = vsel %vm629_vm7, %v3348_v29, %v3357_v34  ;;  %v6360_v24 = vsel %vm530_vm1, %v6331_v17, %v6327_v3  ;;  %v7424_v42 = vrot.slane %v14380_v32, %v11524_v57  ;;  %v7420_v17 = vrot.slane %v14424_v48, %v11524_v57 }
 0x7a2   :  { %v8497_v58 = vrot.slane %v8398_v15, %v11524_v57  ;;  %v14457_v52 = vpop.xlane.xlu1 %5103  ;;  %v3359_v15 = vsel %vm631_vm8, %v3352_v30, %v3358_v63 }
 0x7a3   :  { %8610 = vadd.xlane.f32.xlu1 %v8609_v27  ;;  %v3361_v60 = vsel %vm1115_vm15, %v3359_v15, -inf  ;;  %v7473_v34 = vsel %vm530_vm1, %v7424_v42, %v7420_v17 }
 0x7a4   :  { %v8583_v21 = vsel %vm532_vm2, %v8497_v58, %v8582_v54  ;;  %v5243_v58 = vsel %vm530_vm1, %v5214_v47, %v5210_v11 }
 0x7a5   :  { %v8410_v20 = vpop.xlane.xlu0 %8409  ;;  %v8606_v2 = vsel %vm556_vm3, %v8583_v21, 0.0 }
 0x7a6   :  { %8607 = vadd.xlane.f32.xlu0 %v8606_v2  ;;  %v6218_v10 = vpop.xlane.xlu1 %6217  ;;  %v8513_v29 = vrot.slane %v8410_v20, %v11524_v57 }
 0x7a7   :  { %v6335_v14 = vrot.slane %v6218_v10, %v11524_v57 }
 0x7a8   :  { %v8586_v2 = vsel %vm530_vm1, %v8517_v7, %v8513_v29 }
 0x7a9   :  { %v5101_v9 = vpop.xlane.xlu0 %5100  ;;  %v6361_v0 = vsel %vm532_vm2, %v6335_v14, %v6360_v24 }
 0x7aa   :  { %v5218_v1 = vrot.slane %v5101_v9, %v11524_v57  ;;  %1117 = vmax.xlane.f32.xlu0 %v1116_v53  ;;  %v6224_v55 = vpop.xlane.xlu1 %6223  ;;  %v6390_v56 = vsel %vm556_vm3, %v6361_v0, 0.0 }
 0x7ab   :  { %6391 = vadd.xlane.f32.xlu1 %v6390_v56  ;;  %v6343_v32 = vrot.slane %v6224_v55, %v11524_v57 }
 0x7ac   :  { %v5244_v27 = vsel %vm532_vm2, %v5218_v1, %v5243_v58 }
 0x7ad   :  { %v5107_v59 = vpop.xlane.xlu0 %5106  ;;  %v5273_v12 = vsel %vm556_vm3, %v5244_v27, 0.0 }
 0x7ae   :  { %3362 = vmax.xlane.f32.xlu0 %v3361_v60  ;;  %v7320_v41 = vpop.xlane.xlu1 %7319  ;;  %v5226_v55 = vrot.slane %v5107_v59, %v11524_v57  ;;  %v5222_v60 = vrot.slane %v14457_v52, %v11524_v57 }
 0x7af   :  { %v7432_v42 = vrot.slane %v7320_v41, %v11524_v57 }
 0x7b1   :  { %v6221_v54 = vpop.xlane.xlu0 %6220 }
 0x7b2   :  { %5274 = vadd.xlane.f32.xlu0 %v5273_v12  ;;  %v8416_v62 = vpop.xlane.xlu1 %8415  ;;  %v6339_v14 = vrot.slane %v6221_v54, %v11524_v57  ;;  %v5245_v12 = vsel %vm530_vm1, %v5226_v55, %v5222_v60 }
 0x7b3   :  { %v8521_v21 = vrot.slane %v8416_v62, %v11524_v57 }
 0x7b4   :  { %v6362_v11 = vsel %vm530_vm1, %v6343_v32, %v6339_v14 }
 0x7b5   :  { %v7317_v3 = vpop.xlane.xlu0 %7316  ;;  %v8587_v25 = vsel %vm532_vm2, %v8521_v21, %v8586_v2 }
 0x7b6   :  { %v7428_v20 = vrot.slane %v7317_v3, %v11524_v57  ;;  %v8422_v10 = vpop.xlane.xlu1 %8421  ;;  %v8612_v43 = vsel %vm556_vm3, %v8587_v25, 0.0 }
 0x7b7   :  { %8613 = vadd.xlane.f32.xlu1 %v8612_v43  ;;  %v8529_v15 = vrot.slane %v8422_v10, %v11524_v57 }
 0x7b8   :  { %v7474_v48 = vsel %vm532_vm2, %v7428_v20, %v7473_v34 }
 0x7b9   :  { %v7323_v63 = vpop.xlane.xlu0 %7322  ;;  %v7501_v30 = vsel %vm556_vm3, %v7474_v48, 0.0 }
 0x7ba   :  { %7502 = vadd.xlane.f32.xlu0 %v7501_v30  ;;  %v6227_v24 = vpop.xlane.xlu1 %6226  ;;  %v7436_v29 = vrot.slane %v7323_v63, %v11524_v57 }
 0x7bb   :  { %v6347_v47 = vrot.slane %v6227_v24, %v11524_v57 }
 0x7bc   :  { %v7475_v20 = vsel %vm530_vm1, %v7436_v29, %v7432_v42 }
 0x7bd   :  { %v8419_v9 = vpop.xlane.xlu0 %8418  ;;  %v6363_v53 = vsel %vm532_vm2, %v6347_v47, %v6362_v11 }
 0x7be   :  { %v7329_v0 = vpop.xlane.xlu1 %7328  ;;  %v6393_v1 = vsel %vm556_vm3, %v6363_v53, 0.0  ;;  %v8525_v56 = vrot.slane %v8419_v9, %v11524_v57 }
 0x7bf   :  { %6394 = vadd.xlane.f32.xlu1 %v6393_v1  ;;  %v7444_v11 = vrot.slane %v7329_v0, %v11524_v57 }
 0x7c0   :  { %v8588_v62 = vsel %vm530_vm1, %v8529_v15, %v8525_v56 }
 0x7c1   :  { %v5110_v58 = vpop.xlane.xlu0 %5109 }
 0x7c2   :  { %v5230_v27 = vrot.slane %v5110_v58, %v11524_v57  ;;  %v8425_v7 = vpop.xlane.xlu1 %8424 }
 0x7c3   :  { %v8533_v54 = vrot.slane %v8425_v7, %v11524_v57 }
 0x7c4   :  { %v5246_v59 = vsel %vm532_vm2, %v5230_v27, %v5245_v12 }
 0x7c5   :  { %v7326_v17 = vpop.xlane.xlu0 %7325  ;;  %v5276_v21 = vsel %vm556_vm3, %v5246_v59, 0.0  ;;  %v8589_v52 = vsel %vm532_vm2, %v8533_v54, %v8588_v62 }
 0x7c6   :  { %v7440_v2 = vrot.slane %v7326_v17, %v11524_v57  ;;  %5277 = vadd.xlane.f32.xlu0 %v5276_v21  ;;  %v8431_v3 = vpop.xlane.xlu1 %8430  ;;  %v8615_v25 = vsel %vm556_vm3, %v8589_v52, 0.0 }
 0x7c7   :  { %8616 = vadd.xlane.f32.xlu1 %v8615_v25  ;;  %v8541_v32 = vrot.slane %v8431_v3, %v11524_v57 }
 0x7c8   :  { %v7476_v10 = vsel %vm532_vm2, %v7440_v2, %v7475_v20 }
 0x7c9   :  { %v7332_v43 = vpop.xlane.xlu0 %7331  ;;  %v7504_v34 = vsel %vm556_vm3, %v7476_v10, 0.0 }
 0x7ca   :  { %7505 = vadd.xlane.f32.xlu0 %v7504_v34  ;;  %v7338_v41 = vpop.xlane.xlu1 %7337  ;;  %v7448_v30 = vrot.slane %v7332_v43, %v11524_v57 }
 0x7cb   :  { %v7456_v17 = vrot.slane %v7338_v41, %v11524_v57 }
 0x7cc   :  { %v7477_v56 = vsel %vm530_vm1, %v7448_v30, %v7444_v11 }
 0x7cd   :  { %v8428_v14 = vpop.xlane.xlu0 %8427 }
 0x7ce   :  { %v8537_v48 = vrot.slane %v8428_v14, %v11524_v57  ;;  %v8434_v63 = vpop.xlane.xlu1 %8433 }
 0x7cf   :  { %v8545_v24 = vrot.slane %v8434_v63, %v11524_v57 }
 0x7d0   :  { %v8590_v47 = vsel %vm530_vm1, %v8541_v32, %v8537_v48 }
 0x7d1   :  { %v7335_v9 = vpop.xlane.xlu0 %7334  ;;  %v8591_v53 = vsel %vm532_vm2, %v8545_v24, %v8590_v47 }
 0x7d2   :  { %v7452_v1 = vrot.slane %v7335_v9, %v11524_v57  ;;  %v8440_v55 = vpop.xlane.xlu1 %8439  ;;  %v8618_v15 = vsel %vm556_vm3, %v8591_v53, 0.0 }
 0x7d3   :  { %8619 = vadd.xlane.f32.xlu1 %v8618_v15  ;;  %v8553_v0 = vrot.slane %v8440_v55, %v11524_v57 }
 0x7d4   :  { %v7478_v60 = vsel %vm532_vm2, %v7452_v1, %v7477_v56 }
 0x7d5   :  { %v7341_v58 = vpop.xlane.xlu0 %7340  ;;  %v7507_v27 = vsel %vm556_vm3, %v7478_v60, 0.0 }
 0x7d6   :  { %7508 = vadd.xlane.f32.xlu0 %v7507_v27  ;;  %v8443_v7 = vpop.xlane.xlu1 %8442  ;;  %v7460_v59 = vrot.slane %v7341_v58, %v11524_v57 }
 0x7d7   :  { %v8557_v54 = vrot.slane %v8443_v7, %v11524_v57 }
 0x7d8   :  { %v7479_v25 = vsel %vm530_vm1, %v7460_v59, %v7456_v17 }
 0x7d9   :  { %v8437_v29 = vpop.xlane.xlu0 %8436 }
 0x7da   :  { %v8549_v12 = vrot.slane %v8437_v29, %v11524_v57  ;;  %v8449_v62 = vpop.xlane.xlu1 %8448 }
 0x7db   :  { %v8565_v32 = vrot.slane %v8449_v62, %v11524_v57 }
 0x7dc   :  { %v8592_v42 = vsel %vm530_vm1, %v8553_v0, %v8549_v12 }
 0x7dd   :  { %v7344_v21 = vpop.xlane.xlu0 %7343  ;;  %v8593_v52 = vsel %vm532_vm2, %v8557_v54, %v8592_v42 }
 0x7de   :  { %v7464_v2 = vrot.slane %v7344_v21, %v11524_v57  ;;  %v8621_v3 = vsel %vm556_vm3, %v8593_v52, 0.0  ;;  %v8455_v34 = vpop.xlane.xlu1 %8454 }
 0x7df   :  { %8622 = vadd.xlane.f32.xlu1 %v8621_v3  ;;  %v8573_v53 = vrot.slane %v8455_v34, %v11524_v57 }
 0x7e0   :  { %v7480_v20 = vsel %vm532_vm2, %v7464_v2, %v7479_v25 }
 0x7e1   :  { %v8446_v10 = vpop.xlane.xlu0 %8445  ;;  %v7510_v43 = vsel %vm556_vm3, %v7480_v20, 0.0 }
 0x7e2   :  { %7511 = vadd.xlane.f32.xlu0 %v7510_v43  ;;  %v8561_v41 = vrot.slane %v8446_v10, %v11524_v57  ;;  %v8461_v30 = vpop.xlane.xlu1 %8460 }
 0x7e3   :  { %v8581_v47 = vrot.slane %v8461_v30, %v11524_v57 }
 0x7e4   :  { %v8594_v63 = vsel %vm530_vm1, %v8565_v32, %v8561_v41 }
 0x7e5   :  { %v8452_v14 = vpop.xlane.xlu0 %8451 }
 0x7e6   :  { %v8569_v48 = vrot.slane %v8452_v14, %v11524_v57  ;;  %v14573_v60 = vpop.xlane.xlu1 %5259 }
 0x7e8   :  { %v8595_v24 = vsel %vm532_vm2, %v8569_v48, %v8594_v63 }
 0x7e9   :  { %v8458_v11 = vpop.xlane.xlu0 %8457  ;;  %v8624_v9 = vsel %vm556_vm3, %v8595_v24, 0.0 }
 0x7ea   :  { %v8577_v1 = vrot.slane %v8458_v11, %v11524_v57  ;;  %8625 = vadd.xlane.f32.xlu0 %v8624_v9  ;;  %v14577_v27 = vpop.xlane.xlu1 %6376 }
 0x7eb   :  { %v6411_v14 = vrot.slane %v14577_v27, %v11524_v57 }
 0x7ec   :  { %v8596_v55 = vsel %vm530_vm1, %v8577_v1, %v8573_v53 }
 0x7ed   :  { %v8597_v15 = vsel %vm532_vm2, %v8581_v47, %v8596_v55  ;;  %v14575_v58 = vpop.xlane.xlu0 %5256 }
 0x7ee   :  { %v8627_v56 = vsel %vm556_vm3, %v8597_v15, 0.0  ;;  %v14581_v0 = vpop.xlane.xlu1 %6379 }
 0x7ef   :  { %8628 = vadd.xlane.f32.xlu1 %v8627_v56  ;;  %v6415_v63 = vrot.slane %v14581_v0, %v11524_v57  ;;  %v5290_v56 = vrot.slane %v14575_v58, %v11524_v57 }
 0x7f1   :  { %v14579_v7 = vpop.xlane.xlu0 %6373 }
 0x7f2   :  { %v14585_v54 = vpop.xlane.xlu1 %6382  ;;  %v6407_v32 = vrot.slane %v14579_v7, %v11524_v57 }
 0x7f3   :  { %v6419_v24 = vrot.slane %v14585_v54, %v11524_v57 }
 0x7f4   :  { %v6436_v30 = vsel %vm530_vm1, %v6411_v14, %v6407_v32 }
 0x7f5   :  { %v14583_v29 = vpop.xlane.xlu0 %5262  ;;  %v6437_v53 = vsel %vm532_vm2, %v6415_v63, %v6436_v30 }
 0x7f6   :  { %v14589_v59 = vpop.xlane.xlu1 %7493  ;;  %v6438_v55 = vsel %vm623_vm4, %v6419_v24, %v6437_v53  ;;  %v5298_v26 = vrot.slane %v14583_v29, %v11524_v57  ;;  %v5294_v24 = vrot.slane %v14573_v60, %v11524_v57 }
 0x7f9   :  { %v14587_v12 = vpop.xlane.xlu0 %5265 }
 0x7fa   :  { %18122 = vst [vmem:[#allocation27_spill] sm:$0xff] %v14587_v12  ;;  %v5302_v53 = vrot.slane %v14587_v12, %v11524_v57 }
 0x7fd   :  { %v14593_v42 = vpop.xlane.xlu0 %7490 }
 0x800   :  { %v14591_v62 = vpop.xlane.xlu1 %6385 }
 0x801   :  { %18123 = vst [vmem:[#allocation31_spill] sm:$0xff] %v14591_v62  ;;  %v14597_v21 = vpop.xlane.xlu0 %5268  ;;  %v6423_v47 = vrot.slane %v14591_v62, %v11524_v57  ;;  %v5319_v62 = vsel %vm530_vm1, %v5294_v24, %v5290_v56 }
 0x802   :  { %18124 = vst [vmem:[#allocation25_spill] sm:$0xff] %v14597_v21 }
 0x803   :  { %v6439_v32 = vsel %vm625_vm5, %v6423_v47, %v6438_v55  ;;  %v5306_v47 = vrot.slane %v14597_v21, %v11524_v57 }
 0x80b   :  { %v14601_v2 = vpop.xlane.xlu0 %7496 }
 0x80c   :  { %v7532_v24 = vrot.slane %v14601_v2, %v11524_v57 }
 0x814   :  { %v14595_v17 = vpop.xlane.xlu1 %5271 }
 0x820   :  { %v14599_v52 = vpop.xlane.xlu1 %7499 }
 0x823   :  { %v14605_v25 = vpop.xlane.xlu0 %6388 }
 0x824   :  { %v14603_v3 = vpop.xlane.xlu1 %2244  ;;  %18125 = vst [vmem:[#allocation34_spill] sm:$0xff] %v14605_v25  ;;  %v6427_v9 = vrot.slane %v14605_v25, %v11524_v57 }
 0x826   :  { %v6440_v30 = vsel %vm627_vm6, %v6427_v9, %v6439_v32  ;;  %v5310_v9 = vrot.slane %v14595_v17, %v11524_v57 }
 0x828   :  { %v14609_v10 = vpop.xlane.xlu1 %4480 }
 0x82c   :  { %v14613_v34 = vpop.xlane.xlu1 %8610 }
 0x82d   :  { %18127 = vst [vmem:[#allocation35_spill] sm:$0xff] %v14613_v34 }
 0x82f   :  { %v14607_v20 = vpop.xlane.xlu0 %8607 }
 0x830   :  { %18126 = vst [vmem:[#allocation33_spill] sm:$0xff] %v14607_v20 }
 0x833   :  { %v14611_v43 = vpop.xlane.xlu0 %1117 }
 0x834   :  { %v14617_v41 = vpop.xlane.xlu1 %6391 }
 0x835   :  { %18128 = vst [vmem:[#allocation36_spill] sm:$0xff] %v14617_v41  ;;  %v6431_v1 = vrot.slane %v14617_v41, %v11524_v57 }
 0x837   :  { %v14621_v48 = vpop.xlane.xlu0 %3362  ;;  %v6441_v41 = vsel %vm629_vm7, %v6431_v1, %v6440_v30 }
 0x83b   :  { %v14638_v15 = vpop.xlane.xlu0 %5274 }
 0x83c   :  { %18130 = vst [vmem:[#allocation37_spill] sm:$0xff] %v14638_v15  ;;  %v5314_v12 = vrot.slane %v14638_v15, %v11524_v57 }
 0x840   :  { %v14630_v11 = vpop.xlane.xlu1 %8613 }
 0x841   :  { %18129 = vst [vmem:[#allocation32_spill] sm:$0xff] %v14630_v11 }
 0x843   :  { %v14657_v55 = vpop.xlane.xlu0 %7502 }
 0x844   :  { %18132 = vst [vmem:[#allocation39_spill] sm:$0xff] %v14657_v55 }
 0x848   :  { %v14643_v14 = vpop.xlane.xlu1 %6394 }
 0x849   :  { %18131 = vst [vmem:[#allocation40_spill] sm:$0xff] %v14643_v14  ;;  %v6435_v63 = vrot.slane %v14643_v14, %v11524_v57  ;;  %v5320_v14 = vsel %vm532_vm2, %v5298_v26, %v5319_v62 }
 0x84a   :  { %v5321_v1 = vsel %vm623_vm4, %v5302_v53, %v5320_v14  ;;  %v7524_v14 = vrot.slane %v14593_v42, %v11524_v57  ;;  %v7528_v53 = vrot.slane %v14589_v59, %v11524_v57 }
 0x84b   :  { %v6442_v25 = vsel %vm631_vm8, %v6435_v63, %v6441_v41  ;;  %v5322_v30 = vsel %vm625_vm5, %v5306_v47, %v5321_v1  ;;  %v7536_v47 = vrot.slane %v14599_v52, %v11524_v57 }
 0x84c   :  { %v6444_v32 = vsel %vm634_vm9, %v6442_v25, -inf  ;;  %v5323_v56 = vsel %vm627_vm6, %v5310_v9, %v5322_v30  ;;  %v7540_v9 = vrot.slane %v14657_v55, %v11524_v57 }
 0x84d   :  { %6445 = vmax.xlane.f32.xlu1 %v6444_v32  ;;  %v5324_v63 = vsel %vm629_vm7, %v5314_v12, %v5323_v56  ;;  %v7553_v32 = vsel %vm530_vm1, %v7528_v53, %v7524_v14 }
 0x84e   :  { %v7554_v30 = vsel %vm532_vm2, %v7532_v24, %v7553_v32 }
 0x84f   :  { %v14669_v21 = vpop.xlane.xlu0 %5277  ;;  %v7555_v56 = vsel %vm623_vm4, %v7536_v47, %v7554_v30 }
 0x850   :  { %18133 = vst [vmem:[#allocation38_spill] sm:$0xff] %v14669_v21  ;;  %v5318_v41 = vrot.slane %v14669_v21, %v11524_v57  ;;  %v1127_v21 = vrot.slane %v14611_v43, %v12107_v19 }
 0x852   :  { %v5325_v25 = vsel %vm631_vm8, %v5318_v41, %v5324_v63  ;;  %v14698_v63 = vpop.xlane.xlu1 %8616 }
 0x853   :  { %v5327_v26 = vsel %vm634_vm9, %v5325_v25, -inf  ;;  %v14677_v62 = vpop.xlane.xlu0 %7505  ;;  %18136 = vst [vmem:[#allocation41_spill] sm:$0xff] %v14698_v63  ;;  %v7556_v25 = vsel %vm625_vm5, %v7540_v9, %v7555_v56  ;;  %v1161_v56 = vsub.f32 %v14111_v45, %v1127_v21  ;;  %v18142_v45 = vld [vmem:[#allocation12_spill] sm:$0xff] }
 0x854   :  { %5328 = vmax.xlane.f32.xlu0 %v5327_v26  ;;  %18134 = vst [vmem:[#allocation42_spill] sm:$0xff] %v14677_v62  ;;  %v7544_v1 = vrot.slane %v14677_v62, %v11524_v57  ;;  %v8641_v62 = vrot.slane %v14607_v20, %v11524_v57  ;;  %v1147_v21 = vrot.slane %v14611_v43, %v18142_v45 }
 0x855   :  { %v2250_v20 = vrot.slane %v14603_v3, %v11262_v8 }
 0x856   :  { %v7557_v53 = vsel %vm627_vm6, %v7544_v1, %v7556_v25  ;;  %v8645_v1 = vrot.slane %v14613_v34, %v11524_v57 }
 0x858   :  { %v8670_v55 = vsel %vm530_vm1, %v8645_v1, %v8641_v62  ;;  %v1166_v62 = vsub.f32 %v14312_v18, %v1147_v21 }
 0x85c   :  { %v14709_v32 = vpop.xlane.xlu1 %8619 }
 0x85d   :  { %18138 = vst [vmem:[#allocation49_spill] sm:$0xff] %v14709_v32 }
 0x85f   :  { %v14687_v12 = vpop.xlane.xlu0 %7508 }
 0x860   :  { %18135 = vst [vmem:[#allocation45_spill] sm:$0xff] %v14687_v12  ;;  %v7548_v41 = vrot.slane %v14687_v12, %v11524_v57  ;;  %v18139_v12 = vld [vmem:[#allocation10_spill] sm:$0xff] }
 0x861   :  { %v1139_v9 = vrot.slane %v14611_v43, %v18139_v12 }
 0x862   :  { %v7558_v24 = vsel %vm629_vm7, %v7548_v41, %v7557_v53  ;;  %v8649_v41 = vrot.slane %v14630_v11, %v11524_v57  ;;  %v8653_v53 = vrot.slane %v14698_v63, %v11524_v57 }
 0x864   :  { %v8671_v15 = vsel %vm532_vm2, %v8649_v41, %v8670_v55 }
 0x868   :  { %v14722_v25 = vpop.xlane.xlu1 %8622 }
 0x869   :  { %18140 = vst [vmem:[#allocation47_spill] sm:$0xff] %v14722_v25  ;;  %v8661_v11 = vrot.slane %v14722_v25, %v11524_v57 }
 0x86b   :  { %v14701_v26 = vpop.xlane.xlu0 %7511 }
 0x86c   :  { %18137 = vst [vmem:[#allocation43_spill] sm:$0xff] %v14701_v26  ;;  %v7552_v14 = vrot.slane %v14701_v26, %v11524_v57  ;;  %v8657_v26 = vrot.slane %v14709_v32, %v11524_v57  ;;  %v18143_v32 = vld [vmem:[#allocation9_spill] sm:$0xff] }
 0x86d   :  { %v2262_v34 = vrot.slane %v14603_v3, %v18143_v32  ;;  %v1135_v18 = vrot.slane %v14611_v43, %v18143_v32 }
 0x86e   :  { %v7559_v47 = vsel %vm631_vm8, %v7552_v14, %v7558_v24  ;;  %v1123_v14 = vrot.slane %v14611_v43, %v11262_v8 }
 0x86f   :  { %v7561_v30 = vsel %vm634_vm9, %v7559_v47, -inf  ;;  %v1164_v47 = vsub.f32 %v14169_v4, %v1139_v9  ;;  %v1131_v4 = vrot.slane %v14611_v43, %v12110_v22 }
 0x870   :  { %7562 = vmax.xlane.f32.xlu0 %v7561_v30  ;;  %v1170_v30 = vmul.f32 1.442695, %v1161_v56  ;;  %v1160_v9 = vsub.f32 %v14103_v38, %v1123_v14  ;;  %v8672_v56 = vsel %vm623_vm4, %v8653_v53, %v8671_v15  ;;  %v2287_v15 = vsub.f32 %v14173_v31, %v2250_v20  ;;  %v18144_v53 = vld [vmem:[#allocation20_spill] sm:$0xff]  ;;  %v18147_v20 = vld [vmem:[#allocation21_spill] sm:$0xff] }
 0x871   :  { %v1176_v1 = vmul.f32 1.442695, %v1164_v47  ;;  %v8673_v25 = vsel %vm625_vm5, %v8657_v26, %v8672_v56  ;;  %v1162_v21 = vsub.f32 %v18144_v53, %v1131_v4  ;;  %v1180_v47 = vmul.f32 1.442695, %v1166_v62  ;;  %v18146_v56 = vld [vmem:[#allocation22_spill] sm:$0xff]  ;;  %v18148_v4 = vld [vmem:[#allocation13_spill] sm:$0xff] }
 0x872   :  { %10700 = vpow2.f32 %v1170_v30  ;;  %v1168_v14 = vmul.f32 1.442695, %v1160_v9  ;;  %v1163_v9 = vsub.f32 %v18147_v20, %v1135_v18  ;;  %v2278_v62 = vrot.slane %v14603_v3, %v18148_v4 }
 0x873   :  { %v14728_v24 = vpop.xlane.xlu0 %8625  ;;  %10702 = vpow2.f32 %v1176_v1  ;;  %v18149_v1 = vld [vmem:[#allocation29_spill] sm:$0xff]  ;;  %v1151_v53 = vrot.slane %v14611_v43, %v18148_v4  ;;  %v2254_v18 = vrot.slane %v14603_v3, %v12107_v19 }
 0x874   :  { %18141 = vst [vmem:[#allocation44_spill] sm:$0xff] %v14728_v24  ;;  %v8665_v63 = vrot.slane %v14728_v24, %v11524_v57  ;;  %v8674_v24 = vsel %vm627_vm6, %v8661_v11, %v8673_v25  ;;  %v18145_v11 = vld [vmem:[#allocation11_spill] sm:$0xff]  ;;  %10704 = vpow2.f32 %v1168_v14 }
 0x875   :  { %v2270_v25 = vrot.slane %v14603_v3, %v18145_v11  ;;  %v1143_v31 = vrot.slane %v14611_v43, %v18145_v11  ;;  %10706 = vpow2.f32 %v1180_v47 }
 0x876   :  { %v8675_v38 = vsel %vm629_vm7, %v8665_v63, %v8674_v24  ;;  %v2290_v63 = vsub.f32 %v18146_v56, %v2262_v34  ;;  %v2295_v24 = vmul.f32 1.442695, %v2287_v15  ;;  %v1174_v15 = vmul.f32 1.442695, %v1163_v9 }
 0x877   :  { %v1165_v34 = vsub.f32 %v14223_v16, %v1143_v31  ;;  %v3372_v16 = vrot.slane %v14621_v48, %v12107_v19 }
 0x878   :  { %v14749_v55 = vpop.xlane.xlu1 %8628  ;;  %10708 = vpow2.f32 %v2295_v24  ;;  %v18151_v24 = vld [vmem:[#allocation24_spill] sm:$0xff] }
 0x879   :  { %v8669_v41 = vrot.slane %v14749_v55, %v11524_v57  ;;  %v1178_v56 = vmul.f32 1.442695, %v1165_v34  ;;  %v2288_v31 = vsub.f32 %v18151_v24, %v2254_v18  ;;  %v3392_v18 = vrot.slane %v14621_v48, %v18142_v45 }
 0x87a   :  { %v4486_v24 = vrot.slane %v14609_v10, %v11262_v8 }
 0x87b   :  { %v8676_v26 = vsel %vm631_vm8, %v8669_v41, %v8675_v38  ;;  %v1172_v41 = vmul.f32 1.442695, %v1162_v21  ;;  %v2292_v38 = vsub.f32 %v18149_v1, %v2270_v25  ;;  %v18150_v21 = vld [vmem:[#allocation23_spill] sm:$0xff]  ;;  %v1167_v25 = vsub.f32 %v14421_v13, %v1151_v53 }
 0x87c   :  { %v8678_v30 = vsel %vm634_vm9, %v8676_v26, -inf  ;;  %v2301_v26 = vmul.f32 1.442695, %v2290_v63  ;;  %v2294_v47 = vsub.f32 %v18150_v21, %v2278_v62  ;;  %v2258_v63 = vrot.slane %v14603_v3, %v12110_v22 }
 0x87d   :  { %8679 = vmax.xlane.f32.xlu1 %v8678_v30  ;;  %10710 = vpow2.f32 %v1172_v41  ;;  %v2305_v30 = vmul.f32 1.442695, %v2292_v38  ;;  %v1182_v13 = vmul.f32 1.442695, %v1167_v25  ;;  %v3384_v41 = vrot.slane %v14621_v48, %v18139_v12  ;;  %v18153_v25 = vld [vmem:[#allocation28_spill] sm:$0xff] }
 0x87e   :  { %10712 = vpow2.f32 %v2301_v26  ;;  %v2309_v20 = vmul.f32 1.442695, %v2294_v47  ;;  %v3406_v62 = vsub.f32 %v14323_v37, %v3372_v16  ;;  %v2266_v38 = vrot.slane %v14603_v3, %v18139_v12  ;;  %v18152_v26 = vld [vmem:[#allocation26_spill] sm:$0xff] }
 0x87f   :  { %v14775_v14 = vpop.eup %10700  ;;  %10714 = vpow2.f32 %v1174_v15  ;;  %v2289_v53 = vsub.f32 %v18152_v26, %v2258_v63  ;;  %v2297_v34 = vmul.f32 1.442695, %v2288_v31  ;;  %v3409_v37 = vsub.f32 %v14408_v5, %v3384_v41 }
 0x880   :  { %v14784_v43 = vpop.eup %10702  ;;  %10716 = vpow2.f32 %v2305_v30  ;;  %v3415_v21 = vmul.f32 1.442695, %v3406_v62  ;;  %v2274_v30 = vrot.slane %v14603_v3, %v18142_v45  ;;  %v3411_v5 = vsub.f32 %v14441_v28, %v3392_v18  ;;  %v18154_v3 = vld [vmem:[#allocation30_spill] sm:$0xff] }
 0x881   :  { %v14790_v9 = vpop.eup %10704  ;;  %10718 = vpow2.f32 %v1178_v56  ;;  %v2291_v56 = vsub.f32 %v18153_v25, %v2266_v38  ;;  %v2299_v16 = vmul.f32 1.442695, %v2289_v53  ;;  %v3421_v31 = vmul.f32 1.442695, %v3409_v37 }
 0x882   :  { %v14795_v1 = vpop.eup %10706  ;;  %10720 = vpow2.f32 %v2309_v20  ;;  %v4498_v62 = vrot.slane %v14609_v10, %v18143_v32  ;;  %v4523_v26 = vsub.f32 %v14288_v6, %v4486_v24  ;;  %v3368_v28 = vrot.slane %v14621_v48, %v11262_v8 }
 0x883   :  { %10722 = vpow2.f32 %v1182_v13  ;;  %v2293_v13 = vsub.f32 %v18154_v3, %v2274_v30  ;;  %v2303_v41 = vmul.f32 1.442695, %v2291_v56  ;;  %v3425_v53 = vmul.f32 1.442695, %v3411_v5 }
 0x884   :  { %10724 = vpow2.f32 %v2297_v34  ;;  %v4506_v37 = vrot.slane %v14609_v10, %v18145_v11  ;;  %v4531_v6 = vmul.f32 1.442695, %v4523_v26  ;;  %v3376_v25 = vrot.slane %v14621_v48, %v12110_v22 }
 0x885   :  { %v14802_v15 = vpop.eup %10708  ;;  %10726 = vpow2.f32 %v3415_v21  ;;  %v2307_v18 = vmul.f32 1.442695, %v2293_v13  ;;  %v4526_v21 = vsub.f32 %v14309_v61, %v4498_v62  ;;  %v3405_v56 = vsub.f32 %v14316_v33, %v3368_v28 }
 0x886   :  { %1196 = vperm.xlu0 %10696, %v14775_v14   ;;  %10728 = vpow2.f32 %v2299_v16  ;;  %v4514_v24 = vrot.slane %v14609_v10, %v18148_v4  ;;  %v4528_v61 = vsub.f32 %v14338_v35, %v4506_v37  ;;  %v3380_v33 = vrot.slane %v14621_v48, %v18143_v32 }
 0x887   :  { %10730 = vpow2.f32 %v3421_v31  ;;  %v4537_v5 = vmul.f32 1.442695, %v4526_v21  ;;  %v3407_v3 = vsub.f32 %v14372_v49, %v3376_v25  ;;  %v3413_v13 = vmul.f32 1.442695, %v3405_v56 }
 0x888   :  { %10732 = vpow2.f32 %v2303_v41  ;;  %v4530_v62 = vsub.f32 %v14361_v51, %v4514_v24  ;;  %v4541_v35 = vmul.f32 1.442695, %v4528_v61  ;;  %v3388_v28 = vrot.slane %v14621_v48, %v18145_v11 }
 0x889   :  { %10734 = vpow2.f32 %v3425_v53  ;;  %v3408_v53 = vsub.f32 %v14413_v23, %v3380_v33  ;;  %v3417_v49 = vmul.f32 1.442695, %v3407_v3  ;;  %v3396_v21 = vrot.slane %v14621_v48, %v18148_v4 }
 0x88a   :  { %1205 = vperm.xlu0 %10696, %v14784_v43   ;;  %v14807_v47 = vpop.eup %10710  ;;  %10736 = vpow2.f32 %v2307_v18  ;;  %v4545_v37 = vmul.f32 1.442695, %v4530_v62  ;;  %v4490_v24 = vrot.slane %v14609_v10, %v12107_v19  ;;  %v4494_v33 = vrot.slane %v14609_v10, %v12110_v22 }
 0x88b   :  { %v14814_v63 = vpop.eup %10712  ;;  %10738 = vpow2.f32 %v4531_v6  ;;  %v3410_v6 = vsub.f32 %v14449_v36, %v3388_v28  ;;  %v3419_v25 = vmul.f32 1.442695, %v3408_v53  ;;  %v3412_v61 = vsub.f32 %v14469_v39, %v3396_v21 }
 0x88c   :  { %v14819_v20 = vpop.eup %10714  ;;  %10740 = vpow2.f32 %v4537_v5  ;;  %v4524_v3 = vsub.f32 %v14306_v40, %v4490_v24  ;;  %v4525_v28 = vsub.f32 %v14300_v50, %v4494_v33 }
 0x88d   :  { %v14826_v38 = vpop.eup %10716  ;;  %10742 = vpow2.f32 %v3413_v13  ;;  %v3423_v48 = vmul.f32 1.442695, %v3410_v6  ;;  %v3427_v13 = vmul.f32 1.442695, %v3412_v61 }
 0x88e   :  { %1211 = vperm.xlu0 %10696, %v14795_v1   ;;  %1193 = vperm.xlu1 %10697, %v14790_v9   ;;  %v14831_v34 = vpop.eup %10718  ;;  %10744 = vpow2.f32 %v4541_v35  ;;  %v4502_v35 = vrot.slane %v14609_v10, %v18139_v12  ;;  %v4533_v53 = vmul.f32 1.442695, %v4524_v3  ;;  %v4535_v6 = vmul.f32 1.442695, %v4525_v28 }
 0x88f   :  { %v14838_v30 = vpop.eup %10720  ;;  %10746 = vpow2.f32 %v3417_v49 }
 0x890   :  { %v14843_v16 = vpop.eup %10722  ;;  %10748 = vpow2.f32 %v4545_v37  ;;  %v4510_v37 = vrot.slane %v14609_v10, %v18142_v45  ;;  %v4527_v21 = vsub.f32 %v14341_v46, %v4502_v35 }
 0x891   :  { %v14850_v31 = vpop.eup %10724  ;;  %10750 = vpow2.f32 %v3419_v25 }
 0x892   :  { %2320 = vperm.xlu0 %10696, %v14802_v15   ;;  %1199 = vperm.xlu1 %10697, %v14807_v47   ;;  %v14855_v41 = vpop.eup %10726  ;;  %10752 = vpow2.f32 %v3423_v48  ;;  %v4529_v50 = vsub.f32 %v14368_v44, %v4510_v37  ;;  %v4539_v24 = vmul.f32 1.442695, %v4527_v21 }
 0x893   :  { %v14860_v26 = vpop.eup %10728  ;;  %10754 = vpow2.f32 %v3427_v13 }
 0x894   :  { %v14865_v18 = vpop.eup %10730  ;;  %10756 = vpow2.f32 %v4533_v53  ;;  %v4543_v10 = vmul.f32 1.442695, %v4529_v50 }
 0x895   :  { %v14869_v51 = vpop.eup %10732  ;;  %10758 = vpow2.f32 %v4535_v6  ;;  %v18166_v6 = vld [vmem:[#allocation7_spill] sm:$0xff] }
 0x896   :  { %2329 = vperm.xlu0 %10696, %v14814_v63   ;;  %1202 = vperm.xlu1 %10697, %v14819_v20   ;;  %v14874_v23 = vpop.eup %10734  ;;  %10760 = vpow2.f32 %v4539_v24 }
 0x897   :  { %18155 = vst [vmem:[#allocation46_spill] sm:$0xff] %v14874_v23  ;;  %v14878_v56 = vpop.eup %10736  ;;  %10762 = vpow2.f32 %v4543_v10 }
 0x898   :  { %v14883_v5 = vpop.eup %10738 }
 0x899   :  { %18156 = vst [vmem:[#allocation51_spill] sm:$0xff] %v14883_v5  ;;  %v14887_v36 = vpop.eup %10740 }
 0x89a   :  { %2335 = vperm.xlu0 %10696, %v14826_v38   ;;  %1208 = vperm.xlu1 %10697, %v14831_v34   ;;  %18157 = vst [vmem:[#allocation53_spill] sm:$0xff] %v14887_v36  ;;  %v14892_v62 = vpop.eup %10742 }
 0x89b   :  { %v14896_v39 = vpop.eup %10744 }
 0x89c   :  { %18158 = vst [vmem:[#allocation48_spill] sm:$0xff] %v14896_v39  ;;  %v14901_v49 = vpop.eup %10746 }
 0x89d   :  { %v14905_v40 = vpop.eup %10748 }
 0x89e   :  { %2341 = vperm.xlu0 %10696, %v14838_v30   ;;  %1214 = vperm.xlu1 %10697, %v14843_v16   ;;  %18159 = vst [vmem:[#allocation50_spill] sm:$0xff] %v14905_v40  ;;  %v14910_v25 = vpop.eup %10750 }
 0x89f   :  { %v14915_v61 = vpop.eup %10752 }
 0x8a0   :  { %18160 = vst [vmem:[#allocation52_spill] sm:$0xff] %v14915_v61  ;;  %v14918_v48 = vpop.eup %10754 }
 0x8a1   :  { %18161 = vst [vmem:[#allocation20_spill] sm:$0xff] %v14918_v48  ;;  %v14921_v46 = vpop.eup %10756 }
 0x8a2   :  { %3441 = vperm.xlu0 %10696, %v14855_v41   ;;  %2323 = vperm.xlu1 %10697, %v14850_v31   ;;  %18162 = vst [vmem:[#allocation22_spill] sm:$0xff] %v14921_v46  ;;  %v14924_v33 = vpop.eup %10758 }
 0x8a3   :  { %18163 = vst [vmem:[#allocation21_spill] sm:$0xff] %v14924_v33  ;;  %v14927_v44 = vpop.eup %10760 }
 0x8a4   :  { %18164 = vst [vmem:[#allocation29_spill] sm:$0xff] %v14927_v44  ;;  %v14930_v3 = vpop.eup %10762 }
 0x8a5   :  { %18165 = vst [vmem:[#allocation23_spill] sm:$0xff] %v14930_v3 }
 0x8a6   :  { %3450 = vperm.xlu0 %10696, %v14865_v18   ;;  %2326 = vperm.xlu1 %10697, %v14860_v26  }
 0x8aa   :  { %3456 = vperm.xlu0 %10696, %v14874_v23   ;;  %2332 = vperm.xlu1 %10697, %v14869_v51  }
 0x8ae   :  { %4556 = vperm.xlu0 %10696, %v14883_v5   ;;  %2338 = vperm.xlu1 %10697, %v14878_v56  }
 0x8b2   :  { %4565 = vperm.xlu0 %10696, %v14887_v36   ;;  %3438 = vperm.xlu1 %10697, %v14892_v62  }
 0x8b6   :  { %4571 = vperm.xlu0 %10696, %v14896_v39   ;;  %3444 = vperm.xlu1 %10697, %v14901_v49  }
 0x8ba   :  { %4577 = vperm.xlu0 %10696, %v14905_v40   ;;  %3447 = vperm.xlu1 %10697, %v14910_v25  }
 0x8be   :  { %3453 = vperm.xlu1 %10697, %v14915_v61  }
 0x8c2   :  { %3459 = vperm.xlu1 %10697, %v14918_v48  }
 0x8c6   :  { %4559 = vperm.xlu1 %10697, %v14921_v46  }
 0x8ca   :  { %4562 = vperm.xlu1 %10697, %v14924_v33  }
 0x8ce   :  { %4568 = vperm.xlu1 %10697, %v14927_v44  }
 0x8d2   :  { %4574 = vperm.xlu1 %10697, %v14930_v3  }
 0x8d6   :  { %v14933_v13 = vpop.xlane.xlu1 %6445 }
 0x8d7   :  { %v6455_v37 = vrot.slane %v14933_v13, %v12107_v19  ;;  %v6451_v21 = vrot.slane %v14933_v13, %v11262_v8  ;;  %v6459_v10 = vrot.slane %v14933_v13, %v12110_v22 }
 0x8d9   :  { %vm6489_vm12 = vcmp.eq.f32.partialorder %v14577_v27, %v6455_v37  ;;  %vm6488_vm13 = vcmp.eq.f32.partialorder %v14579_v7, %v6451_v21  ;;  %vm6490_vm14 = vcmp.eq.f32.partialorder %v14581_v0, %v6459_v10  ;;  %v18167_v37 = vld [vmem:[#allocation27_spill] sm:$0xff] }
 0x8da   :  { %v6498_v7 = vsel %vm6490_vm14, %v18166_v6, 3 }
 0x8dd   :  { %v14935_v35 = vpop.xlane.xlu0 %5328 }
 0x8de   :  { %v5334_v28 = vrot.slane %v14935_v35, %v11262_v8  ;;  %v5338_v53 = vrot.slane %v14935_v35, %v12107_v19  ;;  %v5342_v40 = vrot.slane %v14935_v35, %v12110_v22  ;;  %v5346_v27 = vrot.slane %v14935_v35, %v18143_v32 }
 0x8e0   :  { %vm5371_vm3 = vcmp.eq.f32.partialorder %v14575_v58, %v5334_v28  ;;  %vm5372_vm11 = vcmp.eq.f32.partialorder %v14573_v60, %v5338_v53  ;;  %v6497_v58 = vsel %vm6489_vm12, %v18166_v6, 3  ;;  %v6496_v60 = vsel %vm6488_vm13, %v18166_v6, 3 }
 0x8e1   :  { %v5379_v50 = vsel %vm5371_vm3, %v18166_v6, 3  ;;  %v5380_v24 = vsel %vm5372_vm11, %v18166_v6, 3  ;;  %v6463_v28 = vrot.slane %v14933_v13, %v18143_v32  ;;  %vm5373_vm10 = vcmp.eq.f32.partialorder %v14583_v29, %v5342_v40 }
 0x8e2   :  { %5388 = vperm.xlu0 %10696, %v5379_v50   ;;  %5391 = vperm.xlu1 %10697, %v5380_v24   ;;  %v5381_v53 = vsel %vm5373_vm10, %v18166_v6, 3  ;;  %vm5374_vm11 = vcmp.eq.f32.partialorder %v18167_v37, %v5346_v27  ;;  %v6467_v29 = vrot.slane %v14933_v13, %v18139_v12  ;;  %v5354_v27 = vrot.slane %v14935_v35, %v18145_v11 }
 0x8e3   :  { %vm6491_vm3 = vcmp.eq.f32.partialorder %v14585_v54, %v6463_v28  ;;  %v5382_v50 = vsel %vm5374_vm11, %v18166_v6, 3  ;;  %v5350_v54 = vrot.slane %v14935_v35, %v18139_v12  ;;  %v18169_v28 = vld [vmem:[#allocation25_spill] sm:$0xff]  ;;  %v6471_v37 = vrot.slane %v14933_v13, %v18145_v11 }
 0x8e4   :  { %v6499_v21 = vsel %vm6491_vm3, %v18166_v6, 3  ;;  %vm5376_vm3 = vcmp.eq.f32.partialorder %v14595_v17, %v5354_v27  ;;  %v18171_v27 = vld [vmem:[#allocation35_spill] sm:$0xff] }
 0x8e5   :  { %vm5375_vm10 = vcmp.eq.f32.partialorder %v18169_v28, %v5350_v54  ;;  %v18170_v54 = vld [vmem:[#allocation34_spill] sm:$0xff] }
 0x8e6   :  { %6508 = vperm.xlu0 %10696, %v6497_v58   ;;  %6505 = vperm.xlu1 %10697, %v6496_v60   ;;  %v18168_v60 = vld [vmem:[#allocation31_spill] sm:$0xff] }
 0x8e7   :  { %vm6492_vm14 = vcmp.eq.f32.partialorder %v18168_v60, %v6467_v29  ;;  %v5384_v29 = vsel %vm5376_vm3, %v18166_v6, 3  ;;  %v6475_v60 = vrot.slane %v14933_v13, %v18142_v45 }
 0x8ea   :  { %6511 = vperm.xlu0 %10696, %v6498_v7   ;;  %5394 = vperm.xlu1 %10697, %v5381_v53  }
 0x8ee   :  { %6514 = vperm.xlu0 %10696, %v6499_v21   ;;  %5397 = vperm.xlu1 %10697, %v5382_v50  }
 0x8f9   :  { %v14969_v0 = vpop.xlane.xlu0 %7562 }
 0x8fa   :  { %v7572_v40 = vrot.slane %v14969_v0, %v12107_v19  ;;  %v7568_v24 = vrot.slane %v14969_v0, %v11262_v8  ;;  %v7576_v7 = vrot.slane %v14969_v0, %v12110_v22  ;;  %v7580_v21 = vrot.slane %v14969_v0, %v18143_v32 }
 0x8fc   :  { %vm7606_vm12 = vcmp.eq.f32.partialorder %v14589_v59, %v7572_v40  ;;  %vm7605_vm13 = vcmp.eq.f32.partialorder %v14593_v42, %v7568_v24  ;;  %v6500_v59 = vsel %vm6492_vm14, %v18166_v6, 3  ;;  %v5383_v42 = vsel %vm5375_vm10, %v18166_v6, 3 }
 0x8fd   :  { %v7614_v10 = vsel %vm7606_vm12, %v18166_v6, 3  ;;  %v7613_v58 = vsel %vm7605_vm13, %v18166_v6, 3  ;;  %vm7607_vm11 = vcmp.eq.f32.partialorder %v14601_v2, %v7576_v7  ;;  %vm7608_vm12 = vcmp.eq.f32.partialorder %v14599_v52, %v7580_v21  ;;  %v18172_v52 = vld [vmem:[#allocation33_spill] sm:$0xff]  ;;  %v18173_v21 = vld [vmem:[#allocation36_spill] sm:$0xff] }
 0x8fe   :  { %7625 = vperm.xlu0 %10696, %v7614_v10   ;;  %7622 = vperm.xlu1 %10697, %v7613_v58   ;;  %v7615_v40 = vsel %vm7607_vm11, %v18166_v6, 3  ;;  %vm6493_vm13 = vcmp.eq.f32.partialorder %v18170_v54, %v6471_v37  ;;  %v7616_v10 = vsel %vm7608_vm12, %v18166_v6, 3  ;;  %v5358_v7 = vrot.slane %v14935_v35, %v18142_v45 }
 0x8ff   :  { %v6501_v58 = vsel %vm6493_vm13, %v18166_v6, 3  ;;  %vm6494_vm3 = vcmp.eq.f32.partialorder %v18173_v21, %v6475_v60  ;;  %v18175_v60 = vld [vmem:[#allocation32_spill] sm:$0xff] }
 0x901   :  { %v14989_v53 = vpop.permute.xlu0 %1196 }
 0x902   :  { %6517 = vperm.xlu0 %10696, %v6500_v59   ;;  %5400 = vperm.xlu1 %10697, %v5383_v42  }
 0x905   :  { %v14999_v50 = vpop.permute.xlu0 %1205 }
 0x906   :  { %5403 = vperm.xlu0 %10696, %v5384_v29   ;;  %7628 = vperm.xlu1 %10697, %v7615_v40   ;;  %v15003_v24 = vpop.xlane.xlu1 %8679  ;;  %v18174_v40 = vld [vmem:[#allocation37_spill] sm:$0xff] }
 0x907   :  { %v8689_v17 = vrot.slane %v15003_v24, %v12107_v19  ;;  %v8685_v2 = vrot.slane %v15003_v24, %v11262_v8  ;;  %vm5377_vm11 = vcmp.eq.f32.partialorder %v18174_v40, %v5358_v7  ;;  %v8693_v54 = vrot.slane %v15003_v24, %v12110_v22 }
 0x909   :  { %vm8723_vm14 = vcmp.eq.f32.partialorder %v18171_v27, %v8689_v17  ;;  %vm8722_vm10 = vcmp.eq.f32.partialorder %v18172_v52, %v8685_v2  ;;  %v1212_v59 = vpop.permute.xlu0 %1211  ;;  %v7584_v17 = vrot.slane %v14969_v0, %v18139_v12  ;;  %vm8724_vm12 = vcmp.eq.f32.partialorder %v18175_v60, %v8693_v54  ;;  %v18176_v52 = vld [vmem:[#allocation39_spill] sm:$0xff] }
 0x90a   :  { %7631 = vperm.xlu0 %10696, %v7616_v10   ;;  %6520 = vperm.xlu1 %10697, %v6501_v58   ;;  %v1194_v28 = vpop.permute.xlu1 %1193  ;;  %v8731_v42 = vsel %vm8723_vm14, %v18166_v6, 3  ;;  %v8730_v37 = vsel %vm8722_vm10, %v18166_v6, 3  ;;  %v6502_v10 = vsel %vm6494_vm3, %v18166_v6, 3  ;;  %v5385_v58 = vsel %vm5377_vm11, %v18166_v6, 3 }
 0x90b   :  { %vm7609_vm13 = vcmp.eq.f32.partialorder %v18176_v52, %v7584_v17  ;;  %v8732_v7 = vsel %vm8724_vm12, %v18166_v6, 3  ;;  %v1223_v54 = vrot.slane %v14989_v53, %v11524_v57  ;;  %v1235_v53 = vrot.slane %v14999_v50, %v11524_v57 }
 0x90d   :  { %v2321_v2 = vpop.permute.xlu0 %2320 }
 0x90e   :  { %8742 = vperm.xlu0 %10696, %v8731_v42   ;;  %8739 = vperm.xlu1 %10697, %v8730_v37   ;;  %v1200_v29 = vpop.permute.xlu1 %1199  ;;  %v7617_v42 = vsel %vm7609_vm13, %v18166_v6, 3  ;;  %v2346_v33 = vrot.slane %v2321_v2, %v11524_v57 }
 0x90f   :  { %v1227_v36 = vrot.slane %v1200_v29, %v11524_v57 }
 0x911   :  { %v2330_v21 = vpop.permute.xlu0 %2329 }
 0x912   :  { %6523 = vperm.xlu0 %10696, %v6502_v10   ;;  %5406 = vperm.xlu1 %10697, %v5385_v58   ;;  %v1203_v27 = vpop.permute.xlu1 %1202  ;;  %v1219_v10 = vrot.slane %v1194_v28, %v11524_v57 }
 0x913   :  { %v1231_v17 = vrot.slane %v1203_v27, %v11524_v57 }
 0x915   :  { %v2336_v3 = vpop.permute.xlu0 %2335 }
 0x916   :  { %8745 = vperm.xlu0 %10696, %v8732_v7   ;;  %7634 = vperm.xlu1 %10697, %v7617_v42   ;;  %v1209_v37 = vpop.permute.xlu1 %1208  ;;  %v1248_v7 = vsel %vm530_vm1, %v1223_v54, %v1219_v10 }
 0x917   :  { %v1249_v48 = vsel %vm532_vm2, %v1227_v36, %v1248_v7  ;;  %v1239_v29 = vrot.slane %v1209_v37, %v11524_v57  ;;  %v1243_v37 = vrot.slane %v1212_v59, %v11524_v57 }
 0x918   :  { %v1250_v28 = vsel %vm623_vm4, %v1231_v17, %v1249_v48 }
 0x919   :  { %v2342_v58 = vpop.permute.xlu0 %2341  ;;  %v1251_v2 = vsel %vm625_vm5, %v1235_v53, %v1250_v28 }
 0x91a   :  { %v1215_v40 = vpop.permute.xlu1 %1214  ;;  %v1252_v36 = vsel %vm627_vm6, %v1239_v29, %v1251_v2 }
 0x91b   :  { %v1247_v48 = vrot.slane %v1215_v40, %v11524_v57 }
 0x91d   :  { %v3442_v46 = vpop.permute.xlu0 %3441 }
 0x91e   :  { %v2324_v39 = vpop.permute.xlu1 %2323 }
 0x91f   :  { %v2350_v60 = vrot.slane %v2324_v39, %v11524_v57 }
 0x921   :  { %v2375_v27 = vsel %vm530_vm1, %v2350_v60, %v2346_v33  ;;  %v3451_v17 = vpop.permute.xlu0 %3450 }
 0x922   :  { %v2327_v44 = vpop.permute.xlu1 %2326 }
 0x923   :  { %v2354_v42 = vrot.slane %v2327_v44, %v11524_v57  ;;  %v2358_v44 = vrot.slane %v2330_v21, %v11524_v57  ;;  %v1253_v21 = vsel %vm629_vm7, %v1243_v37, %v1252_v36  ;;  %v3480_v37 = vrot.slane %v3451_v17, %v11524_v57 }
 0x924   :  { %v1254_v7 = vsel %vm631_vm8, %v1247_v48, %v1253_v21 }
 0x925   :  { %v2376_v23 = vsel %vm532_vm2, %v2354_v42, %v2375_v27  ;;  %v1256_v53 = vsel %vm1115_vm15, %v1254_v7, 0.0  ;;  %v3468_v27 = vrot.slane %v3442_v46, %v11524_v57 }
 0x926   :  { %v2333_v52 = vpop.permute.xlu1 %2332  ;;  %v2377_v54 = vsel %vm623_vm4, %v2358_v44, %v2376_v23  ;;  %v2374_v23 = vrot.slane %v2342_v58, %v11524_v57 }
 0x927   :  { %v2362_v10 = vrot.slane %v2333_v52, %v11524_v57  ;;  %v2366_v52 = vrot.slane %v2336_v3, %v11524_v57  ;;  %v3457_v3 = vpop.permute.xlu0 %3456 }
 0x929   :  { %v2378_v33 = vsel %vm625_vm5, %v2362_v10, %v2377_v54 }
 0x92a   :  { %v2339_v39 = vpop.permute.xlu1 %2338  ;;  %v2379_v28 = vsel %vm627_vm6, %v2366_v52, %v2378_v33  ;;  %v3488_v52 = vrot.slane %v3457_v3, %v11524_v57 }
 0x92b   :  { %v2370_v60 = vrot.slane %v2339_v39, %v11524_v57  ;;  %v4557_v46 = vpop.permute.xlu0 %4556 }
 0x92d   :  { %v2380_v59 = vsel %vm629_vm7, %v2370_v60, %v2379_v28 }
 0x92e   :  { %v3439_v50 = vpop.permute.xlu1 %3438  ;;  %v2381_v10 = vsel %vm631_vm8, %v2374_v23, %v2380_v59 }
 0x92f   :  { %v3464_v40 = vrot.slane %v3439_v50, %v11524_v57  ;;  %v2383_v58 = vsel %vm1115_vm15, %v2381_v10, 0.0  ;;  %v4566_v28 = vpop.permute.xlu0 %4565 }
 0x931   :  { %v3493_v44 = vsel %vm530_vm1, %v3468_v27, %v3464_v40 }
 0x932   :  { %v3445_v42 = vpop.permute.xlu1 %3444 }
 0x933   :  { %v3472_v29 = vrot.slane %v3445_v42, %v11524_v57  ;;  %v4572_v27 = vpop.permute.xlu0 %4571 }
 0x935   :  { %1257 = vadd.xlane.f32.xlu0 %v1256_v53  ;;  %v3494_v36 = vsel %vm532_vm2, %v3472_v29, %v3493_v44  ;;  %v4582_v29 = vrot.slane %v4557_v46, %v11524_v57  ;;  %v4594_v44 = vrot.slane %v4566_v28, %v11524_v57  ;;  %v18177_v28 = vld [vmem:[#allocation40_spill] sm:$0xff] }
 0x936   :  { %v3448_v39 = vpop.permute.xlu1 %3447 }
 0x937   :  { %v3476_v2 = vrot.slane %v3448_v39, %v11524_v57 }
 0x939   :  { %v3495_v48 = vsel %vm623_vm4, %v3476_v2, %v3494_v36 }
 0x93a   :  { %2384 = vadd.xlane.f32.xlu1 %v2383_v58  ;;  %v3454_v54 = vpop.permute.xlu1 %3453  ;;  %v3496_v33 = vsel %vm625_vm5, %v3480_v37, %v3495_v48  ;;  %v4578_v58 = vpop.permute.xlu0 %4577 }
 0x93b   :  { %v3484_v50 = vrot.slane %v3454_v54, %v11524_v57  ;;  %v4602_v54 = vrot.slane %v4572_v27, %v11524_v57  ;;  %v5362_v27 = vrot.slane %v14935_v35, %v18148_v4  ;;  %v18182_v35 = vld [vmem:[#allocation42_spill] sm:$0xff] }
 0x93d   :  { %v3497_v60 = vsel %vm627_vm6, %v3484_v50, %v3496_v33  ;;  %v4610_v33 = vrot.slane %v4578_v58, %v11524_v57  ;;  %v7592_v58 = vrot.slane %v14969_v0, %v18142_v45 }
 0x93e   :  { %v3460_v21 = vpop.permute.xlu1 %3459  ;;  %v3498_v42 = vsel %vm629_vm7, %v3488_v52, %v3497_v60 }
 0x93f   :  { %v3492_v7 = vrot.slane %v3460_v21, %v11524_v57  ;;  %v6479_v21 = vrot.slane %v14933_v13, %v18148_v4 }
 0x941   :  { %v3499_v40 = vsel %vm631_vm8, %v3492_v7, %v3498_v42  ;;  %vm6495_vm14 = vcmp.eq.f32.partialorder %v18177_v28, %v6479_v21  ;;  %v18185_v21 = vld [vmem:[#allocation44_spill] sm:$0xff] }
 0x942   :  { %v4560_v17 = vpop.permute.xlu1 %4559  ;;  %v3501_v59 = vsel %vm1115_vm15, %v3499_v40, 0.0  ;;  %v8697_v40 = vrot.slane %v15003_v24, %v18143_v32 }
 0x943   :  { %3502 = vadd.xlane.f32.xlu0 %v3501_v59  ;;  %v4586_v23 = vrot.slane %v4560_v17, %v11524_v57  ;;  %v6503_v17 = vsel %vm6495_vm14, %v18166_v6, 3  ;;  %v18178_v59 = vld [vmem:[#allocation41_spill] sm:$0xff] }
 0x944   :  { %vm8725_vm10 = vcmp.eq.f32.partialorder %v18178_v59, %v8697_v40 }
 0x945   :  { %v4611_v39 = vsel %vm530_vm1, %v4586_v23, %v4582_v29  ;;  %v8701_v23 = vrot.slane %v15003_v24, %v18139_v12  ;;  %v8733_v13 = vsel %vm8725_vm10, %v18166_v6, 3  ;;  %v18179_v29 = vld [vmem:[#allocation49_spill] sm:$0xff] }
 0x946   :  { %v4563_v53 = vpop.permute.xlu1 %4562 }
 0x947   :  { %v4590_v3 = vrot.slane %v4563_v53, %v11524_v57  ;;  %vm8726_vm3 = vcmp.eq.f32.partialorder %v18179_v29, %v8701_v23  ;;  %v8705_v53 = vrot.slane %v15003_v24, %v18145_v11 }
 0x949   :  { %v4612_v10 = vsel %vm532_vm2, %v4590_v3, %v4611_v39  ;;  %v8734_v3 = vsel %vm8726_vm3, %v18166_v6, 3  ;;  %v18180_v39 = vld [vmem:[#allocation47_spill] sm:$0xff] }
 0x94a   :  { %v4569_v2 = vpop.permute.xlu1 %4568  ;;  %v4613_v48 = vsel %vm623_vm4, %v4594_v44, %v4612_v10  ;;  %vm8727_vm11 = vcmp.eq.f32.partialorder %v18180_v39, %v8705_v53  ;;  %v18181_v10 = vld [vmem:[#allocation38_spill] sm:$0xff]  ;;  %v8713_v44 = vrot.slane %v15003_v24, %v18148_v4 }
 0x94b   :  { %v4598_v36 = vrot.slane %v4569_v2, %v11524_v57  ;;  %vm5378_vm12 = vcmp.eq.f32.partialorder %v18181_v10, %v5362_v27  ;;  %v7588_v2 = vrot.slane %v14969_v0, %v18145_v11 }
 0x94c   :  { %vm8729_vm13 = vcmp.eq.f32.partialorder %v14749_v55, %v8713_v44  ;;  %v18184_v55 = vld [vmem:[#allocation43_spill] sm:$0xff] }
 0x94d   :  { %v4614_v37 = vsel %vm625_vm5, %v4598_v36, %v4613_v48  ;;  %v8735_v36 = vsel %vm8727_vm11, %v18166_v6, 3  ;;  %v5386_v48 = vsel %vm5378_vm12, %v18166_v6, 3  ;;  %vm7610_vm14 = vcmp.eq.f32.partialorder %v18182_v35, %v7588_v2 }
 0x94e   :  { %v4575_v46 = vpop.permute.xlu1 %4574  ;;  %v4615_v60 = vsel %vm627_vm6, %v4602_v54, %v4614_v37  ;;  %v8737_v37 = vsel %vm8729_vm13, %v18166_v6, 3  ;;  %v7618_v54 = vsel %vm7610_vm14, %v18166_v6, 3 }
 0x94f   :  { %v4606_v50 = vrot.slane %v4575_v46, %v11524_v57  ;;  %v18183_v46 = vld [vmem:[#allocation45_spill] sm:$0xff] }
 0x950   :  { %vm7611_vm10 = vcmp.eq.f32.partialorder %v18183_v46, %v7592_v58 }
 0x951   :  { %v4616_v52 = vsel %vm629_vm7, %v4606_v50, %v4615_v60  ;;  %v7596_v50 = vrot.slane %v14969_v0, %v18148_v4  ;;  %v8709_v60 = vrot.slane %v15003_v24, %v18142_v45 }
 0x952   :  { %v4617_v7 = vsel %vm631_vm8, %v4610_v33, %v4616_v52  ;;  %v7619_v33 = vsel %vm7611_vm10, %v18166_v6, 3 }
 0x953   :  { %v4619_v42 = vsel %vm1115_vm15, %v4617_v7, 0.0  ;;  %vm7612_vm3 = vcmp.eq.f32.partialorder %v18184_v55, %v7596_v50  ;;  %vm8728_vm11 = vcmp.eq.f32.partialorder %v18185_v21, %v8709_v60 }
 0x954   :  { %4620 = vadd.xlane.f32.xlu1 %v4619_v42  ;;  %v7620_v52 = vsel %vm7612_vm3, %v18166_v6, 3  ;;  %v8736_v7 = vsel %vm8728_vm11, %v18166_v6, 3 }
 0x959   :  { %6526 = vperm.xlu0 %10696, %v6503_v17  }
 0x95d   :  { %8748 = vperm.xlu0 %10696, %v8733_v13   ;;  %v5389_v42 = vpop.permute.xlu0 %5388  ;;  %v5392_v0 = vpop.permute.xlu1 %5391 }
 0x961   :  { %8751 = vperm.xlu0 %10696, %v8734_v3   ;;  %v6509_v28 = vpop.permute.xlu0 %6508  ;;  %v6506_v59 = vpop.permute.xlu1 %6505 }
 0x962   :  { %v6535_v58 = vrot.slane %v6509_v28, %v11524_v57 }
 0x965   :  { %8754 = vperm.xlu0 %10696, %v8735_v36   ;;  %5409 = vperm.xlu1 %10697, %v5386_v48   ;;  %v6512_v40 = vpop.permute.xlu0 %6511  ;;  %v5395_v13 = vpop.permute.xlu1 %5394 }
 0x969   :  { %8760 = vperm.xlu0 %10696, %v8737_v37   ;;  %7637 = vperm.xlu1 %10697, %v7618_v54   ;;  %v6515_v17 = vpop.permute.xlu0 %6514  ;;  %v5398_v53 = vpop.permute.xlu1 %5397  ;;  %v6531_v37 = vrot.slane %v6506_v59, %v11524_v57  ;;  %v6539_v54 = vrot.slane %v6512_v40, %v11524_v57 }
 0x96a   :  { %v6543_v46 = vrot.slane %v6515_v17, %v11524_v57 }
 0x96b   :  { %v6560_v60 = vsel %vm530_vm1, %v6535_v58, %v6531_v37 }
 0x96c   :  { %v6561_v21 = vsel %vm532_vm2, %v6539_v54, %v6560_v60  ;;  %v5414_v54 = vrot.slane %v5389_v42, %v11524_v57 }
 0x96d   :  { %7640 = vperm.xlu1 %10697, %v7619_v33   ;;  %v6562_v28 = vsel %vm623_vm4, %v6543_v46, %v6561_v21  ;;  %v5418_v46 = vrot.slane %v5392_v0, %v11524_v57 }
 0x971   :  { %7643 = vperm.xlu1 %10697, %v7620_v52  }
 0x975   :  { %8757 = vperm.xlu1 %10697, %v8736_v7  }
 0x979   :  { %v15139_v23 = vpop.permute.xlu0 %7625  ;;  %v15141_v27 = vpop.permute.xlu1 %7622 }
 0x97d   :  { %v6518_v29 = vpop.permute.xlu0 %6517  ;;  %v5401_v39 = vpop.permute.xlu1 %5400 }
 0x97e   :  { %v6547_v33 = vrot.slane %v6518_v29, %v11524_v57  ;;  %v5430_v21 = vrot.slane %v5401_v39, %v11524_v57 }
 0x980   :  { %v6563_v59 = vsel %vm625_vm5, %v6547_v33, %v6562_v28  ;;  %v5422_v33 = vrot.slane %v5395_v13, %v11524_v57 }
 0x981   :  { %v5404_v24 = vpop.permute.xlu0 %5403  ;;  %v15147_v6 = vpop.permute.xlu1 %7628 }
 0x982   :  { %v5434_v28 = vrot.slane %v5404_v24, %v11524_v57 }
 0x985   :  { %v15143_v3 = vpop.permute.xlu0 %7631  ;;  %v6521_v2 = vpop.permute.xlu1 %6520 }
 0x986   :  { %v6551_v52 = vrot.slane %v6521_v2, %v11524_v57 }
 0x988   :  { %v6564_v17 = vsel %vm627_vm6, %v6551_v52, %v6563_v59  ;;  %v5426_v52 = vrot.slane %v5398_v53, %v11524_v57 }
 0x989   :  { %v15145_v10 = vpop.permute.xlu0 %8742  ;;  %v15151_v48 = vpop.permute.xlu1 %8739 }
 0x98d   :  { %v6524_v44 = vpop.permute.xlu0 %6523  ;;  %v5407_v50 = vpop.permute.xlu1 %5406 }
 0x98e   :  { %v6555_v7 = vrot.slane %v6524_v44, %v11524_v57  ;;  %v5438_v0 = vrot.slane %v5407_v50, %v11524_v57  ;;  %v7652_v50 = vrot.slane %v15139_v23, %v11524_v57 }
 0x990   :  { %v6565_v61 = vsel %vm629_vm7, %v6555_v7, %v6564_v17  ;;  %v5443_v7 = vsel %vm530_vm1, %v5418_v46, %v5414_v54  ;;  %v7648_v46 = vrot.slane %v15141_v27, %v11524_v57  ;;  %v8769_v27 = vrot.slane %v15145_v10, %v11524_v57 }
 0x991   :  { %v15149_v36 = vpop.permute.xlu0 %8745  ;;  %v7635_v5 = vpop.permute.xlu1 %7634  ;;  %v5444_v42 = vsel %vm532_vm2, %v5422_v33, %v5443_v7 }
 0x992   :  { %v5445_v13 = vsel %vm623_vm4, %v5426_v52, %v5444_v42  ;;  %v7656_v52 = vrot.slane %v15147_v6, %v11524_v57  ;;  %v8765_v6 = vrot.slane %v15151_v48, %v11524_v57 }
 0x994   :  { %v8794_v48 = vsel %vm530_vm1, %v8769_v27, %v8765_v6 }
 0x9be   :  { %v15153_v35 = vpop.xlane.xlu0 %1257 }
 0x9c3   :  { %v15175_v37 = vpop.xlane.xlu1 %2384 }
 0x9cc   :  { %v15160_v55 = vpop.xlane.xlu0 %3502 }
 0x9d4   :  { %v6527_v40 = vpop.permute.xlu0 %6526 }
 0x9d5   :  { %v6559_v29 = vrot.slane %v6527_v40, %v11524_v57  ;;  %v5446_v40 = vsel %vm625_vm5, %v5430_v21, %v5445_v13  ;;  %v7660_v21 = vrot.slane %v15143_v3, %v11524_v57 }
 0x9d6   :  { %v5447_v39 = vsel %vm627_vm6, %v5434_v28, %v5446_v40  ;;  %v7664_v28 = vrot.slane %v7635_v5, %v11524_v57  ;;  %v8773_v5 = vrot.slane %v15149_v36, %v11524_v57 }
 0x9d7   :  { %v6566_v58 = vsel %vm631_vm8, %v6559_v29, %v6565_v61  ;;  %v5448_v29 = vsel %vm629_vm7, %v5438_v0, %v5447_v39  ;;  %v7677_v0 = vsel %vm530_vm1, %v7652_v50, %v7648_v46 }
 0x9d8   :  { %v15173_v2 = vsel %vm634_vm9, %v6566_v58, 2147483647  ;;  %v8749_v59 = vpop.permute.xlu0 %8748  ;;  %v7678_v23 = vsel %vm532_vm2, %v7656_v52, %v7677_v0 }
 0x9d9   :  { %v6569_v44 = vshra.s32 %v15173_v2, 16 }
 0x9db   :  { %v15181_v60 = vcvt.s32.f32 %v6569_v44 }
 0x9dc   :  { %v8752_v58 = vpop.permute.xlu0 %8751 }
 0x9dd   :  { %6572 = vmin.xlane.f32.xlu0 %v15181_v60  ;;  %v15186_v61 = vpop.xlane.xlu1 %4620 }
 0x9e0   :  { %v8755_v13 = vpop.permute.xlu0 %8754 }
 0x9e1   :  { %v5410_v53 = vpop.permute.xlu1 %5409  ;;  %v8785_v50 = vrot.slane %v8755_v13, %v11524_v57 }
 0x9e2   :  { %v5442_v17 = vrot.slane %v5410_v53, %v11524_v57  ;;  %v7679_v53 = vsel %vm623_vm4, %v7660_v21, %v7678_v23 }
 0x9e3   :  { %v7680_v39 = vsel %vm625_vm5, %v7664_v28, %v7679_v53 }
 0x9e4   :  { %v5449_v44 = vsel %vm631_vm8, %v5442_v17, %v5448_v29  ;;  %v8777_v17 = vrot.slane %v8749_v59, %v11524_v57  ;;  %v8761_v36 = vpop.permute.xlu0 %8760 }
 0x9e5   :  { %v7638_v24 = vpop.permute.xlu1 %7637  ;;  %v5450_v54 = vsel %vm634_vm9, %v5449_v44, 2147483647  ;;  %v8781_v44 = vrot.slane %v8752_v58, %v11524_v57  ;;  %v8793_v13 = vrot.slane %v8761_v36, %v11524_v57 }
 0x9e6   :  { %v5452_v33 = vshra.s32 %v5450_v54, 16  ;;  %v7668_v40 = vrot.slane %v7638_v24, %v11524_v57 }
 0x9e8   :  { %v5454_v7 = vcvt.s32.f32 %v5452_v33  ;;  %v7681_v24 = vsel %vm627_vm6, %v7668_v40, %v7680_v39  ;;  %v8795_v33 = vsel %vm532_vm2, %v8773_v5, %v8794_v48  ;;  %v6568_v39 = vand.u32 65535, %v15173_v2 }
 0x9e9   :  { %v7641_v42 = vpop.permute.xlu1 %7640  ;;  %v8796_v59 = vsel %vm623_vm4, %v8777_v17, %v8795_v33 }
 0x9ea   :  { %5455 = vmin.xlane.f32.xlu1 %v5454_v7  ;;  %v7672_v3 = vrot.slane %v7641_v42, %v11524_v57  ;;  %v8797_v28 = vsel %vm625_vm5, %v8781_v44, %v8796_v59 }
 0x9eb   :  { %v8798_v40 = vsel %vm627_vm6, %v8785_v50, %v8797_v28 }
 0x9ec   :  { %v7682_v46 = vsel %vm629_vm7, %v7672_v3, %v7681_v24  ;;  %v5451_v24 = vand.u32 65535, %v5450_v54 }
 0x9ed   :  { %v7644_v29 = vpop.permute.xlu1 %7643 }
 0x9ee   :  { %v7676_v10 = vrot.slane %v7644_v29, %v11524_v57  ;;  %v6570_v29 = vcvt.s32.f32 %v6568_v39  ;;  %v5453_v48 = vcvt.s32.f32 %v5451_v24 }
 0x9f0   :  { %v7683_v52 = vsel %vm631_vm8, %v7676_v10, %v7682_v46 }
 0x9f1   :  { %v8758_v21 = vpop.permute.xlu1 %8757  ;;  %v7684_v58 = vsel %vm634_vm9, %v7683_v52, 2147483647 }
 0x9f2   :  { %v8789_v42 = vrot.slane %v8758_v21, %v11524_v57  ;;  %v7686_v0 = vshra.s32 %v7684_v58, 16  ;;  %v7685_v46 = vand.u32 65535, %v7684_v58 }
 0x9f4   :  { %v8799_v23 = vsel %vm629_vm7, %v8789_v42, %v8798_v40  ;;  %v7688_v27 = vcvt.s32.f32 %v7686_v0  ;;  %v7687_v36 = vcvt.s32.f32 %v7685_v46  ;;  %v1291_v0 = vrot.slane %v15153_v35, %v18148_v4  ;;  %v18186_v40 = vld [vmem:[#allocation6_spill] sm:$0xff] }
 0x9f5   :  { %v8800_v6 = vsel %vm631_vm8, %v8793_v13, %v8799_v23  ;;  %v18187_v13 = vmov 0.0  }
 0x9f6   :  { %7689 = vmin.xlane.f32.xlu0 %v7688_v27  ;;  %v8801_v3 = vsel %vm634_vm9, %v8800_v6, 2147483647  ;;  %10764 = vrcp.f32 %v1291_v0  ;;  %v2390_v6 = vrot.slane %v15175_v37, %v11262_v8  ;;  %v2410_v0 = vrot.slane %v15175_v37, %v18145_v11 }
 0x9f7   :  { %v8803_v53 = vshra.s32 %v8801_v3, 16  ;;  %v8802_v52 = vand.u32 65535, %v8801_v3 }
 0x9f8   :  { %10766 = vrcp.f32 %v2390_v6 }
 0x9f9   :  { %v8805_v5 = vcvt.s32.f32 %v8803_v53  ;;  %v1263_v53 = vrot.slane %v15153_v35, %v11262_v8 }
 0x9fb   :  { %8806 = vmin.xlane.f32.xlu1 %v8805_v5  ;;  %10768 = vrcp.f32 %v1263_v53 }
 0xa66   :  { %v6573_v17 = vpop.xlane.xlu0 %6572 }
 0xa67   :  { %vm6574_vm12 = vcmp.eq.f32.partialorder %v15181_v60, %v6573_v17  ;;  %v8804_v60 = vcvt.s32.f32 %v8802_v52  ;;  %v6579_v21 = vcvt.f32.s32 %v6573_v17  ;;  %v2402_v52 = vrot.slane %v15175_v37, %v18143_v32 }
 0xa68   :  { %v6575_v44 = vsel %vm6574_vm12, %v6570_v29, inf }
 0xa69   :  { %6576 = vmin.xlane.f32.xlu1 %v6575_v44  ;;  %v6580_v28 = vshll.u32 %v6579_v21, 16  ;;  %v1267_v44 = vrot.slane %v15153_v35, %v12107_v19 }
 0xa73   :  { %v5456_v10 = vpop.xlane.xlu1 %5455 }
 0xa74   :  { %vm5457_vm13 = vcmp.eq.f32.partialorder %v5454_v7, %v5456_v10  ;;  %v5462_v3 = vcvt.f32.s32 %v5456_v10 }
 0xa75   :  { %v5458_v50 = vsel %vm5457_vm13, %v5453_v48, inf  ;;  %v2398_v48 = vrot.slane %v15175_v37, %v12110_v22 }
 0xa76   :  { %5459 = vmin.xlane.f32.xlu0 %v5458_v50  ;;  %v5463_v17 = vshll.u32 %v5462_v3, 16  ;;  %v1271_v50 = vrot.slane %v15153_v35, %v12110_v22  ;;  %v18188_v3 = vld [vmem:[#allocation8_spill] sm:$0xff] }
 0xa7f   :  { %v15240_v33 = vpop.xlane.xlu0 %7689 }
 0xa80   :  { %vm7691_vm9 = vcmp.eq.f32.partialorder %v7688_v27, %v15240_v33 }
 0xa81   :  { %v7692_v2 = vsel %vm7691_vm9, %v7687_v36, inf }
 0xa82   :  { %7693 = vmin.xlane.f32.xlu0 %v7692_v2  ;;  %v10765_v2 = vpop.eup %10764 }
 0xa84   :  { %v15243_v59 = vpop.xlane.xlu1 %8806 }
 0xa85   :  { %vm8808_vm14 = vcmp.eq.f32.partialorder %v8805_v5, %v15243_v59  ;;  %v2394_v5 = vrot.slane %v15175_v37, %v12107_v19 }
 0xa86   :  { %v8809_v54 = vsel %vm8808_vm14, %v8804_v60, inf  ;;  %v1275_v60 = vrot.slane %v15153_v35, %v18143_v32 }
 0xa87   :  { %8810 = vmin.xlane.f32.xlu1 %v8809_v54  ;;  %10770 = vrcp.f32 %v2394_v5  ;;  %v2406_v54 = vrot.slane %v15175_v37, %v18139_v12 }
 0xa88   :  { %10772 = vrcp.f32 %v1267_v44 }
 0xa89   :  { %10774 = vrcp.f32 %v2398_v48 }
 0xa8a   :  { %10776 = vrcp.f32 %v1271_v50 }
 0xa8b   :  { %10778 = vrcp.f32 %v2402_v52 }
 0xa8c   :  { %10780 = vrcp.f32 %v1275_v60 }
 0xa8d   :  { %10782 = vrcp.f32 %v2406_v54 }
 0xaf2   :  { %v6577_v7 = vpop.xlane.xlu1 %6576 }
 0xaf3   :  { %v6578_v42 = vcvt.f32.s32 %v6577_v7 }
 0xaf5   :  { %v6581_v58 = vadd.s32 %v6580_v28, %v6578_v42  ;;  %v1315_v28 = vmul.f32 %v10765_v2, %v14843_v16  ;;  %v10767_v42 = vpop.eup %10766 }
 0xaf6   :  { %v2428_v5 = vmul.f32 %v10767_v42, %v14802_v15 }
 0xaf7   :  { %vm6582_vm10 = vcmp.eq.s32.totalorder %v18186_v40, %v6581_v58  ;;  %v1279_v58 = vrot.slane %v15153_v35, %v18139_v12  ;;  %v1332_v53 = vmul.f32 %v18188_v3, %v1315_v28 }
 0xaf8   :  { %v15250_v23 = vsel %vm6582_vm10, 1.0, %v18187_v13 }
 0xaf9   :  { %v6588_v27 = vrot.slane %v15250_v23, %v11262_v8  ;;  %v6595_v6 = vrot.slane %v15250_v23, %v12107_v19  ;;  %10784 = vrcp.f32 %v1279_v58  ;;  %v6602_v44 = vrot.slane %v15250_v23, %v12110_v22 }
 0xafa   :  { %10786 = vrcp.f32 %v2410_v0  ;;  %v3512_v0 = vrot.slane %v15160_v55, %v12107_v19 }
 0xafb   :  { %6590 = vbcast.lane.b32.xlu0 %v6588_v27, 256  ;;  %v10769_v27 = vpop.eup %10768 }
 0xafc   :  { %v10771_v16 = vpop.eup %10770  ;;  %v1301_v15 = vmul.f32 %v10769_v27, %v14790_v9 }
 0xafd   :  { %v2430_v48 = vmul.f32 %v10771_v16, %v14850_v31 }
 0xafe   :  { %v1325_v2 = vmul.f32 %v18188_v3, %v1301_v15 }
 0xaff   :  { %v5460_v39 = vpop.xlane.xlu0 %5459  ;;  %v2444_v60 = vmul.f32 %v2430_v48, %v18188_v3 }
 0xb00   :  { %v5461_v29 = vcvt.f32.s32 %v5460_v39  ;;  %v1283_v39 = vrot.slane %v15153_v35, %v18145_v11 }
 0xb02   :  { %v5464_v24 = vadd.s32 %v5463_v17, %v5461_v29  ;;  %v2414_v17 = vrot.slane %v15175_v37, %v18142_v45  ;;  %v10773_v29 = vpop.eup %10772  ;;  %10788 = vrcp.f32 %v1283_v39 }
 0xb03   :  { %v10775_v50 = vpop.eup %10774  ;;  %v1303_v9 = vmul.f32 %v10773_v29, %v14775_v14 }
 0xb04   :  { %vm5465_vm3 = vcmp.eq.s32.totalorder %v18186_v40, %v5464_v24  ;;  %v2443_v24 = vmul.f32 %v2428_v5, %v18188_v3  ;;  %10790 = vrcp.f32 %v2414_v17  ;;  %v10777_v52 = vpop.eup %10776  ;;  %v2432_v31 = vmul.f32 %v10775_v50, %v14860_v26 }
 0xb05   :  { %v15266_v10 = vsel %vm5465_vm3, 1.0, %v18187_v13  ;;  %v10779_v54 = vpop.eup %10778  ;;  %v1305_v28 = vmul.f32 %v10777_v52, %v14807_v47  ;;  %v7696_v17 = vcvt.f32.s32 %v15240_v33  ;;  %v3520_v50 = vrot.slane %v15160_v55, %v18143_v32 }
 0xb06   :  { %v5471_v46 = vrot.slane %v15266_v10, %v11262_v8  ;;  %v5485_v36 = vrot.slane %v15266_v10, %v12110_v22  ;;  %v5478_v21 = vrot.slane %v15266_v10, %v12107_v19  ;;  %v5492_v7 = vrot.slane %v15266_v10, %v18143_v32 }
 0xb07   :  { %v2434_v42 = vmul.f32 %v10779_v54, %v14814_v63 }
 0xb08   :  { %5473 = vbcast.lane.b32.xlu1 %v5471_v46, 256  ;;  %5487 = vbcast.lane.b32.xlu0 %v5485_v36, 256  ;;  %v1287_v46 = vrot.slane %v15153_v35, %v18142_v45  ;;  %v2418_v36 = vrot.slane %v15175_v37, %v18148_v4  ;;  %v3508_v35 = vrot.slane %v15160_v55, %v11262_v8 }
 0xb09   :  { %v1326_v37 = vmul.f32 %v18188_v3, %v1303_v9 }
 0xb0a   :  { %10792 = vrcp.f32 %v1287_v46 }
 0xb0b   :  { %10794 = vrcp.f32 %v2418_v36  ;;  %v7694_v63 = vpop.xlane.xlu0 %7693  ;;  %v7697_v36 = vshll.u32 %v7696_v17, 16 }
 0xb0c   :  { %5480 = vbcast.lane.b32.xlu1 %v5478_v21, 256  ;;  %5494 = vbcast.lane.b32.xlu0 %v5492_v7, 256  ;;  %v10781_v21 = vpop.eup %10780  ;;  %v2445_v7 = vmul.f32 %v2432_v31, %v18188_v3  ;;  %10796 = vrcp.f32 %v3508_v35 }
 0xb0d   :  { %v10783_v14 = vpop.eup %10782  ;;  %v1307_v58 = vmul.f32 %v10781_v21, %v14819_v20  ;;  %10798 = vrcp.f32 %v3512_v0  ;;  %v3516_v20 = vrot.slane %v15160_v55, %v12110_v22 }
 0xb0e   :  { %v10785_v26 = vpop.eup %10784  ;;  %v2436_v5 = vmul.f32 %v10783_v14, %v14869_v51  ;;  %v3532_v14 = vrot.slane %v15160_v55, %v18142_v45 }
 0xb0f   :  { %v10787_v27 = vpop.eup %10786  ;;  %v1328_v16 = vmul.f32 %v18188_v3, %v1307_v58  ;;  %10800 = vrcp.f32 %v3516_v20 }
 0xb10   :  { %6597 = vbcast.lane.b32.xlu1 %v6595_v6, 256  ;;  %1370 = vperm.xlu0 %10696, %v1332_v53   ;;  %v1327_v6 = vmul.f32 %v18188_v3, %v1305_v28  ;;  %v2446_v53 = vmul.f32 %v2434_v42, %v18188_v3  ;;  %v10789_v47 = vpop.eup %10788  ;;  %v2447_v29 = vmul.f32 %v2436_v5, %v18188_v3  ;;  %10802 = vrcp.f32 %v3520_v50  ;;  %v8811_v28 = vpop.xlane.xlu1 %8810 }
 0xb11   :  { %v10791_v39 = vpop.eup %10790  ;;  %v2438_v51 = vmul.f32 %v10787_v27, %v14826_v38  ;;  %v1311_v48 = vmul.f32 %v10789_v47, %v14831_v34  ;;  %v3524_v38 = vrot.slane %v15160_v55, %v18139_v12  ;;  %v4634_v5 = vrot.slane %v15186_v61, %v12110_v22 }
 0xb13   :  { %v2448_v52 = vmul.f32 %v2438_v51, %v18188_v3  ;;  %v1330_v34 = vmul.f32 %v18188_v3, %v1311_v48  ;;  %10804 = vrcp.f32 %v3524_v38  ;;  %v4642_v48 = vrot.slane %v15186_v61, %v18139_v12 }
 0xb14   :  { %6604 = vbcast.lane.b32.xlu1 %v6602_v44, 256  ;;  %2453 = vperm.xlu0 %10696, %v2443_v24   ;;  %v1309_v44 = vmul.f32 %v10785_v26, %v14784_v43  ;;  %v7695_v24 = vcvt.f32.s32 %v7694_v63  ;;  %v2440_v43 = vmul.f32 %v10791_v39, %v14878_v56  ;;  %v3528_v56 = vrot.slane %v15160_v55, %v18145_v11 }
 0xb15   :  { %v4630_v26 = vrot.slane %v15186_v61, %v12107_v19 }
 0xb16   :  { %v1329_v33 = vmul.f32 %v18188_v3, %v1309_v44  ;;  %10806 = vrcp.f32 %v3528_v56  ;;  %v18192_v56 = vld [vmem:[#allocation22_spill] sm:$0xff] }
 0xb17   :  { %v10793_v15 = vpop.eup %10792 }
 0xb18   :  { %1335 = vperm.xlu1 %10697, %v1325_v2   ;;  %2458 = vperm.xlu0 %10696, %v2444_v60   ;;  %v10795_v46 = vpop.eup %10794  ;;  %v7698_v2 = vadd.s32 %v7697_v36, %v7695_v24  ;;  %v2449_v60 = vmul.f32 %v2440_v43, %v18188_v3  ;;  %v1313_v9 = vmul.f32 %v10793_v15, %v14795_v1 }
 0xb19   :  { %v2442_v31 = vmul.f32 %v10795_v46, %v14838_v30  ;;  %v10797_v54 = vpop.eup %10796  ;;  %v4626_v1 = vrot.slane %v15186_v61, %v11262_v8  ;;  %v6623_v15 = vrot.slane %v15250_v23, %v18145_v11  ;;  %v18189_v46 = vld [vmem:[#allocation52_spill] sm:$0xff] }
 0xb1a   :  { %vm7699_vm11 = vcmp.eq.s32.totalorder %v18186_v40, %v7698_v2  ;;  %v10799_v35 = vpop.eup %10798  ;;  %v1331_v21 = vmul.f32 %v18188_v3, %v1313_v9  ;;  %v4646_v2 = vrot.slane %v15186_v61, %v18145_v11 }
 0xb1b   :  { %v15350_v30 = vsel %vm7699_vm11, 1.0, %v18187_v13  ;;  %v3548_v42 = vmul.f32 %v10799_v35, %v14855_v41  ;;  %10808 = vrcp.f32 %v4626_v1 }
 0xb1c   :  { %1340 = vperm.xlu1 %10697, %v1326_v37   ;;  %2463 = vperm.xlu0 %10696, %v2445_v7   ;;  %v2450_v37 = vmul.f32 %v2442_v31, %v18188_v3  ;;  %v3546_v7 = vmul.f32 %v10797_v54, %v14892_v62  ;;  %v10801_v58 = vpop.eup %10800  ;;  %v8813_v62 = vcvt.f32.s32 %v15243_v59  ;;  %v7705_v27 = vrot.slane %v15350_v30, %v11262_v8 }
 0xb1d   :  { %v3550_v41 = vmul.f32 %v10801_v58, %v14901_v49  ;;  %10810 = vrcp.f32 %v3532_v14  ;;  %v10803_v47 = vpop.eup %10802  ;;  %v3562_v63 = vmul.f32 %v3548_v42, %v18188_v3  ;;  %v4638_v49 = vrot.slane %v15186_v61, %v18143_v32  ;;  %v18194_v14 = vld [vmem:[#allocation21_spill] sm:$0xff] }
 0xb1e   :  { %v3561_v0 = vmul.f32 %v3546_v7, %v18188_v3  ;;  %v8814_v59 = vshll.u32 %v8813_v62, 16  ;;  %10812 = vrcp.f32 %v4630_v26  ;;  %v7719_v17 = vrot.slane %v15350_v30, %v12110_v22 }
 0xb20   :  { %1345 = vperm.xlu1 %10697, %v1327_v6   ;;  %2468 = vperm.xlu0 %10696, %v2446_v53   ;;  %v8812_v6 = vcvt.f32.s32 %v8811_v28  ;;  %v3536_v53 = vrot.slane %v15160_v55, %v18148_v4  ;;  %v10805_v39 = vpop.eup %10804  ;;  %v3563_v55 = vmul.f32 %v3550_v41, %v18188_v3  ;;  %v18193_v28 = vld [vmem:[#allocation20_spill] sm:$0xff] }
 0xb21   :  { %v3554_v44 = vmul.f32 %v10805_v39, %v14865_v18 }
 0xb22   :  { %v8815_v20 = vadd.s32 %v8814_v59, %v8812_v6  ;;  %10814 = vrcp.f32 %v3536_v53  ;;  %v6609_v53 = vrot.slane %v15250_v23, %v18143_v32 }
 0xb23   :  { %10816 = vrcp.f32 %v4634_v5  ;;  %v10807_v51 = vpop.eup %10806 }
 0xb24   :  { %1350 = vperm.xlu1 %10697, %v1328_v16   ;;  %2473 = vperm.xlu0 %10696, %v2447_v29   ;;  %v5499_v16 = vrot.slane %v15266_v10, %v18139_v12  ;;  %v3552_v29 = vmul.f32 %v10803_v47, %v14910_v25  ;;  %vm8816_vm12 = vcmp.eq.s32.totalorder %v18186_v40, %v8815_v20  ;;  %10818 = vrcp.f32 %v4638_v49  ;;  %v18196_v47 = vld [vmem:[#allocation29_spill] sm:$0xff]  ;;  %v18197_v49 = vld [vmem:[#allocation48_spill] sm:$0xff] }
 0xb25   :  { %v15383_v25 = vsel %vm8816_vm12, 1.0, %v18187_v13  ;;  %v3565_v40 = vmul.f32 %v3554_v44, %v18188_v3  ;;  %v3556_v18 = vmul.f32 %v10807_v51, %v18189_v46  ;;  %10820 = vrcp.f32 %v4642_v48  ;;  %v18198_v44 = vld [vmem:[#allocation23_spill] sm:$0xff] }
 0xb26   :  { %v3564_v24 = vmul.f32 %v3552_v29, %v18188_v3  ;;  %10822 = vrcp.f32 %v4646_v2  ;;  %v7726_v48 = vrot.slane %v15350_v30, %v18143_v32  ;;  %v7733_v46 = vrot.slane %v15350_v30, %v18139_v12 }
 0xb27   :  { %v7747_v2 = vrot.slane %v15350_v30, %v18142_v45 }
 0xb28   :  { %1355 = vperm.xlu1 %10697, %v1329_v33   ;;  %2478 = vperm.xlu0 %10696, %v2448_v52   ;;  %v10809_v50 = vpop.eup %10808  ;;  %v8822_v33 = vrot.slane %v15383_v25, %v11262_v8  ;;  %v18190_v52 = vld [vmem:[#allocation51_spill] sm:$0xff] }
 0xb29   :  { %v4664_v43 = vmul.f32 %v10809_v50, %v18190_v52  ;;  %v5513_v50 = vrot.slane %v15266_v10, %v18142_v45  ;;  %v7740_v52 = vrot.slane %v15350_v30, %v18145_v11 }
 0xb2a   :  { %v10811_v36 = vpop.eup %10810 }
 0xb2b   :  { %v10813_v38 = vpop.eup %10812  ;;  %v4679_v54 = vmul.f32 %v4664_v43, %v18188_v3  ;;  %v6637_v43 = vrot.slane %v15250_v23, %v18148_v4 }
 0xb2c   :  { %1360 = vperm.xlu1 %10697, %v1330_v34   ;;  %2483 = vperm.xlu0 %10696, %v2449_v60   ;;  %v3566_v34 = vmul.f32 %v3556_v18, %v18188_v3  ;;  %v18191_v60 = vld [vmem:[#allocation46_spill] sm:$0xff]  ;;  %v4666_v35 = vmul.f32 %v10813_v38, %v18192_v56  ;;  %v6630_v18 = vrot.slane %v15250_v23, %v18142_v45 }
 0xb2d   :  { %v3558_v9 = vmul.f32 %v10811_v36, %v18191_v60  ;;  %v5520_v36 = vrot.slane %v15266_v10, %v18148_v4  ;;  %v7754_v38 = vrot.slane %v15350_v30, %v18148_v4  ;;  %v8850_v60 = vrot.slane %v15383_v25, %v18139_v12 }
 0xb2e   :  { %v4680_v1 = vmul.f32 %v4666_v35, %v18188_v3 }
 0xb2f   :  { %v10815_v31 = vpop.eup %10814  ;;  %v3567_v7 = vmul.f32 %v3558_v9, %v18188_v3 }
 0xb30   :  { %1365 = vperm.xlu1 %10697, %v1331_v21   ;;  %2488 = vperm.xlu0 %10696, %v2450_v37   ;;  %v4650_v21 = vrot.slane %v15186_v61, %v18142_v45  ;;  %v10817_v37 = vpop.eup %10816  ;;  %v3560_v42 = vmul.f32 %v10815_v31, %v18193_v28  ;;  %v8857_v31 = vrot.slane %v15383_v25, %v18145_v11  ;;  %v11076_v28 = vld [vmem:[%s17802_s4 + $0x300] sm:$0x1f] }
 0xb31   :  { %v4668_v26 = vmul.f32 %v10817_v37, %v18194_v14  ;;  %v10819_v58 = vpop.eup %10818  ;;  %v11077_v14 = vld [vmem:[%s17802_s4 + $0x308] sm:$0x1f] }
 0xb32   :  { %10824 = vrcp.f32 %v4650_v21  ;;  %v3568_v62 = vmul.f32 %v3560_v42, %v18188_v3  ;;  %v10821_v41 = vpop.eup %10820 }
 0xb33   :  { %v4672_v59 = vmul.f32 %v10821_v41, %v18196_v47 }
 0xb34   :  { %3571 = vperm.xlu1 %10697, %v3561_v0   ;;  %7707 = vbcast.lane.b32.xlu0 %v7705_v27, 256  ;;  %v4681_v0 = vmul.f32 %v4668_v26, %v18188_v3  ;;  %v18195_v27 = vld [vmem:[#allocation53_spill] sm:$0xff] }
 0xb35   :  { %v4670_v6 = vmul.f32 %v10819_v58, %v18195_v27  ;;  %v4683_v20 = vmul.f32 %v4672_v59, %v18188_v3  ;;  %v11079_v27 = vld [vmem:[%s17802_s4 + $0x320] sm:$0x1f] }
 0xb37   :  { %v4682_v5 = vmul.f32 %v4670_v6, %v18188_v3 }
 0xb38   :  { %3576 = vperm.xlu1 %10697, %v3562_v63   ;;  %5501 = vbcast.lane.b32.xlu0 %v5499_v16, 256  ;;  %v10823_v63 = vpop.eup %10822  ;;  %v7712_v16 = vrot.slane %v15350_v30, %v12107_v19  ;;  %v8871_v30 = vrot.slane %v15383_v25, %v18148_v4 }
 0xb39   :  { %v4674_v39 = vmul.f32 %v10823_v63, %v18197_v49 }
 0xb3b   :  { %v4684_v29 = vmul.f32 %v4674_v39, %v18188_v3 }
 0xb3c   :  { %3581 = vperm.xlu1 %10697, %v3563_v55   ;;  %7721 = vbcast.lane.b32.xlu0 %v7719_v17, 256  ;;  %v6616_v17 = vrot.slane %v15250_v23, %v18139_v12  ;;  %v8864_v23 = vrot.slane %v15383_v25, %v18142_v45 }
 0xb3f   :  { %v10825_v55 = vpop.eup %10824 }
 0xb40   :  { %3586 = vperm.xlu1 %10697, %v3564_v24   ;;  %6625 = vbcast.lane.b32.xlu0 %v6623_v15, 256  ;;  %v4676_v51 = vmul.f32 %v10825_v55, %v18198_v44  ;;  %v5506_v24 = vrot.slane %v15266_v10, %v18145_v11  ;;  %v8843_v10 = vrot.slane %v15383_v25, %v18143_v32 }
 0xb42   :  { %v4685_v15 = vmul.f32 %v4676_v51, %v18188_v3  ;;  %v11082_v51 = vld [vmem:[%s17802_s4 + $0x380] sm:$0x1f] }
 0xb44   :  { %3591 = vperm.xlu1 %10697, %v3565_v40   ;;  %8824 = vbcast.lane.b32.xlu0 %v8822_v33, 256  ;;  %v8829_v40 = vrot.slane %v15383_v25, %v12107_v19  ;;  %v8836_v33 = vrot.slane %v15383_v25, %v12110_v22 }
 0xb48   :  { %3596 = vperm.xlu1 %10697, %v3566_v34   ;;  %4689 = vperm.xlu0 %10696, %v4679_v54  }
 0xb4c   :  { %3601 = vperm.xlu1 %10697, %v3567_v7   ;;  %4694 = vperm.xlu0 %10696, %v4680_v1  }
 0xb50   :  { %3606 = vperm.xlu1 %10697, %v3568_v62   ;;  %4699 = vperm.xlu0 %10696, %v4681_v0   ;;  %v11078_v62 = vld [vmem:[%s17802_s4 + $0x318] sm:$0x1f] }
 0xb54   :  { %6611 = vbcast.lane.b32.xlu1 %v6609_v53, 256  ;;  %4704 = vperm.xlu0 %10696, %v4682_v5  }
 0xb58   :  { %7714 = vbcast.lane.b32.xlu1 %v7712_v16, 256  ;;  %4709 = vperm.xlu0 %10696, %v4683_v20   ;;  %v11080_v20 = vld [vmem:[%s17802_s4 + $0x310] sm:$0x1f] }
 0xb5c   :  { %6618 = vbcast.lane.b32.xlu1 %v6616_v17, 256  ;;  %4714 = vperm.xlu0 %10696, %v4684_v29   ;;  %v11081_v29 = vld [vmem:[%s17802_s4 + $0x378] sm:$0x1f] }
 0xb60   :  { %5508 = vbcast.lane.b32.xlu1 %v5506_v24, 256  ;;  %4719 = vperm.xlu0 %10696, %v4685_v15  }
 0xb64   :  { %7728 = vbcast.lane.b32.xlu1 %v7726_v48, 256  ;;  %5515 = vbcast.lane.b32.xlu0 %v5513_v50, 256 }
 0xb68   :  { %8831 = vbcast.lane.b32.xlu1 %v8829_v40, 256  ;;  %7735 = vbcast.lane.b32.xlu0 %v7733_v46, 256  ;;  %v11083_v40 = vld [vmem:[%s17802_s4 + $0x328] sm:$0x1f] }
 0xb6c   :  { %6632 = vbcast.lane.b32.xlu1 %v6630_v18, 256  ;;  %5522 = vbcast.lane.b32.xlu0 %v5520_v36, 256 }
 0xb6d   :  { %v6591_v9 = vpop.permute.xlu0 %6590 }
 0xb6e   :  { %v6644_v37 = vrot.slane %v6591_v9, %v11262_v8  ;;  %v6648_v7 = vrot.slane %v6591_v9, %v12107_v19  ;;  %v6652_v63 = vrot.slane %v6591_v9, %v12110_v22 }
 0xb70   :  { %8838 = vbcast.lane.b32.xlu1 %v8836_v33, 256  ;;  %7742 = vbcast.lane.b32.xlu0 %v7740_v52, 256  ;;  %v6737_v0 = vmul.f32 %v11078_v62, %v6644_v37  ;;  %v6738_v6 = vmul.f32 %v11079_v27, %v6648_v7  ;;  %v6739_v46 = vmul.f32 %v11083_v40, %v6652_v63  ;;  %v11086_v37 = vld [vmem:[%s17802_s4 + $0x360] sm:$0x1f]  ;;  %v18201_v27 = vld [vmem:[#allocation14_spill] sm:$0xff] }
 0xb71   :  { %v11092_v40 = vld [vmem:[%s17802_s4 + $0x370] sm:$0x1f] }
 0xb72   :  { %v6761_v55 = vsel %vm335_vm0, %v6737_v0, 0.0  ;;  %v6762_v17 = vsel %vm335_vm0, %v6738_v6, 0.0 }
 0xb74   :  { %6639 = vbcast.lane.b32.xlu1 %v6637_v43, 256  ;;  %7749 = vbcast.lane.b32.xlu0 %v7747_v2, 256  ;;  %v6763_v43 = vadd.f32 %v6762_v17, %v6761_v55 }
 0xb78   :  { %8845 = vbcast.lane.b32.xlu1 %v8843_v10, 256  ;;  %7756 = vbcast.lane.b32.xlu0 %v7754_v38, 256 }
 0xb7a   :  { %v5474_v34 = vpop.permute.xlu1 %5473  ;;  %v15452_v56 = vpop.permute.xlu0 %5487 }
 0xb7b   :  { %v5527_v35 = vrot.slane %v5474_v34, %v11262_v8  ;;  %v5531_v21 = vrot.slane %v5474_v34, %v12107_v19  ;;  %v5535_v58 = vrot.slane %v5474_v34, %v12110_v22  ;;  %v5551_v2 = vrot.slane %v15452_v56, %v11262_v8  ;;  %v11084_v34 = vld [vmem:[%s17802_s4 + $0x3d8] sm:$0x1f] }
 0xb7c   :  { %8852 = vbcast.lane.b32.xlu1 %v8850_v60, 256  ;;  %8866 = vbcast.lane.b32.xlu0 %v8864_v23, 256  ;;  %v5555_v10 = vrot.slane %v15452_v56, %v12107_v19  ;;  %v11085_v23 = vld [vmem:[%s17802_s4 + $0x3e0] sm:$0x1f] }
 0xb7d   :  { %v5620_v42 = vmul.f32 %v11076_v28, %v5527_v35  ;;  %v5621_v25 = vmul.f32 %v11077_v14, %v5531_v21  ;;  %v5622_v49 = vmul.f32 %v11080_v20, %v5535_v58  ;;  %v11088_v14 = vld [vmem:[%s17802_s4 + $0x388] sm:$0x1f] }
 0xb7e   :  { %v15450_v54 = vpop.permute.xlu1 %5480  ;;  %v15466_v26 = vpop.permute.xlu0 %5494 }
 0xb7f   :  { %v5644_v47 = vsel %vm335_vm0, %v5620_v42, 0.0  ;;  %v5645_v59 = vsel %vm335_vm0, %v5621_v25, 0.0  ;;  %v5539_v18 = vrot.slane %v15450_v54, %v11262_v8  ;;  %v5543_v36 = vrot.slane %v15450_v54, %v12107_v19 }
 0xb80   :  { %8859 = vbcast.lane.b32.xlu1 %v8857_v31, 256  ;;  %v5646_v39 = vadd.f32 %v5645_v59, %v5644_v47  ;;  %v5647_v52 = vsel %vm335_vm0, %v5622_v49, 0.0  ;;  %v6764_v42 = vsel %vm335_vm0, %v6739_v46, 0.0  ;;  %v5547_v0 = vrot.slane %v15450_v54, %v12110_v22  ;;  %v11090_v59 = vld [vmem:[%s17802_s4 + $0x3c8] sm:$0x1f] }
 0xb81   :  { %v5623_v7 = vmul.f32 %v11086_v37, %v5539_v18  ;;  %v15535_v62 = vadd.f32 %v6764_v42, %v6763_v43  ;;  %v5627_v63 = vmul.f32 %v11090_v59, %v5555_v10  ;;  %v5567_v55 = vrot.slane %v15466_v26, %v12107_v19 }
 0xb82   :  { %v6598_v1 = vpop.permute.xlu1 %6597  ;;  %v15510_v38 = vadd.f32 %v5647_v52, %v5646_v39  ;;  %v5563_v39 = vrot.slane %v15466_v26, %v11262_v8  ;;  %v5625_v46 = vmul.f32 %v11092_v40, %v5547_v0 }
 0xb83   :  { %v6656_v41 = vrot.slane %v6598_v1, %v11262_v8  ;;  %v6660_v53 = vrot.slane %v6598_v1, %v12107_v19  ;;  %v6664_v33 = vrot.slane %v6598_v1, %v12110_v22  ;;  %v11087_v1 = vld [vmem:[%s17802_s4 + $0x368] sm:$0x1f]  ;;  %18200 = vst [vmem:[#allocation26_spill] sm:$0xff] %v15535_v62  ;;  %v5649_v17 = vsel %vm335_vm0, %v5623_v7, 0.0 }
 0xb84   :  { %8873 = vbcast.lane.b32.xlu1 %v8871_v30, 256  ;;  %18199 = vst [vmem:[#allocation24_spill] sm:$0xff] %v15510_v38  ;;  %v5624_v28 = vmul.f32 %v11087_v1, %v5543_v36  ;;  %v5684_v6 = vmul.f32 %v15510_v38, %v18201_v27  ;;  %v5571_v1 = vrot.slane %v15466_v26, %v12110_v22  ;;  %v11096_v26 = vld [vmem:[%s17802_s4 + $0x430] sm:$0x1f] }
 0xb85   :  { %v6740_v44 = vmul.f32 %v11081_v29, %v6656_v41  ;;  %v6741_v24 = vmul.f32 %v11082_v51, %v6660_v53  ;;  %v6742_v25 = vmul.f32 %v11088_v14, %v6664_v33  ;;  %v11089_v53 = vld [vmem:[%s17802_s4 + $0x3c0] sm:$0x1f]  ;;  %v11091_v51 = vld [vmem:[%s17802_s4 + $0x3e8] sm:$0x1f] }
 0xb86   :  { %v6605_v16 = vpop.permute.xlu1 %6604  ;;  %v5626_v47 = vmul.f32 %v11089_v53, %v5551_v2  ;;  %v5650_v29 = vsel %vm335_vm0, %v5624_v28, 0.0  ;;  %v5692_v18 = vsel %vm335_vm0, %v5684_v6, 0.0  ;;  %v11093_v2 = vld [vmem:[%s17802_s4 + $0x420] sm:$0x1f]  ;;  %v18203_v28 = vld [vmem:[#allocation16_spill] sm:$0xff]  ;;  %v5631_v59 = vmul.f32 %v11096_v26, %v5571_v1 }
 0xb87   :  { %v6668_v15 = vrot.slane %v6605_v16, %v11262_v8  ;;  %v6672_v48 = vrot.slane %v6605_v16, %v12107_v19  ;;  %v6766_v35 = vsel %vm335_vm0, %v6740_v44, 0.0  ;;  %v6767_v21 = vsel %vm335_vm0, %v6741_v24, 0.0 }
 0xb88   :  { %v6676_v58 = vrot.slane %v6605_v16, %v12110_v22  ;;  %v6768_v41 = vadd.f32 %v6767_v21, %v6766_v35  ;;  %v5559_v44 = vrot.slane %v15452_v56, %v12110_v22  ;;  %v5651_v43 = vadd.f32 %v5650_v29, %v5649_v17  ;;  %v11095_v35 = vld [vmem:[%s17802_s4 + $0x3d0] sm:$0x1f] }
 0xb89   :  { %v6743_v60 = vmul.f32 %v11084_v34, %v6668_v15  ;;  %v6744_v9 = vmul.f32 %v11085_v23, %v6672_v48  ;;  %v6801_v15 = vmul.f32 %v15535_v62, %v18201_v27  ;;  %v6769_v48 = vsel %vm335_vm0, %v6742_v25, 0.0  ;;  %v11094_v34 = vld [vmem:[%s17802_s4 + $0x428] sm:$0x1f] }
 0xb8a   :  { %v6745_v24 = vmul.f32 %v11091_v51, %v6676_v58  ;;  %v15571_v36 = vadd.f32 %v6769_v48, %v6768_v41  ;;  %v5629_v10 = vmul.f32 %v11093_v2, %v5563_v39  ;;  %v5654_v23 = vsel %vm335_vm0, %v5626_v47, 0.0 }
 0xb8b   :  { %v15477_v5 = vpop.permute.xlu0 %1370  ;;  %v6771_v54 = vsel %vm335_vm0, %v6743_v60, 0.0  ;;  %v6772_v49 = vsel %vm335_vm0, %v6744_v9, 0.0  ;;  %v5630_v60 = vmul.f32 %v11094_v34, %v5567_v55  ;;  %v5655_v9 = vsel %vm335_vm0, %v5627_v63, 0.0  ;;  %v18212_v34 = vld [vmem:[#allocation17_spill] sm:$0xff] }
 0xb8c   :  { %18202 = vst [vmem:[#allocation28_spill] sm:$0xff] %v15571_v36  ;;  %v6773_v56 = vadd.f32 %v6772_v49, %v6771_v54  ;;  %v5628_v21 = vmul.f32 %v11095_v35, %v5559_v44  ;;  %v6809_v37 = vsel %vm335_vm0, %v6801_v15, 0.0  ;;  %v6774_v7 = vsel %vm335_vm0, %v6745_v24, 0.0  ;;  %v18206_v54 = vld [vmem:[#allocation15_spill] sm:$0xff] }
 0xb8d   :  { %v6802_v42 = vmul.f32 %v15571_v36, %v18203_v28  ;;  %v5652_v25 = vsel %vm335_vm0, %v5625_v46, 0.0  ;;  %v5656_v41 = vadd.f32 %v5655_v9, %v5654_v23  ;;  %v5659_v53 = vsel %vm335_vm0, %v5629_v10, 0.0 }
 0xb8e   :  { %v15594_v14 = vadd.f32 %v6774_v7, %v6773_v56  ;;  %v15601_v6 = vadd.f32 %v5652_v25, %v5651_v43  ;;  %v5660_v47 = vsel %vm335_vm0, %v5630_v60, 0.0  ;;  %v5657_v39 = vsel %vm335_vm0, %v5628_v21, 0.0 }
 0xb8f   :  { %v15495_v50 = vpop.permute.xlu0 %2453  ;;  %v6812_v63 = vsel %vm335_vm0, %v6802_v42, 0.0  ;;  %v15618_v44 = vadd.f32 %v5657_v39, %v5656_v41  ;;  %v5661_v51 = vadd.f32 %v5660_v47, %v5659_v53  ;;  %v5662_v15 = vsel %vm335_vm0, %v5631_v59, 0.0  ;;  %v11098_v39 = vld [vmem:[%s17802_s4 + $0x338] sm:$0x1f] }
 0xb90   :  { %18204 = vst [vmem:[#allocation30_spill] sm:$0xff] %v15594_v14  ;;  %18205 = vst [vmem:[#allocation7_spill] sm:$0xff] %v15601_v6  ;;  %v6803_v49 = vmul.f32 %v15594_v14, %v18206_v54  ;;  %v5685_v29 = vmul.f32 %v15601_v6, %v18203_v28  ;;  %v11110_v6 = vld [vmem:[%s17802_s4 + $0x350] sm:$0x1f] }
 0xb91   :  { %18207 = vst [vmem:[#allocation27_spill] sm:$0xff] %v15618_v44  ;;  %v15629_v56 = vadd.f32 %v5662_v15, %v5661_v51 }
 0xb92   :  { %v6815_v24 = vsel %vm335_vm0, %v6803_v49, 0.0  ;;  %v5695_v46 = vsel %vm335_vm0, %v5685_v29, 0.0 }
 0xb93   :  { %v15518_v31 = vpop.permute.xlu0 %2458  ;;  %v15520_v30 = vpop.permute.xlu1 %1335  ;;  %18209 = vst [vmem:[#allocation25_spill] sm:$0xff] %v15629_v56  ;;  %v5687_v60 = vmul.f32 %v15629_v56, %v18212_v34  ;;  %v18230_v56 = vld [vmem:[#allocation19_spill] sm:$0xff] }
 0xb95   :  { %v5701_v35 = vsel %vm335_vm0, %v5687_v60, 0.0 }
 0xb97   :  { %v15547_v16 = vpop.permute.xlu0 %2463  ;;  %v15549_v20 = vpop.permute.xlu1 %1340 }
 0xb9b   :  { %v15573_v33 = vpop.permute.xlu0 %2468  ;;  %5693 = vadd.xlane.f32.xlu0 %v5692_v18  ;;  %v15575_v52 = vpop.permute.xlu1 %1345  ;;  %v5686_v18 = vmul.f32 %v15618_v44, %v18206_v54 }
 0xb9d   :  { %v5698_v10 = vsel %vm335_vm0, %v5686_v18, 0.0 }
 0xb9f   :  { %v15597_v58 = vpop.permute.xlu0 %2473  ;;  %6810 = vadd.xlane.f32.xlu0 %v6809_v37  ;;  %v15599_v0 = vpop.permute.xlu1 %1350 }
 0xba3   :  { %v15612_v55 = vpop.permute.xlu0 %2478  ;;  %6813 = vadd.xlane.f32.xlu0 %v6812_v63  ;;  %v15614_v17 = vpop.permute.xlu1 %1355  ;;  %v11097_v63 = vld [vmem:[%s17802_s4 + $0x330] sm:$0x1f] }
 0xba7   :  { %v15622_v48 = vpop.permute.xlu0 %2483  ;;  %6816 = vadd.xlane.f32.xlu0 %v6815_v24  ;;  %v15624_v40 = vpop.permute.xlu1 %1360  ;;  %v11099_v24 = vld [vmem:[%s17802_s4 + $0x340] sm:$0x1f] }
 0xba8   :  { %18208 = vst [vmem:[#allocation31_spill] sm:$0xff] %v15624_v40  ;;  %5696 = vadd.xlane.f32.xlu1 %v5695_v46 }
 0xbab   :  { %v15631_v43 = vpop.permute.xlu0 %2488  ;;  %v15633_v2 = vpop.permute.xlu1 %1365 }
 0xbac   :  { %18210 = vst [vmem:[#allocation34_spill] sm:$0xff] %v15631_v43  ;;  %18211 = vst [vmem:[#allocation35_spill] sm:$0xff] %v15633_v2  ;;  %5699 = vadd.xlane.f32.xlu1 %v5698_v10 }
 0xbaf   :  { %v7708_v23 = vpop.permute.xlu0 %7707  ;;  %v15638_v9 = vpop.permute.xlu1 %3571 }
 0xbb0   :  { %18213 = vst [vmem:[#allocation33_spill] sm:$0xff] %v15638_v9  ;;  %5702 = vadd.xlane.f32.xlu1 %v5701_v35  ;;  %v7761_v41 = vrot.slane %v7708_v23, %v11262_v8  ;;  %v7765_v53 = vrot.slane %v7708_v23, %v12107_v19  ;;  %v7769_v47 = vrot.slane %v7708_v23, %v12110_v22 }
 0xbb2   :  { %v7854_v49 = vmul.f32 %v11097_v63, %v7761_v41  ;;  %v7855_v29 = vmul.f32 %v11098_v39, %v7765_v53  ;;  %v7856_v15 = vmul.f32 %v11099_v24, %v7769_v47  ;;  %v11100_v53 = vld [vmem:[%s17802_s4 + $0x480] sm:$0x1f] }
 0xbb3   :  { %v5502_v21 = vpop.permute.xlu0 %5501  ;;  %v15641_v37 = vpop.permute.xlu1 %3576 }
 0xbb4   :  { %18214 = vst [vmem:[#allocation36_spill] sm:$0xff] %v15641_v37  ;;  %v5575_v51 = vrot.slane %v5502_v21, %v11262_v8  ;;  %v5579_v46 = vrot.slane %v5502_v21, %v12107_v19  ;;  %v7878_v18 = vsel %vm335_vm0, %v7854_v49, 0.0  ;;  %v7879_v10 = vsel %vm335_vm0, %v7855_v29, 0.0  ;;  %v11101_v49 = vld [vmem:[%s17802_s4 + $0x488] sm:$0x1f] }
 0xbb5   :  { %v5583_v23 = vrot.slane %v5502_v21, %v12110_v22  ;;  %v7880_v35 = vadd.f32 %v7879_v10, %v7878_v18  ;;  %v7881_v24 = vsel %vm335_vm0, %v7856_v15, 0.0  ;;  %v11102_v18 = vld [vmem:[%s17802_s4 + $0x490] sm:$0x1f] }
 0xbb6   :  { %v5632_v63 = vmul.f32 %v11100_v53, %v5575_v51  ;;  %v5633_v39 = vmul.f32 %v11101_v49, %v5579_v46  ;;  %v11103_v53 = vld [vmem:[%s17802_s4 + $0x3f0] sm:$0x1f] }
 0xbb7   :  { %v7722_v7 = vpop.permute.xlu0 %7721  ;;  %v15643_v1 = vpop.permute.xlu1 %3581  ;;  %v15683_v21 = vadd.f32 %v7881_v24, %v7880_v35  ;;  %v5634_v10 = vmul.f32 %v11102_v18, %v5583_v23  ;;  %v11104_v35 = vld [vmem:[%s17802_s4 + $0x3f8] sm:$0x1f] }
 0xbb8   :  { %18215 = vst [vmem:[#allocation37_spill] sm:$0xff] %v15643_v1  ;;  %v7785_v47 = vrot.slane %v7722_v7, %v11262_v8  ;;  %v7789_v29 = vrot.slane %v7722_v7, %v12107_v19  ;;  %v7793_v51 = vrot.slane %v7722_v7, %v12110_v22  ;;  %v5664_v49 = vsel %vm335_vm0, %v5632_v63, 0.0 }
 0xbb9   :  { %18220 = vst [vmem:[#allocation49_spill] sm:$0xff] %v15683_v21  ;;  %v7918_v46 = vmul.f32 %v15683_v21, %v18201_v27  ;;  %v5665_v23 = vsel %vm335_vm0, %v5633_v39, 0.0  ;;  %v5667_v63 = vsel %vm335_vm0, %v5634_v10, 0.0 }
 0xbba   :  { %v7860_v14 = vmul.f32 %v11103_v53, %v7785_v47  ;;  %v7861_v24 = vmul.f32 %v11104_v35, %v7789_v29  ;;  %v5666_v36 = vadd.f32 %v5665_v23, %v5664_v49  ;;  %v11105_v53 = vld [vmem:[%s17802_s4 + $0x400] sm:$0x1f]  ;;  %v18224_v49 = vld [vmem:[#allocation18_spill] sm:$0xff] }
 0xbbb   :  { %v15645_v42 = vpop.permute.xlu0 %6625  ;;  %v15647_v25 = vpop.permute.xlu1 %3586  ;;  %v7926_v18 = vsel %vm335_vm0, %v7918_v46, 0.0  ;;  %v7862_v21 = vmul.f32 %v11105_v53, %v7793_v51  ;;  %v11106_v51 = vld [vmem:[%s17802_s4 + $0x4f8] sm:$0x1f] }
 0xbbc   :  { %18216 = vst [vmem:[#allocation32_spill] sm:$0xff] %v15647_v25  ;;  %v6704_v47 = vrot.slane %v15645_v42, %v11262_v8  ;;  %7927 = vadd.xlane.f32.xlu1 %v7926_v18  ;;  %v6708_v29 = vrot.slane %v15645_v42, %v12107_v19  ;;  %v15712_v39 = vadd.f32 %v5667_v63, %v5666_v36  ;;  %v7888_v35 = vsel %vm335_vm0, %v7860_v14, 0.0  ;;  %v11107_v14 = vld [vmem:[%s17802_s4 + $0x500] sm:$0x1f] }
 0xbbd   :  { %v7889_v46 = vsel %vm335_vm0, %v7861_v24, 0.0  ;;  %v6712_v10 = vrot.slane %v15645_v42, %v12110_v22  ;;  %v11108_v42 = vld [vmem:[%s17802_s4 + $0x508] sm:$0x1f] }
 0xbbe   :  { %18223 = vst [vmem:[#allocation42_spill] sm:$0xff] %v15712_v39  ;;  %v5688_v23 = vmul.f32 %v15712_v39, %v18224_v49  ;;  %v7890_v18 = vadd.f32 %v7889_v46, %v7888_v35  ;;  %v6752_v53 = vmul.f32 %v11106_v51, %v6704_v47  ;;  %v6753_v24 = vmul.f32 %v11107_v14, %v6708_v29 }
 0xbbf   :  { %v15652_v26 = vpop.permute.xlu0 %8824  ;;  %v15654_v59 = vpop.permute.xlu1 %3591  ;;  %v7891_v35 = vsel %vm335_vm0, %v7862_v21, 0.0  ;;  %v6754_v39 = vmul.f32 %v11108_v42, %v6712_v10  ;;  %v11109_v42 = vld [vmem:[%s17802_s4 + $0x348] sm:$0x1f] }
 0xbc0   :  { %18217 = vst [vmem:[#allocation39_spill] sm:$0xff] %v15654_v59  ;;  %v5704_v63 = vsel %vm335_vm0, %v5688_v23, 0.0  ;;  %v15732_v46 = vadd.f32 %v7891_v35, %v7890_v18  ;;  %v8878_v47 = vrot.slane %v15652_v26, %v11262_v8  ;;  %v6786_v29 = vsel %vm335_vm0, %v6752_v53, 0.0 }
 0xbc1   :  { %5705 = vadd.xlane.f32.xlu1 %v5704_v63  ;;  %v6787_v23 = vsel %vm335_vm0, %v6753_v24, 0.0  ;;  %v8882_v21 = vrot.slane %v15652_v26, %v12107_v19  ;;  %v8886_v35 = vrot.slane %v15652_v26, %v12110_v22  ;;  %v6789_v24 = vsel %vm335_vm0, %v6754_v39, 0.0  ;;  %v11111_v26 = vld [vmem:[%s17802_s4 + $0x358] sm:$0x1f] }
 0xbc2   :  { %18227 = vst [vmem:[#allocation44_spill] sm:$0xff] %v15732_v46  ;;  %v7920_v51 = vmul.f32 %v15732_v46, %v18206_v54  ;;  %v6788_v10 = vadd.f32 %v6787_v23, %v6786_v29  ;;  %v8971_v53 = vmul.f32 %v11109_v42, %v8878_v47 }
 0xbc3   :  { %v15669_v60 = vpop.permute.xlu0 %4689  ;;  %v15672_v41 = vpop.permute.xlu1 %3596 }
 0xbc4   :  { %18218 = vst [vmem:[#allocation40_spill] sm:$0xff] %v15669_v60  ;;  %18219 = vst [vmem:[#allocation41_spill] sm:$0xff] %v15672_v41  ;;  %v7932_v18 = vsel %vm335_vm0, %v7920_v51, 0.0  ;;  %v15754_v46 = vadd.f32 %v6789_v24, %v6788_v10  ;;  %v8972_v51 = vmul.f32 %v11110_v6, %v8882_v21  ;;  %v8995_v47 = vsel %vm335_vm0, %v8971_v53, 0.0 }
 0xbc5   :  { %7933 = vadd.xlane.f32.xlu1 %v7932_v18  ;;  %v8973_v18 = vmul.f32 %v11111_v26, %v8886_v35 }
 0xbc6   :  { %18229 = vst [vmem:[#allocation52_spill] sm:$0xff] %v15754_v46  ;;  %v6806_v29 = vmul.f32 %v15754_v46, %v18230_v56  ;;  %v8996_v42 = vsel %vm335_vm0, %v8972_v51, 0.0 }
 0xbc7   :  { %v15695_v15 = vpop.permute.xlu0 %4694  ;;  %v15701_v7 = vpop.permute.xlu1 %3601  ;;  %v8997_v24 = vadd.f32 %v8996_v42, %v8995_v47  ;;  %v8998_v6 = vsel %vm335_vm0, %v8973_v18, 0.0  ;;  %v11112_v47 = vld [vmem:[%s17802_s4 + $0x438] sm:$0x1f] }
 0xbc8   :  { %18221 = vst [vmem:[#allocation47_spill] sm:$0xff] %v15695_v15  ;;  %18222 = vst [vmem:[#allocation38_spill] sm:$0xff] %v15701_v7  ;;  %v6824_v10 = vsel %vm335_vm0, %v6806_v29, 0.0 }
 0xbc9   :  { %6825 = vadd.xlane.f32.xlu1 %v6824_v10  ;;  %v15770_v21 = vadd.f32 %v8998_v6, %v8997_v24 }
 0xbcb   :  { %v15718_v62 = vpop.permute.xlu0 %4699  ;;  %v15725_v36 = vpop.permute.xlu1 %3606  ;;  %18232 = vst [vmem:[#allocation46_spill] sm:$0xff] %v15770_v21  ;;  %v9035_v38 = vmul.f32 %v15770_v21, %v18201_v27 }
 0xbcc   :  { %18225 = vst [vmem:[#allocation45_spill] sm:$0xff] %v15718_v62  ;;  %18226 = vst [vmem:[#allocation43_spill] sm:$0xff] %v15725_v36 }
 0xbcd   :  { %v9043_v35 = vsel %vm335_vm0, %v9035_v38, 0.0  ;;  %v11113_v38 = vld [vmem:[%s17802_s4 + $0x440] sm:$0x1f] }
 0xbce   :  { %9044 = vadd.xlane.f32.xlu1 %v9043_v35  ;;  %v11114_v35 = vld [vmem:[%s17802_s4 + $0x448] sm:$0x1f] }
 0xbcf   :  { %v15743_v14 = vpop.permute.xlu0 %4704  ;;  %v6612_v63 = vpop.permute.xlu1 %6611 }
 0xbd0   :  { %18228 = vst [vmem:[#allocation6_spill] sm:$0xff] %v15743_v14  ;;  %v6680_v53 = vrot.slane %v6612_v63, %v11262_v8  ;;  %v6684_v51 = vrot.slane %v6612_v63, %v12107_v19  ;;  %v6688_v18 = vrot.slane %v6612_v63, %v12110_v22 }
 0xbd2   :  { %v6746_v10 = vmul.f32 %v11112_v47, %v6680_v53  ;;  %v6747_v27 = vmul.f32 %v11113_v38, %v6684_v51  ;;  %v6748_v21 = vmul.f32 %v11114_v35, %v6688_v18  ;;  %v11115_v47 = vld [vmem:[%s17802_s4 + $0x390] sm:$0x1f] }
 0xbd3   :  { %v15761_v23 = vpop.permute.xlu0 %4709  ;;  %v7715_v39 = vpop.permute.xlu1 %7714 }
 0xbd4   :  { %18231 = vst [vmem:[#allocation51_spill] sm:$0xff] %v15761_v23  ;;  %v7773_v42 = vrot.slane %v7715_v39, %v11262_v8  ;;  %v7777_v63 = vrot.slane %v7715_v39, %v12107_v19  ;;  %v6776_v45 = vsel %vm335_vm0, %v6746_v10, 0.0  ;;  %v7781_v53 = vrot.slane %v7715_v39, %v12110_v22 }
 0xbd6   :  { %v7857_v12 = vmul.f32 %v11115_v47, %v7773_v42  ;;  %v6779_v47 = vsel %vm335_vm0, %v6748_v21, 0.0 }
 0xbd7   :  { %v15772_v46 = vpop.permute.xlu0 %4714  ;;  %v6619_v44 = vpop.permute.xlu1 %6618 }
 0xbd8   :  { %18233 = vst [vmem:[#allocation22_spill] sm:$0xff] %v15772_v46  ;;  %v6692_v51 = vrot.slane %v6619_v44, %v11262_v8  ;;  %v6696_v38 = vrot.slane %v6619_v44, %v12107_v19  ;;  %v6700_v36 = vrot.slane %v6619_v44, %v12110_v22  ;;  %v11116_v46 = vld [vmem:[%s17802_s4 + $0x398] sm:$0x1f] }
 0xbd9   :  { %v7858_v42 = vmul.f32 %v11116_v46, %v7777_v63  ;;  %v11118_v46 = vld [vmem:[%s17802_s4 + $0x498] sm:$0x1f]  ;;  %v11119_v63 = vld [vmem:[%s17802_s4 + $0x4a0] sm:$0x1f] }
 0xbda   :  { %v6749_v21 = vmul.f32 %v11118_v46, %v6692_v51  ;;  %v6750_v15 = vmul.f32 %v11119_v63, %v6696_v38  ;;  %v11122_v51 = vld [vmem:[%s17802_s4 + $0x4e8] sm:$0x1f]  ;;  %v11123_v38 = vld [vmem:[%s17802_s4 + $0x4f0] sm:$0x1f] }
 0xbdb   :  { %v15778_v29 = vpop.permute.xlu0 %4719  ;;  %v5509_v26 = vpop.permute.xlu1 %5508 }
 0xbdc   :  { %18234 = vst [vmem:[#allocation20_spill] sm:$0xff] %v15778_v29  ;;  %v6777_v29 = vsel %vm335_vm0, %v6747_v27, 0.0  ;;  %v5587_v18 = vrot.slane %v5509_v26, %v11262_v8  ;;  %v5591_v35 = vrot.slane %v5509_v26, %v12107_v19  ;;  %v5595_v10 = vrot.slane %v5509_v26, %v12110_v22  ;;  %v11117_v27 = vld [vmem:[%s17802_s4 + $0x3a0] sm:$0x1f] }
 0xbdd   :  { %v6778_v39 = vadd.f32 %v6777_v29, %v6776_v45  ;;  %v7859_v7 = vmul.f32 %v11117_v27, %v7781_v53  ;;  %v11120_v53 = vld [vmem:[%s17802_s4 + $0x4a8] sm:$0x1f] }
 0xbde   :  { %v15836_v46 = vmul.f32 %v11122_v51, %v5591_v35  ;;  %v15841_v63 = vmul.f32 %v11123_v38, %v5595_v10  ;;  %v11125_v35 = vld [vmem:[%s17802_s4 + $0x548] sm:$0x1f]  ;;  %v7883_v10 = vsel %vm335_vm0, %v7857_v12, 0.0  ;;  %v11128_v12 = vld [vmem:[%s17802_s4 + $0x458] sm:$0x1f] }
 0xbdf   :  { %v5516_v24 = vpop.permute.xlu0 %5515  ;;  %v7729_v6 = vpop.permute.xlu1 %7728  ;;  %v15814_v62 = vadd.f32 %v6779_v47, %v6778_v39  ;;  %v6751_v39 = vmul.f32 %v11120_v53, %v6700_v36  ;;  %v11121_v47 = vld [vmem:[%s17802_s4 + $0x4e0] sm:$0x1f] }
 0xbe0   :  { %v5599_v23 = vrot.slane %v5516_v24, %v11262_v8  ;;  %v5603_v44 = vrot.slane %v5516_v24, %v12107_v19  ;;  %v5607_v45 = vrot.slane %v5516_v24, %v12110_v22  ;;  %v7797_v29 = vrot.slane %v7729_v6, %v11262_v8 }
 0xbe1   :  { %18235 = vst [vmem:[#allocation21_spill] sm:$0xff] %v15814_v62  ;;  %v7801_v24 = vrot.slane %v7729_v6, %v12107_v19  ;;  %v15831_v27 = vmul.f32 %v11121_v47, %v5587_v18  ;;  %v6804_v36 = vmul.f32 %v15814_v62, %v18212_v34  ;;  %v11124_v18 = vld [vmem:[%s17802_s4 + $0x540] sm:$0x1f]  ;;  %v7805_v51 = vrot.slane %v7729_v6, %v12110_v22  ;;  %v11126_v62 = vld [vmem:[%s17802_s4 + $0x550] sm:$0x1f] }
 0xbe2   :  { %v15848_v53 = vmul.f32 %v11124_v18, %v5599_v23  ;;  %v15853_v47 = vmul.f32 %v11125_v35, %v5603_v44  ;;  %v15861_v41 = vmul.f32 %v11126_v62, %v5607_v45  ;;  %v11127_v23 = vld [vmem:[%s17802_s4 + $0x450] sm:$0x1f]  ;;  %v7884_v44 = vsel %vm335_vm0, %v7858_v42, 0.0  ;;  %v11129_v62 = vld [vmem:[%s17802_s4 + $0x460] sm:$0x1f] }
 0xbe3   :  { %v7736_v14 = vpop.permute.xlu0 %7735  ;;  %v8832_v26 = vpop.permute.xlu1 %8831  ;;  %v6818_v38 = vsel %vm335_vm0, %v6804_v36, 0.0  ;;  %v15866_v18 = vmul.f32 %v11127_v23, %v7797_v29  ;;  %v15872_v6 = vmul.f32 %v11128_v12, %v7801_v24  ;;  %v15877_v45 = vmul.f32 %v11129_v62, %v7805_v51  ;;  %v11130_v51 = vld [vmem:[%s17802_s4 + $0x4b0] sm:$0x1f] }
 0xbe4   :  { %6819 = vadd.xlane.f32.xlu0 %v6818_v38  ;;  %v7885_v36 = vadd.f32 %v7884_v44, %v7883_v10  ;;  %v7809_v35 = vrot.slane %v7736_v14, %v11262_v8  ;;  %v7886_v23 = vsel %vm335_vm0, %v7859_v7, 0.0  ;;  %v7813_v42 = vrot.slane %v7736_v14, %v12107_v19  ;;  %v11131_v7 = vld [vmem:[%s17802_s4 + $0x4b8] sm:$0x1f] }
 0xbe5   :  { %v7817_v38 = vrot.slane %v7736_v14, %v12110_v22  ;;  %v8890_v60 = vrot.slane %v8832_v26, %v11262_v8  ;;  %v8894_v10 = vrot.slane %v8832_v26, %v12107_v19  ;;  %v8898_v44 = vrot.slane %v8832_v26, %v12110_v22 }
 0xbe6   :  { %v15884_v12 = vadd.f32 %v7886_v23, %v7885_v36  ;;  %v15889_v62 = vmul.f32 %v11130_v51, %v7809_v35  ;;  %v15896_v14 = vmul.f32 %v11131_v7, %v7813_v42  ;;  %v11132_v36 = vld [vmem:[%s17802_s4 + $0x4c0] sm:$0x1f]  ;;  %v11133_v35 = vld [vmem:[%s17802_s4 + $0x3a8] sm:$0x1f]  ;;  %v6781_v26 = vsel %vm335_vm0, %v6749_v21, 0.0 }
 0xbe7   :  { %v5523_v29 = vpop.permute.xlu0 %5522  ;;  %v6633_v24 = vpop.permute.xlu1 %6632  ;;  %v15901_v23 = vmul.f32 %v11132_v36, %v7817_v38  ;;  %v15906_v51 = vmul.f32 %v11133_v35, %v8890_v60  ;;  %v11134_v42 = vld [vmem:[%s17802_s4 + $0x3b0] sm:$0x1f]  ;;  %v11135_v38 = vld [vmem:[%s17802_s4 + $0x3b8] sm:$0x1f]  ;;  %v6782_v60 = vsel %vm335_vm0, %v6750_v15, 0.0  ;;  %v6784_v21 = vsel %vm335_vm0, %v6751_v39, 0.0 }
 0xbe8   :  { %18236 = vst [vmem:[#allocation53_spill] sm:$0xff] %v15884_v12  ;;  %v7919_v59 = vmul.f32 %v15884_v12, %v18203_v28  ;;  %v15914_v7 = vmul.f32 %v11134_v42, %v8894_v10  ;;  %v15919_v36 = vmul.f32 %v11135_v38, %v8898_v44  ;;  %v6783_v35 = vadd.f32 %v6782_v60, %v6781_v26  ;;  %v11136_v15 = vld [vmem:[%s17802_s4 + $0x5a0] sm:$0x1f] }
 0xbe9   :  { %v5611_v11 = vrot.slane %v5523_v29, %v11262_v8  ;;  %v5615_v12 = vrot.slane %v5523_v29, %v12107_v19  ;;  %v5619_v10 = vrot.slane %v5523_v29, %v12110_v22  ;;  %v6716_v42 = vrot.slane %v6633_v24, %v11262_v8 }
 0xbea   :  { %v7929_v25 = vsel %vm335_vm0, %v7919_v59, 0.0  ;;  %v6720_v32 = vrot.slane %v6633_v24, %v12107_v19  ;;  %v15929_v44 = vadd.f32 %v6784_v21, %v6783_v35  ;;  %v11137_v59 = vld [vmem:[%s17802_s4 + $0x5a8] sm:$0x1f]  ;;  %v6724_v29 = vrot.slane %v6633_v24, %v12110_v22 }
 0xbeb   :  { %v7743_v1 = vpop.permute.xlu0 %7742  ;;  %7930 = vadd.xlane.f32.xlu0 %v7929_v25  ;;  %v15934_v39 = vmul.f32 %v11136_v15, %v5611_v11  ;;  %v15939_v26 = vmul.f32 %v11137_v59, %v5615_v12  ;;  %v8839_v38 = vpop.permute.xlu1 %8838  ;;  %v11138_v25 = vld [vmem:[%s17802_s4 + $0x5b0] sm:$0x1f]  ;;  %v11139_v11 = vld [vmem:[%s17802_s4 + $0x558] sm:$0x1f]  ;;  %v11140_v12 = vld [vmem:[%s17802_s4 + $0x560] sm:$0x1f] }
 0xbec   :  { %18237 = vst [vmem:[#allocation29_spill] sm:$0xff] %v15929_v44  ;;  %v15945_v60 = vmul.f32 %v11138_v25, %v5619_v10  ;;  %v15950_v35 = vmul.f32 %v11139_v11, %v6716_v42  ;;  %v15955_v21 = vmul.f32 %v11140_v12, %v6720_v32  ;;  %v5669_v24 = vsel %vm335_vm0, %v15831_v27, 0.0  ;;  %v11141_v10 = vld [vmem:[%s17802_s4 + $0x568] sm:$0x1f] }
 0xbed   :  { %v6805_v15 = vmul.f32 %v15929_v44, %v18224_v49  ;;  %v15964_v59 = vmul.f32 %v11141_v10, %v6724_v29  ;;  %v5670_v42 = vsel %vm335_vm0, %v15836_v46, 0.0  ;;  %v5672_v25 = vsel %vm335_vm0, %v15841_v63, 0.0  ;;  %v11142_v63 = vld [vmem:[%s17802_s4 + $0x510] sm:$0x1f] }
 0xbee   :  { %v5671_v32 = vadd.f32 %v5670_v42, %v5669_v24  ;;  %v7821_v11 = vrot.slane %v7743_v1, %v11262_v8  ;;  %v7825_v27 = vrot.slane %v7743_v1, %v12107_v19  ;;  %v7829_v12 = vrot.slane %v7743_v1, %v12110_v22  ;;  %v11143_v1 = vld [vmem:[%s17802_s4 + $0x518] sm:$0x1f]  ;;  %v11144_v42 = vld [vmem:[%s17802_s4 + $0x520] sm:$0x1f] }
 0xbef   :  { %v6821_v44 = vsel %vm335_vm0, %v6805_v15, 0.0  ;;  %v8902_v37 = vrot.slane %v8839_v38, %v11262_v8  ;;  %v8906_v29 = vrot.slane %v8839_v38, %v12107_v19  ;;  %v8910_v10 = vrot.slane %v8839_v38, %v12110_v22 }
 0xbf0   :  { %6822 = vadd.xlane.f32.xlu0 %v6821_v44  ;;  %v15977_v46 = vadd.f32 %v5672_v25, %v5671_v32  ;;  %v15982_v24 = vmul.f32 %v11142_v63, %v7821_v11  ;;  %v15987_v15 = vmul.f32 %v11143_v1, %v7825_v27  ;;  %v15992_v38 = vmul.f32 %v11144_v42, %v7829_v12  ;;  %v7750_v44 = vpop.permute.xlu0 %7749  ;;  %v11145_v25 = vld [vmem:[%s17802_s4 + $0x408] sm:$0x1f]  ;;  %v11146_v11 = vld [vmem:[%s17802_s4 + $0x410] sm:$0x1f]  ;;  %v11147_v27 = vld [vmem:[%s17802_s4 + $0x418] sm:$0x1f]  ;;  %v6640_v42 = vpop.permute.xlu1 %6639 }
 0xbf1   :  { %v15997_v32 = vmul.f32 %v11145_v25, %v8902_v37  ;;  %v16002_v63 = vmul.f32 %v11146_v11, %v8906_v29  ;;  %v16007_v1 = vmul.f32 %v11147_v27, %v8910_v10  ;;  %v5674_v12 = vsel %vm335_vm0, %v15848_v53, 0.0 }
 0xbf2   :  { %18238 = vst [vmem:[#allocation48_spill] sm:$0xff] %v15977_v46  ;;  %v5689_v37 = vmul.f32 %v15977_v46, %v18230_v56  ;;  %v5675_v25 = vsel %vm335_vm0, %v15853_v47, 0.0  ;;  %v5677_v29 = vsel %vm335_vm0, %v15861_v41, 0.0  ;;  %v7893_v11 = vsel %vm335_vm0, %v15866_v18, 0.0  ;;  %v11148_v18 = vld [vmem:[%s17802_s4 + $0x570] sm:$0x1f] }
 0xbf3   :  { %v5676_v9 = vadd.f32 %v5675_v25, %v5674_v12  ;;  %v7894_v10 = vsel %vm335_vm0, %v15872_v6, 0.0  ;;  %v7896_v53 = vsel %vm335_vm0, %v15877_v45, 0.0  ;;  %v7833_v27 = vrot.slane %v7750_v44, %v11262_v8 }
 0xbf4   :  { %v5707_v46 = vsel %vm335_vm0, %v5689_v37, 0.0  ;;  %v7895_v2 = vadd.f32 %v7894_v10, %v7893_v11  ;;  %v7837_v47 = vrot.slane %v7750_v44, %v12107_v19  ;;  %v7841_v43 = vrot.slane %v7750_v44, %v12110_v22  ;;  %v11149_v37 = vld [vmem:[%s17802_s4 + $0x578] sm:$0x1f]  ;;  %v18241_v11 = vld [vmem:[#allocation86_spill] sm:$0xff] }
 0xbf5   :  { %5708 = vadd.xlane.f32.xlu0 %v5707_v46  ;;  %v16027_v41 = vadd.f32 %v5677_v29, %v5676_v9  ;;  %v16032_v6 = vmul.f32 %v11148_v18, %v7833_v27  ;;  %v6728_v45 = vrot.slane %v6640_v42, %v11262_v8  ;;  %v6732_v12 = vrot.slane %v6640_v42, %v12107_v19  ;;  %v11150_v9 = vld [vmem:[%s17802_s4 + $0x580] sm:$0x1f]  ;;  %v7757_v18 = vpop.permute.xlu0 %7756 }
 0xbf6   :  { %v16036_v25 = vadd.f32 %v7896_v53, %v7895_v2  ;;  %v16041_v44 = vmul.f32 %v11149_v37, %v7837_v47  ;;  %v16046_v46 = vmul.f32 %v11150_v9, %v7841_v43  ;;  %v6736_v29 = vrot.slane %v6640_v42, %v12110_v22  ;;  %v11151_v2 = vld [vmem:[%s17802_s4 + $0x5b8] sm:$0x1f]  ;;  %v11152_v27 = vld [vmem:[%s17802_s4 + $0x5c0] sm:$0x1f]  ;;  %v8846_v42 = vpop.permute.xlu1 %8845  ;;  %v11153_v9 = vld [vmem:[%s17802_s4 + $0x5c8] sm:$0x1f] }
 0xbf7   :  { %18239 = vst [vmem:[#allocation23_spill] sm:$0xff] %v16027_v41  ;;  %v5690_v10 = vmul.f32 %v16027_v41, %v18241_v11  ;;  %v16054_v53 = vmul.f32 %v11151_v2, %v6728_v45  ;;  %v16059_v47 = vmul.f32 %v11152_v27, %v6732_v12  ;;  %v7898_v43 = vsel %vm335_vm0, %v15889_v62, 0.0 }
 0xbf8   :  { %18240 = vst [vmem:[#allocation14_spill] sm:$0xff] %v16036_v25  ;;  %v7921_v37 = vmul.f32 %v16036_v25, %v18212_v34  ;;  %v16068_v45 = vmul.f32 %v11153_v9, %v6736_v29  ;;  %v7899_v2 = vsel %vm335_vm0, %v15896_v14, 0.0  ;;  %v7901_v12 = vsel %vm335_vm0, %v15901_v23, 0.0 }
 0xbf9   :  { %v5710_v27 = vsel %vm335_vm0, %v5690_v10, 0.0  ;;  %v7900_v62 = vadd.f32 %v7899_v2, %v7898_v43  ;;  %v9000_v41 = vsel %vm335_vm0, %v15906_v51, 0.0  ;;  %v9001_v25 = vsel %vm335_vm0, %v15914_v7, 0.0  ;;  %v11154_v7 = vld [vmem:[%s17802_s4 + $0x5d0] sm:$0x1f] }
 0xbfa   :  { %5711 = vadd.xlane.f32.xlu1 %v5710_v27  ;;  %v7935_v40 = vsel %vm335_vm0, %v7921_v37, 0.0  ;;  %v9002_v29 = vadd.f32 %v9001_v25, %v9000_v41  ;;  %v9003_v9 = vsel %vm335_vm0, %v15919_v36, 0.0  ;;  %v7845_v14 = vrot.slane %v7757_v18, %v11262_v8 }
 0xbfb   :  { %7936 = vadd.xlane.f32.xlu0 %v7935_v40  ;;  %v16083_v23 = vadd.f32 %v7901_v12, %v7900_v62  ;;  %v7849_v10 = vrot.slane %v7757_v18, %v12107_v19  ;;  %v7853_v43 = vrot.slane %v7757_v18, %v12110_v22  ;;  %v8914_v51 = vrot.slane %v8846_v42, %v11262_v8  ;;  %v11155_v18 = vld [vmem:[%s17802_s4 + $0x5d8] sm:$0x1f]  ;;  %v11156_v12 = vld [vmem:[%s17802_s4 + $0x5e0] sm:$0x1f]  ;;  %v11157_v62 = vld [vmem:[%s17802_s4 + $0x468] sm:$0x1f] }
 0xbfc   :  { %v16088_v2 = vadd.f32 %v9003_v9, %v9002_v29  ;;  %v16093_v41 = vmul.f32 %v11154_v7, %v7845_v14  ;;  %v8918_v36 = vrot.slane %v8846_v42, %v12107_v19  ;;  %v8922_v40 = vrot.slane %v8846_v42, %v12110_v22  ;;  %v8853_v29 = vpop.permute.xlu1 %8852  ;;  %v11158_v14 = vld [vmem:[%s17802_s4 + $0x470] sm:$0x1f] }
 0xbfd   :  { %18242 = vst [vmem:[#allocation16_spill] sm:$0xff] %v16083_v23  ;;  %v7922_v25 = vmul.f32 %v16083_v23, %v18224_v49  ;;  %v16102_v37 = vmul.f32 %v11155_v18, %v7849_v10  ;;  %v16107_v27 = vmul.f32 %v11156_v12, %v7853_v43  ;;  %v16112_v42 = vmul.f32 %v11157_v62, %v8914_v51  ;;  %v11159_v43 = vld [vmem:[%s17802_s4 + $0x478] sm:$0x1f]  ;;  %v8867_v18 = vpop.permute.xlu0 %8866 }
 0xbfe   :  { %18243 = vst [vmem:[#allocation15_spill] sm:$0xff] %v16088_v2  ;;  %v9036_v9 = vmul.f32 %v16088_v2, %v18203_v28  ;;  %v16119_v10 = vmul.f32 %v11158_v14, %v8918_v36  ;;  %v16124_v7 = vmul.f32 %v11159_v43, %v8922_v40  ;;  %v5679_v51 = vsel %vm335_vm0, %v15934_v39, 0.0 }
 0xbff   :  { %v7938_v12 = vsel %vm335_vm0, %v7922_v25, 0.0  ;;  %v5680_v28 = vsel %vm335_vm0, %v15939_v26, 0.0  ;;  %v5682_v62 = vsel %vm335_vm0, %v15945_v60, 0.0  ;;  %v6791_v36 = vsel %vm335_vm0, %v15950_v35, 0.0 }
 0xc00   :  { %7939 = vadd.xlane.f32.xlu1 %v7938_v12  ;;  %v9046_v14 = vsel %vm335_vm0, %v9036_v9, 0.0  ;;  %v5681_v40 = vadd.f32 %v5680_v28, %v5679_v51  ;;  %v6792_v43 = vsel %vm335_vm0, %v15955_v21, 0.0  ;;  %v6794_v39 = vsel %vm335_vm0, %v15964_v59, 0.0  ;;  %v11160_v59 = vld [vmem:[%s17802_s4 + $0x588] sm:$0x1f] }
 0xc01   :  { %9047 = vadd.xlane.f32.xlu0 %v9046_v14  ;;  %v6793_v25 = vadd.f32 %v6792_v43, %v6791_v36  ;;  %v8950_v26 = vrot.slane %v8867_v18, %v11262_v8  ;;  %v8954_v23 = vrot.slane %v8867_v18, %v12107_v19  ;;  %v8958_v60 = vrot.slane %v8867_v18, %v12110_v22  ;;  %v11161_v18 = vld [vmem:[%s17802_s4 + $0x590] sm:$0x1f]  ;;  %v11163_v43 = vld [vmem:[%s17802_s4 + $0x4c8] sm:$0x1f] }
 0xc02   :  { %v16143_v2 = vadd.f32 %v5682_v62, %v5681_v40  ;;  %v8926_v35 = vrot.slane %v8853_v29, %v11262_v8  ;;  %v8930_v9 = vrot.slane %v8853_v29, %v12107_v19  ;;  %v8934_v51 = vrot.slane %v8853_v29, %v12110_v22  ;;  %v11162_v62 = vld [vmem:[%s17802_s4 + $0x598] sm:$0x1f]  ;;  %v8860_v29 = vpop.permute.xlu1 %8859  ;;  %v18246_v14 = vld [vmem:[#allocation87_spill] sm:$0xff] }
 0xc03   :  { %v16148_v21 = vadd.f32 %v6794_v39, %v6793_v25  ;;  %v16153_v12 = vmul.f32 %v11160_v59, %v8950_v26  ;;  %v16158_v28 = vmul.f32 %v11161_v18, %v8954_v23  ;;  %v16163_v36 = vmul.f32 %v11162_v62, %v8958_v60  ;;  %v11164_v23 = vld [vmem:[%s17802_s4 + $0x4d0] sm:$0x1f]  ;;  %v11165_v26 = vld [vmem:[%s17802_s4 + $0x4d8] sm:$0x1f] }
 0xc04   :  { %18244 = vst [vmem:[#allocation17_spill] sm:$0xff] %v16143_v2  ;;  %v5691_v40 = vmul.f32 %v16143_v2, %v18246_v14  ;;  %v16170_v39 = vmul.f32 %v11163_v43, %v8926_v35  ;;  %v16175_v25 = vmul.f32 %v11164_v23, %v8930_v9  ;;  %v16180_v60 = vmul.f32 %v11165_v26, %v8934_v51 }
 0xc05   :  { %18245 = vst [vmem:[#allocation18_spill] sm:$0xff] %v16148_v21  ;;  %v6807_v59 = vmul.f32 %v16148_v21, %v18241_v11  ;;  %v7903_v18 = vsel %vm335_vm0, %v15982_v24, 0.0  ;;  %v7904_v35 = vsel %vm335_vm0, %v15987_v15, 0.0  ;;  %v7906_v62 = vsel %vm335_vm0, %v15992_v38, 0.0 }
 0xc06   :  { %v5713_v9 = vsel %vm335_vm0, %v5691_v40, 0.0  ;;  %v7905_v43 = vadd.f32 %v7904_v35, %v7903_v18  ;;  %v9005_v23 = vsel %vm335_vm0, %v15997_v32, 0.0  ;;  %v9006_v51 = vsel %vm335_vm0, %v16002_v63, 0.0 }
 0xc07   :  { %5714 = vadd.xlane.f32.xlu1 %v5713_v9  ;;  %v6827_v26 = vsel %vm335_vm0, %v6807_v59, 0.0  ;;  %v9007_v21 = vadd.f32 %v9006_v51, %v9005_v23  ;;  %v9008_v24 = vsel %vm335_vm0, %v16007_v1, 0.0  ;;  %v8938_v15 = vrot.slane %v8860_v29, %v11262_v8  ;;  %v11166_v59 = vld [vmem:[%s17802_s4 + $0x528] sm:$0x1f]  ;;  %v8874_v9 = vpop.permute.xlu1 %8873 }
 0xc08   :  { %6828 = vadd.xlane.f32.xlu0 %v6827_v26  ;;  %v16199_v38 = vadd.f32 %v7906_v62, %v7905_v43  ;;  %v8942_v40 = vrot.slane %v8860_v29, %v12107_v19  ;;  %v8946_v18 = vrot.slane %v8860_v29, %v12110_v22  ;;  %v7908_v32 = vsel %vm335_vm0, %v16032_v6, 0.0  ;;  %v11167_v6 = vld [vmem:[%s17802_s4 + $0x530] sm:$0x1f]  ;;  %v11168_v43 = vld [vmem:[%s17802_s4 + $0x538] sm:$0x1f] }
 0xc09   :  { %v16205_v63 = vadd.f32 %v9008_v24, %v9007_v21  ;;  %v8986_v35 = vmul.f32 %v11166_v59, %v8938_v15  ;;  %v7909_v1 = vsel %vm335_vm0, %v16041_v44, 0.0  ;;  %v7911_v62 = vsel %vm335_vm0, %v16046_v46, 0.0 }
 0xc0a   :  { %18247 = vst [vmem:[#allocation19_spill] sm:$0xff] %v16199_v38  ;;  %v7923_v29 = vmul.f32 %v16199_v38, %v18230_v56  ;;  %v8987_v21 = vmul.f32 %v11167_v6, %v8942_v40  ;;  %v8988_v23 = vmul.f32 %v11168_v43, %v8946_v18  ;;  %v7910_v51 = vadd.f32 %v7909_v1, %v7908_v32 }
 0xc0b   :  { %18248 = vst [vmem:[#allocation86_spill] sm:$0xff] %v16205_v63  ;;  %v9037_v44 = vmul.f32 %v16205_v63, %v18206_v54  ;;  %v6796_v46 = vsel %vm335_vm0, %v16054_v53, 0.0  ;;  %v6797_v26 = vsel %vm335_vm0, %v16059_v47, 0.0  ;;  %v6799_v24 = vsel %vm335_vm0, %v16068_v45, 0.0 }
 0xc0c   :  { %v7941_v15 = vsel %vm335_vm0, %v7923_v29, 0.0  ;;  %v16231_v40 = vadd.f32 %v7911_v62, %v7910_v51  ;;  %v6798_v59 = vadd.f32 %v6797_v26, %v6796_v46  ;;  %v8962_v18 = vrot.slane %v8874_v9, %v11262_v8  ;;  %v11169_v62 = vld [vmem:[%s17802_s4 + $0x5e8] sm:$0x1f] }
 0xc0d   :  { %7942 = vadd.xlane.f32.xlu1 %v7941_v15  ;;  %v9049_v32 = vsel %vm335_vm0, %v9037_v44, 0.0  ;;  %v8966_v54 = vrot.slane %v8874_v9, %v12107_v19  ;;  %v8970_v53 = vrot.slane %v8874_v9, %v12110_v22  ;;  %v7913_v47 = vsel %vm335_vm0, %v16093_v41, 0.0  ;;  %v11170_v9 = vld [vmem:[%s17802_s4 + $0x5f0] sm:$0x1f]  ;;  %v11171_v41 = vld [vmem:[%s17802_s4 + $0x5f8] sm:$0x1f] }
 0xc0e   :  { %18249 = vst [vmem:[#allocation87_spill] sm:$0xff] %v16231_v40  ;;  %9050 = vadd.xlane.f32.xlu0 %v9049_v32  ;;  %v7924_v45 = vmul.f32 %v16231_v40, %v18241_v11  ;;  %v16241_v1 = vadd.f32 %v6799_v24, %v6798_v59  ;;  %v8992_v29 = vmul.f32 %v11169_v62, %v8962_v18  ;;  %v7914_v6 = vsel %vm335_vm0, %v16102_v37, 0.0  ;;  %s16585_s4 = sld [smem:[#allocation2]] }
 0xc0f   :  { %v8993_v43 = vmul.f32 %v11170_v9, %v8966_v54  ;;  %v8994_v51 = vmul.f32 %v11171_v41, %v8970_v53  ;;  %v7915_v44 = vadd.f32 %v7914_v6, %v7913_v47  ;;  %v7916_v46 = vsel %vm335_vm0, %v16107_v27, 0.0 }
 0xc10   :  { %18250 = vst [vmem:[#allocation88_spill] sm:$0xff] %v16241_v1  ;;  %v7944_v26 = vsel %vm335_vm0, %v7924_v45, 0.0  ;;  %v6808_v24 = vmul.f32 %v16241_v1, %v18246_v14  ;;  %v9010_v37 = vsel %vm335_vm0, %v16112_v42, 0.0  ;;  %v9011_v15 = vsel %vm335_vm0, %v16119_v10, 0.0 }
 0xc11   :  { %7945 = vadd.xlane.f32.xlu1 %v7944_v26  ;;  %v16263_v59 = vadd.f32 %v7916_v46, %v7915_v44  ;;  %v9012_v18 = vadd.f32 %v9011_v15, %v9010_v37  ;;  %v9013_v32 = vsel %vm335_vm0, %v16124_v7, 0.0  ;;  %v9025_v27 = vsel %vm335_vm0, %v16153_v12, 0.0 }
 0xc12   :  { %v6830_v54 = vsel %vm335_vm0, %v6808_v24, 0.0  ;;  %v9026_v53 = vsel %vm335_vm0, %v16158_v28, 0.0  ;;  %v9028_v42 = vsel %vm335_vm0, %v16163_v36, 0.0  ;;  %v9015_v10 = vsel %vm335_vm0, %v16170_v39, 0.0 }
 0xc13   :  { %18251 = vst [vmem:[#allocation89_spill] sm:$0xff] %v16263_v59  ;;  %6831 = vadd.xlane.f32.xlu0 %v6830_v54  ;;  %v7925_v47 = vmul.f32 %v16263_v59, %v18246_v14  ;;  %v16278_v45 = vadd.f32 %v9013_v32, %v9012_v18  ;;  %v9027_v7 = vadd.f32 %v9026_v53, %v9025_v27  ;;  %v9016_v12 = vsel %vm335_vm0, %v16175_v25, 0.0 }
 0xc14   :  { %v9017_v62 = vadd.f32 %v9016_v12, %v9015_v10  ;;  %v9018_v28 = vsel %vm335_vm0, %v16180_v60, 0.0  ;;  %v9020_v6 = vsel %vm335_vm0, %v8986_v35, 0.0  ;;  %v9021_v36 = vsel %vm335_vm0, %v8987_v21, 0.0  ;;  %s120_s14 = ssub.f32 1.0, %s16585_s4 }
 0xc15   :  { %18252 = vst [vmem:[#allocation90_spill] sm:$0xff] %v16278_v45  ;;  %v7947_v39 = vsel %vm335_vm0, %v7925_v47, 0.0  ;;  %v9038_v9 = vmul.f32 %v16278_v45, %v18212_v34  ;;  %v16289_v41 = vadd.f32 %v9028_v42, %v9027_v7  ;;  %v9022_v44 = vadd.f32 %v9021_v36, %v9020_v6 }
 0xc16   :  { %7948 = vadd.xlane.f32.xlu1 %v7947_v39  ;;  %v16291_v46 = vadd.f32 %v9018_v28, %v9017_v62  ;;  %v9023_v25 = vsel %vm335_vm0, %v8988_v23, 0.0  ;;  %v9030_v26 = vsel %vm335_vm0, %v8992_v29, 0.0  ;;  %v9031_v60 = vsel %vm335_vm0, %v8993_v43, 0.0  ;;  %s16619_s15 = ssub.f32 %s120_s14, %s16591_s12 }
 0xc17   :  { %18253 = vst [vmem:[#allocation91_spill] sm:$0xff] %v16289_v41  ;;  %v9052_v35 = vsel %vm335_vm0, %v9038_v9, 0.0  ;;  %v9041_v21 = vmul.f32 %v16289_v41, %v18241_v11  ;;  %v16299_v24 = vadd.f32 %v9023_v25, %v9022_v44  ;;  %v9032_v34 = vadd.f32 %v9031_v60, %v9030_v26 }
 0xc18   :  { %18254 = vst [vmem:[#allocation92_spill] sm:$0xff] %v16291_v46  ;;  %9053 = vadd.xlane.f32.xlu0 %v9052_v35  ;;  %v9039_v37 = vmul.f32 %v16291_v46, %v18224_v49  ;;  %v9033_v15 = vsel %vm335_vm0, %v8994_v51, 0.0  ;;  %s122_s16 = ssub.f32 %s16619_s15, %s16601_s13 }
 0xc19   :  { %18255 = vst [vmem:[#allocation93_spill] sm:$0xff] %v16299_v24  ;;  %v9061_v23 = vsel %vm335_vm0, %v9041_v21, 0.0  ;;  %v9040_v29 = vmul.f32 %v16299_v24, %v18230_v56  ;;  %v16307_v43 = vadd.f32 %v9033_v15, %v9032_v34 }
 0xc1a   :  { %9062 = vadd.xlane.f32.xlu1 %v9061_v23  ;;  %v9055_v18 = vsel %vm335_vm0, %v9039_v37, 0.0 }
 0xc1b   :  { %18256 = vst [vmem:[#allocation94_spill] sm:$0xff] %v16307_v43  ;;  %v9058_v11 = vsel %vm335_vm0, %v9040_v29, 0.0  ;;  %v9042_v32 = vmul.f32 %v16307_v43, %v18246_v14 }
 0xc1c   :  { %9056 = vadd.xlane.f32.xlu0 %v9055_v18 }
 0xc1d   :  { %v9064_v49 = vsel %vm335_vm0, %v9042_v32, 0.0 }
 0xc20   :  { %9059 = vadd.xlane.f32.xlu0 %v9058_v11 }
 0xc24   :  { %9065 = vadd.xlane.f32.xlu0 %v9064_v49  ;;  %v5694_v27 = vpop.xlane.xlu0 %5693 }
 0xc25   :  { %vm5716_vm13 = vcmp.ne.f32.partialorder %v5694_v27, 0.0 }
 0xc26   :  { %v5724_v28 = vsel %vm5716_vm13, 1.0, %v18187_v13 }
 0xc27   :  { %v10599_v6 = vadd.f32 -1.0, %v5724_v28 }
 0xc28   :  { %v6811_v56 = vpop.xlane.xlu0 %6810 }
 0xc29   :  { %vm6833_vm9 = vcmp.ne.f32.partialorder %v6811_v56, 0.0  ;;  %v5740_v34 = vmul.f32 9999.0, %v10599_v6 }
 0xc2a   :  { %v6841_v36 = vsel %vm6833_vm9, 1.0, %v18187_v13 }
 0xc2b   :  { %v10608_v60 = vadd.f32 -1.0, %v6841_v36  ;;  %v16347_v28 = vadd.f32 %v5740_v34, %v5694_v27 }
 0xc2c   :  { %v6814_v42 = vpop.xlane.xlu0 %6813 }
 0xc2d   :  { %vm6834_vm14 = vcmp.ne.f32.partialorder %v6814_v42, 0.0  ;;  %v6857_v11 = vmul.f32 9999.0, %v10608_v60  ;;  %v5767_v34 = vrot.slane %v16347_v28, %v11524_v57 }
 0xc2e   :  { %v6842_v39 = vsel %vm6834_vm14, 1.0, %v18187_v13 }
 0xc2f   :  { %v10609_v37 = vadd.f32 -1.0, %v6842_v39  ;;  %v16354_v60 = vadd.f32 %v6857_v11, %v6811_v56 }
 0xc30   :  { %v6817_v47 = vpop.xlane.xlu0 %6816 }
 0xc31   :  { %v5697_v51 = vpop.xlane.xlu1 %5696  ;;  %vm6835_vm10 = vcmp.ne.f32.partialorder %v6817_v47, 0.0  ;;  %v6858_v36 = vmul.f32 9999.0, %v10609_v37  ;;  %18257 = vst [vmem:[#allocation95_spill] sm:$0xff] %v16354_v60 }
 0xc32   :  { %vm5717_vm3 = vcmp.ne.f32.partialorder %v5697_v51, 0.0  ;;  %v6843_v25 = vsel %vm6835_vm10, 1.0, %v18187_v13 }
 0xc33   :  { %v5725_v26 = vsel %vm5717_vm3, 1.0, %v18187_v13  ;;  %v10610_v15 = vadd.f32 -1.0, %v6843_v25  ;;  %v16359_v37 = vadd.f32 %v6858_v36, %v6814_v42 }
 0xc34   :  { %v10600_v23 = vadd.f32 -1.0, %v5725_v26 }
 0xc35   :  { %v16314_v54 = vpop.xlane.xlu1 %5699  ;;  %v6859_v39 = vmul.f32 9999.0, %v10610_v15  ;;  %18258 = vst [vmem:[#allocation96_spill] sm:$0xff] %v16359_v37 }
 0xc36   :  { %vm5718_vm11 = vcmp.ne.f32.partialorder %v16314_v54, 0.0  ;;  %v5741_v25 = vmul.f32 9999.0, %v10600_v23 }
 0xc37   :  { %v5726_v35 = vsel %vm5718_vm11, 1.0, %v18187_v13 }
 0xc38   :  { %v10601_v29 = vadd.f32 -1.0, %v5726_v35  ;;  %v16362_v23 = vadd.f32 %v5741_v25, %v5697_v51 }
 0xc39   :  { %v16316_v53 = vpop.xlane.xlu1 %5702 }
 0xc3a   :  { %vm5719_vm12 = vcmp.ne.f32.partialorder %v16316_v53, 0.0  ;;  %v5742_v26 = vmul.f32 9999.0, %v10601_v29 }
 0xc3b   :  { %v5727_v21 = vsel %vm5719_vm12, 1.0, %v18187_v13 }
 0xc3c   :  { %v10602_v18 = vadd.f32 -1.0, %v5727_v21  ;;  %v16372_v11 = vadd.f32 %v5742_v26, %v16314_v54  ;;  %v6884_v54 = vrot.slane %v16354_v60, %v11524_v57 }
 0xc3e   :  { %v5743_v41 = vmul.f32 9999.0, %v10602_v18  ;;  %v16369_v18 = vadd.f32 %v6859_v39, %v6817_v47  ;;  %v5775_v26 = vrot.slane %v16372_v11, %v11524_v57 }
 0xc40   :  { %18259 = vst [vmem:[#allocation97_spill] sm:$0xff] %v16369_v18  ;;  %v16375_v42 = vadd.f32 %v5743_v41, %v16316_v53  ;;  %v6888_v41 = vrot.slane %v16359_v37, %v11524_v57  ;;  %v5771_v53 = vrot.slane %v16362_v23, %v11524_v57  ;;  %v6892_v39 = vrot.slane %v16369_v18, %v11524_v57 }
 0xc42   :  { %v6913_v18 = vsel %vm530_vm1, %v6888_v41, %v6884_v54 }
 0xc43   :  { %v6914_v60 = vsel %vm532_vm2, %v6892_v39, %v6913_v18 }
 0xc45   :  { %v16318_v10 = vpop.xlane.xlu1 %7927 }
 0xc46   :  { %vm7950_vm13 = vcmp.ne.f32.partialorder %v16318_v10, 0.0 }
 0xc47   :  { %v7958_v43 = vsel %vm7950_vm13, 1.0, %v18187_v13 }
 0xc48   :  { %v10617_v35 = vadd.f32 -1.0, %v7958_v43 }
 0xc4a   :  { %v16320_v7 = vpop.xlane.xlu1 %5705  ;;  %v7974_v51 = vmul.f32 9999.0, %v10617_v35  ;;  %v5779_v35 = vrot.slane %v16375_v42, %v11524_v57 }
 0xc4b   :  { %vm5720_vm9 = vcmp.ne.f32.partialorder %v16320_v7, 0.0 }
 0xc4c   :  { %v5728_v6 = vsel %vm5720_vm9, 1.0, %v18187_v13 }
 0xc4d   :  { %v10603_v27 = vadd.f32 -1.0, %v5728_v6 }
 0xc4e   :  { %v16324_v14 = vpop.xlane.xlu1 %7933 }
 0xc4f   :  { %vm7952_vm14 = vcmp.ne.f32.partialorder %v16324_v14, 0.0  ;;  %v5744_v6 = vmul.f32 9999.0, %v10603_v27 }
 0xc50   :  { %v7960_v15 = vsel %vm7952_vm14, 1.0, %v18187_v13 }
 0xc51   :  { %v10619_v25 = vadd.f32 -1.0, %v7960_v15 }
 0xc52   :  { %v16333_v9 = vpop.xlane.xlu1 %6825 }
 0xc53   :  { %vm6838_vm10 = vcmp.ne.f32.partialorder %v16333_v9, 0.0  ;;  %v7976_v1 = vmul.f32 9999.0, %v10619_v25 }
 0xc54   :  { %v6846_v29 = vsel %vm6838_vm10, 1.0, %v18187_v13 }
 0xc55   :  { %v10613_v59 = vadd.f32 -1.0, %v6846_v29  ;;  %v16396_v29 = vadd.f32 %v7974_v51, %v16318_v10  ;;  %v16414_v25 = vadd.f32 %v7976_v1, %v16324_v14 }
 0xc57   :  { %v16343_v32 = vpop.xlane.xlu1 %9044  ;;  %18260 = vst [vmem:[#allocation98_spill] sm:$0xff] %v16396_v29  ;;  %v6862_v63 = vmul.f32 9999.0, %v10613_v59  ;;  %18261 = vst [vmem:[#allocation99_spill] sm:$0xff] %v16414_v25  ;;  %v8009_v39 = vrot.slane %v16414_v25, %v11524_v57 }
 0xc58   :  { %vm9067_vm10 = vcmp.ne.f32.partialorder %v16343_v32, 0.0 }
 0xc6d   :  { %v16322_v12 = vpop.xlane.xlu0 %6819 }
 0xc6e   :  { %vm6836_vm3 = vcmp.ne.f32.partialorder %v16322_v12, 0.0 }
 0xc6f   :  { %v6844_v56 = vsel %vm6836_vm3, 1.0, %v18187_v13 }
 0xc70   :  { %v10611_v46 = vadd.f32 -1.0, %v6844_v56  ;;  %v16399_v56 = vadd.f32 %v5744_v6, %v16320_v7  ;;  %v8001_v6 = vrot.slane %v16396_v29, %v11524_v57 }
 0xc72   :  { %v6860_v2 = vmul.f32 9999.0, %v10611_v46  ;;  %v5783_v59 = vrot.slane %v16399_v56, %v11524_v57 }
 0xc74   :  { %v16326_v62 = vpop.xlane.xlu0 %7930  ;;  %v16420_v18 = vadd.f32 %v6860_v2, %v16322_v12 }
 0xc75   :  { %vm7951_vm13 = vcmp.ne.f32.partialorder %v16326_v62, 0.0 }
 0xc76   :  { %v7959_v40 = vsel %vm7951_vm13, 1.0, %v18187_v13  ;;  %18263 = vst [vmem:[#allocation101_spill] sm:$0xff] %v16420_v18 }
 0xc77   :  { %v10618_v45 = vadd.f32 -1.0, %v7959_v40 }
 0xc79   :  { %v16335_v44 = vpop.xlane.xlu0 %6822  ;;  %v7975_v46 = vmul.f32 9999.0, %v10618_v45 }
 0xc7a   :  { %vm6837_vm9 = vcmp.ne.f32.partialorder %v16335_v44, 0.0 }
 0xc7b   :  { %v16432_v2 = vadd.f32 %v7975_v46, %v16326_v62  ;;  %v9075_v62 = vsel %vm9067_vm10, 1.0, %v18187_v13 }
 0xc7d   :  { %18264 = vst [vmem:[#allocation102_spill] sm:$0xff] %v16432_v2 }
 0xc7e   :  { %v16345_v49 = vpop.xlane.xlu0 %5708 }
 0xc7f   :  { %vm5721_vm11 = vcmp.ne.f32.partialorder %v16345_v49, 0.0 }
 0xc80   :  { %v5729_v36 = vsel %vm5721_vm11, 1.0, %v18187_v13 }
 0xc81   :  { %v10604_v47 = vadd.f32 -1.0, %v5729_v36  ;;  %v6845_v36 = vsel %vm6837_vm9, 1.0, %v18187_v13 }
 0xc82   :  { %v10612_v51 = vadd.f32 -1.0, %v6845_v36 }
 0xc83   :  { %v5712_v21 = vpop.xlane.xlu1 %5711  ;;  %v5745_v37 = vmul.f32 9999.0, %v10604_v47 }
 0xc84   :  { %vm5722_vm12 = vcmp.ne.f32.partialorder %v5712_v21, 0.0  ;;  %v16367_v43 = vpop.xlane.xlu0 %7936  ;;  %v6861_v1 = vmul.f32 9999.0, %v10612_v51 }
 0xc85   :  { %v5730_v24 = vsel %vm5722_vm12, 1.0, %v18187_v13  ;;  %vm7953_vm14 = vcmp.ne.f32.partialorder %v16367_v43, 0.0  ;;  %v16425_v41 = vadd.f32 %v5745_v37, %v16345_v49  ;;  %v6896_v37 = vrot.slane %v16420_v18, %v11524_v57 }
 0xc86   :  { %v10605_v27 = vadd.f32 -1.0, %v5730_v24  ;;  %v5796_v24 = vsel %vm530_vm1, %v5771_v53, %v5767_v34  ;;  %v16417_v34 = vadd.f32 %v6862_v63, %v16333_v9  ;;  %v7961_v12 = vsel %vm7953_vm14, 1.0, %v18187_v13 }
 0xc87   :  { %v5797_v10 = vsel %vm532_vm2, %v5775_v26, %v5796_v24  ;;  %v5787_v26 = vrot.slane %v16425_v41, %v11524_v57  ;;  %v16450_v36 = vadd.f32 %v6861_v1, %v16335_v44  ;;  %v10620_v24 = vadd.f32 -1.0, %v7961_v12 }
 0xc88   :  { %v5746_v7 = vmul.f32 9999.0, %v10605_v27  ;;  %v5798_v40 = vsel %vm623_vm4, %v5779_v35, %v5797_v10  ;;  %18262 = vst [vmem:[#allocation100_spill] sm:$0xff] %v16417_v34  ;;  %v6904_v27 = vrot.slane %v16417_v34, %v11524_v57 }
 0xc89   :  { %v16393_v15 = vpop.xlane.xlu1 %7939  ;;  %v5799_v49 = vsel %vm625_vm5, %v5783_v59, %v5798_v40  ;;  %18265 = vst [vmem:[#allocation103_spill] sm:$0xff] %v16450_v36 }
 0xc8a   :  { %v16402_v38 = vpop.xlane.xlu0 %9047  ;;  %vm7954_vm3 = vcmp.ne.f32.partialorder %v16393_v15, 0.0  ;;  %v16428_v14 = vadd.f32 %v5746_v7, %v5712_v21  ;;  %v8005_v7 = vrot.slane %v16432_v2, %v11524_v57  ;;  %v5800_v25 = vsel %vm627_vm6, %v5787_v26, %v5799_v49 }
 0xc8b   :  { %v7962_v47 = vsel %vm7954_vm3, 1.0, %v18187_v13  ;;  %vm9068_vm9 = vcmp.ne.f32.partialorder %v16402_v38, 0.0 }
 0xc8c   :  { %v5791_v10 = vrot.slane %v16428_v14, %v11524_v57  ;;  %v10621_v40 = vadd.f32 -1.0, %v7962_v47  ;;  %v7977_v47 = vmul.f32 9999.0, %v10620_v24  ;;  %v9076_v2 = vsel %vm9068_vm9, 1.0, %v18187_v13 }
 0xc90   :  { %v5715_v54 = vpop.xlane.xlu1 %5714 }
 0xc91   :  { %v6829_v45 = vpop.xlane.xlu0 %6828  ;;  %vm5723_vm11 = vcmp.ne.f32.partialorder %v5715_v54, 0.0 }
 0xc92   :  { %vm6839_vm12 = vcmp.ne.f32.partialorder %v6829_v45, 0.0  ;;  %v5731_v63 = vsel %vm5723_vm11, 1.0, %v18187_v13 }
 0xc93   :  { %v6847_v9 = vsel %vm6839_vm12, 1.0, %v18187_v13  ;;  %v10606_v53 = vadd.f32 -1.0, %v5731_v63  ;;  %v10626_v63 = vadd.f32 -1.0, %v9075_v62 }
 0xc94   :  { %v10614_v21 = vadd.f32 -1.0, %v6847_v9  ;;  %v6915_v9 = vsel %vm623_vm4, %v6896_v37, %v6914_v60  ;;  %v5801_v60 = vsel %vm629_vm7, %v5791_v10, %v5800_v25  ;;  %v8030_v37 = vsel %vm530_vm1, %v8005_v7, %v8001_v6 }
 0xc95   :  { %v5747_v35 = vmul.f32 9999.0, %v10606_v53  ;;  %v9091_v6 = vmul.f32 9999.0, %v10626_v63  ;;  %v16479_v10 = vadd.f32 %v7977_v47, %v16367_v43 }
 0xc96   :  { %v7943_v51 = vpop.xlane.xlu1 %7942  ;;  %v6863_v53 = vmul.f32 9999.0, %v10614_v21  ;;  %v7978_v21 = vmul.f32 9999.0, %v10621_v40  ;;  %v10627_v40 = vadd.f32 -1.0, %v9076_v2 }
 0xc97   :  { %v16456_v59 = vadd.f32 %v5747_v35, %v5715_v54  ;;  %v16458_v46 = vpop.xlane.xlu0 %9050  ;;  %vm7955_vm13 = vcmp.ne.f32.partialorder %v7943_v51, 0.0  ;;  %v6900_v54 = vrot.slane %v16450_v36, %v11524_v57  ;;  %18267 = vst [vmem:[#allocation105_spill] sm:$0xff] %v16479_v10 }
 0xc98   :  { %v7963_v44 = vsel %vm7955_vm13, 1.0, %v18187_v13  ;;  %vm9069_vm14 = vcmp.ne.f32.partialorder %v16458_v46, 0.0 }
 0xc99   :  { %v5795_v1 = vrot.slane %v16456_v59, %v11524_v57  ;;  %v10622_v12 = vadd.f32 -1.0, %v7963_v44  ;;  %v16473_v44 = vadd.f32 %v6863_v53, %v6829_v45  ;;  %v9077_v36 = vsel %vm9069_vm14, 1.0, %v18187_v13 }
 0xc9a   :  { %v7946_v62 = vpop.xlane.xlu1 %7945  ;;  %v6916_v45 = vsel %vm625_vm5, %v6900_v54, %v6915_v9  ;;  %v16484_v53 = vadd.f32 %v7978_v21, %v16393_v15  ;;  %v10628_v63 = vadd.f32 -1.0, %v9077_v36  ;;  %v8013_v15 = vrot.slane %v16479_v10, %v11524_v57 }
 0xc9b   :  { %vm7956_vm10 = vcmp.ne.f32.partialorder %v7946_v62, 0.0  ;;  %v5802_v35 = vsel %vm631_vm8, %v5795_v1, %v5801_v60  ;;  %18266 = vst [vmem:[#allocation104_spill] sm:$0xff] %v16473_v44  ;;  %v7979_v29 = vmul.f32 9999.0, %v10622_v12  ;;  %v8031_v12 = vsel %vm532_vm2, %v8009_v39, %v8030_v37 }
 0xc9c   :  { %v6832_v49 = vpop.xlane.xlu0 %6831  ;;  %v7964_v26 = vsel %vm7956_vm10, 1.0, %v18187_v13  ;;  %v5804_v24 = vsel %vm1115_vm15, %v5802_v35, -inf  ;;  %18268 = vst [vmem:[#allocation106_spill] sm:$0xff] %v16484_v53  ;;  %v6917_v39 = vsel %vm627_vm6, %v6904_v27, %v6916_v45  ;;  %v9092_v37 = vmul.f32 9999.0, %v10627_v40 }
 0xc9d   :  { %vm6840_vm3 = vcmp.ne.f32.partialorder %v6832_v49, 0.0  ;;  %v10623_v25 = vadd.f32 -1.0, %v7964_v26  ;;  %5805 = vmax.xlane.f32.xlu1 %v5804_v24  ;;  %v6908_v26 = vrot.slane %v16473_v44, %v11524_v57  ;;  %v16489_v43 = vadd.f32 %v7979_v29, %v7943_v51 }
 0xc9e   :  { %v6848_v7 = vsel %vm6840_vm3, 1.0, %v18187_v13  ;;  %v8017_v36 = vrot.slane %v16484_v53, %v11524_v57  ;;  %vm4826_vm3 = vcmask 261120  }
 0xc9f   :  { %v10615_v1 = vadd.f32 -1.0, %v6848_v7  ;;  %v7980_v60 = vmul.f32 9999.0, %v10623_v25  ;;  %v7949_v35 = vpop.xlane.xlu1 %7948  ;;  %18269 = vst [vmem:[#allocation107_spill] sm:$0xff] %v16489_v43 }
 0xca0   :  { %vm7957_vm11 = vcmp.ne.f32.partialorder %v7949_v35, 0.0 }
 0xca1   :  { %v6864_v47 = vmul.f32 9999.0, %v10615_v1  ;;  %v16491_v24 = vadd.f32 %v7980_v60, %v7946_v62  ;;  %v9054_v9 = vpop.xlane.xlu0 %9053  ;;  %v7965_v2 = vsel %vm7957_vm11, 1.0, %v18187_v13  ;;  %v9093_v62 = vmul.f32 9999.0, %v10628_v63 }
 0xca2   :  { %vm9070_vm12 = vcmp.ne.f32.partialorder %v9054_v9, 0.0  ;;  %v10624_v54 = vadd.f32 -1.0, %v7965_v2  ;;  %v8021_v1 = vrot.slane %v16489_v43, %v11524_v57  ;;  %v16513_v2 = vadd.f32 %v9091_v6, %v16343_v32 }
 0xca3   :  { %18270 = vst [vmem:[#allocation108_spill] sm:$0xff] %v16491_v24  ;;  %v16499_v21 = vadd.f32 %v6864_v47, %v6832_v49  ;;  %v9078_v29 = vsel %vm9070_vm12, 1.0, %v18187_v13  ;;  %v9063_v51 = vpop.xlane.xlu1 %9062  ;;  %v8025_v27 = vrot.slane %v16491_v24, %v11524_v57  ;;  %v6918_v49 = vsel %vm629_vm7, %v6908_v26, %v6917_v39 }
 0xca4   :  { %v10629_v25 = vadd.f32 -1.0, %v9078_v29  ;;  %v7981_v7 = vmul.f32 9999.0, %v10624_v54  ;;  %vm9073_vm13 = vcmp.ne.f32.partialorder %v9063_v51, 0.0  ;;  %18273 = vst [vmem:[#allocation111_spill] sm:$0xff] %v16513_v2  ;;  %v8032_v54 = vsel %vm623_vm4, %v8013_v15, %v8031_v12 }
 0xca5   :  { %18271 = vst [vmem:[#allocation109_spill] sm:$0xff] %v16499_v21  ;;  %v6912_v60 = vrot.slane %v16499_v21, %v11524_v57  ;;  %v9057_v45 = vpop.xlane.xlu0 %9056  ;;  %v9081_v63 = vsel %vm9073_vm13, 1.0, %v18187_v13  ;;  %v16519_v24 = vadd.f32 %v9092_v37, %v16402_v38  ;;  %v8033_v26 = vsel %vm625_vm5, %v8017_v36, %v8032_v54 }
 0xca6   :  { %v9094_v40 = vmul.f32 9999.0, %v10629_v25  ;;  %v16509_v47 = vadd.f32 %v7981_v7, %v7949_v35  ;;  %vm9071_vm9 = vcmp.ne.f32.partialorder %v9057_v45, 0.0  ;;  %v16525_v25 = vadd.f32 %v9093_v62, %v16458_v46 }
 0xca7   :  { %v9079_v29 = vsel %vm9071_vm9, 1.0, %v18187_v13  ;;  %v6919_v43 = vsel %vm631_vm8, %v6912_v60, %v6918_v49  ;;  %18274 = vst [vmem:[#allocation112_spill] sm:$0xff] %v16519_v24  ;;  %v10632_v32 = vadd.f32 -1.0, %v9081_v63  ;;  %v8034_v15 = vsel %vm627_vm6, %v8021_v1, %v8033_v26 }
 0xca8   :  { %18272 = vst [vmem:[#allocation110_spill] sm:$0xff] %v16509_v47  ;;  %v8029_v35 = vrot.slane %v16509_v47, %v11524_v57  ;;  %v10630_v39 = vadd.f32 -1.0, %v9079_v29  ;;  %18275 = vst [vmem:[#allocation113_spill] sm:$0xff] %v16525_v25  ;;  %v6921_v12 = vsel %vm1115_vm15, %v6919_v43, -inf  ;;  %v16529_v7 = vadd.f32 %v9094_v40, %v9054_v9 }
 0xca9   :  { %v9060_v6 = vpop.xlane.xlu0 %9059  ;;  %6922 = vmax.xlane.f32.xlu0 %v6921_v12  ;;  %v8035_v38 = vsel %vm629_vm7, %v8025_v27, %v8034_v15  ;;  %v9122_v46 = vrot.slane %v16519_v24, %v11524_v57  ;;  %v9126_v43 = vrot.slane %v16525_v25, %v11524_v57  ;;  %v9097_v9 = vmul.f32 9999.0, %v10632_v32 }
 0xcaa   :  { %18276 = vst [vmem:[#allocation114_spill] sm:$0xff] %v16529_v7  ;;  %v9095_v60 = vmul.f32 9999.0, %v10630_v39  ;;  %vm9072_vm14 = vcmp.ne.f32.partialorder %v9060_v6, 0.0  ;;  %v8036_v36 = vsel %vm631_vm8, %v8029_v35, %v8035_v38  ;;  %v9118_v27 = vrot.slane %v16513_v2, %v11524_v57 }
 0xcab   :  { %v9080_v37 = vsel %vm9072_vm14, 1.0, %v18187_v13  ;;  %v8038_v40 = vsel %vm1115_vm15, %v8036_v36, -inf  ;;  %v9130_v63 = vrot.slane %v16529_v7, %v11524_v57  ;;  %v16552_v12 = vadd.f32 %v9097_v9, %v9063_v51 }
 0xcac   :  { %v16536_v62 = vadd.f32 %v9095_v60, %v9057_v45  ;;  %v10631_v49 = vadd.f32 -1.0, %v9080_v37  ;;  %8039 = vmax.xlane.f32.xlu1 %v8038_v40  ;;  %v9147_v26 = vsel %vm530_vm1, %v9122_v46, %v9118_v27  ;;  %v4654_v51 = vrot.slane %v15186_v61, %v18148_v4  ;;  %v18281_v27 = vld [vmem:[#allocation50_spill] sm:$0xff] }
 0xcad   :  { %v9066_v1 = vpop.xlane.xlu0 %9065  ;;  %v9148_v32 = vsel %vm532_vm2, %v9126_v43, %v9147_v26  ;;  %18279 = vst [vmem:[#allocation117_spill] sm:$0xff] %v16552_v12  ;;  %v18283_v26 = vld [vmem:[#allocation54_spill] sm:$0xff]  ;;  %vm9543_vm11 = vcmask 523264  }
 0xcae   :  { %18277 = vst [vmem:[#allocation115_spill] sm:$0xff] %v16536_v62  ;;  %v9096_v54 = vmul.f32 9999.0, %v10631_v49  ;;  %vm9074_vm10 = vcmp.ne.f32.partialorder %v9066_v1, 0.0  ;;  %v9134_v45 = vrot.slane %v16536_v62, %v11524_v57  ;;  %v9149_v15 = vsel %vm623_vm4, %v9130_v63, %v9148_v32 }
 0xcaf   :  { %v9082_v29 = vsel %vm9074_vm10, 1.0, %v18187_v13  ;;  %10826 = vrcp.f32 %v4654_v51  ;;  %v1373_v61 = vmul.f32 %v15520_v30, %v18283_v26  ;;  %v18288_v51 = vld [vmem:[#allocation64_spill] sm:$0xff] }
 0xcb0   :  { %v16549_v35 = vadd.f32 %v9096_v54, %v9060_v6  ;;  %v10633_v39 = vadd.f32 -1.0, %v9082_v29  ;;  %v9150_v37 = vsel %vm625_vm5, %v9134_v45, %v9149_v15  ;;  %v9142_v6 = vrot.slane %v16552_v12, %v11524_v57  ;;  %v18282_v45 = vld [vmem:[#allocation60_spill] sm:$0xff]  ;;  %v18285_v15 = vld [vmem:[#allocation63_spill] sm:$0xff] }
 0xcb1   :  { %v1380_v29 = vmul.f32 %v15477_v5, %v18282_v45  ;;  %v1381_v5 = vsel %vm335_vm0, %v1373_v61, 0.0  ;;  %v2493_v30 = vmul.f32 %v15547_v16, %v18288_v51 }
 0xcb2   :  { %18278 = vst [vmem:[#allocation116_spill] sm:$0xff] %v16549_v35  ;;  %v9138_v60 = vrot.slane %v16549_v35, %v11524_v57  ;;  %v9098_v38 = vmul.f32 9999.0, %v10633_v39  ;;  %v18284_v39 = vld [vmem:[#allocation62_spill] sm:$0xff] }
 0xcb3   :  { %v2491_v32 = vmul.f32 %v15495_v50, %v18284_v39 }
 0xcb4   :  { %v16558_v36 = vadd.f32 %v9098_v38, %v9066_v1  ;;  %v9151_v49 = vsel %vm627_vm6, %v9138_v60, %v9150_v37  ;;  %v2492_v60 = vmul.f32 %v15518_v31, %v18285_v15  ;;  %v18286_v38 = vld [vmem:[#allocation55_spill] sm:$0xff]  ;;  %v18291_v15 = vld [vmem:[#allocation65_spill] sm:$0xff] }
 0xcb5   :  { %v9152_v43 = vsel %vm629_vm7, %v9142_v6, %v9151_v49  ;;  %v1374_v37 = vmul.f32 %v15549_v20, %v18286_v38  ;;  %v1430_v49 = vsel %vm335_vm0, %v1380_v29, 0.0  ;;  %v18287_v6 = vld [vmem:[#allocation57_spill] sm:$0xff]  ;;  %v2499_v50 = vsel %vm335_vm0, %v2491_v32, 0.0 }
 0xcb6   :  { %18280 = vst [vmem:[#allocation118_spill] sm:$0xff] %v16558_v36  ;;  %v9146_v46 = vrot.slane %v16558_v36, %v11524_v57  ;;  %v2506_v31 = vsel %vm335_vm0, %v2492_v60, 0.0  ;;  %v2500_v16 = vrot.slane %v2499_v50, 4 }
 0xcb7   :  { %v1388_v20 = vsel %vm335_vm0, %v1374_v37, 0.0  ;;  %v2507_v45 = vrot.slane %v2506_v31, 4  ;;  %v18292_v37 = vld [vmem:[#allocation68_spill] sm:$0xff] }
 0xcb8   :  { %v9153_v9 = vsel %vm631_vm8, %v9146_v46, %v9152_v43  ;;  %v1375_v46 = vmul.f32 %v15575_v52, %v18287_v6  ;;  %v1431_v43 = vrot.slane %v1430_v49, 4  ;;  %v1389_v29 = vrot.slane %v1388_v20, 4 }
 0xcb9   :  { %v9155_v40 = vsel %vm1115_vm15, %v9153_v9, -inf  ;;  %v18289_v9 = vld [vmem:[#allocation66_spill] sm:$0xff]  ;;  %v2501_v38 = vadd.f32 %v2500_v16, %v2499_v50  ;;  %v2496_v6 = vmul.f32 %v15612_v55, %v18292_v37 }
 0xcba   :  { %9156 = vmax.xlane.f32.xlu0 %v9155_v40  ;;  %v2494_v52 = vmul.f32 %v15573_v33, %v18289_v9  ;;  %v1382_v40 = vrot.slane %v1381_v5, 4  ;;  %v1432_v26 = vadd.f32 %v1431_v43, %v1430_v49  ;;  %v1390_v51 = vadd.f32 %v1389_v29, %v1388_v20  ;;  %v18293_v49 = vld [vmem:[#allocation59_spill] sm:$0xff]  ;;  %v18297_v16 = vld [vmem:[#allocation58_spill] sm:$0xff] }
 0xcbb   :  { %v1377_v43 = vmul.f32 %v15614_v17, %v18293_v49  ;;  %v16613_v9 = vstv %s16585_s4  ;;  %v2502_v20 = vrot.slane %v2501_v38, 2  ;;  %v18296_v17 = vld [vmem:[#allocation67_spill] sm:$0xff] }
 0xcbc   :  { %v10827_v1 = vpop.eup %10826  ;;  %v2520_v61 = vsel %vm335_vm0, %v2494_v52, 0.0  ;;  %v1383_v33 = vadd.f32 %v1382_v40, %v1381_v5  ;;  %18294 = vst [vmem:[#allocation50_spill] sm:$0xff] %v16613_v9  ;;  %v16616_v52 = vstv %s16591_s12  ;;  %s10463_s12 = sld [smem:[#allocation2 + $0x4]] }
 0xcbd   :  { %v4678_v63 = vmul.f32 %v10827_v1, %v18281_v27  ;;  %v1395_v1 = vsel %vm335_vm0, %v1375_v46, 0.0  ;;  %v18290_v27 = vld [vmem:[#allocation56_spill] sm:$0xff]  ;;  %v2508_v46 = vadd.f32 %v2507_v45, %v2506_v31  ;;  %18295 = vst [vmem:[#allocation60_spill] sm:$0xff] %v16616_v52  ;;  %v18298_v45 = vld [vmem:[#allocation31_spill] sm:$0xff]  ;;  %v1409_v37 = vsel %vm335_vm0, %v1377_v43, 0.0 }
 0xcbe   :  { %v1396_v39 = vrot.slane %v1395_v1, 4  ;;  %v1384_v50 = vrot.slane %v1383_v33, 2  ;;  %v1410_v44 = vrot.slane %v1409_v37, 4 }
 0xcbf   :  { %v4686_v54 = vmul.f32 %v4678_v63, %v18188_v3  ;;  %v1376_v63 = vmul.f32 %v15599_v0, %v18290_v27  ;;  %v2495_v0 = vmul.f32 %v15597_v58, %v18291_v15  ;;  %v1433_v58 = vrot.slane %v1432_v26, 2 }
 0xcc0   :  { %v1397_v5 = vadd.f32 %v1396_v39, %v1395_v1  ;;  %v2534_v27 = vsel %vm335_vm0, %v2496_v6, 0.0  ;;  %v1378_v1 = vmul.f32 %v18298_v45, %v18297_v16  ;;  %v2509_v29 = vrot.slane %v2508_v46, 2  ;;  %v18300_v16 = vld [vmem:[#allocation70_spill] sm:$0xff] }
 0xcc1   :  { %v1402_v60 = vsel %vm335_vm0, %v1376_v63, 0.0  ;;  %v2527_v31 = vsel %vm335_vm0, %v2495_v0, 0.0  ;;  %v2497_v63 = vmul.f32 %v15622_v48, %v18296_v17  ;;  %v1391_v39 = vrot.slane %v1390_v51, 2  ;;  %v18301_v45 = vld [vmem:[#allocation34_spill] sm:$0xff] }
 0xcc2   :  { %v1403_v40 = vrot.slane %v1402_v60, 4  ;;  %v1398_v49 = vrot.slane %v1397_v5, 2  ;;  %v2528_v12 = vrot.slane %v2527_v31, 4  ;;  %v1385_v0 = vadd.f32 %v1384_v50, %v1383_v33 }
 0xcc3   :  { %v2535_v25 = vrot.slane %v2534_v27, 4  ;;  %v2541_v48 = vsel %vm335_vm0, %v2497_v63, 0.0  ;;  %v1416_v17 = vsel %vm335_vm0, %v1378_v1, 0.0  ;;  %v2510_v43 = vadd.f32 %v2509_v29, %v2508_v46 }
 0xcc4   :  { %v1404_v47 = vadd.f32 %v1403_v40, %v1402_v60  ;;  %v1392_v24 = vadd.f32 %v1391_v39, %v1390_v51  ;;  %v1399_v60 = vadd.f32 %v1398_v49, %v1397_v5  ;;  %v2529_v40 = vadd.f32 %v2528_v12, %v2527_v31  ;;  %v18303_v12 = vld [vmem:[#allocation61_spill] sm:$0xff]  ;;  %v18304_v31 = vld [vmem:[#allocation35_spill] sm:$0xff] }
 0xcc5   :  { %v16637_v3 = vstv %s122_s16  ;;  %v2536_v33 = vadd.f32 %v2535_v25, %v2534_v27  ;;  %v1417_v50 = vrot.slane %v1416_v17, 4  ;;  %v1386_v18 = vrot.slane %v1385_v0, 1 }
 0xcc6   :  { %v1405_v10 = vrot.slane %v1404_v47, 2  ;;  %18302 = vst [vmem:[#allocation62_spill] sm:$0xff] %v16637_v3  ;;  %v1411_v36 = vadd.f32 %v1410_v44, %v1409_v37  ;;  %v1400_v51 = vrot.slane %v1399_v60, 1  ;;  %v1379_v29 = vmul.f32 %v18304_v31, %v18303_v12 }
 0xcc7   :  { %v2537_v39 = vrot.slane %v2536_v33, 2  ;;  %v1418_v25 = vadd.f32 %v1417_v50, %v1416_v17  ;;  %v1387_v62 = vadd.f32 %v1386_v18, %v1385_v0 }
 0xcc8   :  { %v1406_v5 = vadd.f32 %v1405_v10, %v1404_v47  ;;  %v1412_v44 = vrot.slane %v1411_v36, 2  ;;  %v1401_v21 = vadd.f32 %v1400_v51, %v1399_v60  ;;  %v1423_v10 = vsel %vm335_vm0, %v1379_v29, 0.0 }
 0xcc9   :  { %v2538_v47 = vadd.f32 %v2537_v39, %v2536_v33  ;;  %v1419_v12 = vrot.slane %v1418_v25, 2  ;;  %v1438_v18 = vmul.f32 %v16613_v9, %v1387_v62  ;;  %v18309_v39 = vld [vmem:[#allocation74_spill] sm:$0xff] }
 0xcca   :  { %v1413_v0 = vadd.f32 %v1412_v44, %v1411_v36  ;;  %v1440_v60 = vmul.f32 %v16613_v9, %v1401_v21 }
 0xccb   :  { %v2539_v33 = vrot.slane %v2538_v47, 1  ;;  %v1420_v50 = vadd.f32 %v1419_v12, %v1418_v25 }
 0xccc   :  { %v1414_v36 = vrot.slane %v1413_v0, 1 }
 0xcd0   :  { %4724 = vperm.xlu0 %10696, %v4686_v54   ;;  %v2513_v54 = vsel %vm335_vm0, %v2493_v30, 0.0  ;;  %v2521_v30 = vrot.slane %v2520_v61, 4 }
 0xcd1   :  { %v2514_v32 = vrot.slane %v2513_v54, 4 }
 0xcd2   :  { %v2522_v15 = vadd.f32 %v2521_v30, %v2520_v61  ;;  %v2498_v61 = vmul.f32 %v18301_v45, %v18300_v16  ;;  %v2503_v30 = vadd.f32 %v2502_v20, %v2501_v38  ;;  %v2511_v16 = vrot.slane %v2510_v43, 1 }
 0xcd3   :  { %v2515_v55 = vadd.f32 %v2514_v32, %v2513_v54  ;;  %v16629_v54 = vstv %s16601_s13  ;;  %v1434_v32 = vadd.f32 %v1433_v58, %v1432_v26  ;;  %v2542_v58 = vrot.slane %v2541_v48, 4 }
 0xcd4   :  { %18299 = vst [vmem:[#allocation54_spill] sm:$0xff] %v16629_v54  ;;  %v2523_v2 = vrot.slane %v2522_v15, 2  ;;  %v2548_v1 = vsel %vm335_vm0, %v2498_v61, 0.0  ;;  %v2504_v35 = vrot.slane %v2503_v30, 1  ;;  %v1393_v38 = vrot.slane %v1392_v24, 1 }
 0xcd5   :  { %v2516_v6 = vrot.slane %v2515_v55, 2  ;;  %v1435_v26 = vrot.slane %v1434_v32, 1  ;;  %v2530_v20 = vrot.slane %v2529_v40, 2  ;;  %v2543_v49 = vadd.f32 %v2542_v58, %v2541_v48 }
 0xcd6   :  { %v2524_v46 = vadd.f32 %v2523_v2, %v2522_v15  ;;  %v2549_v27 = vrot.slane %v2548_v1, 4  ;;  %v2505_v37 = vadd.f32 %v2504_v35, %v2503_v30  ;;  %v1394_v61 = vadd.f32 %v1393_v38, %v1392_v24  ;;  %v18306_v38 = vld [vmem:[#allocation33_spill] sm:$0xff] }
 0xcd7   :  { %v2517_v63 = vadd.f32 %v2516_v6, %v2515_v55  ;;  %v1436_v45 = vadd.f32 %v1435_v26, %v1434_v32  ;;  %v2512_v6 = vadd.f32 %v2511_v16, %v2510_v43  ;;  %v2531_v2 = vadd.f32 %v2530_v20, %v2529_v40 }
 0xcd8   :  { %v2525_v7 = vrot.slane %v2524_v46, 1  ;;  %v1407_v15 = vrot.slane %v1406_v5, 1  ;;  %v2544_v53 = vrot.slane %v2543_v49, 2  ;;  %v2550_v31 = vadd.f32 %v2549_v27, %v2548_v1 }
 0xcd9   :  { %v2518_v55 = vrot.slane %v2517_v63, 1  ;;  %v16644_v48 = vmul.f32 %v16613_v9, %v1436_v45  ;;  %v2556_v35 = vmul.f32 %v16616_v52, %v2505_v37  ;;  %v2557_v24 = vmul.f32 %v16616_v52, %v2512_v6 }
 0xcda   :  { %v1439_v17 = vmul.f32 %v16613_v9, %v1394_v61  ;;  %v1424_v30 = vrot.slane %v1423_v10, 4  ;;  %v2526_v43 = vadd.f32 %v2525_v7, %v2524_v46  ;;  %v2532_v40 = vrot.slane %v2531_v2, 1  ;;  %v18307_v7 = vld [vmem:[#allocation72_spill] sm:$0xff] }
 0xcdb   :  { %v2519_v32 = vadd.f32 %v2518_v55, %v2517_v63  ;;  %v1408_v26 = vadd.f32 %v1407_v15, %v1406_v5  ;;  %v2545_v58 = vadd.f32 %v2544_v53, %v2543_v49  ;;  %v2551_v1 = vrot.slane %v2550_v31, 2  ;;  %v18305_v63 = vld [vmem:[#allocation69_spill] sm:$0xff]  ;;  %v18308_v46 = vld [vmem:[#allocation36_spill] sm:$0xff] }
 0xcdc   :  { %v16651_v16 = vadd.f32 %v2556_v35, %v1438_v18  ;;  %v3609_v51 = vmul.f32 %v18306_v38, %v18305_v63  ;;  %v16656_v20 = vadd.f32 %v2557_v24, %v1439_v17  ;;  %v1425_v29 = vadd.f32 %v1424_v30, %v1423_v10  ;;  %v18310_v5 = vld [vmem:[#allocation37_spill] sm:$0xff]  ;;  %v18313_v17 = vld [vmem:[#allocation32_spill] sm:$0xff] }
 0xcdd   :  { %v2558_v62 = vmul.f32 %v16616_v52, %v2519_v32  ;;  %v3610_v21 = vmul.f32 %v18308_v46, %v18307_v7  ;;  %v3611_v27 = vmul.f32 %v18310_v5, %v18309_v39  ;;  %v2559_v53 = vmul.f32 %v16616_v52, %v2526_v43  ;;  %v18311_v18 = vld [vmem:[#allocation9_spill] sm:$0xff]  ;;  %v18314_v43 = vld [vmem:[#allocation11_spill] sm:$0xff] }
 0xcde   :  { %v2533_v25 = vadd.f32 %v2532_v40, %v2531_v2  ;;  %v1441_v45 = vmul.f32 %v16613_v9, %v1408_v26  ;;  %v2540_v55 = vadd.f32 %v2539_v33, %v2538_v47  ;;  %v2546_v44 = vrot.slane %v2545_v58, 1  ;;  %v18312_v47 = vld [vmem:[#allocation71_spill] sm:$0xff] }
 0xcdf   :  { %v16663_v49 = vadd.f32 %v2558_v62, %v1440_v60  ;;  %v1421_v37 = vrot.slane %v1420_v50, 1  ;;  %v2552_v6 = vadd.f32 %v2551_v1, %v2550_v31  ;;  %v1415_v15 = vadd.f32 %v1414_v36, %v1413_v0 }
 0xce0   :  { %v3617_v10 = vsel %vm335_vm0, %v3609_v51, 0.0  ;;  %v1426_v35 = vrot.slane %v1425_v29, 2  ;;  %v3624_v2 = vsel %vm335_vm0, %v3610_v21, 0.0  ;;  %v3631_v24 = vsel %vm335_vm0, %v3611_v27, 0.0 }
 0xce1   :  { %v3612_v30 = vmul.f32 %v18313_v17, %v18312_v47  ;;  %v2560_v31 = vmul.f32 %v16616_v52, %v2533_v25  ;;  %v2547_v26 = vadd.f32 %v2546_v44, %v2545_v58  ;;  %v1422_v33 = vadd.f32 %v1421_v37, %v1420_v50  ;;  %v18316_v44 = vld [vmem:[#allocation39_spill] sm:$0xff]  ;;  %v18319_v47 = vld [vmem:[#allocation73_spill] sm:$0xff] }
 0xce2   :  { %v2553_v1 = vrot.slane %v2552_v6, 1  ;;  %v3618_v62 = vrot.slane %v3617_v10, 4  ;;  %v16682_v36 = vadd.f32 %v2559_v53, %v1441_v45  ;;  %v3625_v63 = vrot.slane %v3624_v2, 4  ;;  %v18320_v17 = vld [vmem:[#allocation41_spill] sm:$0xff] }
 0xce3   :  { %v3632_v38 = vrot.slane %v3631_v24, 4  ;;  %v2561_v7 = vmul.f32 %v16616_v52, %v2540_v55  ;;  %v1442_v46 = vmul.f32 %v16613_v9, %v1415_v15  ;;  %v16686_v21 = vadd.f32 %v1426_v35, %v1425_v29  ;;  %v18315_v55 = vld [vmem:[#allocation76_spill] sm:$0xff] }
 0xce4   :  { %v3638_v39 = vsel %vm335_vm0, %v3612_v30, 0.0  ;;  %v16693_v50 = vmul.f32 %v16616_v52, %v2547_v26  ;;  %v1443_v5 = vmul.f32 %v16613_v9, %v1422_v33  ;;  %v2554_v27 = vadd.f32 %v2553_v1, %v2552_v6  ;;  %v18323_v26 = vld [vmem:[#allocation80_spill] sm:$0xff]  ;;  %v18324_v33 = vld [vmem:[#allocation45_spill] sm:$0xff] }
 0xce5   :  { %v3619_v53 = vadd.f32 %v3618_v62, %v3617_v10  ;;  %v3626_v25 = vadd.f32 %v3625_v63, %v3624_v2  ;;  %v3633_v45 = vadd.f32 %v3632_v38, %v3631_v24  ;;  %v3639_v29 = vrot.slane %v3638_v39, 4 }
 0xce6   :  { %v3613_v37 = vmul.f32 %v18316_v44, %v18315_v55  ;;  %v16698_v15 = vadd.f32 %v2560_v31, %v1442_v46  ;;  %v3614_v30 = vmul.f32 %v18320_v17, %v18319_v47  ;;  %v16708_v24 = vadd.f32 %v2561_v7, %v1443_v5  ;;  %v18328_v5 = vld [vmem:[#allocation6_spill] sm:$0xff]  ;;  %v18329_v44 = vld [vmem:[#allocation81_spill] sm:$0xff] }
 0xce7   :  { %v16711_v31 = vmul.f32 %v16616_v52, %v2554_v27  ;;  %v4729_v1 = vmul.f32 %v18324_v33, %v18323_v26  ;;  %v3627_v62 = vrot.slane %v3626_v25, 2  ;;  %v3634_v63 = vrot.slane %v3633_v45, 2 }
 0xce8   :  { %v3640_v38 = vadd.f32 %v3639_v29, %v3638_v39 }
 0xce9   :  { %v4749_v29 = vsel %vm335_vm0, %v4729_v1, 0.0  ;;  %v3628_v33 = vadd.f32 %v3627_v62, %v3626_v25 }
 0xcea   :  { %v4750_v1 = vrot.slane %v4749_v29, 4 }
 0xd26   :  { %v16666_v61 = vpop.xlane.xlu1 %5805 }
 0xd27   :  { %v5811_v12 = vrot.slane %v16666_v61, %v11262_v8  ;;  %v5823_v32 = vrot.slane %v16666_v61, %v18311_v18  ;;  %v5831_v0 = vrot.slane %v16666_v61, %v18314_v43  ;;  %v4751_v8 = vadd.f32 %v4750_v1, %v4749_v29 }
 0xd29   :  { %v5848_v60 = vsub.f32 %v16347_v28, %v5811_v12  ;;  %v5851_v40 = vsub.f32 %v16375_v42, %v5823_v32  ;;  %v5839_v28 = vrot.slane %v16666_v61, %v18148_v4  ;;  %v5853_v42 = vsub.f32 %v16425_v41, %v5831_v0  ;;  %v18317_v41 = vld [vmem:[#allocation79_spill] sm:$0xff]  ;;  %v18318_v32 = vld [vmem:[#allocation40_spill] sm:$0xff]  ;;  %v18321_v0 = vld [vmem:[#allocation78_spill] sm:$0xff] }
 0xd2a   :  { %v1428_v12 = vrot.slane %v16686_v21, 1  ;;  %v4727_v35 = vmul.f32 %v18318_v32, %v18317_v41  ;;  %v18330_v41 = vld [vmem:[#allocation51_spill] sm:$0xff] }
 0xd2b   :  { %v5856_v51 = vmul.f32 1.442695, %v5848_v60  ;;  %v5862_v58 = vmul.f32 1.442695, %v5851_v40  ;;  %v18322_v60 = vld [vmem:[#allocation47_spill] sm:$0xff]  ;;  %v5855_v10 = vsub.f32 %v16456_v59, %v5839_v28  ;;  %v3620_v40 = vrot.slane %v3619_v53, 2 }
 0xd2c   :  { %v4728_v6 = vmul.f32 %v18322_v60, %v18321_v0  ;;  %v5866_v2 = vmul.f32 1.442695, %v5853_v42  ;;  %v4735_v46 = vsel %vm335_vm0, %v4727_v35, 0.0  ;;  %v3652_v59 = vsel %vm335_vm0, %v3614_v30, 0.0  ;;  %v18325_v28 = vld [vmem:[#allocation77_spill] sm:$0xff]  ;;  %v18326_v42 = vld [vmem:[#allocation38_spill] sm:$0xff] }
 0xd2d   :  { %10828 = vpow2.f32 %v5856_v51  ;;  %v3645_v51 = vsel %vm335_vm0, %v3613_v37, 0.0  ;;  %v3615_v7 = vmul.f32 %v18326_v42, %v18325_v28  ;;  %v4731_v32 = vmul.f32 %v18330_v41, %v18329_v44  ;;  %v18331_v37 = vld [vmem:[#allocation84_spill] sm:$0xff]  ;;  %v18332_v35 = vld [vmem:[#allocation22_spill] sm:$0xff]  ;;  %v18336_v44 = vld [vmem:[#allocation43_spill] sm:$0xff] }
 0xd2e   :  { %10830 = vpow2.f32 %v5862_v58  ;;  %v18327_v58 = vld [vmem:[#allocation83_spill] sm:$0xff]  ;;  %v4742_v55 = vsel %vm335_vm0, %v4728_v6, 0.0  ;;  %v5870_v47 = vmul.f32 1.442695, %v5855_v10  ;;  %v3646_v39 = vrot.slane %v3645_v51, 4  ;;  %v18333_v30 = vld [vmem:[#allocation82_spill] sm:$0xff] }
 0xd2f   :  { %v4730_v27 = vmul.f32 %v18328_v5, %v18327_v58  ;;  %10832 = vpow2.f32 %v5866_v2  ;;  %v4732_v17 = vmul.f32 %v18332_v35, %v18331_v37  ;;  %v18334_v0 = vld [vmem:[#allocation20_spill] sm:$0xff]  ;;  %v3621_v26 = vadd.f32 %v3620_v40, %v3619_v53  ;;  %v18335_v5 = vld [vmem:[#allocation75_spill] sm:$0xff] }
 0xd30   :  { %v4733_v60 = vmul.f32 %v18334_v0, %v18333_v30  ;;  %v4736_v28 = vrot.slane %v4735_v46, 4  ;;  %v3653_v42 = vrot.slane %v3652_v59, 4  ;;  %v4743_v58 = vrot.slane %v4742_v55, 4 }
 0xd31   :  { %v3659_v6 = vsel %vm335_vm0, %v3615_v7, 0.0  ;;  %v3616_v2 = vmul.f32 %v18336_v44, %v18335_v5  ;;  %v4756_v10 = vsel %vm335_vm0, %v4730_v27, 0.0  ;;  %v3641_v41 = vrot.slane %v3640_v38, 2 }
 0xd32   :  { %v4763_v52 = vsel %vm335_vm0, %v4731_v32, 0.0  ;;  %10834 = vpow2.f32 %v5870_v47  ;;  %v3635_v35 = vadd.f32 %v3634_v63, %v3633_v45  ;;  %v3647_v53 = vadd.f32 %v3646_v39, %v3645_v51  ;;  %v16760_v34 = vpop.xlane.xlu0 %6922 }
 0xd33   :  { %v4770_v25 = vsel %vm335_vm0, %v4732_v17, 0.0  ;;  %v4777_v40 = vsel %vm335_vm0, %v4733_v60, 0.0  ;;  %v3622_v62 = vrot.slane %v3621_v26, 1  ;;  %v4737_v7 = vadd.f32 %v4736_v28, %v4735_v46 }
 0xd34   :  { %v3660_v30 = vrot.slane %v3659_v6, 4  ;;  %v4757_v0 = vrot.slane %v4756_v10, 4  ;;  %v3654_v27 = vadd.f32 %v3653_v42, %v3652_v59  ;;  %v4744_v5 = vadd.f32 %v4743_v58, %v4742_v55  ;;  %v9523_v59 = vld [vmem:[%s17806_s8 + $0xa8] sm:$0xff] }
 0xd35   :  { %v3666_v44 = vsel %vm335_vm0, %v3616_v2, 0.0  ;;  %v4764_v32 = vrot.slane %v4763_v52, 4  ;;  %v3642_v47 = vadd.f32 %v3641_v41, %v3640_v38  ;;  %v4771_v18 = vrot.slane %v4770_v25, 4  ;;  %v9524_v38 = vld [vmem:[%s17806_s8 + $0xb0] sm:$0xff] }
 0xd36   :  { %v4778_v45 = vrot.slane %v4777_v40, 4  ;;  %v1429_v51 = vadd.f32 %v1428_v12, %v16686_v21  ;;  %v3629_v39 = vrot.slane %v3628_v33, 1  ;;  %v3636_v17 = vrot.slane %v3635_v35, 1  ;;  %v9521_v21 = vld [vmem:[%s17806_s8 + $0x98] sm:$0xff]  ;;  %9566 = vmatprep.subr.mxu0 %v9524_v38 }
 0xd37   :  { %v3648_v46 = vrot.slane %v3647_v53, 2  ;;  %v4738_v60 = vrot.slane %v4737_v7, 2  ;;  %v3661_v28 = vadd.f32 %v3660_v30, %v3659_v6  ;;  %v3667_v4 = vrot.slane %v3666_v44, 4  ;;  %9567 = vmatpush1.msra.mxu0 %v9523_v59 }
 0xd38   :  { %v3623_v12 = vadd.f32 %v3622_v62, %v3621_v26  ;;  %v3655_v55 = vrot.slane %v3654_v27, 2  ;;  %v4745_v29 = vrot.slane %v4744_v5, 2  ;;  %v4765_v42 = vadd.f32 %v4764_v32, %v4763_v52  ;;  %9568 = vmatprep.subr.mxu0 %v9521_v21  ;;  %v9520_v26 = vld [vmem:[%s17806_s8 + $0x90] sm:$0xff] }
 0xd39   :  { %v3643_v58 = vrot.slane %v3642_v47, 1  ;;  %v4752_v6 = vrot.slane %v4751_v8, 2  ;;  %v4772_v2 = vadd.f32 %v4771_v18, %v4770_v25  ;;  %v1444_v1 = vmul.f32 %v16613_v9, %v1429_v51  ;;  %9569 = vmatpush1.msra.mxu0 %v9520_v26  ;;  %v9518_v18 = vld [vmem:[%s17806_s8 + $0x80] sm:$0xff] }
 0xd3a   :  { %v16735_v37 = vpop.eup %10828  ;;  %v3630_v30 = vadd.f32 %v3629_v39, %v3628_v33  ;;  %v4739_v62 = vadd.f32 %v4738_v60, %v4737_v7  ;;  %v3662_v52 = vrot.slane %v3661_v28, 2  ;;  %v3668_v32 = vadd.f32 %v3667_v4, %v3666_v44  ;;  %v9517_v33 = vld [vmem:[%s17806_s8 + $0x78] sm:$0xff]  ;;  %9570 = vmatprep.subr.mxu0 %v9518_v18  ;;  %v9514_v7 = vld [vmem:[%s17806_s8 + $0x60] sm:$0xff] }
 0xd3b   :  { %18337 = vst [vmem:[#allocation63_spill] sm:$0xff] %v16735_v37  ;;  %5881 = vperm.xlu0 %10696, %v16735_v37   ;;  %v16741_v63 = vpop.eup %10830  ;;  %v4758_v37 = vadd.f32 %v4757_v0, %v4756_v10  ;;  %v4779_v10 = vadd.f32 %v4778_v45, %v4777_v40  ;;  %v3637_v0 = vadd.f32 %v3636_v17, %v3635_v35  ;;  %v9515_v35 = vld [vmem:[%s17806_s8 + $0x68] sm:$0xff]  ;;  %v4766_v40 = vrot.slane %v4765_v42, 2  ;;  %v9512_v17 = vld [vmem:[%s17806_s8 + $0x50] sm:$0xff] }
 0xd3c   :  { %18338 = vst [vmem:[#allocation55_spill] sm:$0xff] %v16741_v63  ;;  %v16754_v41 = vpop.eup %10832  ;;  %v3674_v4 = vmul.f32 %v16629_v54, %v3623_v12  ;;  %v4746_v25 = vadd.f32 %v4745_v29, %v4744_v5  ;;  %v3644_v44 = vadd.f32 %v3643_v58, %v3642_v47  ;;  %v4753_v45 = vadd.f32 %v4752_v6, %v4751_v8  ;;  %v9511_v8 = vld [vmem:[%s17806_s8 + $0x48] sm:$0xff] }
 0xd3d   :  { %v4759_v38 = vrot.slane %v4758_v37, 2  ;;  %v4773_v51 = vrot.slane %v4772_v2, 2  ;;  %v4780_v39 = vrot.slane %v4779_v10, 2  ;;  %9571 = vmatpush1.msra.mxu0 %v9517_v33  ;;  %v3675_v5 = vmul.f32 %v16629_v54, %v3630_v30 }
 0xd3e   :  { %v3676_v60 = vmul.f32 %v16629_v54, %v3637_v0  ;;  %9572 = vmatprep.subr.mxu0 %v9515_v35  ;;  %v4740_v47 = vrot.slane %v4739_v62, 1  ;;  %v3663_v21 = vadd.f32 %v3662_v52, %v3661_v28  ;;  %v3669_v12 = vrot.slane %v3668_v32, 2  ;;  %v9508_v28 = vld [vmem:[%s17806_s8 + $0x30] sm:$0xff]  ;;  %v9505_v35 = vld [vmem:[%s17806_s8 + $0x18] sm:$0xff] }
 0xd3f   :  { %5890 = vperm.xlu0 %10696, %v16741_v63   ;;  %v3649_v63 = vadd.f32 %v3648_v46, %v3647_v53  ;;  %v3656_v53 = vadd.f32 %v3655_v55, %v3654_v27  ;;  %v16779_v46 = vpop.eup %10834  ;;  %v16782_v27 = vadd.f32 %v16693_v50, %v1444_v1  ;;  %v4760_v55 = vadd.f32 %v4759_v38, %v4758_v37  ;;  %v9509_v50 = vld [vmem:[%s17806_s8 + $0x38] sm:$0xff]  ;;  %v9506_v38 = vld [vmem:[%s17806_s8 + $0x20] sm:$0xff] }
 0xd40   :  { %9573 = vmatpush1.msra.mxu0 %v9514_v7  ;;  %v3682_v58 = vadd.f32 %v3674_v4, %v16651_v16  ;;  %v4747_v1 = vrot.slane %v4746_v25, 1  ;;  %v4767_v30 = vadd.f32 %v4766_v40, %v4765_v42  ;;  %v3677_v37 = vmul.f32 %v16629_v54, %v3644_v44 }
 0xd41   :  { %v3650_v59 = vrot.slane %v3649_v63, 1  ;;  %v3657_v6 = vrot.slane %v3656_v53, 1  ;;  %9574 = vmatprep.subr.mxu0 %v9512_v17  ;;  %v4754_v0 = vrot.slane %v4753_v45, 1  ;;  %v4774_v26 = vadd.f32 %v4773_v51, %v4772_v2  ;;  %v18339_v51 = vld [vmem:[#allocation85_spill] sm:$0xff] }
 0xd42   :  { %v4781_v52 = vadd.f32 %v4780_v39, %v4779_v10  ;;  %9575 = vmatpush1.msra.mxu0 %v9511_v8  ;;  %v3683_v16 = vadd.f32 %v3675_v5, %v16656_v20  ;;  %v3684_v18 = vadd.f32 %v3676_v60, %v16663_v49  ;;  %v5815_v33 = vrot.slane %v16666_v61, %v12107_v19  ;;  %v9503_v20 = vld [vmem:[%s17806_s8 + $0x8] sm:$0xff] }
 0xd43   :  { %5896 = vperm.xlu0 %10696, %v16754_v41   ;;  %v16789_v29 = vpop.xlane.xlu0 %9156  ;;  %v3651_v42 = vadd.f32 %v3650_v59, %v3649_v63  ;;  %9576 = vmatprep.subr.mxu0 %v9509_v50  ;;  %v4741_v2 = vadd.f32 %v4740_v47, %v4739_v62  ;;  %v3664_v10 = vrot.slane %v3663_v21, 1  ;;  %v3670_v4 = vadd.f32 %v3669_v12, %v3668_v32 }
 0xd44   :  { %v4761_v40 = vrot.slane %v4760_v55, 1  ;;  %9577 = vmatpush1.msra.mxu0 %v9508_v28  ;;  %v3658_v49 = vadd.f32 %v3657_v6, %v3656_v53  ;;  %v4748_v63 = vadd.f32 %v4747_v1, %v4746_v25  ;;  %v4768_v44 = vrot.slane %v4767_v30, 1 }
 0xd45   :  { %9578 = vmatprep.subr.mxu0 %v9506_v38  ;;  %v3685_v17 = vadd.f32 %v3677_v37, %v16682_v36  ;;  %v4755_v5 = vadd.f32 %v4754_v0, %v4753_v45  ;;  %v4775_v60 = vrot.slane %v4774_v26, 1  ;;  %v4782_v62 = vrot.slane %v4781_v52, 1 }
 0xd46   :  { %9579 = vmatpush1.msra.mxu0 %v9505_v35  ;;  %v3678_v32 = vmul.f32 %v16629_v54, %v3651_v42  ;;  %v5819_v59 = vrot.slane %v16666_v61, %v12110_v22  ;;  %v5849_v8 = vsub.f32 %v16362_v23, %v5815_v33  ;;  %v3665_v25 = vadd.f32 %v3664_v10, %v3663_v21  ;;  %v18340_v42 = vld [vmem:[#allocation10_spill] sm:$0xff] }
 0xd47   :  { %5902 = vperm.xlu0 %10696, %v16779_v46   ;;  %9580 = vmatprep.subr.mxu0 %v9503_v20  ;;  %v3671_v47 = vrot.slane %v3670_v4, 1  ;;  %v4762_v12 = vadd.f32 %v4761_v40, %v4760_v55  ;;  %v4792_v36 = vmul.f32 %v16637_v3, %v4741_v2  ;;  %v3679_v45 = vmul.f32 %v16629_v54, %v3658_v49 }
 0xd48   :  { %v4793_v6 = vmul.f32 %v16637_v3, %v4748_v63  ;;  %v4769_v1 = vadd.f32 %v4768_v44, %v4767_v30  ;;  %v4794_v28 = vmul.f32 %v16637_v3, %v4755_v5  ;;  %v4776_v37 = vadd.f32 %v4775_v60, %v4774_v26  ;;  %v9502_v30 = vld [vmem:[%s17806_s8] sm:$0xff]  ;;  %v18341_v63 = vld [vmem:[#allocation12_spill] sm:$0xff] }
 0xd49   :  { %v4783_v0 = vadd.f32 %v4782_v62, %v4781_v52  ;;  %v3686_v23 = vadd.f32 %v3678_v32, %v16698_v15  ;;  %v5827_v21 = vrot.slane %v16666_v61, %v18340_v42  ;;  %v5850_v55 = vsub.f32 %v16372_v11, %v5819_v59  ;;  %9581 = vmatpush1.msra.mxu0 %v9502_v30 }
 0xd4a   :  { %v5858_v33 = vmul.f32 1.442695, %v5849_v8  ;;  %v3680_v35 = vmul.f32 %v16629_v54, %v3665_v25  ;;  %v3672_v2 = vadd.f32 %v3671_v47, %v3670_v4  ;;  %v4795_v10 = vmul.f32 %v16637_v3, %v4762_v12 }
 0xd4b   :  { %v4725_v7 = vpop.permute.xlu0 %4724  ;;  %v4800_v26 = vadd.f32 %v4792_v36, %v3682_v58  ;;  %v3687_v52 = vadd.f32 %v3679_v45, %v16708_v24  ;;  %v4801_v15 = vadd.f32 %v4793_v6, %v3683_v16  ;;  %v4802_v20 = vadd.f32 %v4794_v28, %v3684_v18  ;;  %v16866_v28 = vpop.xlane.xlu1 %8039 }
 0xd4c   :  { %v4734_v39 = vmul.f32 %v4725_v7, %v18339_v51  ;;  %v4796_v7 = vmul.f32 %v16637_v3, %v4769_v1  ;;  %v4797_v11 = vmul.f32 %v16637_v3, %v4776_v37  ;;  %v4798_v49 = vmul.f32 %v16637_v3, %v4783_v0  ;;  %v11172_v0 = vld [vmem:[%s17799_s1] sm:$0xff] }
 0xd4d   :  { %v5835_v44 = vrot.slane %v16666_v61, %v18341_v63  ;;  %v5852_v51 = vsub.f32 %v16399_v56, %v5827_v21  ;;  %10836 = vpow2.f32 %v5858_v33  ;;  %v3681_v58 = vmul.f32 %v16629_v54, %v3672_v2 }
 0xd4e   :  { %v4784_v53 = vsel %vm335_vm0, %v4734_v39, 0.0  ;;  %v5860_v39 = vmul.f32 1.442695, %v5850_v55  ;;  %v4803_v24 = vadd.f32 %v4795_v10, %v3685_v17  ;;  %v3688_v5 = vadd.f32 %v3680_v35, %v16782_v27 }
 0xd4f   :  { %v4785_v50 = vrot.slane %v4784_v53, 4  ;;  %v4804_v60 = vadd.f32 %v4796_v7, %v3686_v23  ;;  %v2571_v18 = vadd.f32 %v16711_v31, %v16644_v48  ;;  %v4805_v32 = vadd.f32 %v4797_v11, %v3687_v52 }
 0xd50   :  { %v4806_v59 = vadd.f32 %v4798_v49, %v3688_v5  ;;  %v4816_v8 = vsel %vm530_vm1, %v4801_v15, %v4800_v26  ;;  %v5854_v61 = vsub.f32 %v16428_v14, %v5835_v44  ;;  %10838 = vpow2.f32 %v5860_v39 }
 0xd51   :  { %v4786_v38 = vadd.f32 %v4785_v50, %v4784_v53  ;;  %v5864_v56 = vmul.f32 1.442695, %v5852_v51  ;;  %v4817_v53 = vsel %vm532_vm2, %v4802_v20, %v4816_v8  ;;  %v3689_v25 = vadd.f32 %v3681_v58, %v2571_v18  ;;  %v18342_v51 = vld [vmem:[#allocation100_spill] sm:$0xff]  ;;  %v18344_v8 = vld [vmem:[#allocation106_spill] sm:$0xff] }
 0xd52   :  { %v4818_v27 = vsel %vm623_vm4, %v4803_v24, %v4817_v53  ;;  %v5868_v31 = vmul.f32 1.442695, %v5854_v61  ;;  %v8061_v58 = vrot.slane %v16866_v28, %v18340_v42  ;;  %v18345_v53 = vld [vmem:[#allocation109_spill] sm:$0xff] }
 0xd53   :  { %v4787_v40 = vrot.slane %v4786_v38, 2  ;;  %v4819_v47 = vsel %vm625_vm5, %v4804_v60, %v4818_v27  ;;  %10840 = vpow2.f32 %v5864_v56  ;;  %v18346_v27 = vld [vmem:[#allocation9_spill] sm:$0xff] }
 0xd54   :  { %v4820_v48 = vsel %vm627_vm6, %v4805_v32, %v4819_v47  ;;  %10842 = vpow2.f32 %v5868_v31  ;;  %v8086_v61 = vsub.f32 %v18344_v8, %v8061_v58  ;;  %v9174_v47 = vrot.slane %v16789_v29, %v18346_v27  ;;  %v18347_v31 = vld [vmem:[#allocation114_spill] sm:$0xff] }
 0xd55   :  { %v4788_v4 = vadd.f32 %v4787_v40, %v4786_v38  ;;  %v4821_v50 = vsel %vm629_vm7, %v4806_v59, %v4820_v48  ;;  %v9178_v48 = vrot.slane %v16789_v29, %v18340_v42 }
 0xd57   :  { %v4789_v16 = vrot.slane %v4788_v4, 1 }
 0xd59   :  { %v4790_v62 = vadd.f32 %v4789_v16, %v4788_v4 }
 0xd5a   :  { %v16854_v36 = vpop.eup %10836 }
 0xd5b   :  { %v4799_v17 = vmul.f32 %v16637_v3, %v4790_v62  ;;  %v18343_v62 = vld [vmem:[#allocation13_spill] sm:$0xff] }
 0xd5c   :  { %v6956_v32 = vrot.slane %v16760_v34, %v18343_v62 }
 0xd5d   :  { %v4807_v12 = vadd.f32 %v4799_v17, %v3689_v25  ;;  %v16857_v45 = vpop.eup %10838  ;;  %v8098_v25 = vmul.f32 1.442695, %v8086_v61  ;;  %v18356_v61 = vld [vmem:[#allocation101_spill] sm:$0xff] }
 0xd5e   :  { %v6972_v17 = vsub.f32 %v18345_v53, %v6956_v32  ;;  %v18355_v32 = vld [vmem:[#allocation97_spill] sm:$0xff] }
 0xd5f   :  { %v4822_v14 = vsel %vm631_vm8, %v4807_v12, %v4821_v50  ;;  %v9202_v50 = vsub.f32 %v18347_v31, %v9174_v47  ;;  %v18357_v47 = vld [vmem:[#allocation63_spill] sm:$0xff]  ;;  %v8049_v31 = vrot.slane %v16866_v28, %v12107_v19 }
 0xd60   :  { %4823 = vrot.lane.b32.xlu1 %v4822_v14, %s11192_s22  ;;  %v16860_v6 = vpop.eup %10840  ;;  %v6987_v12 = vmul.f32 1.442695, %v6972_v17  ;;  %v9182_v14 = vrot.slane %v16789_v29, %v18314_v43 }
 0xd61   :  { %v16863_v1 = vpop.eup %10842 }
 0xd64   :  { %5884 = vperm.xlu1 %10697, %v16854_v36  }
 0xd68   :  { %5887 = vperm.xlu1 %10697, %v16857_v45  }
 0xd6c   :  { %5893 = vperm.xlu1 %10697, %v16860_v6  }
 0xd70   :  { %5899 = vperm.xlu1 %10697, %v16863_v1  }
 0xdb6   :  { %v5882_v23 = vpop.permute.xlu0 %5881 }
 0xdb7   :  { %v5907_v35 = vrot.slane %v5882_v23, %v11524_v57  ;;  %v9190_v23 = vrot.slane %v16789_v29, %v18343_v62 }
 0xdba   :  { %v5891_v21 = vpop.permute.xlu0 %5890 }
 0xdbb   :  { %v5919_v52 = vrot.slane %v5891_v21, %v11524_v57  ;;  %v18349_v21 = vld [vmem:[#allocation116_spill] sm:$0xff] }
 0xdbe   :  { %v5897_v10 = vpop.permute.xlu0 %5896 }
 0xdbf   :  { %v5927_v4 = vrot.slane %v5897_v10, %v11524_v57 }
 0xdc2   :  { %v5903_v11 = vpop.permute.xlu0 %5902 }
 0xdc3   :  { %v5935_v16 = vrot.slane %v5903_v11, %v11524_v57  ;;  %v18352_v11 = vld [vmem:[#allocation5_spill] sm:$0xff] }
 0xdc4   :  { %v8045_v17 = vrot.slane %v16866_v28, %v18352_v11 }
 0xdd2   :  { %v4824_v37 = vpop.permute.xlu1 %4823 }
 0xdd3   :  { %v4827_v38 = vsel %vm4826_vm3, %v11172_v0, %v4824_v37  ;;  %v18348_v37 = vld [vmem:[#allocation115_spill] sm:$0xff] }
 0xdd4   :  { %10634 = vmatmul.mubr.msk.f32.vlgmr.msra.gmra.mxu0 %vm9543_vm11, %v4827_v38  ;;  %10688 = vmatprep.mubr.msk.f32.mxu1 %vm9543_vm11, %v4827_v38  ;;  %v9203_v0 = vsub.f32 %v18348_v37, %v9178_v48  ;;  %v9213_v38 = vmul.f32 1.442695, %v9202_v50  ;;  %v18358_v50 = vld [vmem:[#allocation98_spill] sm:$0xff]  ;;  %v18359_v37 = vld [vmem:[#allocation8_spill] sm:$0xff] }
 0xdd5   :  { %9620 = vmatprep.mubr.f32.mxu0 %v18187_v13  ;;  %v6948_v13 = vrot.slane %v16760_v34, %v18314_v43 }
 0xdd7   :  { %v6970_v39 = vsub.f32 %v18342_v51, %v6948_v13  ;;  %v6932_v51 = vrot.slane %v16760_v34, %v12107_v19 }
 0xdd9   :  { %v6983_v59 = vmul.f32 1.442695, %v6970_v39  ;;  %v18353_v39 = vld [vmem:[#allocation95_spill] sm:$0xff] }
 0xddb   :  { %10844 = vpow2.f32 %v6983_v59 }
 0xddc   :  { %10846 = vpow2.f32 %v8098_v25 }
 0xddd   :  { %10848 = vpow2.f32 %v6987_v12 }
 0xdde   :  { %10850 = vpow2.f32 %v9213_v38  ;;  %v6944_v38 = vrot.slane %v16760_v34, %v18340_v42 }
 0xddf   :  { %v5885_v55 = vpop.permute.xlu1 %5884 }
 0xde0   :  { %v5911_v33 = vrot.slane %v5885_v55, %v11524_v57  ;;  %v9204_v55 = vsub.f32 %v18349_v21, %v9182_v14  ;;  %v8082_v14 = vsub.f32 %v18358_v50, %v8045_v17  ;;  %v6952_v17 = vrot.slane %v16760_v34, %v18341_v63 }
 0xde2   :  { %v5936_v30 = vsel %vm530_vm1, %v5911_v33, %v5907_v35  ;;  %v9215_v33 = vmul.f32 1.442695, %v9203_v0 }
 0xde3   :  { %v5888_v2 = vpop.permute.xlu1 %5887 }
 0xde4   :  { %v5915_v40 = vrot.slane %v5888_v2, %v11524_v57  ;;  %v18350_v2 = vld [vmem:[#allocation118_spill] sm:$0xff]  ;;  %10852 = vpow2.f32 %v9215_v33 }
 0xde5   :  { %v9206_v10 = vsub.f32 %v18350_v2, %v9190_v23  ;;  %v18360_v23 = vld [vmem:[#allocation102_spill] sm:$0xff]  ;;  %v18361_v2 = vld [vmem:[#allocation103_spill] sm:$0xff] }
 0xde6   :  { %v5937_v26 = vsel %vm532_vm2, %v5915_v40, %v5936_v30  ;;  %v9217_v40 = vmul.f32 1.442695, %v9204_v55  ;;  %v8083_v21 = vsub.f32 %v18360_v23, %v8049_v31  ;;  %v8090_v55 = vmul.f32 1.442695, %v8082_v14  ;;  %v18366_v31 = vld [vmem:[#allocation104_spill] sm:$0xff] }
 0xde7   :  { %v5894_v15 = vpop.permute.xlu1 %5893  ;;  %v5938_v20 = vsel %vm623_vm4, %v5919_v52, %v5937_v26  ;;  %v9221_v26 = vmul.f32 1.442695, %v9206_v10  ;;  %v6969_v10 = vsub.f32 %v18361_v2, %v6944_v38  ;;  %v6971_v50 = vsub.f32 %v18366_v31, %v6952_v17  ;;  %v18371_v17 = vld [vmem:[#allocation117_spill] sm:$0xff] }
 0xde8   :  { %v5923_v7 = vrot.slane %v5894_v15, %v11524_v57  ;;  %v16911_v35 = vpop.eup %10844  ;;  %10854 = vpow2.f32 %v9217_v40  ;;  %v8053_v40 = vrot.slane %v16866_v28, %v12110_v22  ;;  %v9170_v14 = vrot.slane %v16789_v29, %v12110_v22 }
 0xde9   :  { %v16915_v30 = vpop.eup %10846  ;;  %10856 = vpow2.f32 %v9221_v26  ;;  %v8092_v26 = vmul.f32 1.442695, %v8083_v21  ;;  %v8065_v23 = vrot.slane %v16866_v28, %v18314_v43  ;;  %v18367_v21 = vld [vmem:[#allocation113_spill] sm:$0xff] }
 0xdea   :  { %v5939_v49 = vsel %vm625_vm5, %v5923_v7, %v5938_v20  ;;  %v16918_v52 = vpop.eup %10848 }
 0xdeb   :  { %v5900_v44 = vpop.permute.xlu1 %5899  ;;  %v5940_v5 = vsel %vm627_vm6, %v5927_v4, %v5939_v49  ;;  %v16921_v15 = vpop.eup %10850  ;;  %v6928_v49 = vrot.slane %v16760_v34, %v18352_v11 }
 0xdec   :  { %v5931_v24 = vrot.slane %v5900_v44, %v11524_v57 }
 0xded   :  { %v6965_v58 = vsub.f32 %v18353_v39, %v6928_v49  ;;  %v18362_v39 = vld [vmem:[#allocation99_spill] sm:$0xff] }
 0xdee   :  { %v5941_v60 = vsel %vm629_vm7, %v5931_v24, %v5940_v5  ;;  %v6936_v24 = vrot.slane %v16760_v34, %v12110_v22 }
 0xdef   :  { %v5942_v18 = vsel %vm631_vm8, %v5935_v16, %v5941_v60  ;;  %v18354_v16 = vld [vmem:[#allocation96_spill] sm:$0xff]  ;;  %v6973_v60 = vmul.f32 1.442695, %v6965_v58  ;;  %v8084_v58 = vsub.f32 %v18362_v39, %v8053_v40  ;;  %v18368_v40 = vld [vmem:[#allocation107_spill] sm:$0xff]  ;;  %v8073_v39 = vrot.slane %v16866_v28, %v18343_v62 }
 0xdf0   :  { %v5944_v56 = vsel %vm1115_vm15, %v5942_v18, 0.0  ;;  %v6966_v5 = vsub.f32 %v18354_v16, %v6932_v51  ;;  %v6940_v18 = vrot.slane %v16760_v34, %v18346_v27  ;;  %v6967_v59 = vsub.f32 %v18355_v32, %v6936_v24  ;;  %v18363_v16 = vld [vmem:[#allocation105_spill] sm:$0xff] }
 0xdf1   :  { %5945 = vadd.xlane.f32.xlu1 %v5944_v56  ;;  %v16924_v13 = vpop.eup %10852  ;;  %v8057_v51 = vrot.slane %v16866_v28, %v18346_v27  ;;  %v6985_v34 = vmul.f32 1.442695, %v6971_v50 }
 0xdf2   :  { %v6975_v8 = vmul.f32 1.442695, %v6966_v5  ;;  %v6968_v56 = vsub.f32 %v18356_v61, %v6940_v18  ;;  %v6977_v53 = vmul.f32 1.442695, %v6967_v59  ;;  %v9162_v18 = vrot.slane %v16789_v29, %v18352_v11  ;;  %v18364_v61 = vld [vmem:[#allocation111_spill] sm:$0xff] }
 0xdf3   :  { %v8085_v5 = vsub.f32 %v18363_v16, %v8057_v51 }
 0xdf4   :  { %v6979_v48 = vmul.f32 1.442695, %v6968_v56  ;;  %v9199_v56 = vsub.f32 %v18364_v61, %v9162_v18  ;;  %v18370_v18 = vld [vmem:[#allocation110_spill] sm:$0xff]  ;;  %v9186_v61 = vrot.slane %v16789_v29, %v18341_v63 }
 0xdf5   :  { %v16927_v7 = vpop.eup %10854  ;;  %v8096_v59 = vmul.f32 1.442695, %v8085_v5 }
 0xdf6   :  { %v16930_v20 = vpop.eup %10856 }
 0xdf7   :  { %18351 = vst [vmem:[#allocation57_spill] sm:$0xff] %v16930_v20 }
 0xe02   :  { %7013 = vperm.xlu1 %10697, %v16911_v35  }
 0xe06   :  { %8127 = vperm.xlu1 %10697, %v16915_v30  }
 0xe0a   :  { %7019 = vperm.xlu1 %10697, %v16918_v52  }
 0xe0e   :  { %9241 = vperm.xlu1 %10697, %v16921_v15  }
 0xe12   :  { %9244 = vperm.xlu1 %10697, %v16924_v13  }
 0xe16   :  { %9247 = vperm.xlu1 %10697, %v16927_v7  }
 0xe1a   :  { %9253 = vperm.xlu1 %10697, %v16930_v20  }
 0xe7a   :  { %v16935_v4 = vpop.xlane.xlu1 %5945 }
 0xe7b   :  { %v5951_v44 = vrot.slane %v16935_v4, %v18352_v11 }
 0xe7d   :  { %10858 = vrcp.f32 %v5951_v44  ;;  %v6981_v44 = vmul.f32 1.442695, %v6969_v10  ;;  %v8069_v10 = vrot.slane %v16866_v28, %v18341_v63 }
 0xe7e   :  { %10860 = vpow2.f32 %v6973_v60  ;;  %v8094_v60 = vmul.f32 1.442695, %v8084_v58  ;;  %v18369_v58 = vld [vmem:[#allocation108_spill] sm:$0xff] }
 0xe7f   :  { %10862 = vpow2.f32 %v6975_v8  ;;  %v9166_v8 = vrot.slane %v16789_v29, %v12107_v19  ;;  %v8088_v16 = vsub.f32 %v18369_v58, %v8069_v10 }
 0xe80   :  { %10864 = vpow2.f32 %v6977_v53 }
 0xe81   :  { %10866 = vpow2.f32 %v6979_v48 }
 0xe82   :  { %10868 = vpow2.f32 %v8090_v55  ;;  %v9201_v55 = vsub.f32 %v18367_v21, %v9170_v14 }
 0xe83   :  { %10870 = vpow2.f32 %v8092_v26  ;;  %v8087_v26 = vsub.f32 %v18368_v40, %v8065_v23 }
 0xe84   :  { %10872 = vpow2.f32 %v6981_v44  ;;  %v9211_v44 = vmul.f32 1.442695, %v9201_v55 }
 0xe85   :  { %10874 = vpow2.f32 %v8094_v60  ;;  %v8100_v5 = vmul.f32 1.442695, %v8087_v26 }
 0xe86   :  { %10876 = vpow2.f32 %v8096_v59  ;;  %v8089_v59 = vsub.f32 %v18370_v18, %v8073_v39  ;;  %v7014_v39 = vpop.permute.xlu1 %7013 }
 0xe88   :  { %v8104_v28 = vmul.f32 1.442695, %v8089_v59 }
 0xe8a   :  { %v10859_v25 = vpop.eup %10858 }
 0xe8b   :  { %v5989_v12 = vmul.f32 %v10859_v25, %v18357_v47  ;;  %v16959_v33 = vpop.eup %10860  ;;  %v18365_v25 = vld [vmem:[#allocation112_spill] sm:$0xff] }
 0xe8c   :  { %v16965_v49 = vpop.eup %10862  ;;  %v9200_v47 = vsub.f32 %v18365_v25, %v9166_v8  ;;  %v8102_v8 = vmul.f32 1.442695, %v8088_v16  ;;  %v9205_v25 = vsub.f32 %v18371_v17, %v9186_v61 }
 0xe8d   :  { %v6004_v0 = vmul.f32 %v5989_v12, %v18359_v37  ;;  %v16971_v24 = vpop.eup %10864  ;;  %v9207_v12 = vmul.f32 1.442695, %v9199_v56 }
 0xe8e   :  { %v16977_v32 = vpop.eup %10866 }
 0xe8f   :  { %6014 = vperm.xlu0 %10696, %v6004_v0   ;;  %v16983_v53 = vpop.eup %10868  ;;  %10878 = vpow2.f32 %v9207_v12  ;;  %v9209_v0 = vmul.f32 1.442695, %v9200_v47  ;;  %v9219_v12 = vmul.f32 1.442695, %v9205_v25 }
 0xe90   :  { %v16989_v48 = vpop.eup %10870 }
 0xe91   :  { %v16995_v38 = vpop.eup %10872  ;;  %10880 = vpow2.f32 %v9209_v0 }
 0xe92   :  { %v17001_v2 = vpop.eup %10874  ;;  %10882 = vpow2.f32 %v6985_v34 }
 0xe93   :  { %6998 = vperm.xlu0 %10696, %v16959_v33   ;;  %v17007_v51 = vpop.eup %10876  ;;  %10884 = vpow2.f32 %v9211_v44 }
 0xe94   :  { %10886 = vpow2.f32 %v8100_v5  ;;  %v8128_v5 = vpop.permute.xlu1 %8127 }
 0xe95   :  { %10888 = vpow2.f32 %v8102_v8 }
 0xe96   :  { %10890 = vpow2.f32 %v8104_v28 }
 0xe97   :  { %7001 = vperm.xlu0 %10696, %v16965_v49   ;;  %10892 = vpow2.f32 %v9219_v12 }
 0xe98   :  { %v7020_v17 = vpop.permute.xlu1 %7019 }
 0xe9b   :  { %7004 = vperm.xlu0 %10696, %v16971_v24  }
 0xe9c   :  { %v17013_v60 = vpop.eup %10878 }
 0xe9e   :  { %v17019_v56 = vpop.eup %10880 }
 0xe9f   :  { %7007 = vperm.xlu0 %10696, %v16977_v32   ;;  %v17023_v47 = vpop.eup %10882 }
 0xea0   :  { %v17026_v31 = vpop.eup %10884 }
 0xea1   :  { %v17029_v29 = vpop.eup %10886 }
 0xea2   :  { %v17032_v50 = vpop.eup %10888 }
 0xea3   :  { %8115 = vperm.xlu0 %10696, %v16983_v53   ;;  %v17035_v14 = vpop.eup %10890 }
 0xea4   :  { %v17038_v0 = vpop.eup %10892 }
 0xea5   :  { %18372 = vst [vmem:[#allocation64_spill] sm:$0xff] %v17038_v0 }
 0xea7   :  { %8118 = vperm.xlu0 %10696, %v16989_v48  }
 0xeab   :  { %7010 = vperm.xlu0 %10696, %v16995_v38  }
 0xeaf   :  { %8121 = vperm.xlu0 %10696, %v17001_v2  }
 0xeb3   :  { %8124 = vperm.xlu0 %10696, %v17007_v51  }
 0xeb7   :  { %9232 = vperm.xlu0 %10696, %v17013_v60  }
 0xebb   :  { %9235 = vperm.xlu0 %10696, %v17019_v56  }
 0xebf   :  { %7016 = vperm.xlu0 %10696, %v17023_v47  }
 0xec3   :  { %9238 = vperm.xlu0 %10696, %v17026_v31  }
 0xec7   :  { %8130 = vperm.xlu0 %10696, %v17029_v29  }
 0xecb   :  { %8133 = vperm.xlu0 %10696, %v17032_v50  }
 0xecf   :  { %8136 = vperm.xlu0 %10696, %v17035_v14  }
 0xed3   :  { %9250 = vperm.xlu0 %10696, %v17038_v0  }
 0xf0a   :  { %v17041_v34 = vpop.permute.xlu0 %6014 }
 0xf0b   :  { %18373 = vst [vmem:[#allocation66_spill] sm:$0xff] %v17041_v34 }
 0xf0e   :  { %v6999_v23 = vpop.permute.xlu0 %6998 }
 0xf0f   :  { %v7024_v61 = vrot.slane %v6999_v23, %v11524_v57 }
 0xf12   :  { %v7002_v21 = vpop.permute.xlu0 %7001 }
 0xf13   :  { %v7028_v18 = vrot.slane %v7002_v21, %v11524_v57  ;;  %v7044_v21 = vrot.slane %v7014_v39, %v11524_v57 }
 0xf15   :  { %v7053_v12 = vsel %vm530_vm1, %v7028_v18, %v7024_v61 }
 0xf16   :  { %v7005_v55 = vpop.permute.xlu0 %7004 }
 0xf17   :  { %v7032_v8 = vrot.slane %v7005_v55, %v11524_v57  ;;  %v9242_v55 = vpop.permute.xlu1 %9241 }
 0xf19   :  { %v7054_v54 = vsel %vm532_vm2, %v7032_v8, %v7053_v12 }
 0xf1a   :  { %v7008_v10 = vpop.permute.xlu0 %7007 }
 0xf1b   :  { %v7036_v28 = vrot.slane %v7008_v10, %v11524_v57  ;;  %v7052_v10 = vrot.slane %v7020_v17, %v11524_v57 }
 0xf1d   :  { %v7055_v9 = vsel %vm623_vm4, %v7036_v28, %v7054_v54  ;;  %v9245_v54 = vpop.permute.xlu1 %9244 }
 0xf1e   :  { %v8116_v40 = vpop.permute.xlu0 %8115 }
 0xf1f   :  { %v8141_v17 = vrot.slane %v8116_v40, %v11524_v57 }
 0xf22   :  { %v8119_v26 = vpop.permute.xlu0 %8118 }
 0xf26   :  { %v7011_v44 = vpop.permute.xlu0 %7010 }
 0xf27   :  { %v7040_v25 = vrot.slane %v7011_v44, %v11524_v57 }
 0xf29   :  { %v7056_v34 = vsel %vm625_vm5, %v7040_v25, %v7055_v9  ;;  %v8145_v9 = vrot.slane %v8119_v26, %v11524_v57 }
 0xf2a   :  { %v8122_v58 = vpop.permute.xlu0 %8121  ;;  %v7057_v20 = vsel %vm627_vm6, %v7044_v21, %v7056_v34  ;;  %v5959_v21 = vrot.slane %v16935_v4, %v12110_v22 }
 0xf2b   :  { %v8149_v39 = vrot.slane %v8122_v58, %v11524_v57  ;;  %v8170_v12 = vsel %vm530_vm1, %v8145_v9, %v8141_v17 }
 0xf2c   :  { %10894 = vrcp.f32 %v5959_v21 }
 0xf2d   :  { %v8171_v26 = vsel %vm532_vm2, %v8149_v39, %v8170_v12 }
 0xf2e   :  { %v8125_v16 = vpop.permute.xlu0 %8124 }
 0xf2f   :  { %v8153_v34 = vrot.slane %v8125_v16, %v11524_v57 }
 0xf32   :  { %v9233_v59 = vpop.permute.xlu0 %9232 }
 0xf33   :  { %v9258_v25 = vrot.slane %v9233_v59, %v11524_v57  ;;  %v9270_v59 = vrot.slane %v9242_v55, %v11524_v57 }
 0xf36   :  { %v9236_v3 = vpop.permute.xlu0 %9235 }
 0xf37   :  { %v9262_v28 = vrot.slane %v9236_v3, %v11524_v57  ;;  %v9248_v3 = vpop.permute.xlu1 %9247 }
 0xf38   :  { %v9278_v12 = vrot.slane %v9248_v3, %v11524_v57 }
 0xf39   :  { %v9287_v58 = vsel %vm530_vm1, %v9262_v28, %v9258_v25  ;;  %v9274_v28 = vrot.slane %v9245_v54, %v11524_v57  ;;  %v5971_v25 = vrot.slane %v16935_v4, %v18314_v43 }
 0xf3a   :  { %v7017_v0 = vpop.permute.xlu0 %7016 }
 0xf3b   :  { %v7048_v23 = vrot.slane %v7017_v0, %v11524_v57  ;;  %v9254_v55 = vpop.permute.xlu1 %9253 }
 0xf3d   :  { %v7058_v44 = vsel %vm629_vm7, %v7048_v23, %v7057_v20 }
 0xf3e   :  { %v9239_v18 = vpop.permute.xlu0 %9238  ;;  %v7059_v61 = vsel %vm631_vm8, %v7052_v10, %v7058_v44  ;;  %v8172_v10 = vsel %vm623_vm4, %v8153_v34, %v8171_v26  ;;  %v8157_v44 = vrot.slane %v8128_v5, %v11524_v57 }
 0xf3f   :  { %v7061_v8 = vsel %vm1115_vm15, %v7059_v61, 0.0  ;;  %v9266_v20 = vrot.slane %v9239_v18, %v11524_v57  ;;  %v5963_v61 = vrot.slane %v16935_v4, %v18346_v27 }
 0xf40   :  { %7062 = vadd.xlane.f32.xlu0 %v7061_v8  ;;  %v8173_v9 = vsel %vm625_vm5, %v8157_v44, %v8172_v10 }
 0xf41   :  { %v9288_v40 = vsel %vm532_vm2, %v9266_v20, %v9287_v58  ;;  %10896 = vrcp.f32 %v5963_v61  ;;  %v5955_v58 = vrot.slane %v16935_v4, %v12107_v19 }
 0xf42   :  { %v8131_v0 = vpop.permute.xlu0 %8130  ;;  %v9289_v8 = vsel %vm623_vm4, %v9270_v59, %v9288_v40  ;;  %10898 = vrcp.f32 %v5971_v25  ;;  %v5967_v59 = vrot.slane %v16935_v4, %v18340_v42 }
 0xf43   :  { %v8161_v16 = vrot.slane %v8131_v0, %v11524_v57  ;;  %v9290_v20 = vsel %vm625_vm5, %v9274_v28, %v9289_v8  ;;  %10900 = vrcp.f32 %v5955_v58 }
 0xf44   :  { %v9291_v10 = vsel %vm627_vm6, %v9278_v12, %v9290_v20 }
 0xf45   :  { %v8174_v17 = vsel %vm627_vm6, %v8161_v16, %v8173_v9  ;;  %v5979_v16 = vrot.slane %v16935_v4, %v18343_v62 }
 0xf46   :  { %v8134_v23 = vpop.permute.xlu0 %8133 }
 0xf47   :  { %v8165_v18 = vrot.slane %v8134_v23, %v11524_v57  ;;  %v9286_v23 = vrot.slane %v9254_v55, %v11524_v57  ;;  %10902 = vrcp.f32 %v5979_v16 }
 0xf48   :  { %10904 = vrcp.f32 %v5967_v59 }
 0xf49   :  { %v8175_v5 = vsel %vm629_vm7, %v8165_v18, %v8174_v17  ;;  %v10895_v18 = vpop.eup %10894 }
 0xf4a   :  { %v8137_v39 = vpop.permute.xlu0 %8136  ;;  %v5993_v61 = vmul.f32 %v10895_v18, %v16857_v45 }
 0xf4b   :  { %v8169_v0 = vrot.slane %v8137_v39, %v11524_v57  ;;  %v18374_v39 = vld [vmem:[#allocation55_spill] sm:$0xff] }
 0xf4c   :  { %v6006_v9 = vmul.f32 %v5993_v61, %v18359_v37 }
 0xf4d   :  { %v8176_v34 = vsel %vm631_vm8, %v8169_v0, %v8175_v5 }
 0xf4e   :  { %v9251_v21 = vpop.permute.xlu0 %9250  ;;  %v8178_v54 = vsel %vm1115_vm15, %v8176_v34, 0.0  ;;  %v10897_v8 = vpop.eup %10896 }
 0xf4f   :  { %v9282_v26 = vrot.slane %v9251_v21, %v11524_v57  ;;  %8179 = vadd.xlane.f32.xlu1 %v8178_v54  ;;  %v5975_v57 = vrot.slane %v16935_v4, %v18341_v63  ;;  %v5995_v28 = vmul.f32 %v10897_v8, %v18374_v39  ;;  %v10899_v17 = vpop.eup %10898 }
 0xf50   :  { %v10901_v0 = vpop.eup %10900  ;;  %v5999_v55 = vmul.f32 %v10899_v17, %v16754_v41 }
 0xf51   :  { %v9292_v40 = vsel %vm629_vm7, %v9282_v26, %v9291_v10  ;;  %10906 = vrcp.f32 %v5975_v57  ;;  %v6007_v5 = vmul.f32 %v5995_v28, %v18359_v37  ;;  %v5991_v4 = vmul.f32 %v10901_v0, %v16854_v36 }
 0xf52   :  { %v9293_v3 = vsel %vm631_vm8, %v9286_v23, %v9292_v40  ;;  %v6009_v45 = vmul.f32 %v5999_v55, %v18359_v37 }
 0xf53   :  { %v9295_v44 = vsel %vm1115_vm15, %v9293_v3, 0.0  ;;  %v6005_v12 = vmul.f32 %v5991_v4, %v18359_v37 }
 0xf54   :  { %9296 = vadd.xlane.f32.xlu0 %v9295_v44  ;;  %v10903_v34 = vpop.eup %10902 }
 0xf55   :  { %v10905_v20 = vpop.eup %10904  ;;  %v6003_v25 = vmul.f32 %v10903_v34, %v16779_v46 }
 0xf56   :  { %v5997_v21 = vmul.f32 %v10905_v20, %v16860_v6 }
 0xf57   :  { %v6011_v26 = vmul.f32 %v6003_v25, %v18359_v37 }
 0xf58   :  { %v6008_v41 = vmul.f32 %v5997_v21, %v18359_v37 }
 0xf5e   :  { %v10907_v54 = vpop.eup %10906 }
 0xf5f   :  { %v6001_v58 = vmul.f32 %v10907_v54, %v16863_v1 }
 0xf60   :  { %6024 = vperm.xlu1 %10697, %v6006_v9  }
 0xf61   :  { %v6010_v36 = vmul.f32 %v6001_v58, %v18359_v37 }
 0xf64   :  { %6029 = vperm.xlu1 %10697, %v6007_v5  }
 0xf68   :  { %6039 = vperm.xlu1 %10697, %v6009_v45  }
 0xf6a   :  { %6019 = vperm.xlu0 %10696, %v6005_v12  }
 0xf6c   :  { %6049 = vperm.xlu1 %10697, %v6011_v26  }
 0xf6e   :  { %6034 = vperm.xlu0 %10696, %v6008_v41  }
 0xf72   :  { %6044 = vperm.xlu0 %10696, %v6010_v36  }
 0xfc9   :  { %v7063_v23 = vpop.xlane.xlu0 %7062 }
 0xfca   :  { %v7068_v46 = vrot.slane %v7063_v23, %v18352_v11  ;;  %v7072_v10 = vrot.slane %v7063_v23, %v12107_v19  ;;  %v7076_v6 = vrot.slane %v7063_v23, %v12110_v22  ;;  %v7080_v40 = vrot.slane %v7063_v23, %v18346_v27 }
 0xfcb   :  { %v7084_v3 = vrot.slane %v7063_v23, %v18340_v42  ;;  %v7088_v39 = vrot.slane %v7063_v23, %v18314_v43  ;;  %v7092_v25 = vrot.slane %v7063_v23, %v18341_v63  ;;  %v7096_v21 = vrot.slane %v7063_v23, %v18343_v62 }
 0xfcc   :  { %10908 = vrcp.f32 %v7068_v46 }
 0xfcd   :  { %10910 = vrcp.f32 %v7072_v10 }
 0xfce   :  { %10912 = vrcp.f32 %v7076_v6 }
 0xfcf   :  { %10914 = vrcp.f32 %v7080_v40 }
 0xfd8   :  { %v17123_v16 = vpop.xlane.xlu1 %8179 }
 0xfd9   :  { %v10909_v1 = vpop.eup %10908  ;;  %v8185_v44 = vrot.slane %v17123_v16, %v18352_v11  ;;  %v8189_v59 = vrot.slane %v17123_v16, %v12107_v19  ;;  %v8193_v61 = vrot.slane %v17123_v16, %v12110_v22  ;;  %v8197_v28 = vrot.slane %v17123_v16, %v18346_v27 }
 0xfda   :  { %v10911_v18 = vpop.eup %10910  ;;  %v7106_v9 = vmul.f32 %v10909_v1, %v16959_v33  ;;  %v8205_v46 = vrot.slane %v17123_v16, %v18314_v43 }
 0xfdb   :  { %v10913_v57 = vpop.eup %10912  ;;  %10916 = vrcp.f32 %v8185_v44  ;;  %v7108_v8 = vmul.f32 %v10911_v18, %v16965_v49 }
 0xfdc   :  { %10918 = vrcp.f32 %v8189_v59  ;;  %v7121_v5 = vmul.f32 %v7106_v9, %v18359_v37  ;;  %v10915_v55 = vpop.eup %10914  ;;  %v7110_v34 = vmul.f32 %v10913_v57, %v16971_v24  ;;  %v8201_v24 = vrot.slane %v17123_v16, %v18340_v42 }
 0xfdd   :  { %10920 = vrcp.f32 %v7084_v3  ;;  %v17137_v17 = vpop.xlane.xlu0 %9296  ;;  %v7122_v0 = vmul.f32 %v7108_v8, %v18359_v37  ;;  %v7112_v4 = vmul.f32 %v10915_v55, %v16977_v32  ;;  %v8209_v3 = vrot.slane %v17123_v16, %v18341_v63 }
 0xfde   :  { %10922 = vrcp.f32 %v8193_v61  ;;  %7131 = vperm.xlu0 %10696, %v7121_v5   ;;  %v9302_v33 = vrot.slane %v17137_v17, %v18352_v11  ;;  %v9306_v49 = vrot.slane %v17137_v17, %v12107_v19  ;;  %v7123_v20 = vmul.f32 %v7110_v34, %v18359_v37 }
 0xfdf   :  { %7136 = vperm.xlu1 %10697, %v7122_v0   ;;  %10924 = vrcp.f32 %v7088_v39  ;;  %v7124_v45 = vmul.f32 %v7112_v4, %v18359_v37  ;;  %v9310_v32 = vrot.slane %v17137_v17, %v12110_v22  ;;  %v9314_v10 = vrot.slane %v17137_v17, %v18346_v27 }
 0xfe0   :  { %10926 = vrcp.f32 %v8197_v28  ;;  %v9318_v27 = vrot.slane %v17137_v17, %v18340_v42  ;;  %v9322_v42 = vrot.slane %v17137_v17, %v18314_v43  ;;  %v9330_v43 = vrot.slane %v17137_v17, %v18343_v62 }
 0xfe1   :  { %10928 = vrcp.f32 %v9302_v33 }
 0xfe2   :  { %7141 = vperm.xlu0 %10696, %v7123_v20   ;;  %10930 = vrcp.f32 %v9306_v49 }
 0xfe3   :  { %7146 = vperm.xlu1 %10697, %v7124_v45   ;;  %10932 = vrcp.f32 %v7092_v25 }
 0xfe4   :  { %10934 = vrcp.f32 %v8201_v24 }
 0xfe5   :  { %10936 = vrcp.f32 %v7096_v21 }
 0xfe6   :  { %10938 = vrcp.f32 %v9310_v32 }
 0xfe7   :  { %10940 = vrcp.f32 %v8205_v46 }
 0xfe8   :  { %v10917_v12 = vpop.eup %10916  ;;  %10942 = vrcp.f32 %v9314_v10 }
 0xfe9   :  { %v10919_v54 = vpop.eup %10918  ;;  %v8223_v26 = vmul.f32 %v10917_v12, %v16983_v53  ;;  %10944 = vrcp.f32 %v8209_v3  ;;  %v9510_v3 = vld [vmem:[%s17806_s8 + $0x40] sm:$0xff] }
 0xfea   :  { %v10921_v41 = vpop.eup %10920  ;;  %v8225_v58 = vmul.f32 %v10919_v54, %v16989_v48  ;;  %10946 = vrcp.f32 %v9318_v27  ;;  %v9507_v27 = vld [vmem:[%s17806_s8 + $0x28] sm:$0xff] }
 0xfeb   :  { %v10923_v36 = vpop.eup %10922  ;;  %v8238_v40 = vmul.f32 %v8223_v26, %v18359_v37  ;;  %v7114_v1 = vmul.f32 %v10921_v41, %v16995_v38 }
 0xfec   :  { %v10925_v23 = vpop.eup %10924  ;;  %v8239_v6 = vmul.f32 %v8225_v58, %v18359_v37  ;;  %v8227_v48 = vmul.f32 %v10923_v36, %v17001_v2  ;;  %v8213_v2 = vrot.slane %v17123_v16, %v18343_v62  ;;  %v9326_v16 = vrot.slane %v17137_v17, %v18341_v63 }
 0xfed   :  { %v10927_v53 = vpop.eup %10926  ;;  %8248 = vperm.xlu0 %10696, %v8238_v40   ;;  %v7116_v44 = vmul.f32 %v10925_v23, %v16911_v35  ;;  %v7125_v38 = vmul.f32 %v7114_v1, %v18359_v37  ;;  %v18376_v23 = vld [vmem:[#allocation64_spill] sm:$0xff] }
 0xfee   :  { %8253 = vperm.xlu1 %10697, %v8239_v6   ;;  %v10929_v59 = vpop.eup %10928  ;;  %v8240_v18 = vmul.f32 %v8227_v48, %v18359_v37  ;;  %v8229_v57 = vmul.f32 %v10927_v53, %v17007_v51  ;;  %10948 = vrcp.f32 %v8213_v2  ;;  %v9519_v53 = vld [vmem:[%s17806_s8 + $0x88] sm:$0xff]  ;;  %v9513_v48 = vld [vmem:[%s17806_s8 + $0x58] sm:$0xff] }
 0xfef   :  { %v10931_v61 = vpop.eup %10930  ;;  %v7126_v35 = vmul.f32 %v7116_v44, %v18359_v37  ;;  %v9340_v51 = vmul.f32 %v10929_v59, %v17013_v60  ;;  %10950 = vrcp.f32 %v9322_v42  ;;  %v9504_v44 = vld [vmem:[%s17806_s8 + $0x10] sm:$0xff]  ;;  %v6025_v59 = vpop.permute.xlu1 %6024  ;;  %v18378_v2 = vld [vmem:[#allocation66_spill] sm:$0xff] }
 0xff0   :  { %v10933_v8 = vpop.eup %10932  ;;  %v8241_v9 = vmul.f32 %v8229_v57, %v18359_v37  ;;  %v9342_v39 = vmul.f32 %v10931_v61, %v17019_v56  ;;  %10952 = vrcp.f32 %v9326_v16  ;;  %v6020_v57 = vpop.permute.xlu0 %6019  ;;  %v18377_v61 = vld [vmem:[#allocation24_spill] sm:$0xff] }
 0xff1   :  { %7151 = vperm.xlu0 %10696, %v7125_v38   ;;  %v10935_v28 = vpop.eup %10934  ;;  %v7118_v0 = vmul.f32 %v10933_v8, %v17023_v47  ;;  %v9355_v56 = vmul.f32 %v9340_v51, %v18359_v37  ;;  %10954 = vrcp.f32 %v9330_v43  ;;  %v6052_v42 = vmul.f32 %v18378_v2, %v18377_v61  ;;  %v18381_v51 = vld [vmem:[#allocation48_spill] sm:$0xff] }
 0xff2   :  { %8258 = vperm.xlu1 %10697, %v8240_v18   ;;  %v10937_v5 = vpop.eup %10936  ;;  %v9356_v55 = vmul.f32 %v9342_v39, %v18359_v37  ;;  %v8231_v60 = vmul.f32 %v10935_v28, %v16915_v30 }
 0xff3   :  { %v10939_v34 = vpop.eup %10938  ;;  %v7127_v33 = vmul.f32 %v7118_v0, %v18359_v37  ;;  %v7120_v47 = vmul.f32 %v10937_v5, %v16918_v52  ;;  %v6030_v18 = vpop.permute.xlu1 %6029  ;;  %v6060_v43 = vsel %vm335_vm0, %v6052_v42, 0.0  ;;  %v18382_v5 = vld [vmem:[#allocation7_spill] sm:$0xff]  ;;  %v18388_v42 = vld [vmem:[#allocation30_spill] sm:$0xff] }
 0xff4   :  { %v10941_v63 = vpop.eup %10940  ;;  %v8242_v62 = vmul.f32 %v8231_v60, %v18359_v37  ;;  %v9344_v17 = vmul.f32 %v10939_v34, %v17026_v31  ;;  %v18383_v60 = vld [vmem:[#allocation17_spill] sm:$0xff] }
 0xff5   :  { %7156 = vperm.xlu0 %10696, %v7126_v35   ;;  %v10943_v49 = vpop.eup %10942  ;;  %v7128_v30 = vmul.f32 %v7120_v47, %v18359_v37  ;;  %v8233_v25 = vmul.f32 %v10941_v63, %v17029_v29  ;;  %v18379_v35 = vld [vmem:[#allocation27_spill] sm:$0xff] }
 0xff6   :  { %8263 = vperm.xlu1 %10697, %v8241_v9   ;;  %v10945_v4 = vpop.eup %10944  ;;  %v9357_v20 = vmul.f32 %v9344_v17, %v18359_v37  ;;  %v9346_v45 = vmul.f32 %v10943_v49, %v16921_v15  ;;  %v6054_v8 = vmul.f32 %v6025_v59, %v18379_v35  ;;  %v18380_v9 = vld [vmem:[#allocation25_spill] sm:$0xff] }
 0xff7   :  { %v10947_v24 = vpop.eup %10946  ;;  %v8243_v31 = vmul.f32 %v8233_v25, %v18359_v37  ;;  %v8235_v54 = vmul.f32 %v10945_v4, %v17032_v50  ;;  %v18375_v50 = vld [vmem:[#allocation57_spill] sm:$0xff]  ;;  %v6040_v38 = vpop.permute.xlu1 %6039  ;;  %v6055_v39 = vmul.f32 %v6030_v18, %v18380_v9 }
 0xff8   :  { %v9358_v52 = vmul.f32 %v9346_v45, %v18359_v37  ;;  %v9348_v21 = vmul.f32 %v10947_v24, %v16924_v13  ;;  %v6057_v28 = vmul.f32 %v6040_v38, %v18381_v51  ;;  %v6074_v0 = vsel %vm335_vm0, %v6054_v8, 0.0  ;;  %v18384_v24 = vld [vmem:[#allocation42_spill] sm:$0xff]  ;;  %v18389_v51 = vld [vmem:[#allocation21_spill] sm:$0xff] }
 0xff9   :  { %9365 = vperm.xlu0 %10696, %v9355_v56   ;;  %v8244_v29 = vmul.f32 %v8235_v54, %v18359_v37  ;;  %v6081_v56 = vsel %vm335_vm0, %v6055_v39, 0.0  ;;  %v6075_v47 = vrot.slane %v6074_v0, 4 }
 0xffa   :  { %9370 = vperm.xlu1 %10697, %v9356_v55   ;;  %v9359_v15 = vmul.f32 %v9348_v21, %v18359_v37  ;;  %v6053_v55 = vmul.f32 %v6020_v57, %v18382_v5  ;;  %v6095_v63 = vsel %vm335_vm0, %v6057_v28, 0.0  ;;  %v6082_v17 = vrot.slane %v6081_v56, 4 }
 0xffb   :  { %v10949_v12 = vpop.eup %10948  ;;  %v6050_v16 = vpop.permute.xlu1 %6049  ;;  %v6096_v4 = vrot.slane %v6095_v63, 4  ;;  %v6076_v45 = vadd.f32 %v6075_v47, %v6074_v0 }
 0xffc   :  { %v10951_v32 = vpop.eup %10950  ;;  %v8237_v58 = vmul.f32 %v10949_v12, %v17035_v14  ;;  %v9522_v14 = vld [vmem:[%s17806_s8 + $0xa0] sm:$0xff]  ;;  %v6059_v34 = vmul.f32 %v6050_v16, %v18383_v60  ;;  %v6067_v49 = vsel %vm335_vm0, %v6053_v55, 0.0 }
 0xffd   :  { %7161 = vperm.xlu0 %10696, %v7127_v33   ;;  %v10953_v26 = vpop.eup %10952  ;;  %v9350_v41 = vmul.f32 %v10951_v32, %v16927_v7  ;;  %v9525_v7 = vld [vmem:[%s17806_s8 + $0xb8] sm:$0xff]  ;;  %v6035_v33 = vpop.permute.xlu0 %6034  ;;  %v6068_v25 = vrot.slane %v6067_v49, 4  ;;  %v6097_v54 = vadd.f32 %v6096_v4, %v6095_v63  ;;  %v18385_v32 = vld [vmem:[#allocation23_spill] sm:$0xff] }
 0xffe   :  { %8268 = vperm.xlu1 %10697, %v8242_v62   ;;  %v10955_v36 = vpop.eup %10954  ;;  %v8245_v13 = vmul.f32 %v8237_v58, %v18359_v37  ;;  %v9352_v6 = vmul.f32 %v10953_v26, %v18376_v23  ;;  %10672 = vmatprep.subr.mxu1 %v9525_v7  ;;  %v6061_v62 = vrot.slane %v6060_v43, 4  ;;  %v6056_v12 = vmul.f32 %v6035_v33, %v18384_v24 }
 0xfff   :  { %v9360_v46 = vmul.f32 %v9350_v41, %v18359_v37  ;;  %v9354_v10 = vmul.f32 %v10955_v36, %v18375_v50  ;;  %10673 = vmatpush3.msra.mxu1 %v9525_v7  ;;  %v6069_v41 = vadd.f32 %v6068_v25, %v6067_v49 }
0x1000   :  { %v9361_v1 = vmul.f32 %v9352_v6, %v18359_v37  ;;  %10674 = vmatprep.subr.mxu1 %v9522_v14  ;;  %v6088_v58 = vsel %vm335_vm0, %v6056_v12, 0.0  ;;  %v18387_v6 = vld [vmem:[#allocation28_spill] sm:$0xff] }
0x1001   :  { %9375 = vperm.xlu0 %10696, %v9357_v20   ;;  %v9362_v40 = vmul.f32 %v9354_v10, %v18359_v37  ;;  %10675 = vmatpush3.msra.mxu1 %v9522_v14  ;;  %v9516_v37 = vld [vmem:[%s17806_s8 + $0x70] sm:$0xff]  ;;  %v6062_v20 = vadd.f32 %v6061_v62, %v6060_v43  ;;  %v18386_v10 = vld [vmem:[#allocation26_spill] sm:$0xff]  ;;  %v6089_v7 = vrot.slane %v6088_v58, 4 }
0x1002   :  { %7166 = vperm.xlu1 %10697, %v7128_v30   ;;  %10676 = vmatprep.subr.mxu1 %v9519_v53  ;;  %v6109_v30 = vsel %vm335_vm0, %v6059_v34, 0.0 }
0x1003   :  { %10677 = vmatpush3.msra.mxu1 %v9519_v53  ;;  %v6110_v21 = vrot.slane %v6109_v30, 4  ;;  %v6090_v9 = vadd.f32 %v6089_v7, %v6088_v58 }
0x1004   :  { %10678 = vmatprep.subr.mxu1 %v9516_v37 }
0x1005   :  { %8273 = vperm.xlu0 %10696, %v8243_v31   ;;  %10679 = vmatpush3.msra.mxu1 %v9516_v37  ;;  %v6083_v31 = vadd.f32 %v6082_v17, %v6081_v56  ;;  %v6111_v50 = vadd.f32 %v6110_v21, %v6109_v30  ;;  %v6091_v17 = vrot.slane %v6090_v9, 2 }
0x1006   :  { %9380 = vperm.xlu1 %10697, %v9358_v52   ;;  %10680 = vmatprep.subr.mxu1 %v9513_v48  ;;  %v6045_v52 = vpop.permute.xlu0 %6044 }
0x1007   :  { %10681 = vmatpush3.msra.mxu1 %v9513_v48  ;;  %v6058_v26 = vmul.f32 %v6045_v52, %v18385_v32  ;;  %v6112_v18 = vrot.slane %v6111_v50, 2 }
0x1008   :  { %10682 = vmatprep.subr.mxu1 %v9510_v3 }
0x1009   :  { %8278 = vperm.xlu0 %10696, %v8244_v29   ;;  %10683 = vmatpush3.msra.mxu1 %v9510_v3  ;;  %v6077_v29 = vrot.slane %v6076_v45, 2  ;;  %v6102_v14 = vsel %vm335_vm0, %v6058_v26, 0.0  ;;  %v6113_v56 = vadd.f32 %v6112_v18, %v6111_v50  ;;  %v18390_v26 = vld [vmem:[#allocation50_spill] sm:$0xff] }
0x100a   :  { %9385 = vperm.xlu1 %10697, %v9359_v15   ;;  %10684 = vmatprep.subr.mxu1 %v9507_v27  ;;  %v6063_v15 = vrot.slane %v6062_v20, 2  ;;  %v6103_v61 = vrot.slane %v6102_v14, 4 }
0x100b   :  { %10685 = vmatpush3.msra.mxu1 %v9507_v27  ;;  %v6078_v3 = vadd.f32 %v6077_v29, %v6076_v45  ;;  %v6070_v27 = vrot.slane %v6069_v41, 2  ;;  %v6114_v25 = vrot.slane %v6113_v56, 1 }
0x100c   :  { %10686 = vmatprep.subr.mxu1 %v9504_v44  ;;  %v6064_v48 = vadd.f32 %v6063_v15, %v6062_v20  ;;  %v6104_v63 = vadd.f32 %v6103_v61, %v6102_v14 }
0x100d   :  { %8283 = vperm.xlu0 %10696, %v8245_v13   ;;  %10687 = vmatpush3.msra.mxu1 %v9504_v44  ;;  %v6084_v13 = vrot.slane %v6083_v31, 2  ;;  %v6079_v43 = vrot.slane %v6078_v3, 1  ;;  %v6071_v0 = vadd.f32 %v6070_v27, %v6069_v41 }
0x100e   :  { %9390 = vperm.xlu1 %10697, %v9360_v46   ;;  %v6065_v16 = vrot.slane %v6064_v48, 1 }
0x100f   :  { %v6085_v59 = vadd.f32 %v6084_v13, %v6083_v31  ;;  %v6080_v30 = vadd.f32 %v6079_v43, %v6078_v3  ;;  %v6072_v20 = vrot.slane %v6071_v0, 1  ;;  %v6105_v31 = vrot.slane %v6104_v63, 2 }
0x1010   :  { %v6066_v4 = vadd.f32 %v6065_v16, %v6064_v48  ;;  %v6115_v13 = vadd.f32 %v6114_v25, %v6113_v56 }
0x1011   :  { %9395 = vperm.xlu0 %10696, %v9361_v1   ;;  %v6098_v1 = vrot.slane %v6097_v54, 2  ;;  %v6086_v55 = vrot.slane %v6085_v59, 1  ;;  %v17264_v29 = vmul.f32 %v6080_v30, %v18390_v26  ;;  %v6073_v41 = vadd.f32 %v6072_v20, %v6071_v0  ;;  %v18396_v20 = vld [vmem:[#allocation14_spill] sm:$0xff] }
0x1012   :  { %9400 = vperm.xlu1 %10697, %v9362_v40   ;;  %v17261_v15 = vmul.f32 %v6066_v4, %v18390_v26  ;;  %v6106_v14 = vadd.f32 %v6105_v31, %v6104_v63  ;;  %v18395_v4 = vld [vmem:[#allocation52_spill] sm:$0xff] }
0x1013   :  { %v6099_v57 = vadd.f32 %v6098_v1, %v6097_v54  ;;  %v6087_v12 = vadd.f32 %v6086_v55, %v6085_v59  ;;  %v6092_v54 = vadd.f32 %v6091_v17, %v6090_v9  ;;  %v18394_v9 = vld [vmem:[#allocation44_spill] sm:$0xff] }
0x1014   :  { %v18397_v31 = vld [vmem:[#allocation60_spill] sm:$0xff] }
0x1015   :  { %v6100_v33 = vrot.slane %v6099_v57, 1  ;;  %v17269_v1 = vmul.f32 %v6087_v12, %v18390_v26 }
0x1017   :  { %v6101_v52 = vadd.f32 %v6100_v33, %v6099_v57 }
0x1019   :  { %v17272_v7 = vmul.f32 %v6101_v52, %v18390_v26 }
0x1059   :  { %v7132_v36 = vpop.permute.xlu0 %7131 }
0x105a   :  { %v7137_v46 = vpop.permute.xlu1 %7136  ;;  %v7169_v23 = vmul.f32 %v7132_v36, %v18386_v10  ;;  %v18391_v10 = vld [vmem:[#allocation49_spill] sm:$0xff] }
0x105b   :  { %v7170_v40 = vmul.f32 %v7137_v46, %v18387_v6  ;;  %v18392_v6 = vld [vmem:[#allocation53_spill] sm:$0xff] }
0x105c   :  { %v7177_v53 = vsel %vm335_vm0, %v7169_v23, 0.0 }
0x105d   :  { %v7184_v37 = vsel %vm335_vm0, %v7170_v40, 0.0  ;;  %v7178_v44 = vrot.slane %v7177_v53, 4  ;;  %v7142_v38 = vpop.permute.xlu0 %7141 }
0x105e   :  { %v7185_v2 = vrot.slane %v7184_v37, 4  ;;  %v7171_v35 = vmul.f32 %v7142_v38, %v18388_v42  ;;  %v7147_v8 = vpop.permute.xlu1 %7146 }
0x105f   :  { %v7179_v39 = vadd.f32 %v7178_v44, %v7177_v53  ;;  %v7172_v28 = vmul.f32 %v7147_v8, %v18389_v51  ;;  %v17277_v44 = vmul.f32 %v6073_v41, %v18390_v26  ;;  %v6107_v51 = vrot.slane %v6106_v14, 1 }
0x1060   :  { %v7191_v5 = vsel %vm335_vm0, %v7171_v35, 0.0  ;;  %v7186_v62 = vadd.f32 %v7185_v2, %v7184_v37  ;;  %v6093_v37 = vrot.slane %v6092_v54, 1  ;;  %v17280_v2 = vmul.f32 %v6115_v13, %v18390_v26  ;;  %v18393_v35 = vld [vmem:[#allocation29_spill] sm:$0xff] }
0x1061   :  { %v7192_v60 = vrot.slane %v7191_v5, 4  ;;  %v7198_v34 = vsel %vm335_vm0, %v7172_v28, 0.0  ;;  %v7180_v49 = vrot.slane %v7179_v39, 2  ;;  %v6108_v25 = vadd.f32 %v6107_v51, %v6106_v14 }
0x1062   :  { %v7199_v47 = vrot.slane %v7198_v34, 4  ;;  %v7187_v21 = vrot.slane %v7186_v62, 2  ;;  %v6094_v0 = vadd.f32 %v6093_v37, %v6092_v54 }
0x1063   :  { %v7193_v45 = vadd.f32 %v7192_v60, %v7191_v5  ;;  %v7181_v32 = vadd.f32 %v7180_v49, %v7179_v39 }
0x1064   :  { %v7200_v24 = vadd.f32 %v7199_v47, %v7198_v34  ;;  %v7188_v53 = vadd.f32 %v7187_v21, %v7186_v62 }
0x1065   :  { %v7194_v58 = vrot.slane %v7193_v45, 2  ;;  %v7182_v48 = vrot.slane %v7181_v32, 1 }
0x1066   :  { %v7201_v50 = vrot.slane %v7200_v24, 2  ;;  %v7189_v28 = vrot.slane %v7188_v53, 1 }
0x1067   :  { %v7195_v59 = vadd.f32 %v7194_v58, %v7193_v45  ;;  %v7183_v5 = vadd.f32 %v7182_v48, %v7181_v32 }
0x1068   :  { %v8249_v36 = vpop.permute.xlu0 %8248  ;;  %v7202_v42 = vadd.f32 %v7201_v50, %v7200_v24  ;;  %v7190_v24 = vadd.f32 %v7189_v28, %v7188_v53  ;;  %v18399_v53 = vld [vmem:[#allocation15_spill] sm:$0xff] }
0x1069   :  { %v8254_v46 = vpop.permute.xlu1 %8253  ;;  %v8286_v23 = vmul.f32 %v8249_v36, %v18391_v10  ;;  %v7196_v60 = vrot.slane %v7195_v59, 1  ;;  %v7233_v21 = vmul.f32 %v7183_v5, %v18397_v31 }
0x106a   :  { %v8287_v40 = vmul.f32 %v8254_v46, %v18392_v6  ;;  %v7203_v17 = vrot.slane %v7202_v42, 1  ;;  %v7234_v48 = vmul.f32 %v7190_v24, %v18397_v31 }
0x106b   :  { %v8294_v3 = vsel %vm335_vm0, %v8286_v23, 0.0  ;;  %v7197_v58 = vadd.f32 %v7196_v60, %v7195_v59 }
0x106c   :  { %v8301_v27 = vsel %vm335_vm0, %v8287_v40, 0.0  ;;  %v8295_v18 = vrot.slane %v8294_v3, 4  ;;  %v7152_v57 = vpop.permute.xlu0 %7151  ;;  %v7204_v23 = vadd.f32 %v7203_v17, %v7202_v42  ;;  %v18398_v40 = vld [vmem:[#allocation46_spill] sm:$0xff]  ;;  %v17300_v42 = vmul.f32 %v6108_v25, %v18390_v26 }
0x106d   :  { %v8302_v38 = vrot.slane %v8301_v27, 4  ;;  %v8259_v61 = vpop.permute.xlu1 %8258  ;;  %v7173_v8 = vmul.f32 %v7152_v57, %v18393_v35  ;;  %v17297_v35 = vmul.f32 %v6094_v0, %v18390_v26  ;;  %v18400_v17 = vld [vmem:[#allocation18_spill] sm:$0xff] }
0x106e   :  { %v8288_v39 = vmul.f32 %v8259_v61, %v18394_v9  ;;  %v8296_v16 = vadd.f32 %v8295_v18, %v8294_v3  ;;  %v7236_v28 = vmul.f32 %v7204_v23, %v18397_v31 }
0x106f   :  { %v8303_v43 = vadd.f32 %v8302_v38, %v8301_v27  ;;  %v7205_v55 = vsel %vm335_vm0, %v7173_v8, 0.0  ;;  %v7235_v8 = vmul.f32 %v7197_v58, %v18397_v31 }
0x1070   :  { %v8308_v56 = vsel %vm335_vm0, %v8288_v39, 0.0  ;;  %v8297_v34 = vrot.slane %v8296_v16, 2  ;;  %v7206_v63 = vrot.slane %v7205_v55, 4  ;;  %v7157_v62 = vpop.permute.xlu0 %7156 }
0x1071   :  { %v8304_v33 = vrot.slane %v8303_v43, 2  ;;  %v8264_v47 = vpop.permute.xlu1 %8263  ;;  %v8309_v49 = vrot.slane %v8308_v56, 4  ;;  %v7174_v30 = vmul.f32 %v7157_v62, %v18395_v4  ;;  %v17307_v62 = vadd.f32 %v7235_v8, %v17264_v29  ;;  %v18401_v4 = vld [vmem:[#allocation16_spill] sm:$0xff] }
0x1072   :  { %v8289_v45 = vmul.f32 %v8264_v47, %v18396_v20  ;;  %v8298_v12 = vadd.f32 %v8297_v34, %v8296_v16  ;;  %v7207_v52 = vadd.f32 %v7206_v63, %v7205_v55  ;;  %v7241_v55 = vadd.f32 %v7233_v21, %v17261_v15 }
0x1073   :  { %v8310_v54 = vadd.f32 %v8309_v49, %v8308_v56  ;;  %v7212_v32 = vsel %vm335_vm0, %v7174_v30, 0.0  ;;  %v8305_v36 = vadd.f32 %v8304_v33, %v8303_v43  ;;  %v7242_v56 = vadd.f32 %v7234_v48, %v17277_v44 }
0x1074   :  { %v8315_v41 = vsel %vm335_vm0, %v8289_v45, 0.0  ;;  %v7208_v46 = vrot.slane %v7207_v52, 2  ;;  %v7213_v13 = vrot.slane %v7212_v32, 4  ;;  %v9366_v50 = vpop.permute.xlu0 %9365  ;;  %v8299_v3 = vrot.slane %v8298_v12, 1 }
0x1075   :  { %v9371_v10 = vpop.permute.xlu1 %9370  ;;  %v8316_v6 = vrot.slane %v8315_v41, 4  ;;  %v9403_v14 = vmul.f32 %v9366_v50, %v18398_v40  ;;  %v8311_v27 = vrot.slane %v8310_v54, 2  ;;  %v8306_v9 = vrot.slane %v8305_v36, 1 }
0x1076   :  { %v9404_v37 = vmul.f32 %v9371_v10, %v18399_v53  ;;  %v7214_v18 = vadd.f32 %v7213_v13, %v7212_v32  ;;  %v7209_v38 = vadd.f32 %v7208_v46, %v7207_v52  ;;  %v8300_v60 = vadd.f32 %v8299_v3, %v8298_v12  ;;  %v18402_v12 = vld [vmem:[#allocation54_spill] sm:$0xff] }
0x1077   :  { %v8317_v57 = vadd.f32 %v8316_v6, %v8315_v41  ;;  %v9411_v59 = vsel %vm335_vm0, %v9403_v14, 0.0  ;;  %v8312_v33 = vadd.f32 %v8311_v27, %v8310_v54  ;;  %v8307_v47 = vadd.f32 %v8306_v9, %v8305_v36 }
0x1078   :  { %v9418_v61 = vsel %vm335_vm0, %v9404_v37, 0.0  ;;  %v7162_v39 = vpop.permute.xlu0 %7161  ;;  %v7215_v16 = vrot.slane %v7214_v18, 2  ;;  %v9412_v43 = vrot.slane %v9411_v59, 4  ;;  %v7210_v34 = vrot.slane %v7209_v38, 1  ;;  %v18404_v37 = vld [vmem:[#allocation88_spill] sm:$0xff] }
0x1079   :  { %v8269_v51 = vpop.permute.xlu1 %8268  ;;  %v9419_v5 = vrot.slane %v9418_v61, 4  ;;  %v8318_v0 = vrot.slane %v8317_v57, 2  ;;  %v7175_v49 = vmul.f32 %v7162_v39, %v18400_v17  ;;  %v17312_v15 = vadd.f32 %v7236_v28, %v17269_v1  ;;  %v18403_v1 = vld [vmem:[#allocation86_spill] sm:$0xff]  ;;  %v18405_v28 = vld [vmem:[#allocation19_spill] sm:$0xff] }
0x107a   :  { %v9413_v26 = vadd.f32 %v9412_v43, %v9411_v59  ;;  %v8290_v30 = vmul.f32 %v8269_v51, %v18401_v4  ;;  %v7216_v44 = vadd.f32 %v7215_v16, %v7214_v18  ;;  %v8350_v52 = vmul.f32 %v8300_v60, %v18402_v12 }
0x107b   :  { %v9420_v63 = vadd.f32 %v9419_v5, %v9418_v61  ;;  %v8319_v21 = vadd.f32 %v8318_v0, %v8317_v57  ;;  %v7219_v54 = vsel %vm335_vm0, %v7175_v49, 0.0  ;;  %v7211_v32 = vadd.f32 %v7210_v34, %v7209_v38 }
0x107c   :  { %v9376_v20 = vpop.permute.xlu0 %9375  ;;  %v9414_v25 = vrot.slane %v9413_v26, 2  ;;  %v8322_v29 = vsel %vm335_vm0, %v8290_v30, 0.0  ;;  %v8313_v41 = vrot.slane %v8312_v33, 1  ;;  %v8351_v46 = vmul.f32 %v8307_v47, %v18402_v12 }
0x107d   :  { %v7167_v45 = vpop.permute.xlu1 %7166  ;;  %v9421_v24 = vrot.slane %v9420_v63, 2  ;;  %v7220_v13 = vrot.slane %v7219_v54, 4  ;;  %v8323_v50 = vrot.slane %v8322_v29, 4  ;;  %v9405_v10 = vmul.f32 %v9376_v20, %v18403_v1  ;;  %v18409_v1 = vld [vmem:[#allocation92_spill] sm:$0xff] }
0x107e   :  { %v9415_v58 = vadd.f32 %v9414_v25, %v9413_v26  ;;  %v7217_v40 = vrot.slane %v7216_v44, 1  ;;  %v7176_v48 = vmul.f32 %v7167_v45, %v18404_v37  ;;  %v8320_v3 = vrot.slane %v8319_v21, 1 }
0x107f   :  { %v9422_v36 = vadd.f32 %v9421_v24, %v9420_v63  ;;  %v7221_v27 = vadd.f32 %v7220_v13, %v7219_v54  ;;  %v8324_v18 = vadd.f32 %v8323_v50, %v8322_v29  ;;  %v9425_v38 = vsel %vm335_vm0, %v9405_v10, 0.0 }
0x1080   :  { %v8274_v23 = vpop.permute.xlu0 %8273  ;;  %v9416_v14 = vrot.slane %v9415_v58, 1  ;;  %v8358_v57 = vadd.f32 %v8350_v52, %v7241_v55  ;;  %v7237_v59 = vmul.f32 %v7211_v32, %v18397_v31  ;;  %v8314_v61 = vadd.f32 %v8313_v41, %v8312_v33  ;;  %v18406_v55 = vld [vmem:[#allocation90_spill] sm:$0xff] }
0x1081   :  { %v9381_v6 = vpop.permute.xlu1 %9380  ;;  %v9423_v53 = vrot.slane %v9422_v36, 1  ;;  %v9426_v8 = vrot.slane %v9425_v38, 4  ;;  %v7222_v39 = vrot.slane %v7221_v27, 2  ;;  %v7226_v51 = vsel %vm335_vm0, %v7176_v48, 0.0 }
0x1082   :  { %v9417_v9 = vadd.f32 %v9416_v14, %v9415_v58  ;;  %v8291_v16 = vmul.f32 %v8274_v23, %v18405_v28  ;;  %v7218_v43 = vadd.f32 %v7217_v40, %v7216_v44  ;;  %v7227_v0 = vrot.slane %v7226_v51, 4  ;;  %v18407_v44 = vld [vmem:[#allocation62_spill] sm:$0xff] }
0x1083   :  { %v9424_v5 = vadd.f32 %v9423_v53, %v9422_v36  ;;  %v9427_v60 = vadd.f32 %v9426_v8, %v9425_v38  ;;  %v8321_v26 = vadd.f32 %v8320_v3, %v8319_v21  ;;  %v8325_v63 = vrot.slane %v8324_v18, 2  ;;  %v18408_v36 = vld [vmem:[#allocation87_spill] sm:$0xff] }
0x1084   :  { %v8279_v34 = vpop.permute.xlu0 %8278  ;;  %v8329_v47 = vsel %vm335_vm0, %v8291_v16, 0.0  ;;  %v9406_v17 = vmul.f32 %v9381_v6, %v18406_v55  ;;  %v8359_v33 = vadd.f32 %v8351_v46, %v7242_v56  ;;  %v8352_v4 = vmul.f32 %v8314_v61, %v18402_v12  ;;  %v18410_v16 = vld [vmem:[#allocation89_spill] sm:$0xff] }
0x1085   :  { %v9386_v49 = vpop.permute.xlu1 %9385  ;;  %v7223_v30 = vadd.f32 %v7222_v39, %v7221_v27  ;;  %v7228_v20 = vadd.f32 %v7227_v0, %v7226_v51  ;;  %v17328_v45 = vadd.f32 %v7237_v59, %v17297_v35  ;;  %v9467_v25 = vmul.f32 %v9417_v9, %v18407_v44 }
0x1086   :  { %v8330_v24 = vrot.slane %v8329_v47, 4  ;;  %v9432_v52 = vsel %vm335_vm0, %v9406_v17, 0.0  ;;  %v7238_v21 = vmul.f32 %v7218_v43, %v18397_v31  ;;  %v9468_v54 = vmul.f32 %v9424_v5, %v18407_v44  ;;  %v18411_v5 = vld [vmem:[#allocation93_spill] sm:$0xff] }
0x1087   :  { %v9428_v29 = vrot.slane %v9427_v60, 2  ;;  %v9433_v32 = vrot.slane %v9432_v52, 4  ;;  %v8353_v56 = vmul.f32 %v8321_v26, %v18402_v12  ;;  %v8326_v41 = vadd.f32 %v8325_v63, %v8324_v18 }
0x1088   :  { %v8331_v58 = vadd.f32 %v8330_v24, %v8329_v47  ;;  %v8292_v46 = vmul.f32 %v8279_v34, %v18408_v36  ;;  %v7224_v13 = vrot.slane %v7223_v30, 1  ;;  %v7229_v35 = vrot.slane %v7228_v20, 2  ;;  %v8284_v23 = vpop.permute.xlu0 %8283 }
0x1089   :  { %v9434_v50 = vadd.f32 %v9433_v32, %v9432_v52  ;;  %v9407_v10 = vmul.f32 %v9386_v49, %v18409_v1  ;;  %v17338_v6 = vadd.f32 %v8352_v4, %v17307_v62  ;;  %v9475_v40 = vadd.f32 %v9467_v25, %v8358_v57  ;;  %v9391_v37 = vpop.permute.xlu1 %9390 }
0x108a   :  { %v8332_v14 = vrot.slane %v8331_v58, 2  ;;  %v8336_v53 = vsel %vm335_vm0, %v8292_v46, 0.0  ;;  %v9476_v48 = vadd.f32 %v9468_v54, %v8359_v33  ;;  %v9429_v3 = vadd.f32 %v9428_v29, %v9427_v60 }
0x108b   :  { %v9435_v27 = vrot.slane %v9434_v50, 2  ;;  %v8337_v18 = vrot.slane %v8336_v53, 4  ;;  %v17342_v38 = vadd.f32 %v7238_v21, %v17272_v7  ;;  %v17345_v59 = vadd.f32 %v8353_v56, %v17312_v15  ;;  %v18412_v21 = vld [vmem:[#allocation91_spill] sm:$0xff] }
0x108c   :  { %v8327_v61 = vrot.slane %v8326_v41, 1  ;;  %v9439_v8 = vsel %vm335_vm0, %v9407_v10, 0.0  ;;  %v7225_v62 = vadd.f32 %v7224_v13, %v7223_v30  ;;  %v7230_v9 = vadd.f32 %v7229_v35, %v7228_v20  ;;  %v9396_v26 = vpop.permute.xlu0 %9395 }
0x108d   :  { %v9436_v57 = vadd.f32 %v9435_v27, %v9434_v50  ;;  %v8338_v39 = vadd.f32 %v8337_v18, %v8336_v53  ;;  %v8333_v51 = vadd.f32 %v8332_v14, %v8331_v58  ;;  %v9440_v28 = vrot.slane %v9439_v8, 4  ;;  %v9401_v49 = vpop.permute.xlu1 %9400 }
0x108e   :  { %v8293_v43 = vmul.f32 %v8284_v23, %v18410_v16  ;;  %v9408_v60 = vmul.f32 %v9391_v37, %v18411_v5  ;;  %v17351_v0 = vsel %vm530_vm1, %v9476_v48, %v9475_v40  ;;  %v9430_v7 = vrot.slane %v9429_v3, 1 }
0x108f   :  { %v9437_v34 = vrot.slane %v9436_v57, 1  ;;  %v8339_v15 = vrot.slane %v8338_v39, 2  ;;  %v8328_v63 = vadd.f32 %v8327_v61, %v8326_v41  ;;  %v9441_v47 = vadd.f32 %v9440_v28, %v9439_v8  ;;  %v18413_v41 = vld [vmem:[#allocation94_spill] sm:$0xff] }
0x1090   :  { %v8343_v55 = vsel %vm335_vm0, %v8293_v43, 0.0  ;;  %v9446_v17 = vsel %vm335_vm0, %v9408_v60, 0.0  ;;  %v7239_v33 = vmul.f32 %v7225_v62, %v18397_v31  ;;  %v7231_v4 = vrot.slane %v7230_v9, 1 }
0x1091   :  { %v8340_v30 = vadd.f32 %v8339_v15, %v8338_v39  ;;  %v8344_v20 = vrot.slane %v8343_v55, 4  ;;  %v8334_v25 = vrot.slane %v8333_v51, 1  ;;  %v9442_v24 = vrot.slane %v9441_v47, 2 }
0x1092   :  { %v9447_v52 = vrot.slane %v9446_v17, 4  ;;  %v9409_v54 = vmul.f32 %v9396_v26, %v18412_v21  ;;  %v9431_v29 = vadd.f32 %v9430_v7, %v9429_v3  ;;  %v9438_v32 = vadd.f32 %v9437_v34, %v9436_v57  ;;  %v9747_v21 = vld [vmem:[%s17803_s5 + $0x18] sm:$0xf] }
0x1093   :  { %v8345_v56 = vadd.f32 %v8344_v20, %v8343_v55  ;;  %v9410_v58 = vmul.f32 %v9401_v49, %v18413_v41  ;;  %v8341_v36 = vrot.slane %v8340_v30, 1  ;;  %v9443_v46 = vadd.f32 %v9442_v24, %v9441_v47  ;;  %v9753_v41 = vld [vmem:[%s17803_s5 + $0x30] sm:$0xf] }
0x1094   :  { %v9448_v13 = vadd.f32 %v9447_v52, %v9446_v17  ;;  %v9453_v35 = vsel %vm335_vm0, %v9409_v54, 0.0  ;;  %v8354_v50 = vmul.f32 %v8328_v63, %v18402_v12  ;;  %v7232_v1 = vadd.f32 %v7231_v4, %v7230_v9 }
0x1095   :  { %v8346_v10 = vrot.slane %v8345_v56, 2  ;;  %v9454_v23 = vrot.slane %v9453_v35, 4  ;;  %v8335_v40 = vadd.f32 %v8334_v25, %v8333_v51  ;;  %v9444_v14 = vrot.slane %v9443_v46, 1 }
0x1096   :  { %v9449_v53 = vrot.slane %v9448_v13, 2  ;;  %v9460_v37 = vsel %vm335_vm0, %v9410_v58, 0.0  ;;  %v9469_v48 = vmul.f32 %v9431_v29, %v18407_v44  ;;  %v9470_v61 = vmul.f32 %v9438_v32, %v18407_v44  ;;  %v9756_v58 = vld [vmem:[%s17803_s5 + $0x3c] sm:$0xf] }
0x1097   :  { %v8347_v3 = vadd.f32 %v8346_v10, %v8345_v56  ;;  %v9455_v27 = vadd.f32 %v9454_v23, %v9453_v35  ;;  %v9461_v18 = vrot.slane %v9460_v37, 4  ;;  %v8342_v8 = vadd.f32 %v8341_v36, %v8340_v30  ;;  %v9750_v56 = vld [vmem:[%s17803_s5 + $0x24] sm:$0xf] }
0x1098   :  { %v9445_v62 = vadd.f32 %v9444_v14, %v9443_v46  ;;  %v9450_v57 = vadd.f32 %v9449_v53, %v9448_v13  ;;  %v8362_v39 = vadd.f32 %v8354_v50, %v17328_v45  ;;  %v7240_v51 = vmul.f32 %v7232_v1, %v18397_v31  ;;  %v9741_v31 = vld [vmem:[%s17803_s5] sm:$0xf] }
0x1099   :  { %v8348_v9 = vrot.slane %v8347_v3, 1  ;;  %v9456_v28 = vrot.slane %v9455_v27, 2  ;;  %v9462_v16 = vadd.f32 %v9461_v18, %v9460_v37  ;;  %v8355_v43 = vmul.f32 %v8335_v40, %v18402_v12  ;;  %v9759_v40 = vld [vmem:[%s17803_s5 + $0x48] sm:$0xf] }
0x109a   :  { %v9471_v5 = vmul.f32 %v9445_v62, %v18407_v44  ;;  %v9451_v60 = vrot.slane %v9450_v57, 1  ;;  %v9477_v7 = vadd.f32 %v9469_v48, %v17338_v6  ;;  %v9478_v63 = vadd.f32 %v9470_v61, %v17345_v59 }
0x109b   :  { %v8349_v34 = vadd.f32 %v8348_v9, %v8347_v3  ;;  %v9457_v15 = vadd.f32 %v9456_v28, %v9455_v27  ;;  %v9463_v26 = vrot.slane %v9462_v16, 2  ;;  %v8356_v47 = vmul.f32 %v8342_v8, %v18402_v12 }
0x109c   :  { %v9479_v45 = vadd.f32 %v9471_v5, %v8362_v39  ;;  %v9452_v55 = vadd.f32 %v9451_v60, %v9450_v57  ;;  %vm9789_vm0 = vcmask 257024   ;;  %v7247_v6 = vadd.f32 %v7239_v33, %v17300_v42 }
0x109d   :  { %v8357_v17 = vmul.f32 %v8349_v34, %v18402_v12  ;;  %v9458_v49 = vrot.slane %v9457_v15, 1  ;;  %v9464_v4 = vadd.f32 %v9463_v26, %v9462_v16  ;;  %v7248_v30 = vadd.f32 %v7240_v51, %v17280_v2  ;;  %v9744_v12 = vld [vmem:[%s17803_s5 + $0xc] sm:$0xf] }
0x109e   :  { %v8363_v20 = vadd.f32 %v8355_v43, %v17342_v38  ;;  %v9472_v59 = vmul.f32 %v9452_v55, %v18407_v44  ;;  %v9492_v52 = vsel %vm532_vm2, %v9477_v7, %v17351_v0  ;;  %v9790_v42 = vsel %vm9789_vm0, %v9741_v31, 0.0 }
0x109f   :  { %v9459_v25 = vadd.f32 %v9458_v49, %v9457_v15  ;;  %v9465_v24 = vrot.slane %v9464_v4, 1  ;;  %v8364_v2 = vadd.f32 %v8356_v47, %v7247_v6  ;;  %v9493_v38 = vsel %vm623_vm4, %v9478_v63, %v9492_v52 }
0x10a0   :  { %v9480_v33 = vadd.f32 %v9472_v59, %v8363_v20  ;;  %v8365_v32 = vadd.f32 %v8357_v17, %v7248_v30  ;;  %v9494_v0 = vsel %vm625_vm5, %v9479_v45, %v9493_v38  ;;  %v9791_v46 = vrot.slane %v9790_v42, 4  ;;  %v10638_v17 = vld [vmem:[%s17804_s6 + $0x60] sm:$0xf]  ;;  %v10641_v20 = vld [vmem:[%s17804_s6 + $0x6c] sm:$0xf] }
0x10a1   :  { %v9473_v54 = vmul.f32 %v9459_v25, %v18407_v44  ;;  %v9466_v29 = vadd.f32 %v9465_v24, %v9464_v4  ;;  %v9797_v13 = vsel %vm9789_vm0, %v9744_v12, 0.0  ;;  %v9804_v35 = vsel %vm9789_vm0, %v9747_v21, 0.0  ;;  %v10644_v12 = vld [vmem:[%s17804_s6 + $0x78] sm:$0xf]  ;;  %v10647_v38 = vld [vmem:[%s17804_s6 + $0x84] sm:$0xf] }
0x10a2   :  { %v9495_v36 = vsel %vm627_vm6, %v9480_v33, %v9494_v0  ;;  %v9798_v10 = vrot.slane %v9797_v13, 4  ;;  %v9805_v23 = vrot.slane %v9804_v35, 4  ;;  %v9792_v14 = vadd.f32 %v9791_v46, %v9790_v42 }
0x10a3   :  { %v9474_v50 = vmul.f32 %v9466_v29, %v18407_v44  ;;  %v9481_v1 = vadd.f32 %v9473_v54, %v8364_v2  ;;  %v9811_v53 = vsel %vm9789_vm0, %v9750_v56, 0.0  ;;  %v9818_v37 = vsel %vm9789_vm0, %v9753_v41, 0.0  ;;  %v9762_v44 = vld [vmem:[%s17803_s5 + $0x54] sm:$0xf]  ;;  %v10650_v56 = vld [vmem:[%s17804_s6 + $0x90] sm:$0xf] }
0x10a4   :  { %v9825_v48 = vsel %vm9789_vm0, %v9756_v58, 0.0  ;;  %v9799_v18 = vadd.f32 %v9798_v10, %v9797_v13  ;;  %v9806_v61 = vadd.f32 %v9805_v23, %v9804_v35  ;;  %v9793_v8 = vrot.slane %v9792_v14, 2  ;;  %v10653_v10 = vld [vmem:[%s17804_s6 + $0x9c] sm:$0xf] }
0x10a5   :  { %v9482_v3 = vadd.f32 %v9474_v50, %v8365_v32  ;;  %v9496_v27 = vsel %vm629_vm7, %v9481_v1, %v9495_v36  ;;  %v9812_v62 = vrot.slane %v9811_v53, 4  ;;  %v9819_v57 = vrot.slane %v9818_v37, 4 }
0x10a6   :  { %v9826_v39 = vrot.slane %v9825_v48, 4  ;;  %v9800_v28 = vrot.slane %v9799_v18, 2  ;;  %v9807_v16 = vrot.slane %v9806_v61, 2  ;;  %v9832_v51 = vsel %vm9789_vm0, %v9759_v40, 0.0 }
0x10a7   :  { %v9497_v9 = vsel %vm631_vm8, %v9482_v3, %v9496_v27  ;;  %v9794_v43 = vadd.f32 %v9793_v8, %v9792_v14  ;;  %v9813_v5 = vadd.f32 %v9812_v62, %v9811_v53  ;;  %v9820_v60 = vadd.f32 %v9819_v57, %v9818_v37 }
0x10a8   :  { %9498 = vrot.lane.b32.xlu0 %v9497_v9, %s11192_s22  ;;  %v9827_v7 = vadd.f32 %v9826_v39, %v9825_v48  ;;  %v9801_v34 = vadd.f32 %v9800_v28, %v9799_v18  ;;  %v9808_v15 = vadd.f32 %v9807_v16, %v9806_v61  ;;  %v9833_v26 = vrot.slane %v9832_v51, 4  ;;  %v10656_v18 = vld [vmem:[%s17804_s6 + $0xa8] sm:$0xf]  ;;  %v10659_v16 = vld [vmem:[%s17804_s6 + $0xb4] sm:$0xf] }
0x10a9   :  { %v9839_v63 = vsel %vm9789_vm0, %v9762_v44, 0.0  ;;  %v9795_v47 = vrot.slane %v9794_v43, 1  ;;  %v9814_v45 = vrot.slane %v9813_v5, 2  ;;  %v9821_v55 = vrot.slane %v9820_v60, 2 }
0x10aa   :  { %v9828_v31 = vrot.slane %v9827_v7, 2  ;;  %v9802_v49 = vrot.slane %v9801_v34, 1  ;;  %v9809_v4 = vrot.slane %v9808_v15, 1  ;;  %v9834_v6 = vadd.f32 %v9833_v26, %v9832_v51 }
0x10ab   :  { %v9840_v30 = vrot.slane %v9839_v63, 4  ;;  %v17423_v59 = vadd.f32 %v9795_v47, %v9794_v43  ;;  %v9815_v25 = vadd.f32 %v9814_v45, %v9813_v5  ;;  %v9822_v24 = vadd.f32 %v9821_v55, %v9820_v60 }
0x10ac   :  { %v9829_v52 = vadd.f32 %v9828_v31, %v9827_v7  ;;  %v17428_v21 = vadd.f32 %v9802_v49, %v9801_v34  ;;  %v17430_v42 = vadd.f32 %v9809_v4, %v9808_v15  ;;  %v9835_v2 = vrot.slane %v9834_v6, 2 }
0x10ad   :  { %v9841_v33 = vadd.f32 %v9840_v30, %v9839_v63  ;;  %v9816_v54 = vrot.slane %v9815_v25, 1  ;;  %v9823_v29 = vrot.slane %v9822_v24, 1  ;;  %v9846_v0 = vsel %vm9789_vm0, %v10638_v17, 0.0 }
0x10ae   :  { %v9830_v32 = vrot.slane %v9829_v52, 1  ;;  %v9836_v41 = vadd.f32 %v9835_v2, %v9834_v6  ;;  %v9847_v36 = vrot.slane %v9846_v0, 4  ;;  %v9853_v46 = vsel %vm9789_vm0, %v10641_v20, 0.0 }
0x10af   :  { %v9842_v58 = vrot.slane %v9841_v33, 2  ;;  %v17440_v13 = vadd.f32 %v9816_v54, %v9815_v25  ;;  %v17442_v35 = vadd.f32 %v9823_v29, %v9822_v24  ;;  %v9854_v1 = vrot.slane %v9853_v46, 4 }
0x10b0   :  { %v17444_v50 = vadd.f32 %v9830_v32, %v9829_v52  ;;  %v9837_v23 = vrot.slane %v9836_v41, 1  ;;  %v9848_v14 = vadd.f32 %v9847_v36, %v9846_v0  ;;  %v9860_v53 = vsel %vm9789_vm0, %v10644_v12, 0.0 }
0x10b1   :  { %v9843_v40 = vadd.f32 %v9842_v58, %v9841_v33  ;;  %v9855_v37 = vadd.f32 %v9854_v1, %v9853_v46  ;;  %v9861_v48 = vrot.slane %v9860_v53, 4  ;;  %v9867_v3 = vsel %vm9789_vm0, %v10647_v38, 0.0 }
0x10b2   :  { %v9874_v27 = vsel %vm9789_vm0, %v10650_v56, 0.0  ;;  %v17455_v61 = vadd.f32 %v9837_v23, %v9836_v41  ;;  %v9849_v8 = vrot.slane %v9848_v14, 2  ;;  %v9868_v62 = vrot.slane %v9867_v3, 4 }
0x10b3   :  { %v9844_v44 = vrot.slane %v9843_v40, 1  ;;  %v9856_v57 = vrot.slane %v9855_v37, 2  ;;  %v9862_v39 = vadd.f32 %v9861_v48, %v9860_v53  ;;  %v9875_v9 = vrot.slane %v9874_v27, 4 }
0x10b4   :  { %v9881_v28 = vsel %vm9789_vm0, %v10653_v10, 0.0  ;;  %v9850_v43 = vadd.f32 %v9849_v8, %v9848_v14  ;;  %v9869_v5 = vadd.f32 %v9868_v62, %v9867_v3  ;;  %v9888_v26 = vsel %vm9789_vm0, %v10656_v18, 0.0 }
0x10b5   :  { %v17461_v51 = vadd.f32 %v9844_v44, %v9843_v40  ;;  %v9882_v60 = vrot.slane %v9881_v28, 4  ;;  %v9857_v7 = vadd.f32 %v9856_v57, %v9855_v37  ;;  %v9863_v34 = vrot.slane %v9862_v39, 2 }
0x10b6   :  { %v9876_v15 = vadd.f32 %v9875_v9, %v9874_v27  ;;  %v9851_v63 = vrot.slane %v9850_v43, 1  ;;  %v9870_v47 = vrot.slane %v9869_v5, 2  ;;  %v9889_v55 = vrot.slane %v9888_v26, 4 }
0x10b7   :  { %v9883_v45 = vadd.f32 %v9882_v60, %v9881_v28  ;;  %v9858_v31 = vrot.slane %v9857_v7, 1  ;;  %v9864_v17 = vadd.f32 %v9863_v34, %v9862_v39  ;;  %v9895_v4 = vsel %vm9789_vm0, %v10659_v16, 0.0 }
0x10b8   :  { %v9877_v49 = vrot.slane %v9876_v15, 2  ;;  %v9852_v6 = vadd.f32 %v9851_v63, %v9850_v43  ;;  %v9871_v30 = vadd.f32 %v9870_v47, %v9869_v5  ;;  %v9890_v25 = vadd.f32 %v9889_v55, %v9888_v26  ;;  %v9742_v47 = vld [vmem:[%s17803_s5 + $0x4] sm:$0xf] }
0x10b9   :  { %v9884_v20 = vrot.slane %v9883_v45, 2  ;;  %v9859_v24 = vadd.f32 %v9858_v31, %v9857_v7  ;;  %v9865_v52 = vrot.slane %v9864_v17, 1  ;;  %v9896_v2 = vrot.slane %v9895_v4, 4 }
0x10ba   :  { %v9878_v12 = vadd.f32 %v9877_v49, %v9876_v15  ;;  %v9872_v33 = vrot.slane %v9871_v30, 1  ;;  %v9891_v54 = vrot.slane %v9890_v25, 2  ;;  %v9902_v29 = vmul.f32 %v9852_v6, %v17423_v59 }
0x10bb   :  { %v9885_v38 = vadd.f32 %v9884_v20, %v9883_v45  ;;  %v9866_v32 = vadd.f32 %v9865_v52, %v9864_v17  ;;  %v9897_v56 = vadd.f32 %v9896_v2, %v9895_v4  ;;  %v9903_v41 = vmul.f32 %v9859_v24, %v17428_v21  ;;  %v9748_v20 = vld [vmem:[%s17803_s5 + $0x1c] sm:$0xf] }
0x10bc   :  { %v9879_v0 = vrot.slane %v9878_v12, 1  ;;  %v9873_v58 = vadd.f32 %v9872_v33, %v9871_v30  ;;  %v9892_v46 = vadd.f32 %v9891_v54, %v9890_v25  ;;  %v9929_v1 = vmul.f32 %v17423_v59, %v17423_v59  ;;  %v9745_v30 = vld [vmem:[%s17803_s5 + $0x10] sm:$0xf]  ;;  %v9754_v54 = vld [vmem:[%s17803_s5 + $0x34] sm:$0xf] }
0x10bd   :  { %v9886_v36 = vrot.slane %v9885_v38, 1  ;;  %v9898_v23 = vrot.slane %v9897_v56, 2  ;;  %v9904_v40 = vmul.f32 %v9866_v32, %v17430_v42  ;;  %v9918_v14 = vsel %vm530_vm1, %v9903_v41, %v9902_v29 }
0x10be   :  { %v9880_v10 = vadd.f32 %v9879_v0, %v9878_v12  ;;  %v9893_v37 = vrot.slane %v9892_v46, 1  ;;  %v9905_v48 = vmul.f32 %v9873_v58, %v17440_v13  ;;  %v9930_v3 = vmul.f32 %v17428_v21, %v17428_v21 }
0x10bf   :  { %v9887_v53 = vadd.f32 %v9886_v36, %v9885_v38  ;;  %v9899_v27 = vadd.f32 %v9898_v23, %v9897_v56  ;;  %v9919_v44 = vsel %vm532_vm2, %v9904_v40, %v9918_v14  ;;  %v9931_v59 = vmul.f32 %v17430_v42, %v17430_v42  ;;  %v9751_v38 = vld [vmem:[%s17803_s5 + $0x28] sm:$0xf] }
0x10c0   :  { %v9906_v18 = vmul.f32 %v9880_v10, %v17442_v35  ;;  %v9894_v8 = vadd.f32 %v9893_v37, %v9892_v46  ;;  %v9920_v57 = vsel %vm623_vm4, %v9905_v48, %v9919_v44  ;;  %v9932_v39 = vmul.f32 %v17440_v13, %v17440_v13  ;;  %v9757_v46 = vld [vmem:[%s17803_s5 + $0x40] sm:$0xf]  ;;  %v9760_v48 = vld [vmem:[%s17803_s5 + $0x4c] sm:$0xf] }
0x10c1   :  { %v9907_v62 = vmul.f32 %v9887_v53, %v17444_v50  ;;  %v9900_v9 = vrot.slane %v9899_v27, 1  ;;  %v9933_v21 = vmul.f32 %v17442_v35, %v17442_v35  ;;  %v9934_v16 = vmul.f32 %v17444_v50, %v17444_v50 }
0x10c2   :  { %v9921_v28 = vsel %vm625_vm5, %v9906_v18, %v9920_v57  ;;  %v9908_v43 = vmul.f32 %v9894_v8, %v17455_v61  ;;  %v9935_v5 = vmul.f32 %v17455_v61, %v17455_v61  ;;  %v9936_v60 = vmul.f32 %v17461_v51, %v17461_v51 }
0x10c3   :  { %v9922_v42 = vsel %vm627_vm6, %v9907_v62, %v9921_v28  ;;  %v9901_v13 = vadd.f32 %v9900_v9, %v9899_v27  ;;  %v9945_v7 = vsel %vm530_vm1, %v9930_v3, %v9929_v1  ;;  %v9963_v34 = vmul.f32 %v9852_v6, %v9852_v6  ;;  %v9763_v3 = vld [vmem:[%s17803_s5 + $0x58] sm:$0xf] }
0x10c4   :  { %v9964_v15 = vmul.f32 %v9859_v24, %v9859_v24  ;;  %v9923_v35 = vsel %vm629_vm7, %v9908_v43, %v9922_v42  ;;  %v9946_v26 = vsel %vm532_vm2, %v9931_v59, %v9945_v7  ;;  %v9965_v50 = vmul.f32 %v9866_v32, %v9866_v32 }
0x10c5   :  { %v9966_v63 = vmul.f32 %v9873_v58, %v9873_v58  ;;  %v9909_v61 = vmul.f32 %v9901_v13, %v17461_v51  ;;  %v9947_v45 = vsel %vm623_vm4, %v9932_v39, %v9946_v26  ;;  %v9967_v55 = vmul.f32 %v9880_v10, %v9880_v10 }
0x10c6   :  { %v9968_v31 = vmul.f32 %v9887_v53, %v9887_v53  ;;  %v9948_v17 = vsel %vm625_vm5, %v9933_v21, %v9947_v45  ;;  %v9969_v49 = vmul.f32 %v9894_v8, %v9894_v8  ;;  %v9970_v4 = vmul.f32 %v9901_v13, %v9901_v13 }
0x10c7   :  { %v9979_v6 = vsel %vm530_vm1, %v9964_v15, %v9963_v34  ;;  %v9924_v51 = vsel %vm631_vm8, %v9909_v61, %v9923_v35  ;;  %v9949_v25 = vsel %vm627_vm6, %v9934_v16, %v9948_v17  ;;  %v10001_v52 = vsel %vm9789_vm0, %v9742_v47, 0.0  ;;  %v10639_v15 = vld [vmem:[%s17804_s6 + $0x64] sm:$0xf] }
0x10c8   :  { %v9980_v24 = vsel %vm532_vm2, %v9965_v50, %v9979_v6  ;;  %v9926_v12 = vsel %vm4826_vm3, %v9924_v51, 0.0  ;;  %v9950_v2 = vsel %vm629_vm7, %v9935_v5, %v9949_v25  ;;  %v10002_v29 = vrot.slane %v10001_v52, 4 }
0x10c9   :  { %v9981_v33 = vsel %vm623_vm4, %v9966_v63, %v9980_v24  ;;  %9927 = vadd.xlane.f32.xlu1 %v9926_v12  ;;  %v9951_v32 = vsel %vm631_vm8, %v9936_v60, %v9950_v2  ;;  %v10008_v56 = vsel %vm9789_vm0, %v9745_v30, 0.0  ;;  %v10015_v41 = vsel %vm9789_vm0, %v9748_v20, 0.0  ;;  %v10645_v30 = vld [vmem:[%s17804_s6 + $0x7c] sm:$0xf] }
0x10ca   :  { %v9982_v0 = vsel %vm625_vm5, %v9967_v55, %v9981_v33  ;;  %v9953_v58 = vsel %vm4826_vm3, %v9951_v32, 0.0  ;;  %v10003_v1 = vadd.f32 %v10002_v29, %v10001_v52  ;;  %v10009_v10 = vrot.slane %v10008_v56, 4  ;;  %v10648_v52 = vld [vmem:[%s17804_s6 + $0x88] sm:$0xf] }
0x10cb   :  { %v9983_v36 = vsel %vm627_vm6, %v9968_v31, %v9982_v0  ;;  %9954 = vadd.xlane.f32.xlu0 %v9953_v58  ;;  %v10016_v40 = vrot.slane %v10015_v41, 4  ;;  %v10022_v14 = vsel %vm9789_vm0, %v9751_v38, 0.0  ;;  %v10029_v53 = vsel %vm9789_vm0, %v9754_v54, 0.0  ;;  %v10642_v31 = vld [vmem:[%s17804_s6 + $0x70] sm:$0xf] }
0x10cc   :  { %v9984_v23 = vsel %vm629_vm7, %v9969_v49, %v9983_v36  ;;  %v10004_v27 = vrot.slane %v10003_v1, 2  ;;  %v10010_v18 = vadd.f32 %v10009_v10, %v10008_v56  ;;  %v10023_v44 = vrot.slane %v10022_v14, 4  ;;  %v10651_v56 = vld [vmem:[%s17804_s6 + $0x94] sm:$0xf] }
0x10cd   :  { %v9985_v37 = vsel %vm631_vm8, %v9970_v4, %v9984_v23  ;;  %v10017_v8 = vadd.f32 %v10016_v40, %v10015_v41  ;;  %v10030_v62 = vrot.slane %v10029_v53, 4  ;;  %v10036_v57 = vsel %vm9789_vm0, %v9757_v46, 0.0  ;;  %v10654_v41 = vld [vmem:[%s17804_s6 + $0xa0] sm:$0xf] }
0x10ce   :  { %v9987_v59 = vsel %vm4826_vm3, %v9985_v37, 0.0  ;;  %v10005_v39 = vadd.f32 %v10004_v27, %v10003_v1  ;;  %v10011_v9 = vrot.slane %v10010_v18, 2  ;;  %v10024_v28 = vadd.f32 %v10023_v44, %v10022_v14 }
0x10cf   :  { %9988 = vadd.xlane.f32.xlu1 %v9987_v59  ;;  %v10037_v21 = vrot.slane %v10036_v57, 4  ;;  %v10018_v16 = vrot.slane %v10017_v8, 2  ;;  %v10031_v43 = vadd.f32 %v10030_v62, %v10029_v53  ;;  %v10043_v42 = vsel %vm9789_vm0, %v9760_v48, 0.0  ;;  %v10657_v53 = vld [vmem:[%s17804_s6 + $0xac] sm:$0xf] }
0x10d0   :  { %v10050_v5 = vsel %vm9789_vm0, %v9763_v3, 0.0  ;;  %v10006_v60 = vrot.slane %v10005_v39, 1  ;;  %v10012_v13 = vadd.f32 %v10011_v9, %v10010_v18  ;;  %v10025_v7 = vrot.slane %v10024_v28, 2  ;;  %v10660_v18 = vld [vmem:[%s17804_s6 + $0xb8] sm:$0xf] }
0x10d1   :  { %v10038_v34 = vadd.f32 %v10037_v21, %v10036_v57  ;;  %v10019_v35 = vadd.f32 %v10018_v16, %v10017_v8  ;;  %v10032_v26 = vrot.slane %v10031_v43, 2  ;;  %v10044_v50 = vrot.slane %v10043_v42, 4 }
0x10d2   :  { %v10051_v63 = vrot.slane %v10050_v5, 4  ;;  %v17548_v47 = vadd.f32 %v10006_v60, %v10005_v39  ;;  %v10013_v61 = vrot.slane %v10012_v13, 1  ;;  %v10026_v45 = vadd.f32 %v10025_v7, %v10024_v28 }
0x10d3   :  { %v10039_v55 = vrot.slane %v10038_v34, 2  ;;  %v10020_v17 = vrot.slane %v10019_v35, 1  ;;  %v10033_v49 = vadd.f32 %v10032_v26, %v10031_v43  ;;  %v10045_v4 = vadd.f32 %v10044_v50, %v10043_v42 }
0x10d4   :  { %v10052_v6 = vadd.f32 %v10051_v63, %v10050_v5  ;;  %v17556_v20 = vadd.f32 %v10013_v61, %v10012_v13  ;;  %v10027_v51 = vrot.slane %v10026_v45, 1  ;;  %v10057_v24 = vsel %vm9789_vm0, %v10639_v15, 0.0 }
0x10d5   :  { %v10040_v25 = vadd.f32 %v10039_v55, %v10038_v34  ;;  %v17562_v12 = vadd.f32 %v10020_v17, %v10019_v35  ;;  %v10034_v2 = vrot.slane %v10033_v49, 1  ;;  %v10046_v33 = vrot.slane %v10045_v4, 2 }
0x10d6   :  { %v10053_v38 = vrot.slane %v10052_v6, 2  ;;  %v17564_v54 = vadd.f32 %v10027_v51, %v10026_v45  ;;  %v10058_v32 = vrot.slane %v10057_v24, 4  ;;  %v10064_v0 = vsel %vm9789_vm0, %v10642_v31, 0.0 }
0x10d7   :  { %v10041_v29 = vrot.slane %v10040_v25, 1  ;;  %v17573_v58 = vadd.f32 %v10034_v2, %v10033_v49  ;;  %v10047_v36 = vadd.f32 %v10046_v33, %v10045_v4  ;;  %v10065_v1 = vrot.slane %v10064_v0, 4 }
0x10d8   :  { %v10054_v46 = vadd.f32 %v10053_v38, %v10052_v6  ;;  %v10059_v23 = vadd.f32 %v10058_v32, %v10057_v24  ;;  %v10071_v40 = vsel %vm9789_vm0, %v10645_v30, 0.0  ;;  %v10078_v14 = vsel %vm9789_vm0, %v10648_v52, 0.0 }
0x10d9   :  { %v17575_v10 = vadd.f32 %v10041_v29, %v10040_v25  ;;  %v10048_v37 = vrot.slane %v10047_v36, 1  ;;  %v10066_v3 = vadd.f32 %v10065_v1, %v10064_v0  ;;  %v10072_v27 = vrot.slane %v10071_v40, 4 }
0x10da   :  { %v10055_v48 = vrot.slane %v10054_v46, 1  ;;  %v10060_v44 = vrot.slane %v10059_v23, 2  ;;  %v10079_v59 = vrot.slane %v10078_v14, 4  ;;  %v10085_v8 = vsel %vm9789_vm0, %v10651_v56, 0.0 }
0x10db   :  { %v10092_v62 = vsel %vm9789_vm0, %v10654_v41, 0.0  ;;  %v17587_v57 = vadd.f32 %v10048_v37, %v10047_v36  ;;  %v10067_v9 = vrot.slane %v10066_v3, 2  ;;  %v10073_v28 = vadd.f32 %v10072_v27, %v10071_v40 }
0x10dc   :  { %v17589_v39 = vadd.f32 %v10055_v48, %v10054_v46  ;;  %v10061_v21 = vadd.f32 %v10060_v44, %v10059_v23  ;;  %v10080_v16 = vadd.f32 %v10079_v59, %v10078_v14  ;;  %v10086_v43 = vrot.slane %v10085_v8, 4 }
0x10dd   :  { %v10093_v42 = vrot.slane %v10092_v62, 4  ;;  %v10068_v5 = vadd.f32 %v10067_v9, %v10066_v3  ;;  %v10074_v60 = vrot.slane %v10073_v28, 2  ;;  %v10099_v13 = vsel %vm9789_vm0, %v10657_v53, 0.0 }
0x10de   :  { %v10106_v7 = vsel %vm9789_vm0, %v10660_v18, 0.0  ;;  %v10062_v34 = vrot.slane %v10061_v21, 1  ;;  %v10081_v15 = vrot.slane %v10080_v16, 2  ;;  %v10087_v35 = vadd.f32 %v10086_v43, %v10085_v8 }
0x10df   :  { %v10094_v26 = vadd.f32 %v10093_v42, %v10092_v62  ;;  %v10069_v50 = vrot.slane %v10068_v5, 1  ;;  %v10075_v63 = vadd.f32 %v10074_v60, %v10073_v28  ;;  %v10100_v61 = vrot.slane %v10099_v13, 4 }
0x10e0   :  { %v10107_v45 = vrot.slane %v10106_v7, 4  ;;  %v10063_v55 = vadd.f32 %v10062_v34, %v10061_v21  ;;  %v10082_v31 = vadd.f32 %v10081_v15, %v10080_v16  ;;  %v10088_v17 = vrot.slane %v10087_v35, 2 }
0x10e1   :  { %v10095_v49 = vrot.slane %v10094_v26, 2  ;;  %v10070_v4 = vadd.f32 %v10069_v50, %v10068_v5  ;;  %v10076_v6 = vrot.slane %v10075_v63, 1  ;;  %v10101_v30 = vadd.f32 %v10100_v61, %v10099_v13 }
0x10e2   :  { %v10108_v51 = vadd.f32 %v10107_v45, %v10106_v7  ;;  %v10083_v25 = vrot.slane %v10082_v31, 1  ;;  %v10089_v24 = vadd.f32 %v10088_v17, %v10087_v35  ;;  %v10113_v2 = vmul.f32 %v10063_v55, %v17548_v47 }
0x10e3   :  { %v10096_v52 = vadd.f32 %v10095_v49, %v10094_v26  ;;  %v10077_v33 = vadd.f32 %v10076_v6, %v10075_v63  ;;  %v10102_v38 = vrot.slane %v10101_v30, 2  ;;  %v10114_v32 = vmul.f32 %v10070_v4, %v17556_v20 }
0x10e4   :  { %v10109_v29 = vrot.slane %v10108_v51, 2  ;;  %v10084_v0 = vadd.f32 %v10083_v25, %v10082_v31  ;;  %v10090_v56 = vrot.slane %v10089_v24, 1  ;;  %v10140_v36 = vmul.f32 %v17548_v47, %v17548_v47 }
0x10e5   :  { %v10097_v41 = vrot.slane %v10096_v52, 1  ;;  %v10103_v46 = vadd.f32 %v10102_v38, %v10101_v30  ;;  %v10115_v23 = vmul.f32 %v10077_v33, %v17562_v12  ;;  %v10129_v40 = vsel %vm530_vm1, %v10114_v32, %v10113_v2  ;;  %v11173_v38 = vld [vmem:[%s17800_s2 + $0x8] sm:$0xff] }
0x10e6   :  { %v10110_v1 = vadd.f32 %v10109_v29, %v10108_v51  ;;  %v10091_v14 = vadd.f32 %v10090_v56, %v10089_v24  ;;  %v10116_v37 = vmul.f32 %v10084_v0, %v17564_v54  ;;  %v10141_v48 = vmul.f32 %v17556_v20, %v17556_v20  ;;  %v9743_v32 = vld [vmem:[%s17803_s5 + $0x8] sm:$0xf]  ;;  %v9749_v56 = vld [vmem:[%s17803_s5 + $0x20] sm:$0xf] }
0x10e7   :  { %v10098_v53 = vadd.f32 %v10097_v41, %v10096_v52  ;;  %v10104_v3 = vrot.slane %v10103_v46, 1  ;;  %v10130_v18 = vsel %vm532_vm2, %v10115_v23, %v10129_v40  ;;  %v10142_v47 = vmul.f32 %v17562_v12, %v17562_v12  ;;  %v9752_v41 = vld [vmem:[%s17803_s5 + $0x2c] sm:$0xf]  ;;  %v9764_v23 = vld [vmem:[%s17803_s5 + $0x5c] sm:$0xf] }
0x10e8   :  { %v10111_v27 = vrot.slane %v10110_v1, 1  ;;  %v10117_v44 = vmul.f32 %v10091_v14, %v17573_v58  ;;  %v10131_v8 = vsel %vm623_vm4, %v10116_v37, %v10130_v18  ;;  %v10143_v62 = vmul.f32 %v17564_v54, %v17564_v54 }
0x10e9   :  { %v10118_v59 = vmul.f32 %v10098_v53, %v17575_v10  ;;  %v10105_v9 = vadd.f32 %v10104_v3, %v10103_v46  ;;  %v10144_v20 = vmul.f32 %v17573_v58, %v17573_v58  ;;  %v10145_v21 = vmul.f32 %v17575_v10, %v17575_v10  ;;  %v9758_v46 = vld [vmem:[%s17803_s5 + $0x44] sm:$0xf] }
0x10ea   :  { %v10112_v28 = vadd.f32 %v10111_v27, %v10110_v1  ;;  %v10132_v16 = vsel %vm625_vm5, %v10117_v44, %v10131_v8  ;;  %v10146_v12 = vmul.f32 %v17587_v57, %v17587_v57  ;;  %v10147_v43 = vmul.f32 %v17589_v39, %v17589_v39  ;;  %v9761_v1 = vld [vmem:[%s17803_s5 + $0x50] sm:$0xf] }
0x10eb   :  { %v10156_v42 = vsel %vm530_vm1, %v10141_v48, %v10140_v36  ;;  %v10119_v54 = vmul.f32 %v10105_v9, %v17587_v57  ;;  %v10133_v60 = vsel %vm627_vm6, %v10118_v59, %v10132_v16  ;;  %v10174_v13 = vmul.f32 %v10063_v55, %v10063_v55  ;;  %v9755_v36 = vld [vmem:[%s17803_s5 + $0x38] sm:$0xf] }
0x10ec   :  { %v10120_v5 = vmul.f32 %v10112_v28, %v17589_v39  ;;  %v10157_v58 = vsel %vm532_vm2, %v10142_v47, %v10156_v42  ;;  %v10175_v7 = vmul.f32 %v10070_v4, %v10070_v4  ;;  %v10176_v34 = vmul.f32 %v10077_v33, %v10077_v33 }
0x10ed   :  { %v10158_v10 = vsel %vm623_vm4, %v10143_v62, %v10157_v58  ;;  %v10134_v15 = vsel %vm629_vm7, %v10119_v54, %v10133_v60  ;;  %v10177_v26 = vmul.f32 %v10084_v0, %v10084_v0  ;;  %v10178_v63 = vmul.f32 %v10091_v14, %v10091_v14  ;;  %v9746_v0 = vld [vmem:[%s17803_s5 + $0x14] sm:$0xf] }
0x10ee   :  { %v10159_v35 = vsel %vm625_vm5, %v10144_v20, %v10158_v10  ;;  %v10135_v50 = vsel %vm631_vm8, %v10120_v5, %v10134_v15  ;;  %v10179_v45 = vmul.f32 %v10098_v53, %v10098_v53  ;;  %v10190_v31 = vsel %vm530_vm1, %v10175_v7, %v10174_v13 }
0x10ef   :  { %v10160_v57 = vsel %vm627_vm6, %v10145_v21, %v10159_v35  ;;  %v10137_v39 = vsel %vm4826_vm3, %v10135_v50, 0.0  ;;  %v10180_v17 = vmul.f32 %v10105_v9, %v10105_v9  ;;  %v10191_v49 = vsel %vm532_vm2, %v10176_v34, %v10190_v31 }
0x10f0   :  { %v10161_v61 = vsel %vm629_vm7, %v10146_v12, %v10160_v57  ;;  %10138 = vadd.xlane.f32.xlu0 %v10137_v39  ;;  %v10181_v6 = vmul.f32 %v10112_v28, %v10112_v28  ;;  %v10192_v30 = vsel %vm623_vm4, %v10177_v26, %v10191_v49  ;;  %v10212_v40 = vsel %vm9789_vm0, %v9743_v32, 0.0  ;;  %v10643_v49 = vld [vmem:[%s17804_s6 + $0x74] sm:$0xf] }
0x10f1   :  { %v10162_v55 = vsel %vm631_vm8, %v10147_v43, %v10161_v61  ;;  %v10193_v51 = vsel %vm625_vm5, %v10178_v63, %v10192_v30  ;;  %v10219_v14 = vsel %vm9789_vm0, %v9746_v0, 0.0  ;;  %v10226_v53 = vsel %vm9789_vm0, %v9749_v56, 0.0  ;;  %v10640_v61 = vld [vmem:[%s17804_s6 + $0x68] sm:$0xf]  ;;  %v10658_v0 = vld [vmem:[%s17804_s6 + $0xb0] sm:$0xf] }
0x10f2   :  { %v10164_v4 = vsel %vm4826_vm3, %v10162_v55, 0.0  ;;  %v10194_v25 = vsel %vm627_vm6, %v10179_v45, %v10193_v51  ;;  %v10233_v37 = vsel %vm9789_vm0, %v9752_v41, 0.0  ;;  %v10213_v48 = vrot.slane %v10212_v40, 4 }
0x10f3   :  { %10165 = vadd.xlane.f32.xlu1 %v10164_v4  ;;  %v10195_v24 = vsel %vm629_vm7, %v10180_v17, %v10194_v25  ;;  %v10220_v3 = vrot.slane %v10219_v14, 4  ;;  %v10227_v27 = vrot.slane %v10226_v53, 4  ;;  %v10234_v18 = vrot.slane %v10233_v37, 4  ;;  %v10646_v4 = vld [vmem:[%s17804_s6 + $0x80] sm:$0xf] }
0x10f4   :  { %v10196_v52 = vsel %vm631_vm8, %v10181_v6, %v10195_v24  ;;  %v10240_v47 = vsel %vm9789_vm0, %v9755_v36, 0.0  ;;  %v10247_v44 = vsel %vm9789_vm0, %v9758_v46, 0.0  ;;  %v10254_v59 = vsel %vm9789_vm0, %v9761_v1, 0.0  ;;  %v10649_v6 = vld [vmem:[%s17804_s6 + $0x8c] sm:$0xf] }
0x10f5   :  { %v10198_v2 = vsel %vm4826_vm3, %v10196_v52, 0.0  ;;  %v10261_v8 = vsel %vm9789_vm0, %v9764_v23, 0.0  ;;  %v10214_v62 = vadd.f32 %v10213_v48, %v10212_v40  ;;  %v10221_v9 = vadd.f32 %v10220_v3, %v10219_v14  ;;  %v10652_v52 = vld [vmem:[%s17804_s6 + $0x98] sm:$0xf]  ;;  %v10661_v1 = vld [vmem:[%s17804_s6 + $0xbc] sm:$0xf] }
0x10f6   :  { %10199 = vadd.xlane.f32.xlu0 %v10198_v2  ;;  %v10228_v28 = vadd.f32 %v10227_v27, %v10226_v53  ;;  %v10235_v20 = vadd.f32 %v10234_v18, %v10233_v37  ;;  %v10241_v21 = vrot.slane %v10240_v47, 4  ;;  %v10248_v16 = vrot.slane %v10247_v44, 4  ;;  %v10655_v2 = vld [vmem:[%s17804_s6 + $0xa4] sm:$0xf] }
0x10f7   :  { %v10255_v12 = vrot.slane %v10254_v59, 4  ;;  %v10262_v43 = vrot.slane %v10261_v8, 4  ;;  %v10215_v42 = vrot.slane %v10214_v62, 2  ;;  %v10222_v54 = vrot.slane %v10221_v9, 2 }
0x10f8   :  { %v10229_v5 = vrot.slane %v10228_v28, 2  ;;  %v10236_v60 = vrot.slane %v10235_v20, 2  ;;  %v10242_v58 = vadd.f32 %v10241_v21, %v10240_v47  ;;  %v10249_v10 = vadd.f32 %v10248_v16, %v10247_v44 }
0x10f9   :  { %v10256_v13 = vadd.f32 %v10255_v12, %v10254_v59  ;;  %v10263_v7 = vadd.f32 %v10262_v43, %v10261_v8  ;;  %v10216_v34 = vadd.f32 %v10215_v42, %v10214_v62  ;;  %v10223_v15 = vadd.f32 %v10222_v54, %v10221_v9 }
0x10fa   :  { %v10230_v35 = vadd.f32 %v10229_v5, %v10228_v28  ;;  %v10237_v26 = vadd.f32 %v10236_v60, %v10235_v20  ;;  %v10243_v50 = vrot.slane %v10242_v58, 2  ;;  %v10250_v57 = vrot.slane %v10249_v10, 2 }
0x10fb   :  { %v10257_v63 = vrot.slane %v10256_v13, 2  ;;  %v10264_v39 = vrot.slane %v10263_v7, 2  ;;  %v10217_v45 = vrot.slane %v10216_v34, 1  ;;  %v10224_v31 = vrot.slane %v10223_v15, 1 }
0x10fc   :  { %v10231_v55 = vrot.slane %v10230_v35, 1  ;;  %v10238_v17 = vrot.slane %v10237_v26, 1  ;;  %v10244_v30 = vadd.f32 %v10243_v50, %v10242_v58  ;;  %v10251_v51 = vadd.f32 %v10250_v57, %v10249_v10 }
0x10fd   :  { %v10258_v25 = vadd.f32 %v10257_v63, %v10256_v13  ;;  %v10265_v24 = vadd.f32 %v10264_v39, %v10263_v7  ;;  %v10268_v23 = vsel %vm9789_vm0, %v10640_v61, 0.0  ;;  %v10275_v40 = vsel %vm9789_vm0, %v10643_v49, 0.0 }
0x10fe   :  { %v17703_v32 = vadd.f32 %v10238_v17, %v10237_v26  ;;  %v10245_v56 = vrot.slane %v10244_v30, 1  ;;  %v10252_v41 = vrot.slane %v10251_v51, 1  ;;  %v10282_v14 = vsel %vm9789_vm0, %v10646_v4, 0.0 }
0x10ff   :  { %v10259_v36 = vrot.slane %v10258_v25, 1  ;;  %v10266_v46 = vrot.slane %v10265_v24, 1  ;;  %v10289_v53 = vsel %vm9789_vm0, %v10649_v6, 0.0  ;;  %v10269_v18 = vrot.slane %v10268_v23, 4 }
0x1100   :  { %v17715_v37 = vadd.f32 %v10245_v56, %v10244_v30  ;;  %v17717_v48 = vadd.f32 %v10252_v41, %v10251_v51  ;;  %v10276_v47 = vrot.slane %v10275_v40, 4  ;;  %v10283_v44 = vrot.slane %v10282_v14, 4 }
0x1101   :  { %v17719_v3 = vadd.f32 %v10259_v36, %v10258_v25  ;;  %v17721_v27 = vadd.f32 %v10266_v46, %v10265_v24  ;;  %v10290_v59 = vrot.slane %v10289_v53, 4  ;;  %v10296_v8 = vsel %vm9789_vm0, %v10652_v52, 0.0 }
0x1102   :  { %v10303_v62 = vsel %vm9789_vm0, %v10655_v2, 0.0  ;;  %v10310_v9 = vsel %vm9789_vm0, %v10658_v0, 0.0  ;;  %v10317_v28 = vsel %vm9789_vm0, %v10661_v1, 0.0  ;;  %v10270_v20 = vadd.f32 %v10269_v18, %v10268_v23 }
0x1103   :  { %v10277_v21 = vadd.f32 %v10276_v47, %v10275_v40  ;;  %v10284_v16 = vadd.f32 %v10283_v44, %v10282_v14  ;;  %v10291_v12 = vadd.f32 %v10290_v59, %v10289_v53  ;;  %v10297_v43 = vrot.slane %v10296_v8, 4 }
0x1104   :  { %v10304_v42 = vrot.slane %v10303_v62, 4  ;;  %v10311_v54 = vrot.slane %v10310_v9, 4  ;;  %v10318_v5 = vrot.slane %v10317_v28, 4  ;;  %v10271_v60 = vrot.slane %v10270_v20, 2 }
0x1105   :  { %v10278_v58 = vrot.slane %v10277_v21, 2  ;;  %v10285_v10 = vrot.slane %v10284_v16, 2  ;;  %v10292_v13 = vrot.slane %v10291_v12, 2  ;;  %v10298_v7 = vadd.f32 %v10297_v43, %v10296_v8 }
0x1106   :  { %v10272_v26 = vadd.f32 %v10271_v60, %v10270_v20 }
0x1107   :  { %v10279_v50 = vadd.f32 %v10278_v58, %v10277_v21  ;;  %v10286_v57 = vadd.f32 %v10285_v10, %v10284_v16  ;;  %v10293_v63 = vadd.f32 %v10292_v13, %v10291_v12  ;;  %v10299_v39 = vrot.slane %v10298_v7, 2 }
0x1109   :  { %v10280_v17 = vrot.slane %v10279_v50, 1  ;;  %v10287_v49 = vrot.slane %v10286_v57, 1  ;;  %v10294_v4 = vrot.slane %v10293_v63, 1  ;;  %v10300_v6 = vadd.f32 %v10299_v39, %v10298_v7 }
0x110a   :  { %v10354_v39 = vmul.f32 %v17703_v32, %v17703_v32 }
0x110b   :  { %v10281_v52 = vadd.f32 %v10280_v17, %v10279_v50  ;;  %v10288_v2 = vadd.f32 %v10287_v49, %v10286_v57  ;;  %v10295_v0 = vadd.f32 %v10294_v4, %v10293_v63  ;;  %v10301_v56 = vrot.slane %v10300_v6, 1 }
0x110d   :  { %v10327_v14 = vmul.f32 %v10295_v0, %v17703_v32  ;;  %v10302_v53 = vadd.f32 %v10301_v56, %v10300_v6  ;;  %v10388_v43 = vmul.f32 %v10295_v0, %v10295_v0  ;;  %v10357_v32 = vmul.f32 %v17719_v3, %v17719_v3 }
0x111a   :  { %v9499_v33 = vpop.permute.xlu0 %9498 }
0x111b   :  { %v9501_v29 = vsel %vm4826_vm3, %v11173_v38, %v9499_v33  ;;  %v17697_v33 = vadd.f32 %v10217_v45, %v10216_v34  ;;  %v17699_v38 = vadd.f32 %v10224_v31, %v10223_v15  ;;  %v10305_v34 = vadd.f32 %v10304_v42, %v10303_v62 }
0x111c   :  { %10635 = vmatmul.mubr.msk.f32.gmra.mxu0 %vm9543_vm11, %v9501_v29  ;;  %10689 = vmatmul.mubr.msk.f32.vlgmr.msra.gmra.mxu1 %vm9543_vm11, %v9501_v29  ;;  %v17701_v29 = vadd.f32 %v10231_v55, %v10230_v35  ;;  %v10312_v15 = vadd.f32 %v10311_v54, %v10310_v9  ;;  %v10319_v35 = vadd.f32 %v10318_v5, %v10317_v28  ;;  %v10273_v55 = vrot.slane %v10272_v26, 1 }
0x111d   :  { %v10306_v61 = vrot.slane %v10305_v34, 2  ;;  %v10325_v23 = vmul.f32 %v10281_v52, %v17699_v38  ;;  %v10386_v62 = vmul.f32 %v10281_v52, %v10281_v52  ;;  %v10387_v9 = vmul.f32 %v10288_v2, %v10288_v2 }
0x111e   :  { %v10313_v45 = vrot.slane %v10312_v15, 2  ;;  %v10320_v31 = vrot.slane %v10319_v35, 2  ;;  %v10274_v24 = vadd.f32 %v10273_v55, %v10272_v26  ;;  %v10326_v40 = vmul.f32 %v10288_v2, %v17701_v29 }
0x111f   :  { %v10307_v30 = vadd.f32 %v10306_v61, %v10305_v34  ;;  %v10328_v28 = vmul.f32 %v10302_v53, %v17715_v37  ;;  %v10389_v42 = vmul.f32 %v10302_v53, %v10302_v53  ;;  %v10351_v7 = vmul.f32 %v17697_v33, %v17697_v33 }
0x1120   :  { %v10314_v51 = vadd.f32 %v10313_v45, %v10312_v15  ;;  %v10321_v25 = vadd.f32 %v10320_v31, %v10319_v35  ;;  %v10324_v1 = vmul.f32 %v10274_v24, %v17697_v33  ;;  %v10385_v8 = vmul.f32 %v10274_v24, %v10274_v24 }
0x1121   :  { %v10308_v41 = vrot.slane %v10307_v30, 1  ;;  %v10352_v34 = vmul.f32 %v17699_v38, %v17699_v38  ;;  %v10353_v50 = vmul.f32 %v17701_v29, %v17701_v29  ;;  %v10355_v38 = vmul.f32 %v17715_v37, %v17715_v37 }
0x1122   :  { %v10315_v36 = vrot.slane %v10314_v51, 1  ;;  %v10322_v46 = vrot.slane %v10321_v25, 1  ;;  %v10340_v59 = vsel %vm530_vm1, %v10325_v23, %v10324_v1  ;;  %v10401_v58 = vsel %vm530_vm1, %v10386_v62, %v10385_v8 }
0x1123   :  { %v10309_v18 = vadd.f32 %v10308_v41, %v10307_v30  ;;  %v10341_v12 = vsel %vm532_vm2, %v10326_v40, %v10340_v59  ;;  %v10402_v13 = vsel %vm532_vm2, %v10387_v9, %v10401_v58  ;;  %v10356_v29 = vmul.f32 %v17717_v48, %v17717_v48 }
0x1124   :  { %v10316_v47 = vadd.f32 %v10315_v36, %v10314_v51  ;;  %v10323_v44 = vadd.f32 %v10322_v46, %v10321_v25  ;;  %v10342_v54 = vsel %vm623_vm4, %v10327_v14, %v10341_v12  ;;  %v10403_v26 = vsel %vm623_vm4, %v10388_v43, %v10402_v13  ;;  %v9616_v25 = vpop.f32.mrf.mxu0 }
0x1125   :  { %v10329_v20 = vmul.f32 %v10309_v18, %v17717_v48  ;;  %v10390_v5 = vmul.f32 %v10309_v18, %v10309_v18  ;;  %v10343_v10 = vsel %vm625_vm5, %v10328_v28, %v10342_v54  ;;  %v10404_v63 = vsel %vm625_vm5, %v10389_v42, %v10403_v26 }
0x1126   :  { %v10330_v21 = vmul.f32 %v10316_v47, %v17719_v3  ;;  %v10331_v16 = vmul.f32 %v10323_v44, %v17721_v27  ;;  %v10391_v60 = vmul.f32 %v10316_v47, %v10316_v47  ;;  %v10392_v35 = vmul.f32 %v10323_v44, %v10323_v44  ;;  %v9526_v3 = vld [vmem:[%s17807_s9] sm:$0x7]  ;;  %v9618_v52 = vpop.f32.mrf.mxu0  ;;  %s10462_s9 = sld [smem:[#allocation2 + $0x3]] }
0x1127   :  { %v10344_v15 = vsel %vm627_vm6, %v10329_v20, %v10343_v10  ;;  %v10405_v61 = vsel %vm627_vm6, %v10390_v5, %v10404_v63  ;;  %v10367_v55 = vsel %vm530_vm1, %v10352_v34, %v10351_v7  ;;  %v10358_v37 = vmul.f32 %v17721_v27, %v17721_v27 }
0x1128   :  { %v10345_v57 = vsel %vm629_vm7, %v10330_v21, %v10344_v15  ;;  %v10406_v31 = vsel %vm629_vm7, %v10391_v60, %v10405_v61  ;;  %v10368_v49 = vsel %vm532_vm2, %v10353_v50, %v10367_v55  ;;  %v9535_v24 = vrot.slane %v9526_v3, %v12107_v19 }
0x1129   :  { %v10346_v33 = vsel %vm631_vm8, %v10331_v16, %v10345_v57  ;;  %v10407_v17 = vsel %vm631_vm8, %v10392_v35, %v10406_v31  ;;  %v10369_v4 = vsel %vm623_vm4, %v10354_v39, %v10368_v49  ;;  %v9531_v27 = vrot.slane %v9526_v3, %v18352_v11 }
0x112a   :  { %v10348_v45 = vsel %vm4826_vm3, %v10346_v33, 0.0  ;;  %v10370_v6 = vsel %vm625_vm5, %v10355_v38, %v10369_v4  ;;  %v9619_v2 = vadd.f32 %v9618_v52, %v9535_v24  ;;  %v9539_v46 = vrot.slane %v9526_v3, %v12110_v22 }
0x112b   :  { %10349 = vadd.xlane.f32.xlu1 %v10348_v45  ;;  %v10371_v30 = vsel %vm627_vm6, %v10356_v29, %v10370_v6  ;;  %v9617_v0 = vadd.f32 %v9616_v25, %v9531_v27  ;;  %v10409_v43 = vsel %vm4826_vm3, %v10407_v17, 0.0 }
0x112c   :  { %v10372_v48 = vsel %vm629_vm7, %v10357_v32, %v10371_v30  ;;  %v9710_v1 = vmul.f32 %v9619_v2, %v9619_v2  ;;  %s10428_s13 = ssub.f32 1.0, %s10462_s9 }
0x112d   :  { %v10373_v51 = vsel %vm631_vm8, %v10358_v37, %v10372_v48  ;;  %v9709_v53 = vmul.f32 %v9617_v0, %v9617_v0 }
0x112e   :  { %v10375_v42 = vsel %vm4826_vm3, %v10373_v51, 0.0  ;;  %s10429_s2 = ssub.f32 %s10428_s13, %s10463_s12 }
0x112f   :  { %v9712_v8 = vadd.f32 %v9710_v1, %v9709_v53 }
0x1152   :  { %v17781_v5 = vpop.xlane.xlu1 %9927 }
0x1154   :  { %v9955_v54 = vpop.xlane.xlu0 %9954 }
0x1155   :  { %10956 = vrsqrt.f32 %v9955_v54  ;;  %vm9958_vm1 = vcmp.eq.f32.partialorder %v9955_v54, inf  ;;  %vm9960_vm4 = vcmp.eq.f32.partialorder %v9955_v54, 0.0  ;;  %v9961_v31 = vand.u32 2147483648, %v9955_v54 }
0x1158   :  { %v9989_v58 = vpop.xlane.xlu1 %9988 }
0x1159   :  { %10958 = vrsqrt.f32 %v9989_v58  ;;  %vm9992_vm2 = vcmp.eq.f32.partialorder %v9989_v58, inf  ;;  %vm9994_vm7 = vcmp.eq.f32.partialorder %v9989_v58, 0.0  ;;  %v9995_v29 = vand.u32 2147483648, %v9989_v58 }
0x1162   :  { %v10957_v34 = vpop.eup %10956 }
0x1163   :  { %v9957_v63 = vmul.f32 %v10957_v34, %v9955_v54 }
0x1165   :  { %v9959_v55 = vsel %vm9958_vm1, %v9955_v54, %v9957_v63  ;;  %v10423_v54 = vstv %s10462_s9  ;;  %vm10433_vm1 = vcmask 7168  }
0x1166   :  { %v10959_v15 = vpop.eup %10958  ;;  %v9962_v30 = vsel %vm9960_vm4, %v9961_v31, %v9959_v55 }
0x1167   :  { %v9991_v39 = vmul.f32 %v10959_v15, %v9989_v58  ;;  %v10430_v15 = vstv %s10429_s2 }
0x1169   :  { %v9993_v17 = vsel %vm9992_vm2, %v9989_v58, %v9991_v39  ;;  %v10425_v58 = vstv %s10463_s12  ;;  %vm10435_vm2 = vcmask 15360  }
0x116a   :  { %v9996_v48 = vsel %vm9994_vm7, %v9995_v29, %v9993_v17 }
0x1179   :  { %v17783_v60 = vpop.xlane.xlu0 %10138 }
0x117c   :  { %v10166_v13 = vpop.xlane.xlu1 %10165 }
0x117d   :  { %vm10169_vm6 = vcmp.eq.f32.partialorder %v10166_v13, inf  ;;  %v10172_v49 = vand.u32 2147483648, %v10166_v13  ;;  %vm10171_vm15 = vcmp.eq.f32.partialorder %v10166_v13, 0.0 }
0x117f   :  { %v10200_v10 = vpop.xlane.xlu0 %10199 }
0x1180   :  { %10960 = vrsqrt.f32 %v10200_v10  ;;  %vm10203_vm5 = vcmp.eq.f32.partialorder %v10200_v10, inf  ;;  %vm10205_vm8 = vcmp.eq.f32.partialorder %v10200_v10, 0.0  ;;  %v10206_v32 = vand.u32 2147483648, %v10200_v10 }
0x1181   :  { %10962 = vrsqrt.f32 %v10166_v13 }
0x118d   :  { %v10961_v26 = vpop.eup %10960 }
0x118e   :  { %v10963_v57 = vpop.eup %10962  ;;  %v10202_v61 = vmul.f32 %v10961_v26, %v10200_v10 }
0x118f   :  { %v10168_v38 = vmul.f32 %v10963_v57, %v10166_v13 }
0x1190   :  { %v10204_v4 = vsel %vm10203_vm5, %v10200_v10, %v10202_v61 }
0x1191   :  { %v10170_v6 = vsel %vm10169_vm6, %v10166_v13, %v10168_v38  ;;  %v10207_v51 = vsel %vm10205_vm8, %v10206_v32, %v10204_v4 }
0x1192   :  { %v10173_v25 = vsel %vm10171_vm15, %v10172_v49, %v10170_v6 }
0x1193   :  { %v10208_v52 = vmul.f32 %v10207_v51, %v10173_v25 }
0x11b4   :  { %v17785_v7 = vpop.xlane.xlu1 %10349 }
0x11dc   :  { %v9622_v56 = vpop.f32.mrf.mxu0  ;;  %v10690_v41 = vpop.f32.mrf.mxu1 }
0x11dd   :  { %v9623_v36 = vadd.f32 %v9622_v56, %v9531_v27  ;;  %v9699_v44 = vadd.f32 %v10690_v41, %v9539_v46  ;;  %v10209_v41 = vmax.f32 %v10208_v52, 1e-08 }
0x11de   :  { %v9624_v23 = vpop.f32.mrf.mxu0  ;;  %v9693_v40 = vpop.f32.mrf.mxu1 }
0x11df   :  { %v9625_v14 = vadd.f32 %v9624_v23, %v9535_v24  ;;  %v9694_v18 = vadd.f32 %v9693_v40, %v9539_v46  ;;  %v9702_v47 = vmul.f32 %v9623_v36, %v9617_v0  ;;  %v9723_v62 = vmul.f32 %v9623_v36, %v9623_v36 }
0x11e0   :  { %v9725_v12 = vmul.f32 %v9699_v44, %v9699_v44  ;;  %v9997_v24 = vmul.f32 %v9996_v48, %v9962_v30 }
0x11e1   :  { %v9703_v59 = vmul.f32 %v9625_v14, %v9619_v2  ;;  %v9724_v19 = vmul.f32 %v9625_v14, %v9625_v14  ;;  %v9711_v11 = vmul.f32 %v9694_v18, %v9694_v18  ;;  %v9704_v28 = vmul.f32 %v9699_v44, %v9694_v18 }
0x11e2   :  { %v9998_v0 = vmax.f32 %v9997_v24, 1e-08 }
0x11e3   :  { %v9705_v9 = vadd.f32 %v9703_v59, %v9702_v47  ;;  %v9726_v20 = vadd.f32 %v9724_v19, %v9723_v62  ;;  %v9713_v21 = vadd.f32 %v9712_v8, %v9711_v11 }
0x11e5   :  { %v9706_v16 = vadd.f32 %v9705_v9, %v9704_v28  ;;  %9714 = vadd.xlane.f32.xlu0 %v9713_v21  ;;  %v9727_v22 = vadd.f32 %v9726_v20, %v9725_v12 }
0x11e7   :  { %9707 = vadd.xlane.f32.xlu1 %v9706_v16 }
0x11e9   :  { %9728 = vadd.xlane.f32.xlu0 %v9727_v22 }
0x11eb   :  { %10410 = vadd.xlane.f32.xlu1 %v10409_v43 }
0x11ed   :  { %10376 = vadd.xlane.f32.xlu0 %v10375_v42 }
0x126e   :  { %v9715_v35 = vpop.xlane.xlu0 %9714 }
0x126f   :  { %10964 = vrsqrt.f32 %v9715_v35  ;;  %vm9718_vm12 = vcmp.eq.f32.partialorder %v9715_v35, inf  ;;  %v9721_v53 = vand.u32 2147483648, %v9715_v35  ;;  %vm9720_vm10 = vcmp.eq.f32.partialorder %v9715_v35, 0.0 }
0x1270   :  { %v17787_v50 = vpop.xlane.xlu1 %9707 }
0x1272   :  { %v9729_v33 = vpop.xlane.xlu0 %9728 }
0x1273   :  { %10966 = vrsqrt.f32 %v9729_v33  ;;  %vm9732_vm13 = vcmp.eq.f32.partialorder %v9729_v33, inf  ;;  %v9735_v46 = vand.u32 2147483648, %v9729_v33  ;;  %vm9734_vm9 = vcmp.eq.f32.partialorder %v9729_v33, 0.0 }
0x1274   :  { %v10411_v45 = vpop.xlane.xlu1 %10410 }
0x1275   :  { %10968 = vrsqrt.f32 %v10411_v45  ;;  %vm10414_vm14 = vcmp.eq.f32.partialorder %v10411_v45, inf  ;;  %v10417_v19 = vand.u32 2147483648, %v10411_v45  ;;  %vm10416_vm11 = vcmp.eq.f32.partialorder %v10411_v45, 0.0 }
0x1276   :  { %v10377_v37 = vpop.xlane.xlu0 %10376 }
0x1277   :  { %10970 = vrsqrt.f32 %v10377_v37  ;;  %vm10380_vm3 = vcmp.eq.f32.partialorder %v10377_v37, inf  ;;  %v10383_v8 = vand.u32 2147483648, %v10377_v37  ;;  %vm10382_vm0 = vcmp.eq.f32.partialorder %v10377_v37, 0.0 }
0x1278   :  { %10972 = vrcp.f32 %v9998_v0 }
0x1279   :  { %10974 = vrcp.f32 %v10209_v41 }
0x127c   :  { %v10965_v3 = vpop.eup %10964 }
0x127d   :  { %v9717_v27 = vmul.f32 %v10965_v3, %v9715_v35 }
0x127f   :  { %v9719_v23 = vsel %vm9718_vm12, %v9715_v35, %v9717_v27 }
0x1280   :  { %v10967_v2 = vpop.eup %10966  ;;  %v9722_v59 = vsel %vm9720_vm10, %v9721_v53, %v9719_v23 }
0x1281   :  { %v9731_v36 = vmul.f32 %v10967_v2, %v9729_v33 }
0x1282   :  { %v10969_v56 = vpop.eup %10968 }
0x1283   :  { %v10413_v1 = vmul.f32 %v10969_v56, %v10411_v45  ;;  %v9733_v40 = vsel %vm9732_vm13, %v9729_v33, %v9731_v36 }
0x1284   :  { %v10971_v14 = vpop.eup %10970  ;;  %v9736_v18 = vsel %vm9734_vm9, %v9735_v46, %v9733_v40 }
0x1285   :  { %v10415_v47 = vsel %vm10414_vm14, %v10411_v45, %v10413_v1  ;;  %v10379_v44 = vmul.f32 %v10971_v14, %v10377_v37  ;;  %v9737_v62 = vmul.f32 %v9736_v18, %v9722_v59  ;;  %v10973_v12 = vpop.eup %10972 }
0x1286   :  { %v10418_v9 = vsel %vm10416_vm11, %v10417_v19, %v10415_v47  ;;  %v10975_v22 = vpop.eup %10974  ;;  %v10000_v43 = vmul.f32 %v10973_v12, %v17781_v5 }
0x1287   :  { %v10381_v11 = vsel %vm10380_vm3, %v10377_v37, %v10379_v44  ;;  %v9738_v21 = vmax.f32 %v9737_v62, 1e-08  ;;  %v10211_v42 = vmul.f32 %v10975_v22, %v17783_v60 }
0x1288   :  { %v10384_v28 = vsel %vm10382_vm0, %v10383_v8, %v10381_v11  ;;  %v10424_v10 = vmul.f32 %v10423_v54, %v10000_v43 }
0x1289   :  { %v10419_v20 = vmul.f32 %v10418_v9, %v10384_v28  ;;  %v10426_v13 = vmul.f32 %v10425_v58, %v10211_v42 }
0x128b   :  { %v10420_v16 = vmax.f32 %v10419_v20, 1e-08  ;;  %v10427_v57 = vadd.f32 %v10426_v13, %v10424_v10 }
0x128d   :  { %10976 = vrcp.f32 %v10420_v16 }
0x128e   :  { %10978 = vrcp.f32 %v9738_v21 }
0x129a   :  { %v10977_v34 = vpop.eup %10976 }
0x129b   :  { %v10422_v35 = vmul.f32 %v10977_v34, %v17785_v7  ;;  %v10979_v26 = vpop.eup %10978 }
0x129c   :  { %v9740_v39 = vmul.f32 %v10979_v26, %v17787_v50 }
0x129d   :  { %v10431_v63 = vmul.f32 %v10430_v15, %v10422_v35 }
0x129f   :  { %v10432_v33 = vadd.f32 %v10431_v63, %v10427_v57 }
0x12a1   :  { %v10434_v5 = vsel %vm10433_vm1, %v9740_v39, %v10432_v33 }
0x12a2   :  { %10436 = vst.msk [vmem:[%s17808_s10] sm:$0xff] %vm10435_vm2, %v10434_v5 }
0x12a3   :  { %10441 = vsyncpa [#allocation3], 1 }

</bundles_post_ra>
